<compile_context>
chip_gen: v7x
topology: tpu7x:2x2x1
jax: 0.10.0
libtpu: 0.0.40
codegen_flags: <defaults>
</compile_context>

<pallas_src>
import jax
import jax.numpy as jnp
from jax.experimental import pallas as pl
from jax.experimental.pallas import tpu as pltpu

EPS_BN = 1e-5
LANE = 128


def _resblock_kernel(x_ref, w1_ref, w2_ref, g1_ref, b1_ref, g2_ref, b2_ref,
                     o_ref, pad_ref):
    N, H, W, Cp = x_ref.shape
    M = N * H * W

    # ---- zero only the 1-wide halo ring of the padded VMEM scratch ----------
    pad_ref[:, 0:1, :, :] = jnp.zeros((N, 1, W + 2, Cp), jnp.float32)
    pad_ref[:, H + 1:H + 2, :, :] = jnp.zeros((N, 1, W + 2, Cp), jnp.float32)
    pad_ref[:, 1:H + 1, 0:1, :] = jnp.zeros((N, H, 1, Cp), jnp.float32)
    pad_ref[:, 1:H + 1, W + 1:W + 2, :] = jnp.zeros((N, H, 1, Cp), jnp.float32)

    def conv3x3(w_ref):
        """3x3 conv of the activation staged in pad_ref, as 9 MXU matmuls
        (one per tap) contracting over the lane-aligned channel axis."""
        acc = jnp.zeros((M, Cp), jnp.float32)
        for ky in range(3):
            for kx in range(3):
                patch = pad_ref[:, ky:ky + H, kx:kx + W, :].reshape(M, Cp)
                acc = acc + jnp.dot(patch, w_ref[ky, kx],
                                    preferred_element_type=jnp.float32)
        return acc

    def batchnorm(y, g_ref, b_ref):
        """Training-mode BatchNorm2d: per-channel batch mean / biased variance
        over (N,H,W); single-pass sum & sum-of-squares, gamma folded into the
        rsqrt scale so normalization is one fused multiply-add."""
        inv_n = 1.0 / float(M)
        mu = jnp.sum(y, axis=0, keepdims=True) * inv_n            # (1, Cp)
        ey2 = jnp.sum(y * y, axis=0, keepdims=True) * inv_n       # (1, Cp)
        var = jnp.maximum(ey2 - mu * mu, 0.0)                     # biased var
        scale = g_ref[...] * jax.lax.rsqrt(var + EPS_BN)          # (1, Cp)
        shift = b_ref[...] - mu * scale
        return y * scale + shift

    # conv1 -> bn1 -> relu
    pad_ref[:, 1:H + 1, 1:W + 1, :] = x_ref[...]
    out = jnp.maximum(batchnorm(conv3x3(w1_ref), g1_ref, b1_ref), 0.0)

    # conv2 -> bn2  (halo of pad_ref is still zero; only the interior changes)
    pad_ref[:, 1:H + 1, 1:W + 1, :] = out.reshape(N, H, W, Cp)
    out = batchnorm(conv3x3(w2_ref), g2_ref, b2_ref)

    # residual add + relu
    res = x_ref[...].reshape(M, Cp)
    o_ref[...] = jnp.maximum(out + res, 0.0).astype(o_ref.dtype)


def residual_block_forward(x_nchw, w1_oihw, w2_oihw, g1, b1, g2, b2):
    """x_nchw: (N, C, H, W) float32.  Conv weights in PyTorch OIHW layout
    (already spectral-normalized).  Returns (N, C, H, W) float32."""
    N, C, H, W = x_nchw.shape
    Cp = ((C + LANE - 1) // LANE) * LANE      # channel axis padded to 128 lanes

    # NCHW -> NHWC, pad channels to the lane width (lane-dense layout).
    x = jnp.transpose(x_nchw, (0, 2, 3, 1)).astype(jnp.float32)
    x = jnp.pad(x, ((0, 0), (0, 0), (0, 0), (0, Cp - C)))

    def prep_w(w):
        w = jnp.transpose(w, (2, 3, 1, 0)).astype(jnp.float32)    # OIHW -> HWIO
        return jnp.pad(w, ((0, 0), (0, 0), (0, Cp - C), (0, Cp - C)))

    def prep_v(v, pad_val):
        v = v.astype(jnp.float32).reshape(1, C)
        return jnp.pad(v, ((0, 0), (0, Cp - C)), constant_values=pad_val)

    w1 = prep_w(w1_oihw)
    w2 = prep_w(w2_oihw)
    g1p, b1p = prep_v(g1, 1.0), prep_v(b1, 0.0)
    g2p, b2p = prep_v(g2, 1.0), prep_v(b2, 0.0)

    full = lambda shape: pl.BlockSpec(shape, lambda i: (0,) * len(shape))

    out2d = pl.pallas_call(
        _resblock_kernel,
        out_shape=jax.ShapeDtypeStruct((N * H * W, Cp), jnp.float32),
        grid=(1,),
        in_specs=[
            full((N, H, W, Cp)),      # x (used for staging + residual)
            full((3, 3, Cp, Cp)),     # w1 (HWIO, padded)
            full((3, 3, Cp, Cp)),     # w2
            full((1, Cp)),            # gamma1
            full((1, Cp)),            # beta1
            full((1, Cp)),            # gamma2
            full((1, Cp)),            # beta2
        ],
        out_specs=full((N * H * W, Cp)),
        scratch_shapes=[pltpu.VMEM((N, H + 2, W + 2, Cp), jnp.float32)],
        compiler_params=pltpu.CompilerParams(
            dimension_semantics=("arbitrary",),
            vmem_limit_bytes=64 * 1024 * 1024),
    )(x, w1, w2, g1p, b1p, g2p, b2p)

    out = out2d.reshape(N, H, W, Cp)[:, :, :, :C]
    return jnp.transpose(out, (0, 3, 1, 2))


def spectral_normalize(w_oihw, n_iter=50, eps=1e-12):
    """Divide the OIHW conv weight by its largest singular value (of the
    (Cout, Cin*kh*kw) matrix), mirroring nn.utils.spectral_norm.
    # TODO(synk): PyTorch runs one power-iteration per forward from a persistent
    # random u; here the iteration is run to convergence from a fixed u."""
    cout = w_oihw.shape[0]
    wm = w_oihw.reshape(cout, -1)
    u = jnp.ones((cout,), jnp.float32) / jnp.sqrt(cout)
    v = None
    for _ in range(n_iter):
        v = wm.T @ u
        v = v / (jnp.linalg.norm(v) + eps)
        u = wm @ v
        u = u / (jnp.linalg.norm(u) + eps)
    sigma = u @ (wm @ v)
    return w_oihw / sigma


def reference_forward(x, w1, w2, g1, b1, g2, b2):
    """Pure-JAX reference (NCHW) of the PyTorch forward, for validation."""
    def conv(x, w):
        return jax.lax.conv_general_dilated(
            x, w, window_strides=(1, 1), padding=((1, 1), (1, 1)),
            dimension_numbers=('NCHW', 'OIHW', 'NCHW'))

    def bn(y, g, b):
        mu = y.mean(axis=(0, 2, 3), keepdims=True)
        var = ((y - mu) ** 2).mean(axis=(0, 2, 3), keepdims=True)
        yhat = (y - mu) / jnp.sqrt(var + EPS_BN)
        return yhat * g.reshape(1, -1, 1, 1) + b.reshape(1, -1, 1, 1)

    out = jnp.maximum(bn(conv(x, w1), g1, b1), 0.0)
    out = bn(conv(out, w2), g2, b2)
    return jnp.maximum(out + x, 0.0)


if __name__ == "__main__":
    key = jax.random.PRNGKey(0)
    N, C, H, W = 2, 4, 16, 16            # in_channels == out_channels, stride=1

    k = jax.random.split(key, 7)
    x = jax.random.normal(k[0], (N, C, H, W), jnp.float32)
    w1 = spectral_normalize(jax.random.normal(k[1], (C, C, 3, 3), jnp.float32) * 0.2)
    w2 = spectral_normalize(jax.random.normal(k[2], (C, C, 3, 3), jnp.float32) * 0.2)
    g1 = 1.0 + 0.1 * jax.random.normal(k[3], (C,), jnp.float32)
    b1 = 0.1 * jax.random.normal(k[4], (C,), jnp.float32)
    g2 = 1.0 + 0.1 * jax.random.normal(k[5], (C,), jnp.float32)
    b2 = 0.1 * jax.random.normal(k[6], (C,), jnp.float32)

    out = jax.block_until_ready(residual_block_forward(x, w1, w2, g1, b1, g2, b2))

    ref = jax.block_until_ready(reference_forward(x, w1, w2, g1, b1, g2, b2))
    assert out.shape == (N, C, H, W), out.shape
    err = float(jnp.max(jnp.abs(out - ref)))
    assert jnp.allclose(out, ref, atol=1e-4, rtol=1e-4), err

    print("KERNEL_OK")
</pallas_src>

<mosaic_0001>
module attributes {stable_mosaic.version = 11 : i64} {
  func.func @_resblock_kernel(%arg0: i32, %arg1: memref<2x16x16x128xf32, #tpu.memory_space<vmem>>, %arg2: memref<3x3x128x128xf32, #tpu.memory_space<vmem>>, %arg3: memref<3x3x128x128xf32, #tpu.memory_space<vmem>>, %arg4: memref<1x128xf32, #tpu.memory_space<vmem>>, %arg5: memref<1x128xf32, #tpu.memory_space<vmem>>, %arg6: memref<1x128xf32, #tpu.memory_space<vmem>>, %arg7: memref<1x128xf32, #tpu.memory_space<vmem>>, %arg8: memref<512x128xf32, #tpu.memory_space<vmem>>, %arg9: memref<2x18x18x128xf32, #tpu.memory_space<vmem>>) attributes {dimension_semantics = [#tpu.dimension_semantics<arbitrary>], iteration_bounds = array<i64: 1>, scalar_prefetch = 0 : i64, scratch_operands = 1 : i64, tpu.core_type = #tpu.core_type<tc>, window_params = [{pipeline_mode = #tpu.pipeline_mode<synchronous>, transform_indices = @transform_0, window_bounds = array<i64: 2, 16, 16, 128>}, {pipeline_mode = #tpu.pipeline_mode<synchronous>, transform_indices = @transform_1, window_bounds = array<i64: 3, 3, 128, 128>}, {pipeline_mode = #tpu.pipeline_mode<synchronous>, transform_indices = @transform_2, window_bounds = array<i64: 3, 3, 128, 128>}, {pipeline_mode = #tpu.pipeline_mode<synchronous>, transform_indices = @transform_3, window_bounds = array<i64: 1, 128>}, {pipeline_mode = #tpu.pipeline_mode<synchronous>, transform_indices = @transform_4, window_bounds = array<i64: 1, 128>}, {pipeline_mode = #tpu.pipeline_mode<synchronous>, transform_indices = @transform_5, window_bounds = array<i64: 1, 128>}, {pipeline_mode = #tpu.pipeline_mode<synchronous>, transform_indices = @transform_6, window_bounds = array<i64: 1, 128>}, {pipeline_mode = #tpu.pipeline_mode<synchronous>, transform_indices = @transform_7, window_bounds = array<i64: 512, 128>}]} {
    %cst = arith.constant 0.000000e+00 : f32
    %0 = vector.broadcast %cst : f32 to vector<2x1x18x128xf32>
    %c0 = arith.constant 0 : index
    %c0_0 = arith.constant 0 : index
    %c0_1 = arith.constant 0 : index
    %c0_2 = arith.constant 0 : index
    %1 = vector.load %arg9[%c0, %c0_0, %c0_1, %c0_2] : memref<2x18x18x128xf32, #tpu.memory_space<vmem>>, vector<2x1x18x128xf32>
    tpu.vector_store %arg9[%c0, %c0_0, %c0_1, %c0_2], %0 {strides = array<i32>} : memref<2x18x18x128xf32, #tpu.memory_space<vmem>>, vector<2x1x18x128xf32>,
    %cst_3 = arith.constant 0.000000e+00 : f32
    %2 = vector.broadcast %cst_3 : f32 to vector<2x1x18x128xf32>
    %c0_4 = arith.constant 0 : index
    %c17 = arith.constant 17 : index
    %c0_5 = arith.constant 0 : index
    %c0_6 = arith.constant 0 : index
    %3 = vector.load %arg9[%c0_4, %c17, %c0_5, %c0_6] : memref<2x18x18x128xf32, #tpu.memory_space<vmem>>, vector<2x1x18x128xf32>
    tpu.vector_store %arg9[%c0_4, %c17, %c0_5, %c0_6], %2 {strides = array<i32>} : memref<2x18x18x128xf32, #tpu.memory_space<vmem>>, vector<2x1x18x128xf32>,
    %cst_7 = arith.constant 0.000000e+00 : f32
    %4 = vector.broadcast %cst_7 : f32 to vector<2x16x1x128xf32>
    %c0_8 = arith.constant 0 : index
    %c1 = arith.constant 1 : index
    %c0_9 = arith.constant 0 : index
    %c0_10 = arith.constant 0 : index
    %5 = vector.load %arg9[%c0_8, %c1, %c0_9, %c0_10] : memref<2x18x18x128xf32, #tpu.memory_space<vmem>>, vector<2x16x1x128xf32>
    tpu.vector_store %arg9[%c0_8, %c1, %c0_9, %c0_10], %4 {strides = array<i32>} : memref<2x18x18x128xf32, #tpu.memory_space<vmem>>, vector<2x16x1x128xf32>,
    %cst_11 = arith.constant 0.000000e+00 : f32
    %6 = vector.broadcast %cst_11 : f32 to vector<2x16x1x128xf32>
    %c0_12 = arith.constant 0 : index
    %c1_13 = arith.constant 1 : index
    %c17_14 = arith.constant 17 : index
    %c0_15 = arith.constant 0 : index
    %7 = vector.load %arg9[%c0_12, %c1_13, %c17_14, %c0_15] : memref<2x18x18x128xf32, #tpu.memory_space<vmem>>, vector<2x16x1x128xf32>
    tpu.vector_store %arg9[%c0_12, %c1_13, %c17_14, %c0_15], %6 {strides = array<i32>} : memref<2x18x18x128xf32, #tpu.memory_space<vmem>>, vector<2x16x1x128xf32>,
    %c0_16 = arith.constant 0 : index
    %c0_17 = arith.constant 0 : index
    %c0_18 = arith.constant 0 : index
    %c0_19 = arith.constant 0 : index
    %8 = vector.load %arg1[%c0_16, %c0_17, %c0_18, %c0_19] : memref<2x16x16x128xf32, #tpu.memory_space<vmem>>, vector<2x16x16x128xf32>
    %c0_20 = arith.constant 0 : index
    %c1_21 = arith.constant 1 : index
    %c1_22 = arith.constant 1 : index
    %c0_23 = arith.constant 0 : index
    %9 = vector.load %arg9[%c0_20, %c1_21, %c1_22, %c0_23] : memref<2x18x18x128xf32, #tpu.memory_space<vmem>>, vector<2x16x16x128xf32>
    tpu.vector_store %arg9[%c0_20, %c1_21, %c1_22, %c0_23], %8 {strides = array<i32>} : memref<2x18x18x128xf32, #tpu.memory_space<vmem>>, vector<2x16x16x128xf32>,
    %cst_24 = arith.constant 0.000000e+00 : f32
    %10 = vector.broadcast %cst_24 : f32 to vector<512x128xf32>
    %c0_25 = arith.constant 0 : index
    %c0_26 = arith.constant 0 : index
    %c0_27 = arith.constant 0 : index
    %c0_28 = arith.constant 0 : index
    %11 = vector.load %arg9[%c0_25, %c0_26, %c0_27, %c0_28] : memref<2x18x18x128xf32, #tpu.memory_space<vmem>>, vector<2x16x16x128xf32>
    %12 = vector.shape_cast %11 : vector<2x16x16x128xf32> to vector<512x128xf32>
    %c0_29 = arith.constant 0 : index
    %c0_30 = arith.constant 0 : index
    %c0_31 = arith.constant 0 : index
    %c0_32 = arith.constant 0 : index
    %13 = vector.load %arg2[%c0_29, %c0_30, %c0_31, %c0_32] : memref<3x3x128x128xf32, #tpu.memory_space<vmem>>, vector<1x1x128x128xf32>
    %14 = vector.shape_cast %13 : vector<1x1x128x128xf32> to vector<128x128xf32>
    %cst_33 = arith.constant dense<0.000000e+00> : vector<512x128xf32>
    %15 = tpu.matmul %12, %14, %cst_33 {dimension_numbers = #tpu.dot_dimension_numbers<[1], [0], [0], [1], [0, 0, 1, 1], [], []>} : vector<512x128xf32>, vector<128x128xf32>, vector<512x128xf32> -> vector<512x128xf32>
    %16 = arith.addf %10, %15 : vector<512x128xf32>
    %c0_34 = arith.constant 0 : index
    %c0_35 = arith.constant 0 : index
    %c1_36 = arith.constant 1 : index
    %c0_37 = arith.constant 0 : index
    %17 = vector.load %arg9[%c0_34, %c0_35, %c1_36, %c0_37] : memref<2x18x18x128xf32, #tpu.memory_space<vmem>>, vector<2x16x16x128xf32>
    %18 = vector.shape_cast %17 : vector<2x16x16x128xf32> to vector<512x128xf32>
    %c0_38 = arith.constant 0 : index
    %c1_39 = arith.constant 1 : index
    %c0_40 = arith.constant 0 : index
    %c0_41 = arith.constant 0 : index
    %19 = vector.load %arg2[%c0_38, %c1_39, %c0_40, %c0_41] : memref<3x3x128x128xf32, #tpu.memory_space<vmem>>, vector<1x1x128x128xf32>
    %20 = vector.shape_cast %19 : vector<1x1x128x128xf32> to vector<128x128xf32>
    %cst_42 = arith.constant dense<0.000000e+00> : vector<512x128xf32>
    %21 = tpu.matmul %18, %20, %cst_42 {dimension_numbers = #tpu.dot_dimension_numbers<[1], [0], [0], [1], [0, 0, 1, 1], [], []>} : vector<512x128xf32>, vector<128x128xf32>, vector<512x128xf32> -> vector<512x128xf32>
    %22 = arith.addf %16, %21 : vector<512x128xf32>
    %c0_43 = arith.constant 0 : index
    %c0_44 = arith.constant 0 : index
    %c2 = arith.constant 2 : index
    %c0_45 = arith.constant 0 : index
    %23 = vector.load %arg9[%c0_43, %c0_44, %c2, %c0_45] : memref<2x18x18x128xf32, #tpu.memory_space<vmem>>, vector<2x16x16x128xf32>
    %24 = vector.shape_cast %23 : vector<2x16x16x128xf32> to vector<512x128xf32>
    %c0_46 = arith.constant 0 : index
    %c2_47 = arith.constant 2 : index
    %c0_48 = arith.constant 0 : index
    %c0_49 = arith.constant 0 : index
    %25 = vector.load %arg2[%c0_46, %c2_47, %c0_48, %c0_49] : memref<3x3x128x128xf32, #tpu.memory_space<vmem>>, vector<1x1x128x128xf32>
    %26 = vector.shape_cast %25 : vector<1x1x128x128xf32> to vector<128x128xf32>
    %cst_50 = arith.constant dense<0.000000e+00> : vector<512x128xf32>
    %27 = tpu.matmul %24, %26, %cst_50 {dimension_numbers = #tpu.dot_dimension_numbers<[1], [0], [0], [1], [0, 0, 1, 1], [], []>} : vector<512x128xf32>, vector<128x128xf32>, vector<512x128xf32> -> vector<512x128xf32>
    %28 = arith.addf %22, %27 : vector<512x128xf32>
    %c0_51 = arith.constant 0 : index
    %c1_52 = arith.constant 1 : index
    %c0_53 = arith.constant 0 : index
    %c0_54 = arith.constant 0 : index
    %29 = vector.load %arg9[%c0_51, %c1_52, %c0_53, %c0_54] : memref<2x18x18x128xf32, #tpu.memory_space<vmem>>, vector<2x16x16x128xf32>
    %30 = vector.shape_cast %29 : vector<2x16x16x128xf32> to vector<512x128xf32>
    %c1_55 = arith.constant 1 : index
    %c0_56 = arith.constant 0 : index
    %c0_57 = arith.constant 0 : index
    %c0_58 = arith.constant 0 : index
    %31 = vector.load %arg2[%c1_55, %c0_56, %c0_57, %c0_58] : memref<3x3x128x128xf32, #tpu.memory_space<vmem>>, vector<1x1x128x128xf32>
    %32 = vector.shape_cast %31 : vector<1x1x128x128xf32> to vector<128x128xf32>
    %cst_59 = arith.constant dense<0.000000e+00> : vector<512x128xf32>
    %33 = tpu.matmul %30, %32, %cst_59 {dimension_numbers = #tpu.dot_dimension_numbers<[1], [0], [0], [1], [0, 0, 1, 1], [], []>} : vector<512x128xf32>, vector<128x128xf32>, vector<512x128xf32> -> vector<512x128xf32>
    %34 = arith.addf %28, %33 : vector<512x128xf32>
    %c0_60 = arith.constant 0 : index
    %c1_61 = arith.constant 1 : index
    %c1_62 = arith.constant 1 : index
    %c0_63 = arith.constant 0 : index
    %35 = vector.load %arg9[%c0_60, %c1_61, %c1_62, %c0_63] : memref<2x18x18x128xf32, #tpu.memory_space<vmem>>, vector<2x16x16x128xf32>
    %36 = vector.shape_cast %35 : vector<2x16x16x128xf32> to vector<512x128xf32>
    %c1_64 = arith.constant 1 : index
    %c1_65 = arith.constant 1 : index
    %c0_66 = arith.constant 0 : index
    %c0_67 = arith.constant 0 : index
    %37 = vector.load %arg2[%c1_64, %c1_65, %c0_66, %c0_67] : memref<3x3x128x128xf32, #tpu.memory_space<vmem>>, vector<1x1x128x128xf32>
    %38 = vector.shape_cast %37 : vector<1x1x128x128xf32> to vector<128x128xf32>
    %cst_68 = arith.constant dense<0.000000e+00> : vector<512x128xf32>
    %39 = tpu.matmul %36, %38, %cst_68 {dimension_numbers = #tpu.dot_dimension_numbers<[1], [0], [0], [1], [0, 0, 1, 1], [], []>} : vector<512x128xf32>, vector<128x128xf32>, vector<512x128xf32> -> vector<512x128xf32>
    %40 = arith.addf %34, %39 : vector<512x128xf32>
    %c0_69 = arith.constant 0 : index
    %c1_70 = arith.constant 1 : index
    %c2_71 = arith.constant 2 : index
    %c0_72 = arith.constant 0 : index
    %41 = vector.load %arg9[%c0_69, %c1_70, %c2_71, %c0_72] : memref<2x18x18x128xf32, #tpu.memory_space<vmem>>, vector<2x16x16x128xf32>
    %42 = vector.shape_cast %41 : vector<2x16x16x128xf32> to vector<512x128xf32>
    %c1_73 = arith.constant 1 : index
    %c2_74 = arith.constant 2 : index
    %c0_75 = arith.constant 0 : index
    %c0_76 = arith.constant 0 : index
    %43 = vector.load %arg2[%c1_73, %c2_74, %c0_75, %c0_76] : memref<3x3x128x128xf32, #tpu.memory_space<vmem>>, vector<1x1x128x128xf32>
    %44 = vector.shape_cast %43 : vector<1x1x128x128xf32> to vector<128x128xf32>
    %cst_77 = arith.constant dense<0.000000e+00> : vector<512x128xf32>
    %45 = tpu.matmul %42, %44, %cst_77 {dimension_numbers = #tpu.dot_dimension_numbers<[1], [0], [0], [1], [0, 0, 1, 1], [], []>} : vector<512x128xf32>, vector<128x128xf32>, vector<512x128xf32> -> vector<512x128xf32>
    %46 = arith.addf %40, %45 : vector<512x128xf32>
    %c0_78 = arith.constant 0 : index
    %c2_79 = arith.constant 2 : index
    %c0_80 = arith.constant 0 : index
    %c0_81 = arith.constant 0 : index
    %47 = vector.load %arg9[%c0_78, %c2_79, %c0_80, %c0_81] : memref<2x18x18x128xf32, #tpu.memory_space<vmem>>, vector<2x16x16x128xf32>
    %48 = vector.shape_cast %47 : vector<2x16x16x128xf32> to vector<512x128xf32>
    %c2_82 = arith.constant 2 : index
    %c0_83 = arith.constant 0 : index
    %c0_84 = arith.constant 0 : index
    %c0_85 = arith.constant 0 : index
    %49 = vector.load %arg2[%c2_82, %c0_83, %c0_84, %c0_85] : memref<3x3x128x128xf32, #tpu.memory_space<vmem>>, vector<1x1x128x128xf32>
    %50 = vector.shape_cast %49 : vector<1x1x128x128xf32> to vector<128x128xf32>
    %cst_86 = arith.constant dense<0.000000e+00> : vector<512x128xf32>
    %51 = tpu.matmul %48, %50, %cst_86 {dimension_numbers = #tpu.dot_dimension_numbers<[1], [0], [0], [1], [0, 0, 1, 1], [], []>} : vector<512x128xf32>, vector<128x128xf32>, vector<512x128xf32> -> vector<512x128xf32>
    %52 = arith.addf %46, %51 : vector<512x128xf32>
    %c0_87 = arith.constant 0 : index
    %c2_88 = arith.constant 2 : index
    %c1_89 = arith.constant 1 : index
    %c0_90 = arith.constant 0 : index
    %53 = vector.load %arg9[%c0_87, %c2_88, %c1_89, %c0_90] : memref<2x18x18x128xf32, #tpu.memory_space<vmem>>, vector<2x16x16x128xf32>
    %54 = vector.shape_cast %53 : vector<2x16x16x128xf32> to vector<512x128xf32>
    %c2_91 = arith.constant 2 : index
    %c1_92 = arith.constant 1 : index
    %c0_93 = arith.constant 0 : index
    %c0_94 = arith.constant 0 : index
    %55 = vector.load %arg2[%c2_91, %c1_92, %c0_93, %c0_94] : memref<3x3x128x128xf32, #tpu.memory_space<vmem>>, vector<1x1x128x128xf32>
    %56 = vector.shape_cast %55 : vector<1x1x128x128xf32> to vector<128x128xf32>
    %cst_95 = arith.constant dense<0.000000e+00> : vector<512x128xf32>
    %57 = tpu.matmul %54, %56, %cst_95 {dimension_numbers = #tpu.dot_dimension_numbers<[1], [0], [0], [1], [0, 0, 1, 1], [], []>} : vector<512x128xf32>, vector<128x128xf32>, vector<512x128xf32> -> vector<512x128xf32>
    %58 = arith.addf %52, %57 : vector<512x128xf32>
    %c0_96 = arith.constant 0 : index
    %c2_97 = arith.constant 2 : index
    %c2_98 = arith.constant 2 : index
    %c0_99 = arith.constant 0 : index
    %59 = vector.load %arg9[%c0_96, %c2_97, %c2_98, %c0_99] : memref<2x18x18x128xf32, #tpu.memory_space<vmem>>, vector<2x16x16x128xf32>
    %60 = vector.shape_cast %59 : vector<2x16x16x128xf32> to vector<512x128xf32>
    %c2_100 = arith.constant 2 : index
    %c2_101 = arith.constant 2 : index
    %c0_102 = arith.constant 0 : index
    %c0_103 = arith.constant 0 : index
    %61 = vector.load %arg2[%c2_100, %c2_101, %c0_102, %c0_103] : memref<3x3x128x128xf32, #tpu.memory_space<vmem>>, vector<1x1x128x128xf32>
    %62 = vector.shape_cast %61 : vector<1x1x128x128xf32> to vector<128x128xf32>
    %cst_104 = arith.constant dense<0.000000e+00> : vector<512x128xf32>
    %63 = tpu.matmul %60, %62, %cst_104 {dimension_numbers = #tpu.dot_dimension_numbers<[1], [0], [0], [1], [0, 0, 1, 1], [], []>} : vector<512x128xf32>, vector<128x128xf32>, vector<512x128xf32> -> vector<512x128xf32>
    %64 = arith.addf %58, %63 : vector<512x128xf32>
    %cst_105 = arith.constant dense<0.000000e+00> : vector<128xf32>
    %65 = vector.multi_reduction <add>, %64, %cst_105 [0] : vector<512x128xf32> to vector<128xf32>
    %66 = vector.shape_cast %65 : vector<128xf32> to vector<1x128xf32>
    %cst_106 = arith.constant 0.001953125 : f32
    %67 = vector.broadcast %cst_106 : f32 to vector<1x128xf32>
    %68 = arith.mulf %66, %67 : vector<1x128xf32>
    %69 = arith.mulf %64, %64 : vector<512x128xf32>
    %cst_107 = arith.constant dense<0.000000e+00> : vector<128xf32>
    %70 = vector.multi_reduction <add>, %69, %cst_107 [0] : vector<512x128xf32> to vector<128xf32>
    %71 = vector.shape_cast %70 : vector<128xf32> to vector<1x128xf32>
    %cst_108 = arith.constant 0.001953125 : f32
    %72 = vector.broadcast %cst_108 : f32 to vector<1x128xf32>
    %73 = arith.mulf %71, %72 : vector<1x128xf32>
    %74 = arith.mulf %68, %68 : vector<1x128xf32>
    %75 = arith.subf %73, %74 : vector<1x128xf32>
    %cst_109 = arith.constant 0.000000e+00 : f32
    %76 = vector.broadcast %cst_109 : f32 to vector<1x128xf32>
    %77 = arith.maximumf %75, %76 : vector<1x128xf32>
    %c0_110 = arith.constant 0 : index
    %c0_111 = arith.constant 0 : index
    %78 = vector.load %arg4[%c0_110, %c0_111] : memref<1x128xf32, #tpu.memory_space<vmem>>, vector<1x128xf32>
    %cst_112 = arith.constant 9.99999974E-6 : f32
    %79 = vector.broadcast %cst_112 : f32 to vector<1x128xf32>
    %80 = arith.addf %77, %79 : vector<1x128xf32>
    %81 = math.rsqrt %80 : vector<1x128xf32>
    %82 = arith.mulf %78, %81 : vector<1x128xf32>
    %c0_113 = arith.constant 0 : index
    %c0_114 = arith.constant 0 : index
    %83 = vector.load %arg5[%c0_113, %c0_114] : memref<1x128xf32, #tpu.memory_space<vmem>>, vector<1x128xf32>
    %84 = arith.mulf %68, %82 : vector<1x128xf32>
    %85 = arith.subf %83, %84 : vector<1x128xf32>
    %86 = vector.broadcast %82 : vector<1x128xf32> to vector<512x128xf32>
    %87 = arith.mulf %64, %86 : vector<512x128xf32>
    %88 = vector.broadcast %85 : vector<1x128xf32> to vector<512x128xf32>
    %89 = arith.addf %87, %88 : vector<512x128xf32>
    %cst_115 = arith.constant 0.000000e+00 : f32
    %90 = vector.broadcast %cst_115 : f32 to vector<512x128xf32>
    %91 = arith.maximumf %89, %90 : vector<512x128xf32>
    %92 = vector.shape_cast %91 : vector<512x128xf32> to vector<2x16x16x128xf32>
    %c0_116 = arith.constant 0 : index
    %c1_117 = arith.constant 1 : index
    %c1_118 = arith.constant 1 : index
    %c0_119 = arith.constant 0 : index
    %93 = vector.load %arg9[%c0_116, %c1_117, %c1_118, %c0_119] : memref<2x18x18x128xf32, #tpu.memory_space<vmem>>, vector<2x16x16x128xf32>
    tpu.vector_store %arg9[%c0_116, %c1_117, %c1_118, %c0_119], %92 {strides = array<i32>} : memref<2x18x18x128xf32, #tpu.memory_space<vmem>>, vector<2x16x16x128xf32>,
    %cst_120 = arith.constant 0.000000e+00 : f32
    %94 = vector.broadcast %cst_120 : f32 to vector<512x128xf32>
    %c0_121 = arith.constant 0 : index
    %c0_122 = arith.constant 0 : index
    %c0_123 = arith.constant 0 : index
    %c0_124 = arith.constant 0 : index
    %95 = vector.load %arg9[%c0_121, %c0_122, %c0_123, %c0_124] : memref<2x18x18x128xf32, #tpu.memory_space<vmem>>, vector<2x16x16x128xf32>
    %96 = vector.shape_cast %95 : vector<2x16x16x128xf32> to vector<512x128xf32>
    %c0_125 = arith.constant 0 : index
    %c0_126 = arith.constant 0 : index
    %c0_127 = arith.constant 0 : index
    %c0_128 = arith.constant 0 : index
    %97 = vector.load %arg3[%c0_125, %c0_126, %c0_127, %c0_128] : memref<3x3x128x128xf32, #tpu.memory_space<vmem>>, vector<1x1x128x128xf32>
    %98 = vector.shape_cast %97 : vector<1x1x128x128xf32> to vector<128x128xf32>
    %cst_129 = arith.constant dense<0.000000e+00> : vector<512x128xf32>
    %99 = tpu.matmul %96, %98, %cst_129 {dimension_numbers = #tpu.dot_dimension_numbers<[1], [0], [0], [1], [0, 0, 1, 1], [], []>} : vector<512x128xf32>, vector<128x128xf32>, vector<512x128xf32> -> vector<512x128xf32>
    %100 = arith.addf %94, %99 : vector<512x128xf32>
    %c0_130 = arith.constant 0 : index
    %c0_131 = arith.constant 0 : index
    %c1_132 = arith.constant 1 : index
    %c0_133 = arith.constant 0 : index
    %101 = vector.load %arg9[%c0_130, %c0_131, %c1_132, %c0_133] : memref<2x18x18x128xf32, #tpu.memory_space<vmem>>, vector<2x16x16x128xf32>
    %102 = vector.shape_cast %101 : vector<2x16x16x128xf32> to vector<512x128xf32>
    %c0_134 = arith.constant 0 : index
    %c1_135 = arith.constant 1 : index
    %c0_136 = arith.constant 0 : index
    %c0_137 = arith.constant 0 : index
    %103 = vector.load %arg3[%c0_134, %c1_135, %c0_136, %c0_137] : memref<3x3x128x128xf32, #tpu.memory_space<vmem>>, vector<1x1x128x128xf32>
    %104 = vector.shape_cast %103 : vector<1x1x128x128xf32> to vector<128x128xf32>
    %cst_138 = arith.constant dense<0.000000e+00> : vector<512x128xf32>
    %105 = tpu.matmul %102, %104, %cst_138 {dimension_numbers = #tpu.dot_dimension_numbers<[1], [0], [0], [1], [0, 0, 1, 1], [], []>} : vector<512x128xf32>, vector<128x128xf32>, vector<512x128xf32> -> vector<512x128xf32>
    %106 = arith.addf %100, %105 : vector<512x128xf32>
    %c0_139 = arith.constant 0 : index
    %c0_140 = arith.constant 0 : index
    %c2_141 = arith.constant 2 : index
    %c0_142 = arith.constant 0 : index
    %107 = vector.load %arg9[%c0_139, %c0_140, %c2_141, %c0_142] : memref<2x18x18x128xf32, #tpu.memory_space<vmem>>, vector<2x16x16x128xf32>
    %108 = vector.shape_cast %107 : vector<2x16x16x128xf32> to vector<512x128xf32>
    %c0_143 = arith.constant 0 : index
    %c2_144 = arith.constant 2 : index
    %c0_145 = arith.constant 0 : index
    %c0_146 = arith.constant 0 : index
    %109 = vector.load %arg3[%c0_143, %c2_144, %c0_145, %c0_146] : memref<3x3x128x128xf32, #tpu.memory_space<vmem>>, vector<1x1x128x128xf32>
    %110 = vector.shape_cast %109 : vector<1x1x128x128xf32> to vector<128x128xf32>
    %cst_147 = arith.constant dense<0.000000e+00> : vector<512x128xf32>
    %111 = tpu.matmul %108, %110, %cst_147 {dimension_numbers = #tpu.dot_dimension_numbers<[1], [0], [0], [1], [0, 0, 1, 1], [], []>} : vector<512x128xf32>, vector<128x128xf32>, vector<512x128xf32> -> vector<512x128xf32>
    %112 = arith.addf %106, %111 : vector<512x128xf32>
    %c0_148 = arith.constant 0 : index
    %c1_149 = arith.constant 1 : index
    %c0_150 = arith.constant 0 : index
    %c0_151 = arith.constant 0 : index
    %113 = vector.load %arg9[%c0_148, %c1_149, %c0_150, %c0_151] : memref<2x18x18x128xf32, #tpu.memory_space<vmem>>, vector<2x16x16x128xf32>
    %114 = vector.shape_cast %113 : vector<2x16x16x128xf32> to vector<512x128xf32>
    %c1_152 = arith.constant 1 : index
    %c0_153 = arith.constant 0 : index
    %c0_154 = arith.constant 0 : index
    %c0_155 = arith.constant 0 : index
    %115 = vector.load %arg3[%c1_152, %c0_153, %c0_154, %c0_155] : memref<3x3x128x128xf32, #tpu.memory_space<vmem>>, vector<1x1x128x128xf32>
    %116 = vector.shape_cast %115 : vector<1x1x128x128xf32> to vector<128x128xf32>
    %cst_156 = arith.constant dense<0.000000e+00> : vector<512x128xf32>
    %117 = tpu.matmul %114, %116, %cst_156 {dimension_numbers = #tpu.dot_dimension_numbers<[1], [0], [0], [1], [0, 0, 1, 1], [], []>} : vector<512x128xf32>, vector<128x128xf32>, vector<512x128xf32> -> vector<512x128xf32>
    %118 = arith.addf %112, %117 : vector<512x128xf32>
    %c0_157 = arith.constant 0 : index
    %c1_158 = arith.constant 1 : index
    %c1_159 = arith.constant 1 : index
    %c0_160 = arith.constant 0 : index
    %119 = vector.load %arg9[%c0_157, %c1_158, %c1_159, %c0_160] : memref<2x18x18x128xf32, #tpu.memory_space<vmem>>, vector<2x16x16x128xf32>
    %120 = vector.shape_cast %119 : vector<2x16x16x128xf32> to vector<512x128xf32>
    %c1_161 = arith.constant 1 : index
    %c1_162 = arith.constant 1 : index
    %c0_163 = arith.constant 0 : index
    %c0_164 = arith.constant 0 : index
    %121 = vector.load %arg3[%c1_161, %c1_162, %c0_163, %c0_164] : memref<3x3x128x128xf32, #tpu.memory_space<vmem>>, vector<1x1x128x128xf32>
    %122 = vector.shape_cast %121 : vector<1x1x128x128xf32> to vector<128x128xf32>
    %cst_165 = arith.constant dense<0.000000e+00> : vector<512x128xf32>
    %123 = tpu.matmul %120, %122, %cst_165 {dimension_numbers = #tpu.dot_dimension_numbers<[1], [0], [0], [1], [0, 0, 1, 1], [], []>} : vector<512x128xf32>, vector<128x128xf32>, vector<512x128xf32> -> vector<512x128xf32>
    %124 = arith.addf %118, %123 : vector<512x128xf32>
    %c0_166 = arith.constant 0 : index
    %c1_167 = arith.constant 1 : index
    %c2_168 = arith.constant 2 : index
    %c0_169 = arith.constant 0 : index
    %125 = vector.load %arg9[%c0_166, %c1_167, %c2_168, %c0_169] : memref<2x18x18x128xf32, #tpu.memory_space<vmem>>, vector<2x16x16x128xf32>
    %126 = vector.shape_cast %125 : vector<2x16x16x128xf32> to vector<512x128xf32>
    %c1_170 = arith.constant 1 : index
    %c2_171 = arith.constant 2 : index
    %c0_172 = arith.constant 0 : index
    %c0_173 = arith.constant 0 : index
    %127 = vector.load %arg3[%c1_170, %c2_171, %c0_172, %c0_173] : memref<3x3x128x128xf32, #tpu.memory_space<vmem>>, vector<1x1x128x128xf32>
    %128 = vector.shape_cast %127 : vector<1x1x128x128xf32> to vector<128x128xf32>
    %cst_174 = arith.constant dense<0.000000e+00> : vector<512x128xf32>
    %129 = tpu.matmul %126, %128, %cst_174 {dimension_numbers = #tpu.dot_dimension_numbers<[1], [0], [0], [1], [0, 0, 1, 1], [], []>} : vector<512x128xf32>, vector<128x128xf32>, vector<512x128xf32> -> vector<512x128xf32>
    %130 = arith.addf %124, %129 : vector<512x128xf32>
    %c0_175 = arith.constant 0 : index
    %c2_176 = arith.constant 2 : index
    %c0_177 = arith.constant 0 : index
    %c0_178 = arith.constant 0 : index
    %131 = vector.load %arg9[%c0_175, %c2_176, %c0_177, %c0_178] : memref<2x18x18x128xf32, #tpu.memory_space<vmem>>, vector<2x16x16x128xf32>
    %132 = vector.shape_cast %131 : vector<2x16x16x128xf32> to vector<512x128xf32>
    %c2_179 = arith.constant 2 : index
    %c0_180 = arith.constant 0 : index
    %c0_181 = arith.constant 0 : index
    %c0_182 = arith.constant 0 : index
    %133 = vector.load %arg3[%c2_179, %c0_180, %c0_181, %c0_182] : memref<3x3x128x128xf32, #tpu.memory_space<vmem>>, vector<1x1x128x128xf32>
    %134 = vector.shape_cast %133 : vector<1x1x128x128xf32> to vector<128x128xf32>
    %cst_183 = arith.constant dense<0.000000e+00> : vector<512x128xf32>
    %135 = tpu.matmul %132, %134, %cst_183 {dimension_numbers = #tpu.dot_dimension_numbers<[1], [0], [0], [1], [0, 0, 1, 1], [], []>} : vector<512x128xf32>, vector<128x128xf32>, vector<512x128xf32> -> vector<512x128xf32>
    %136 = arith.addf %130, %135 : vector<512x128xf32>
    %c0_184 = arith.constant 0 : index
    %c2_185 = arith.constant 2 : index
    %c1_186 = arith.constant 1 : index
    %c0_187 = arith.constant 0 : index
    %137 = vector.load %arg9[%c0_184, %c2_185, %c1_186, %c0_187] : memref<2x18x18x128xf32, #tpu.memory_space<vmem>>, vector<2x16x16x128xf32>
    %138 = vector.shape_cast %137 : vector<2x16x16x128xf32> to vector<512x128xf32>
    %c2_188 = arith.constant 2 : index
    %c1_189 = arith.constant 1 : index
    %c0_190 = arith.constant 0 : index
    %c0_191 = arith.constant 0 : index
    %139 = vector.load %arg3[%c2_188, %c1_189, %c0_190, %c0_191] : memref<3x3x128x128xf32, #tpu.memory_space<vmem>>, vector<1x1x128x128xf32>
    %140 = vector.shape_cast %139 : vector<1x1x128x128xf32> to vector<128x128xf32>
    %cst_192 = arith.constant dense<0.000000e+00> : vector<512x128xf32>
    %141 = tpu.matmul %138, %140, %cst_192 {dimension_numbers = #tpu.dot_dimension_numbers<[1], [0], [0], [1], [0, 0, 1, 1], [], []>} : vector<512x128xf32>, vector<128x128xf32>, vector<512x128xf32> -> vector<512x128xf32>
    %142 = arith.addf %136, %141 : vector<512x128xf32>
    %c0_193 = arith.constant 0 : index
    %c2_194 = arith.constant 2 : index
    %c2_195 = arith.constant 2 : index
    %c0_196 = arith.constant 0 : index
    %143 = vector.load %arg9[%c0_193, %c2_194, %c2_195, %c0_196] : memref<2x18x18x128xf32, #tpu.memory_space<vmem>>, vector<2x16x16x128xf32>
    %144 = vector.shape_cast %143 : vector<2x16x16x128xf32> to vector<512x128xf32>
    %c2_197 = arith.constant 2 : index
    %c2_198 = arith.constant 2 : index
    %c0_199 = arith.constant 0 : index
    %c0_200 = arith.constant 0 : index
    %145 = vector.load %arg3[%c2_197, %c2_198, %c0_199, %c0_200] : memref<3x3x128x128xf32, #tpu.memory_space<vmem>>, vector<1x1x128x128xf32>
    %146 = vector.shape_cast %145 : vector<1x1x128x128xf32> to vector<128x128xf32>
    %cst_201 = arith.constant dense<0.000000e+00> : vector<512x128xf32>
    %147 = tpu.matmul %144, %146, %cst_201 {dimension_numbers = #tpu.dot_dimension_numbers<[1], [0], [0], [1], [0, 0, 1, 1], [], []>} : vector<512x128xf32>, vector<128x128xf32>, vector<512x128xf32> -> vector<512x128xf32>
    %148 = arith.addf %142, %147 : vector<512x128xf32>
    %cst_202 = arith.constant dense<0.000000e+00> : vector<128xf32>
    %149 = vector.multi_reduction <add>, %148, %cst_202 [0] : vector<512x128xf32> to vector<128xf32>
    %150 = vector.shape_cast %149 : vector<128xf32> to vector<1x128xf32>
    %cst_203 = arith.constant 0.001953125 : f32
    %151 = vector.broadcast %cst_203 : f32 to vector<1x128xf32>
    %152 = arith.mulf %150, %151 : vector<1x128xf32>
    %153 = arith.mulf %148, %148 : vector<512x128xf32>
    %cst_204 = arith.constant dense<0.000000e+00> : vector<128xf32>
    %154 = vector.multi_reduction <add>, %153, %cst_204 [0] : vector<512x128xf32> to vector<128xf32>
    %155 = vector.shape_cast %154 : vector<128xf32> to vector<1x128xf32>
    %cst_205 = arith.constant 0.001953125 : f32
    %156 = vector.broadcast %cst_205 : f32 to vector<1x128xf32>
    %157 = arith.mulf %155, %156 : vector<1x128xf32>
    %158 = arith.mulf %152, %152 : vector<1x128xf32>
    %159 = arith.subf %157, %158 : vector<1x128xf32>
    %cst_206 = arith.constant 0.000000e+00 : f32
    %160 = vector.broadcast %cst_206 : f32 to vector<1x128xf32>
    %161 = arith.maximumf %159, %160 : vector<1x128xf32>
    %c0_207 = arith.constant 0 : index
    %c0_208 = arith.constant 0 : index
    %162 = vector.load %arg6[%c0_207, %c0_208] : memref<1x128xf32, #tpu.memory_space<vmem>>, vector<1x128xf32>
    %cst_209 = arith.constant 9.99999974E-6 : f32
    %163 = vector.broadcast %cst_209 : f32 to vector<1x128xf32>
    %164 = arith.addf %161, %163 : vector<1x128xf32>
    %165 = math.rsqrt %164 : vector<1x128xf32>
    %166 = arith.mulf %162, %165 : vector<1x128xf32>
    %c0_210 = arith.constant 0 : index
    %c0_211 = arith.constant 0 : index
    %167 = vector.load %arg7[%c0_210, %c0_211] : memref<1x128xf32, #tpu.memory_space<vmem>>, vector<1x128xf32>
    %168 = arith.mulf %152, %166 : vector<1x128xf32>
    %169 = arith.subf %167, %168 : vector<1x128xf32>
    %170 = vector.broadcast %166 : vector<1x128xf32> to vector<512x128xf32>
    %171 = arith.mulf %148, %170 : vector<512x128xf32>
    %172 = vector.broadcast %169 : vector<1x128xf32> to vector<512x128xf32>
    %173 = arith.addf %171, %172 : vector<512x128xf32>
    %c0_212 = arith.constant 0 : index
    %c0_213 = arith.constant 0 : index
    %c0_214 = arith.constant 0 : index
    %c0_215 = arith.constant 0 : index
    %174 = vector.load %arg1[%c0_212, %c0_213, %c0_214, %c0_215] : memref<2x16x16x128xf32, #tpu.memory_space<vmem>>, vector<2x16x16x128xf32>
    %175 = vector.shape_cast %174 : vector<2x16x16x128xf32> to vector<512x128xf32>
    %176 = arith.addf %173, %175 : vector<512x128xf32>
    %cst_216 = arith.constant 0.000000e+00 : f32
    %177 = vector.broadcast %cst_216 : f32 to vector<512x128xf32>
    %178 = arith.maximumf %176, %177 : vector<512x128xf32>
    %c0_217 = arith.constant 0 : index
    %c0_218 = arith.constant 0 : index
    %179 = vector.load %arg8[%c0_217, %c0_218] : memref<512x128xf32, #tpu.memory_space<vmem>>, vector<512x128xf32>
    tpu.vector_store %arg8[%c0_217, %c0_218], %178 {strides = array<i32>} : memref<512x128xf32, #tpu.memory_space<vmem>>, vector<512x128xf32>,
    return
  }
  func.func @transform_0(%arg0: i32) -> (i32, i32, i32, i32) {
    %c0_i32 = arith.constant 0 : i32
    %c0_i32_0 = arith.constant 0 : i32
    %c0_i32_1 = arith.constant 0 : i32
    %c0_i32_2 = arith.constant 0 : i32
    %c0_i32_3 = arith.constant 0 : i32
    return %c0_i32, %c0_i32_0, %c0_i32_1, %c0_i32_2 : i32, i32, i32, i32
  }
  func.func @transform_1(%arg0: i32) -> (i32, i32, i32, i32) {
    %c0_i32 = arith.constant 0 : i32
    %c0_i32_0 = arith.constant 0 : i32
    %c0_i32_1 = arith.constant 0 : i32
    %c0_i32_2 = arith.constant 0 : i32
    %c0_i32_3 = arith.constant 0 : i32
    return %c0_i32, %c0_i32_0, %c0_i32_1, %c0_i32_2 : i32, i32, i32, i32
  }
  func.func @transform_2(%arg0: i32) -> (i32, i32, i32, i32) {
    %c0_i32 = arith.constant 0 : i32
    %c0_i32_0 = arith.constant 0 : i32
    %c0_i32_1 = arith.constant 0 : i32
    %c0_i32_2 = arith.constant 0 : i32
    %c0_i32_3 = arith.constant 0 : i32
    return %c0_i32, %c0_i32_0, %c0_i32_1, %c0_i32_2 : i32, i32, i32, i32
  }
  func.func @transform_3(%arg0: i32) -> (i32, i32) {
    %c0_i32 = arith.constant 0 : i32
    %c0_i32_0 = arith.constant 0 : i32
    %c0_i32_1 = arith.constant 0 : i32
    return %c0_i32, %c0_i32_0 : i32, i32
  }
  func.func @transform_4(%arg0: i32) -> (i32, i32) {
    %c0_i32 = arith.constant 0 : i32
    %c0_i32_0 = arith.constant 0 : i32
    %c0_i32_1 = arith.constant 0 : i32
    return %c0_i32, %c0_i32_0 : i32, i32
  }
  func.func @transform_5(%arg0: i32) -> (i32, i32) {
    %c0_i32 = arith.constant 0 : i32
    %c0_i32_0 = arith.constant 0 : i32
    %c0_i32_1 = arith.constant 0 : i32
    return %c0_i32, %c0_i32_0 : i32, i32
  }
  func.func @transform_6(%arg0: i32) -> (i32, i32) {
    %c0_i32 = arith.constant 0 : i32
    %c0_i32_0 = arith.constant 0 : i32
    %c0_i32_1 = arith.constant 0 : i32
    return %c0_i32, %c0_i32_0 : i32, i32
  }
  func.func @transform_7(%arg0: i32) -> (i32, i32) {
    %c0_i32 = arith.constant 0 : i32
    %c0_i32_0 = arith.constant 0 : i32
    %c0_i32_1 = arith.constant 0 : i32
    return %c0_i32, %c0_i32_0 : i32, i32
  }
}

</mosaic_0001>

<bundles_post_ra>
// kernel: tpu_custom_call.1
= control target key start
LH: loop header
LB: loop body
LE: loop exit
PB: predicated region body
PF: predicated region fallthrough
CT: control target
= control target key end

     0   :  { %12 = vsyncpa [#allocation4], 0  ;;  %s20522_s0 = inlined_call_operand.hbm [shape: f32[2,16,16,128], index: 0, kind: input, shape index: {}]   ;;  %s20523_s1 = inlined_call_operand.hbm [shape: f32[3,3,128,128], index: 1, kind: input, shape index: {}]   ;;  %s20524_s2 = inlined_call_operand.hbm [shape: f32[3,3,128,128], index: 2, kind: input, shape index: {}]   ;;  %s20525_s3 = inlined_call_operand.hbm [shape: f32[1,128], index: 3, kind: input, shape index: {}]   ;;  %s20526_s4 = inlined_call_operand.hbm [shape: f32[1,128], index: 4, kind: input, shape index: {}]   ;;  %s20527_s5 = inlined_call_operand.hbm [shape: f32[1,128], index: 5, kind: input, shape index: {}]   ;;  %s20528_s6 = inlined_call_operand.hbm [shape: f32[1,128], index: 6, kind: input, shape index: {}]   ;;  %s20529_s7 = inlined_call_operand.hbm [shape: f32[512,128], index: 7, kind: output, shape index: {}]  }
   0x1   :  { %13 = vsyncpa [#allocation7], 0 }
   0x2   :  { %14 = vsyncpa [#allocation10], 0 }
   0x3   :  { %15 = vsyncpa [#allocation13], 0 }
   0x4   :  { %16 = vsyncpa [#allocation5], 0  ;;  %s16263_s24 = smov [#allocation6]   ;;  %s16264_s26 = smov [#allocation9]  }
   0x5   :  { %s34_s25 = sshll.u32 %s16263_s24, 4  ;;  %s59_s27 = sshll.u32 %s16264_s26, 4  ;;  %s35_s25 = int_to_ptr.vmem [resolvable:$true] %s34_s25  ;;  %s16314_s27 = int_to_ptr.vmem [resolvable:$true] %s59_s27 }
   0x6   :  { %s16077_s30 = scalar_lea.hbm %s20523_s1, 18432 }
   0x7   :  { %p16078_p0 = scmp.ne.s32.totalorder %s20523_s1, %s16077_s30  ;;  %p16081_p1 = scmp.lt.u32.totalorder %s16077_s30, %s20523_s1 }
   0x9   :  { %p16083_p2 = pnand %p16081_p1, %p16078_p0 }
   0xb   :  { %16086 = shalt.err (!%p16083_p2)
}
   0xc   :  { %s16087_s12 = scalar_lea.vmem %s35_s25, 18432  ;;  %p16092_p4 = scmp.lt.s32.totalorder %s35_s25, %s35_s25 }
   0xd   :  { %p16088_p3 = scmp.ne.s32.totalorder %s35_s25, %s16087_s12  ;;  %p16093_p5 = scmp.lt.s32.totalorder %s16087_s12, %s16087_s12 }
   0xf   :  { %p16094_p6 = por %p16093_p5, %p16092_p4 }
  0x11   :  { %p16095_p7 = pnand %p16094_p6, %p16088_p3 }
  0x13   :  { %16098 = shalt.err (!%p16095_p7)
}
  0x14   :  { %s16265_s13 = smov 128   ;;  %s16266_s14 = smov 8  }
  0x15   :  { %40 = dma.hbm_to_vmem [thread:$0]  %s20523_s1, 18432, %s35_s25, [#allocation7], %s16265_s13, %s16265_s13, %s16266_s14  }
  0x16   :  { %s16099_s19 = scalar_lea.hbm %s20525_s3, 16 }
  0x17   :  { %p16100_p8 = scmp.ne.s32.totalorder %s20525_s3, %s16099_s19  ;;  %p16103_p9 = scmp.lt.u32.totalorder %s16099_s19, %s20525_s3 }
  0x19   :  { %p16105_p10 = pnand %p16103_p9, %p16100_p8 }
  0x1b   :  { %16108 = shalt.err (!%p16105_p10)
}
  0x1c   :  { %s16109_s24 = scalar_lea.vmem %s16314_s27, 16  ;;  %s16113_s1 = scalar_lea.vmem %s16314_s27, 32 }
  0x1d   :  { %p16110_p11 = scmp.ne.s32.totalorder %s16314_s27, %s16109_s24  ;;  %p16114_p12 = scmp.lt.s32.totalorder %s16314_s27, %s16314_s27 }
  0x1e   :  { %p16115_p13 = scmp.lt.s32.totalorder %s16113_s1, %s16109_s24 }
  0x20   :  { %p16116_p0 = por %p16115_p13, %p16114_p12 }
  0x22   :  { %p16117_p1 = pnand %p16116_p0, %p16110_p11 }
  0x24   :  { %16120 = shalt.err (!%p16117_p1)
}
  0x25   :  { %62 = dma.hbm_to_vmem [thread:$0]  %s20525_s3, 16, %s16314_s27, [#allocation10]  }
  0x26   :  { %s16267_s28 = smov [#allocation12]   ;;  %s16268_s30 = smov [#allocation3]  }
  0x27   :  { %s79_s29 = sshll.u32 %s16267_s28, 4  ;;  %s22_s8 = sshll.u32 %s16268_s30, 4  ;;  %s80_s29 = int_to_ptr.vmem [resolvable:$true] %s79_s29  ;;  %s16349_s8 = int_to_ptr.vmem [resolvable:$true] %s22_s8 }
  0x28   :  { %s16121_s11 = scalar_lea.hbm %s20527_s5, 16 }
  0x29   :  { %p16122_p2 = scmp.ne.s32.totalorder %s20527_s5, %s16121_s11  ;;  %p16125_p3 = scmp.lt.u32.totalorder %s16121_s11, %s20527_s5 }
  0x2b   :  { %p16127_p4 = pnand %p16125_p3, %p16122_p2 }
  0x2d   :  { %16130 = shalt.err (!%p16127_p4)
}
  0x2e   :  { %s16131_s3 = scalar_lea.vmem %s80_s29, 16  ;;  %s16135_s27 = scalar_lea.vmem %s80_s29, 32 }
  0x2f   :  { %p16132_p5 = scmp.ne.s32.totalorder %s80_s29, %s16131_s3  ;;  %p16136_p6 = scmp.lt.s32.totalorder %s80_s29, %s80_s29 }
  0x30   :  { %p16137_p7 = scmp.lt.s32.totalorder %s16135_s27, %s16131_s3 }
  0x32   :  { %p16138_p8 = por %p16137_p7, %p16136_p6 }
  0x34   :  { %p16139_p9 = pnand %p16138_p8, %p16132_p5 }
  0x36   :  { %16142 = shalt.err (!%p16139_p9)
}
  0x37   :  { %82 = dma.hbm_to_vmem [thread:$0]  %s20527_s5, 16, %s80_s29, [#allocation13]  }
  0x38   :  { %s16143_s22 = scalar_lea.hbm %s20522_s0, 8192 }
  0x39   :  { %p16144_p10 = scmp.ne.s32.totalorder %s20522_s0, %s16143_s22  ;;  %p16147_p11 = scmp.lt.u32.totalorder %s16143_s22, %s20522_s0 }
  0x3b   :  { %p16149_p12 = pnand %p16147_p11, %p16144_p10 }
  0x3d   :  { %16152 = shalt.err (!%p16149_p12)
}
  0x3e   :  { %s16153_s26 = scalar_lea.vmem %s16349_s8, 8192  ;;  %p16158_p0 = scmp.lt.s32.totalorder %s16349_s8, %s16349_s8 }
  0x3f   :  { %p16154_p13 = scmp.ne.s32.totalorder %s16349_s8, %s16153_s26  ;;  %p16159_p1 = scmp.lt.s32.totalorder %s16153_s26, %s16153_s26 }
  0x41   :  { %p16160_p2 = por %p16159_p1, %p16158_p0 }
  0x43   :  { %p16161_p3 = pnand %p16160_p2, %p16154_p13 }
  0x45   :  { %16164 = shalt.err (!%p16161_p3)
}
  0x46   :  { %28 = dma.hbm_to_vmem [thread:$0]  %s20522_s0, 8192, %s16349_s8, [#allocation4], %s16265_s13, %s16265_s13, %s16266_s14  }
  0x47   :  { %s16269_s29 = smov [#allocation8]   ;;  %s16270_s9 = smov [#allocation11]  }
  0x48   :  { %s46_s30 = sshll.u32 %s16269_s29, 4  ;;  %s69_s10 = sshll.u32 %s16270_s9, 4  ;;  %s47_s30 = int_to_ptr.vmem [resolvable:$true] %s46_s30  ;;  %s70_s10 = int_to_ptr.vmem [resolvable:$true] %s69_s10 }
  0x49   :  { %s16165_s15 = scalar_lea.hbm %s20524_s2, 18432 }
  0x4a   :  { %p16166_p4 = scmp.ne.s32.totalorder %s20524_s2, %s16165_s15  ;;  %p16169_p5 = scmp.lt.u32.totalorder %s16165_s15, %s20524_s2 }
  0x4c   :  { %p16171_p6 = pnand %p16169_p5, %p16166_p4 }
  0x4e   :  { %16174 = shalt.err (!%p16171_p6)
}
  0x4f   :  { %s16175_s0 = scalar_lea.vmem %s47_s30, 18432  ;;  %p16180_p8 = scmp.lt.s32.totalorder %s47_s30, %s47_s30 }
  0x50   :  { %p16176_p7 = scmp.ne.s32.totalorder %s47_s30, %s16175_s0  ;;  %p16181_p9 = scmp.lt.s32.totalorder %s16175_s0, %s16175_s0 }
  0x52   :  { %p16182_p10 = por %p16181_p9, %p16180_p8 }
  0x54   :  { %p16183_p11 = pnand %p16182_p10, %p16176_p7 }
  0x56   :  { %16186 = shalt.err (!%p16183_p11)
}
  0x57   :  { %52 = dma.hbm_to_vmem [thread:$0]  %s20524_s2, 18432, %s47_s30, [#allocation7], %s16265_s13, %s16265_s13, %s16266_s14  }
  0x58   :  { %s16187_s21 = scalar_lea.hbm %s20526_s4, 16 }
  0x59   :  { %p16188_p12 = scmp.ne.s32.totalorder %s20526_s4, %s16187_s21  ;;  %p16191_p13 = scmp.lt.u32.totalorder %s16187_s21, %s20526_s4 }
  0x5b   :  { %p16193_p0 = pnand %p16191_p13, %p16188_p12 }
  0x5d   :  { %16196 = shalt.err (!%p16193_p0)
}
  0x5e   :  { %s16197_s25 = scalar_lea.vmem %s70_s10, 16  ;;  %s16201_s26 = scalar_lea.vmem %s70_s10, 32 }
  0x5f   :  { %p16198_p1 = scmp.ne.s32.totalorder %s70_s10, %s16197_s25  ;;  %p16202_p2 = scmp.lt.s32.totalorder %s70_s10, %s70_s10 }
  0x60   :  { %p16203_p3 = scmp.lt.s32.totalorder %s16201_s26, %s16197_s25 }
  0x62   :  { %p16204_p4 = por %p16203_p3, %p16202_p2 }
  0x64   :  { %p16205_p5 = pnand %p16204_p4, %p16198_p1 }
  0x66   :  { %16208 = shalt.err (!%p16205_p5)
}
  0x67   :  { %72 = dma.hbm_to_vmem [thread:$0]  %s20526_s4, 16, %s70_s10, [#allocation10]  }
  0x68   :  { %s16271_s28 = smov [#allocation14]   ;;  %s16209_s11 = scalar_lea.hbm %s20528_s6, 16 }
  0x69   :  { %s89_s29 = sshll.u32 %s16271_s28, 4  ;;  %p16210_p6 = scmp.ne.s32.totalorder %s20528_s6, %s16209_s11  ;;  %s90_s29 = int_to_ptr.vmem [resolvable:$true] %s89_s29 }
  0x6a   :  { %p16213_p7 = scmp.lt.u32.totalorder %s16209_s11, %s20528_s6 }
  0x6c   :  { %p16215_p8 = pnand %p16213_p7, %p16210_p6 }
  0x6e   :  { %16218 = shalt.err (!%p16215_p8)
}
  0x6f   :  { %s16219_s3 = scalar_lea.vmem %s90_s29, 16  ;;  %s16223_s4 = scalar_lea.vmem %s90_s29, 32 }
  0x70   :  { %p16220_p9 = scmp.ne.s32.totalorder %s90_s29, %s16219_s3  ;;  %p16224_p10 = scmp.lt.s32.totalorder %s90_s29, %s90_s29 }
  0x71   :  { %p16225_p11 = scmp.lt.s32.totalorder %s16223_s4, %s16219_s3 }
  0x73   :  { %p16226_p12 = por %p16225_p11, %p16224_p10 }
  0x75   :  { %p16227_p13 = pnand %p16226_p12, %p16220_p9 }
  0x77   :  { %16230 = shalt.err (!%p16227_p13)
}
  0x78   :  { %92 = dma.hbm_to_vmem [thread:$0]  %s20528_s6, 16, %s90_s29, [#allocation13]  }
  0x79   :  { %16253 = dma.done.wait [#allocation4], 8192  }
  0x7a   :  { %16254 = vsyncadd [#allocation4], 4294959104 }
  0x7b   :  { %16255 = dma.done.wait [#allocation7], 36864  }
  0x7c   :  { %16256 = vsyncadd [#allocation7], 4294930432 }
  0x7d   :  { %16257 = dma.done.wait [#allocation10], 32  }
  0x7e   :  { %16258 = vsyncadd [#allocation10], 4294967264 }
  0x7f   :  { %16259 = dma.done.wait [#allocation13], 32  }
  0x80   :  { %16260 = vsyncadd [#allocation13], 4294967264  ;;  %v20530_v0 = vmov 0.0   ;;  %v465_v1 = vld [vmem:[#allocation6 + $0x80] sm:$0xff]  ;;  %v466_v2 = vld [vmem:[#allocation6 + $0x88] sm:$0xff]  ;;  %s16273_s6 = smov [#allocation15]  }
  0x81   :  { %114 = vst [vmem:[#allocation2] sm:$0xff] %v20530_v0  ;;  %115 = vst [vmem:[#allocation2 + $0x8] sm:$0xff] %v20530_v0  ;;  %v467_v3 = vld [vmem:[#allocation6 + $0x90] sm:$0xff]  ;;  %v14459_v4 = vpack.c.bf16 %v466_v2, %v465_v1  ;;  %v468_v5 = vld [vmem:[#allocation6 + $0x98] sm:$0xff]  ;;  %s10700_s0 = sshll.u32 %s16273_s6, 4  ;;  %s10701_s0 = int_to_ptr.vmem [resolvable:$true] %s10700_s0 }
  0x82   :  { %116 = vst [vmem:[#allocation2 + $0x10] sm:$0x3] %v20530_v0  ;;  %117 = vst [vmem:[#allocation2 + $0x1b0] sm:$0xff] %v20530_v0  ;;  %v14463_v6 = vpack.c.bf16 %v468_v5, %v467_v3  ;;  %v469_v7 = vld [vmem:[#allocation6 + $0xa0] sm:$0xff]  ;;  %v470_v8 = vld [vmem:[#allocation6 + $0xa8] sm:$0xff]  ;;  %s16231_s8 = scalar_lea.vmem %s10701_s0, 8192  ;;  %p16236_p1 = scmp.lt.s32.totalorder %s10701_s0, %s10701_s0 }
  0x83   :  { %118 = vst [vmem:[#allocation2 + $0x1b8] sm:$0xff] %v20530_v0  ;;  %119 = vst [vmem:[#allocation2 + $0x1c0] sm:$0x3] %v20530_v0  ;;  %14460 = vmatprep.subr.bf16.mxu0 %v14459_v4  ;;  %v14467_v9 = vpack.c.bf16 %v470_v8, %v469_v7  ;;  %v471_v11 = vld [vmem:[#allocation6 + $0xb0] sm:$0xff]  ;;  %v472_v12 = vld [vmem:[#allocation6 + $0xb8] sm:$0xff]  ;;  %p16232_p0 = scmp.ne.s32.totalorder %s10701_s0, %s16231_s8  ;;  %p16237_p2 = scmp.lt.s32.totalorder %s16231_s8, %s16231_s8 }
  0x84   :  { %121 = vst [vmem:[#allocation2 + $0x198] sm:$0xff] %v20530_v0  ;;  %122 = vst [vmem:[#allocation2 + $0x1a0] sm:$0xff] %v20530_v0  ;;  %14462 = vmatpush3.bf16.msra.mxu0 %v14459_v4  ;;  %v16498_v13 = vld [vmem:[#allocation3] sm:$0xff]  ;;  %v16501_v14 = vld [vmem:[#allocation3 + $0x8] sm:$0xff]  ;;  %v14471_v20 = vpack.c.bf16 %v472_v12, %v471_v11 }
  0x85   :  { %123 = vst [vmem:[#allocation2 + $0x1a8] sm:$0x3] %v20530_v0  ;;  %124 = vst [vmem:[#allocation2 + $0x348] sm:$0xff] %v20530_v0  ;;  %14464 = vmatprep.subr.bf16.mxu0 %v14463_v6  ;;  %v16503_v15 = vld [vmem:[#allocation3 + $0x10] sm:$0xff]  ;;  %v16505_v16 = vld [vmem:[#allocation3 + $0x18] sm:$0xff]  ;;  %p16238_p3 = por %p16237_p2, %p16236_p1 }
  0x86   :  { %125 = vst [vmem:[#allocation2 + $0x350] sm:$0xff] %v20530_v0  ;;  %126 = vst [vmem:[#allocation2 + $0x358] sm:$0x3] %v20530_v0  ;;  %v16510_v17 = vld [vmem:[#allocation3 + $0x20] sm:$0xff]  ;;  %v16512_v18 = vld [vmem:[#allocation3 + $0x28] sm:$0xff] }
  0x87   :  { %128 = vst [vmem:[#allocation2 + $0x18] sm:$0x1] %v20530_v0  ;;  %129 = vst [vmem:[#allocation2 + $0x30] sm:$0x1] %v20530_v0  ;;  %v16514_v19 = vld [vmem:[#allocation3 + $0x30] sm:$0xff]  ;;  %v473_v21 = vld [vmem:[#allocation6 + $0xc0] sm:$0xff]  ;;  %p16239_p4 = pnand %p16238_p3, %p16232_p0 }
  0x88   :  { %130 = vst [vmem:[#allocation2 + $0x48] sm:$0x1] %v20530_v0  ;;  %131 = vst [vmem:[#allocation2 + $0x60] sm:$0x1] %v20530_v0  ;;  %v400_v10 = vld [vmem:[#allocation2 + $0x1] sm:$0xff]  ;;  %14466 = vmatpush3.bf16.msra.mxu0 %v14463_v6  ;;  %v16519_v23 = vld [vmem:[#allocation3 + $0x38] sm:$0xff] }
  0x89   :  { %132 = vst [vmem:[#allocation2 + $0x78] sm:$0x1] %v20530_v0  ;;  %133 = vst [vmem:[#allocation2 + $0x90] sm:$0x1] %v20530_v0  ;;  %12187 = vmatprep.mubr.f32.mxu0 %v400_v10  ;;  %14468 = vmatprep.subr.bf16.mxu0 %v14467_v9  ;;  %v474_v22 = vld [vmem:[#allocation6 + $0xc8] sm:$0xff]  ;;  %v16522_v24 = vld [vmem:[#allocation3 + $0x40] sm:$0xff] }
  0x8a   :  { %134 = vst [vmem:[#allocation2 + $0xa8] sm:$0x1] %v20530_v0  ;;  %135 = vst [vmem:[#allocation2 + $0xc0] sm:$0x1] %v20530_v0  ;;  %v16524_v25 = vld [vmem:[#allocation3 + $0x48] sm:$0xff]  ;;  %v16526_v26 = vld [vmem:[#allocation3 + $0x50] sm:$0xff]  ;;  %v14475_v33 = vpack.c.bf16 %v474_v22, %v473_v21 }
  0x8b   :  { %136 = vst [vmem:[#allocation2 + $0xd8] sm:$0x1] %v20530_v0  ;;  %137 = vst [vmem:[#allocation2 + $0xf0] sm:$0x1] %v20530_v0  ;;  %v16531_v27 = vld [vmem:[#allocation3 + $0x58] sm:$0xff]  ;;  %v16533_v28 = vld [vmem:[#allocation3 + $0x60] sm:$0xff] }
  0x8c   :  { %138 = vst [vmem:[#allocation2 + $0x108] sm:$0x1] %v20530_v0  ;;  %139 = vst [vmem:[#allocation2 + $0x120] sm:$0x1] %v20530_v0  ;;  %v16535_v29 = vld [vmem:[#allocation3 + $0x68] sm:$0xff]  ;;  %14470 = vmatpush3.bf16.msra.mxu0 %v14467_v9  ;;  %v475_v30 = vld [vmem:[#allocation6 + $0xd0] sm:$0xff] }
  0x8d   :  { %140 = vst [vmem:[#allocation2 + $0x138] sm:$0x1] %v20530_v0  ;;  %141 = vst [vmem:[#allocation2 + $0x150] sm:$0x1] %v20530_v0  ;;  %v16540_v31 = vld [vmem:[#allocation3 + $0x70] sm:$0xff]  ;;  %v16542_v32 = vld [vmem:[#allocation3 + $0x78] sm:$0xff]  ;;  %14472 = vmatprep.subr.bf16.mxu0 %v14471_v20 }
  0x8e   :  { %142 = vst [vmem:[#allocation2 + $0x168] sm:$0x1] %v20530_v0  ;;  %143 = vst [vmem:[#allocation2 + $0x180] sm:$0x1] %v20530_v0  ;;  %v476_v34 = vld [vmem:[#allocation6 + $0xd8] sm:$0xff]  ;;  %v16546_v35 = vld [vmem:[#allocation3 + $0x80] sm:$0xff] }
  0x8f   :  { %144 = vst [vmem:[#allocation2 + $0x1c8] sm:$0x1] %v20530_v0  ;;  %145 = vst [vmem:[#allocation2 + $0x1e0] sm:$0x1] %v20530_v0  ;;  %v16548_v36 = vld [vmem:[#allocation3 + $0x88] sm:$0xff]  ;;  %v16552_v37 = vld [vmem:[#allocation3 + $0x90] sm:$0xff]  ;;  %v14479_v45 = vpack.c.bf16 %v476_v34, %v475_v30 }
  0x90   :  { %146 = vst [vmem:[#allocation2 + $0x1f8] sm:$0x1] %v20530_v0  ;;  %147 = vst [vmem:[#allocation2 + $0x210] sm:$0x1] %v20530_v0  ;;  %v16554_v38 = vld [vmem:[#allocation3 + $0x98] sm:$0xff]  ;;  %v16556_v39 = vld [vmem:[#allocation3 + $0xa0] sm:$0xff]  ;;  %14474 = vmatpush3.bf16.msra.mxu0 %v14471_v20 }
  0x91   :  { %148 = vst [vmem:[#allocation2 + $0x228] sm:$0x1] %v20530_v0  ;;  %149 = vst [vmem:[#allocation2 + $0x240] sm:$0x1] %v20530_v0  ;;  %v16561_v40 = vld [vmem:[#allocation3 + $0xa8] sm:$0xff]  ;;  %v16563_v41 = vld [vmem:[#allocation3 + $0xb0] sm:$0xff]  ;;  %14476 = vmatprep.subr.bf16.mxu0 %v14475_v33 }
  0x92   :  { %150 = vst [vmem:[#allocation2 + $0x258] sm:$0x1] %v20530_v0  ;;  %151 = vst [vmem:[#allocation2 + $0x270] sm:$0x1] %v20530_v0  ;;  %v16565_v42 = vld [vmem:[#allocation3 + $0xb8] sm:$0xff]  ;;  %v477_v43 = vld [vmem:[#allocation6 + $0xe0] sm:$0xff] }
  0x93   :  { %152 = vst [vmem:[#allocation2 + $0x288] sm:$0x1] %v20530_v0  ;;  %153 = vst [vmem:[#allocation2 + $0x2a0] sm:$0x1] %v20530_v0  ;;  %v16570_v44 = vld [vmem:[#allocation3 + $0xc0] sm:$0xff]  ;;  %v16573_v46 = vld [vmem:[#allocation3 + $0xc8] sm:$0xff] }
  0x94   :  { %154 = vst [vmem:[#allocation2 + $0x2b8] sm:$0x1] %v20530_v0  ;;  %155 = vst [vmem:[#allocation2 + $0x2d0] sm:$0x1] %v20530_v0  ;;  %v16575_v47 = vld [vmem:[#allocation3 + $0xd0] sm:$0xff]  ;;  %v16577_v48 = vld [vmem:[#allocation3 + $0xd8] sm:$0xff]  ;;  %14478 = vmatpush3.bf16.msra.mxu0 %v14475_v33 }
  0x95   :  { %156 = vst [vmem:[#allocation2 + $0x2e8] sm:$0x1] %v20530_v0  ;;  %157 = vst [vmem:[#allocation2 + $0x300] sm:$0x1] %v20530_v0  ;;  %v478_v49 = vld [vmem:[#allocation6 + $0xe8] sm:$0xff]  ;;  %v16582_v50 = vld [vmem:[#allocation3 + $0xe0] sm:$0xff]  ;;  %14480 = vmatprep.subr.bf16.mxu0 %v14479_v45 }
  0x96   :  { %158 = vst [vmem:[#allocation2 + $0x318] sm:$0x1] %v20530_v0  ;;  %159 = vst [vmem:[#allocation2 + $0x330] sm:$0x1] %v20530_v0  ;;  %v16584_v51 = vld [vmem:[#allocation3 + $0xe8] sm:$0xff]  ;;  %v479_v52 = vld [vmem:[#allocation6 + $0xf0] sm:$0xff]  ;;  %v14483_v56 = vpack.c.bf16 %v478_v49, %v477_v43 }
  0x97   :  { %160 = vst [vmem:[#allocation2 + $0x29] sm:$0x1] %v20530_v0  ;;  %161 = vst [vmem:[#allocation2 + $0x41] sm:$0x1] %v20530_v0  ;;  %v16588_v53 = vld [vmem:[#allocation3 + $0x100] sm:$0xff]  ;;  %v16590_v54 = vld [vmem:[#allocation3 + $0x108] sm:$0xff] }
  0x98   :  { %162 = vst [vmem:[#allocation2 + $0x59] sm:$0x1] %v20530_v0  ;;  %163 = vst [vmem:[#allocation2 + $0x71] sm:$0x1] %v20530_v0  ;;  %v16592_v55 = vld [vmem:[#allocation3 + $0x110] sm:$0xff]  ;;  %v16597_v57 = vld [vmem:[#allocation3 + $0x118] sm:$0xff]  ;;  %14482 = vmatpush3.bf16.msra.mxu0 %v14479_v45 }
  0x99   :  { %164 = vst [vmem:[#allocation2 + $0x89] sm:$0x1] %v20530_v0  ;;  %165 = vst [vmem:[#allocation2 + $0xa1] sm:$0x1] %v20530_v0  ;;  %v16599_v58 = vld [vmem:[#allocation3 + $0x120] sm:$0xff]  ;;  %v16601_v59 = vld [vmem:[#allocation3 + $0x128] sm:$0xff]  ;;  %14484 = vmatprep.subr.bf16.mxu0 %v14483_v56 }
  0x9a   :  { %166 = vst [vmem:[#allocation2 + $0xb9] sm:$0x1] %v20530_v0  ;;  %167 = vst [vmem:[#allocation2 + $0xd1] sm:$0x1] %v20530_v0  ;;  %v480_v60 = vld [vmem:[#allocation6 + $0xf8] sm:$0xff]  ;;  %v16606_v61 = vld [vmem:[#allocation3 + $0x130] sm:$0xff] }
  0x9b   :  { %168 = vst [vmem:[#allocation2 + $0xe9] sm:$0x1] %v20530_v0  ;;  %169 = vst [vmem:[#allocation2 + $0x101] sm:$0x1] %v20530_v0  ;;  %v16608_v62 = vld [vmem:[#allocation3 + $0x138] sm:$0xff]  ;;  %v16612_v63 = vld [vmem:[#allocation3 + $0x140] sm:$0xff]  ;;  %v14487_v5 = vpack.c.bf16 %v480_v60, %v479_v52 }
  0x9c   :  { %170 = vst [vmem:[#allocation2 + $0x119] sm:$0x1] %v20530_v0  ;;  %171 = vst [vmem:[#allocation2 + $0x131] sm:$0x1] %v20530_v0  ;;  %v16614_v1 = vld [vmem:[#allocation3 + $0x148] sm:$0xff]  ;;  %v16618_v2 = vld [vmem:[#allocation3 + $0x150] sm:$0xff]  ;;  %14486 = vmatpush3.bf16.msra.mxu0 %v14483_v56 }
  0x9d   :  { %172 = vst [vmem:[#allocation2 + $0x149] sm:$0x1] %v20530_v0  ;;  %173 = vst [vmem:[#allocation2 + $0x161] sm:$0x1] %v20530_v0  ;;  %v16620_v3 = vld [vmem:[#allocation3 + $0x158] sm:$0xff]  ;;  %v16622_v4 = vld [vmem:[#allocation3 + $0x160] sm:$0xff]  ;;  %14488 = vmatprep.subr.bf16.mxu0 %v14487_v5 }
  0x9e   :  { %174 = vst [vmem:[#allocation2 + $0x179] sm:$0x1] %v20530_v0  ;;  %175 = vst [vmem:[#allocation2 + $0x191] sm:$0x1] %v20530_v0  ;;  %v16627_v6 = vld [vmem:[#allocation3 + $0x168] sm:$0xff]  ;;  %v16629_v7 = vld [vmem:[#allocation3 + $0x170] sm:$0xff] }
  0x9f   :  { %176 = vst [vmem:[#allocation2 + $0x1d9] sm:$0x1] %v20530_v0  ;;  %177 = vst [vmem:[#allocation2 + $0x1f1] sm:$0x1] %v20530_v0  ;;  %v16631_v8 = vld [vmem:[#allocation3 + $0x178] sm:$0xff]  ;;  %v384_v9 = vld [vmem:[#allocation6] sm:$0xff] }
  0xa0   :  { %178 = vst [vmem:[#allocation2 + $0x209] sm:$0x1] %v20530_v0  ;;  %179 = vst [vmem:[#allocation2 + $0x221] sm:$0x1] %v20530_v0  ;;  %v385_v10 = vld [vmem:[#allocation6 + $0x8] sm:$0xff]  ;;  %v16636_v11 = vld [vmem:[#allocation3 + $0x180] sm:$0xff]  ;;  %14490 = vmatpush3.bf16.msra.mxu0 %v14487_v5 }
  0xa1   :  { %180 = vst [vmem:[#allocation2 + $0x239] sm:$0x1] %v20530_v0  ;;  %181 = vst [vmem:[#allocation2 + $0x251] sm:$0x1] %v20530_v0  ;;  %v16639_v12 = vld [vmem:[#allocation3 + $0x188] sm:$0xff]  ;;  %v16641_v20 = vld [vmem:[#allocation3 + $0x190] sm:$0xff]  ;;  %v14491_v34 = vpack.c.bf16 %v385_v10, %v384_v9 }
  0xa2   :  { %182 = vst [vmem:[#allocation2 + $0x269] sm:$0x1] %v20530_v0  ;;  %183 = vst [vmem:[#allocation2 + $0x281] sm:$0x1] %v20530_v0  ;;  %v16643_v21 = vld [vmem:[#allocation3 + $0x198] sm:$0xff]  ;;  %v16648_v22 = vld [vmem:[#allocation3 + $0x1a0] sm:$0xff] }
  0xa3   :  { %184 = vst [vmem:[#allocation2 + $0x299] sm:$0x1] %v20530_v0  ;;  %185 = vst [vmem:[#allocation2 + $0x2b1] sm:$0x1] %v20530_v0  ;;  %v16650_v30 = vld [vmem:[#allocation3 + $0x1a8] sm:$0xff]  ;;  %v16652_v33 = vld [vmem:[#allocation3 + $0x1b0] sm:$0xff]  ;;  %14492 = vmatprep.subr.bf16.mxu0 %v14491_v34 }
  0xa4   :  { %186 = vst [vmem:[#allocation2 + $0x2c9] sm:$0x1] %v20530_v0  ;;  %187 = vst [vmem:[#allocation2 + $0x2e1] sm:$0x1] %v20530_v0  ;;  %v386_v43 = vld [vmem:[#allocation6 + $0x10] sm:$0xff]  ;;  %v387_v45 = vld [vmem:[#allocation6 + $0x18] sm:$0xff] }
  0xa5   :  { %188 = vst [vmem:[#allocation2 + $0x2f9] sm:$0x1] %v20530_v0  ;;  %189 = vst [vmem:[#allocation2 + $0x311] sm:$0x1] %v20530_v0  ;;  %v16657_v49 = vld [vmem:[#allocation3 + $0x1b8] sm:$0xff]  ;;  %v16660_v52 = vld [vmem:[#allocation3 + $0x1c0] sm:$0xff] }
  0xa6   :  { %190 = vst [vmem:[#allocation2 + $0x329] sm:$0x1] %v20530_v0  ;;  %191 = vst [vmem:[#allocation2 + $0x341] sm:$0x1] %v20530_v0  ;;  %v16662_v56 = vld [vmem:[#allocation3 + $0x1c8] sm:$0xff]  ;;  %v16664_v60 = vld [vmem:[#allocation3 + $0x1d0] sm:$0xff] }
  0xa7   :  { %256 = vst [vmem:[#allocation2 + $0x19] sm:$0xff] %v16498_v13  ;;  %257 = vst [vmem:[#allocation2 + $0x21] sm:$0xff] %v16501_v14  ;;  %v16669_v9 = vld [vmem:[#allocation3 + $0x1d8] sm:$0xff]  ;;  %v16671_v10 = vld [vmem:[#allocation3 + $0x1e0] sm:$0xff] }
  0xa8   :  { %258 = vst [vmem:[#allocation2 + $0x31] sm:$0xff] %v16503_v15  ;;  %259 = vst [vmem:[#allocation2 + $0x39] sm:$0xff] %v16505_v16  ;;  %v16673_v0 = vld [vmem:[#allocation3 + $0x1e8] sm:$0xff] }
  0xa9   :  { %260 = vst [vmem:[#allocation2 + $0x49] sm:$0xff] %v16510_v17  ;;  %261 = vst [vmem:[#allocation2 + $0x51] sm:$0xff] %v16512_v18 }
  0xaa   :  { %262 = vst [vmem:[#allocation2 + $0x61] sm:$0xff] %v16514_v19  ;;  %263 = vst [vmem:[#allocation2 + $0x69] sm:$0xff] %v16519_v23 }
  0xab   :  { %264 = vst [vmem:[#allocation2 + $0x79] sm:$0xff] %v16522_v24  ;;  %265 = vst [vmem:[#allocation2 + $0x81] sm:$0xff] %v16524_v25 }
  0xac   :  { %266 = vst [vmem:[#allocation2 + $0x91] sm:$0xff] %v16526_v26  ;;  %267 = vst [vmem:[#allocation2 + $0x99] sm:$0xff] %v16531_v27 }
  0xad   :  { %268 = vst [vmem:[#allocation2 + $0xa9] sm:$0xff] %v16533_v28  ;;  %269 = vst [vmem:[#allocation2 + $0xb1] sm:$0xff] %v16535_v29 }
  0xae   :  { %270 = vst [vmem:[#allocation2 + $0xc1] sm:$0xff] %v16540_v31  ;;  %271 = vst [vmem:[#allocation2 + $0xc9] sm:$0xff] %v16542_v32 }
  0xaf   :  { %272 = vst [vmem:[#allocation2 + $0xd9] sm:$0xff] %v16546_v35  ;;  %273 = vst [vmem:[#allocation2 + $0xe1] sm:$0xff] %v16548_v36 }
  0xb0   :  { %274 = vst [vmem:[#allocation2 + $0xf1] sm:$0xff] %v16552_v37  ;;  %275 = vst [vmem:[#allocation2 + $0xf9] sm:$0xff] %v16554_v38 }
  0xb1   :  { %276 = vst [vmem:[#allocation2 + $0x109] sm:$0xff] %v16556_v39  ;;  %277 = vst [vmem:[#allocation2 + $0x111] sm:$0xff] %v16561_v40 }
  0xb2   :  { %278 = vst [vmem:[#allocation2 + $0x121] sm:$0xff] %v16563_v41  ;;  %279 = vst [vmem:[#allocation2 + $0x129] sm:$0xff] %v16565_v42 }
  0xb3   :  { %280 = vst [vmem:[#allocation2 + $0x139] sm:$0xff] %v16570_v44  ;;  %281 = vst [vmem:[#allocation2 + $0x141] sm:$0xff] %v16573_v46 }
  0xb4   :  { %282 = vst [vmem:[#allocation2 + $0x151] sm:$0xff] %v16575_v47  ;;  %283 = vst [vmem:[#allocation2 + $0x159] sm:$0xff] %v16577_v48 }
  0xb5   :  { %284 = vst [vmem:[#allocation2 + $0x169] sm:$0xff] %v16582_v50  ;;  %285 = vst [vmem:[#allocation2 + $0x171] sm:$0xff] %v16584_v51 }
  0xb6   :  { %288 = vst [vmem:[#allocation2 + $0x1c9] sm:$0xff] %v16588_v53  ;;  %289 = vst [vmem:[#allocation2 + $0x1d1] sm:$0xff] %v16590_v54 }
  0xb7   :  { %290 = vst [vmem:[#allocation2 + $0x1e1] sm:$0xff] %v16592_v55  ;;  %291 = vst [vmem:[#allocation2 + $0x1e9] sm:$0xff] %v16597_v57 }
  0xb8   :  { %292 = vst [vmem:[#allocation2 + $0x1f9] sm:$0xff] %v16599_v58  ;;  %293 = vst [vmem:[#allocation2 + $0x201] sm:$0xff] %v16601_v59 }
  0xb9   :  { %294 = vst [vmem:[#allocation2 + $0x211] sm:$0xff] %v16606_v61  ;;  %295 = vst [vmem:[#allocation2 + $0x219] sm:$0xff] %v16608_v62 }
  0xba   :  { %296 = vst [vmem:[#allocation2 + $0x229] sm:$0xff] %v16612_v63  ;;  %297 = vst [vmem:[#allocation2 + $0x231] sm:$0xff] %v16614_v1 }
  0xbb   :  { %298 = vst [vmem:[#allocation2 + $0x241] sm:$0xff] %v16618_v2  ;;  %299 = vst [vmem:[#allocation2 + $0x249] sm:$0xff] %v16620_v3 }
  0xbc   :  { %300 = vst [vmem:[#allocation2 + $0x259] sm:$0xff] %v16622_v4  ;;  %301 = vst [vmem:[#allocation2 + $0x261] sm:$0xff] %v16627_v6 }
  0xbd   :  { %302 = vst [vmem:[#allocation2 + $0x271] sm:$0xff] %v16629_v7  ;;  %303 = vst [vmem:[#allocation2 + $0x279] sm:$0xff] %v16631_v8 }
  0xbe   :  { %304 = vst [vmem:[#allocation2 + $0x289] sm:$0xff] %v16636_v11  ;;  %305 = vst [vmem:[#allocation2 + $0x291] sm:$0xff] %v16639_v12 }
  0xbf   :  { %306 = vst [vmem:[#allocation2 + $0x2a1] sm:$0xff] %v16641_v20  ;;  %307 = vst [vmem:[#allocation2 + $0x2a9] sm:$0xff] %v16643_v21 }
  0xc0   :  { %20807 = vst [vmem:[#allocation21_spill] sm:$0xff] %v16648_v22  ;;  %20808 = vst [vmem:[#allocation22_spill] sm:$0xff] %v16650_v30 }
  0xc1   :  { %20809 = vst [vmem:[#allocation23_spill] sm:$0xff] %v16652_v33  ;;  %308 = vst [vmem:[#allocation2 + $0x2b9] sm:$0xff] %v16648_v22  ;;  %v391_v22 = vld [vmem:[#allocation6 + $0x38] sm:$0xff] }
  0xc2   :  { %309 = vst [vmem:[#allocation2 + $0x2c1] sm:$0xff] %v16650_v30  ;;  %310 = vst [vmem:[#allocation2 + $0x2d1] sm:$0xff] %v16652_v33  ;;  %v388_v33 = vld [vmem:[#allocation6 + $0x20] sm:$0xff]  ;;  %v390_v30 = vld [vmem:[#allocation6 + $0x30] sm:$0xff] }
  0xc3   :  { %20810 = vst [vmem:[#allocation24_spill] sm:$0xff] %v16657_v49  ;;  %311 = vst [vmem:[#allocation2 + $0x2d9] sm:$0xff] %v16657_v49  ;;  %v401_v49 = vld [vmem:[#allocation2 + $0x9] sm:$0xff]  ;;  %v14503_v5 = vpack.c.bf16 %v391_v22, %v390_v30 }
  0xc4   :  { %20811 = vst [vmem:[#allocation25_spill] sm:$0xff] %v16660_v52  ;;  %20812 = vst [vmem:[#allocation26_spill] sm:$0xff] %v16662_v56  ;;  %12188 = vmatmul.mubr.f32.vlgmr.msra.gmra.mrb[0].mxu0 %v401_v49  ;;  %v397_v22 = vld [vmem:[#allocation6 + $0x68] sm:$0xff] }
  0xc5   :  { %20813 = vst [vmem:[#allocation27_spill] sm:$0xff] %v16664_v60  ;;  %312 = vst [vmem:[#allocation2 + $0x2e9] sm:$0xff] %v16660_v52  ;;  %v14495_v52 = vpack.c.bf16 %v387_v45, %v386_v43  ;;  %14494 = vmatpush3.bf16.msra.mxu0 %v14491_v34  ;;  %12190 = vmatprep.mubr.f32.mxu0 %v16498_v13  ;;  %v394_v34 = vld [vmem:[#allocation6 + $0x50] sm:$0xff]  ;;  %v1317_v30 = vld [vmem:[#allocation6 + $0x108] sm:$0xff] }
  0xc6   :  { %313 = vst [vmem:[#allocation2 + $0x2f1] sm:$0xff] %v16662_v56  ;;  %314 = vst [vmem:[#allocation2 + $0x301] sm:$0xff] %v16664_v60  ;;  %v389_v56 = vld [vmem:[#allocation6 + $0x28] sm:$0xff]  ;;  %v1331_v43 = vld [vmem:[#allocation6 + $0x178] sm:$0xff] }
  0xc7   :  { %20814 = vst [vmem:[#allocation28_spill] sm:$0xff] %v16671_v10  ;;  %20815 = vst [vmem:[#allocation29_spill] sm:$0xff] %v16673_v0  ;;  %14496 = vmatprep.subr.bf16.mxu0 %v14495_v52  ;;  %v14499_v60 = vpack.c.bf16 %v389_v56, %v388_v33  ;;  %v395_v33 = vld [vmem:[#allocation6 + $0x58] sm:$0xff]  ;;  %v16775_v49 = vld [vmem:[#allocation2 + $0xa8] sm:$0xff] }
  0xc8   :  { %315 = vst [vmem:[#allocation2 + $0x309] sm:$0xff] %v16669_v9  ;;  %316 = vst [vmem:[#allocation2 + $0x319] sm:$0xff] %v16671_v10  ;;  %12191 = vmatmul.mubr.f32.gmra.mrb[2].mxu0 %v16501_v14  ;;  %v393_v10 = vld [vmem:[#allocation6 + $0x48] sm:$0xff]  ;;  %v14511_v14 = vpack.c.bf16 %v395_v33, %v394_v34  ;;  %v16773_v45 = vld [vmem:[#allocation2 + $0x98] sm:$0xff] }
  0xc9   :  { %317 = vst [vmem:[#allocation2 + $0x321] sm:$0xff] %v16673_v0  ;;  %12193 = vmatprep.mubr.f32.mxu0 %v16503_v15  ;;  %14498 = vmatpush3.bf16.msra.mxu0 %v14495_v52  ;;  %v392_v0 = vld [vmem:[#allocation6 + $0x40] sm:$0xff]  ;;  %v16789_v34 = vld [vmem:[#allocation2 + $0xd8] sm:$0xff] }
  0xca   :  { %14500 = vmatprep.subr.bf16.mxu0 %v14499_v60  ;;  %v14507_v13 = vpack.c.bf16 %v393_v10, %v392_v0  ;;  %v396_v15 = vld [vmem:[#allocation6 + $0x60] sm:$0xff]  ;;  %v399_v0 = vld [vmem:[#allocation6 + $0x78] sm:$0xff] }
  0xcb   :  { %v1846_v56 = vld [vmem:[#allocation6 + $0x180] sm:$0xff] }
  0xcc   :  { %12194 = vmatmul.mubr.f32.gmra.mrb[4].mxu0 %v16505_v16  ;;  %v14515_v16 = vpack.c.bf16 %v397_v22, %v396_v15  ;;  %v16781_v10 = vld [vmem:[#allocation2 + $0xc0] sm:$0xff]  ;;  %v16800_v15 = vld [vmem:[#allocation2 + $0xf8] sm:$0xff]  ;;  %v16802_v22 = vld [vmem:[#allocation2 + $0x108] sm:$0xff] }
  0xcd   :  { %12196 = vmatprep.mubr.f32.mxu0 %v16510_v17  ;;  %14502 = vmatpush3.bf16.msra.mxu0 %v14499_v60  ;;  %v398_v17 = vld [vmem:[#allocation6 + $0x70] sm:$0xff]  ;;  %v1847_v60 = vld [vmem:[#allocation6 + $0x188] sm:$0xff]  ;;  %v16794_v33 = vld [vmem:[#allocation2 + $0xe0] sm:$0xff] }
  0xce   :  { %14504 = vmatprep.subr.bf16.mxu0 %v14503_v5 }
  0xd0   :  { %12197 = vmatmul.mubr.f32.gmra.mrb[6].mxu0 %v16512_v18  ;;  %v14519_v18 = vpack.c.bf16 %v399_v0, %v398_v17  ;;  %v16808_v17 = vld [vmem:[#allocation2 + $0x120] sm:$0xff]  ;;  %v16812_v0 = vld [vmem:[#allocation2 + $0x128] sm:$0xff] }
  0xd1   :  { %12199 = vmatprep.mubr.f32.mxu0 %v16514_v19  ;;  %14506 = vmatpush3.bf16.msra.mxu0 %v14503_v5  ;;  %v1316_v19 = vld [vmem:[#allocation6 + $0x100] sm:$0xff]  ;;  %v16783_v5 = vpack.c.bf16 %v1847_v60, %v1846_v56  ;;  %v1848_v56 = vld [vmem:[#allocation6 + $0x190] sm:$0xff]  ;;  %v1849_v60 = vld [vmem:[#allocation6 + $0x198] sm:$0xff] }
  0xd2   :  { %14508 = vmatprep.subr.bf16.mxu0 %v14507_v13 }
  0xd4   :  { %12200 = vmatmul.mubr.f32.gmra.mrb[8].mxu0 %v16519_v23  ;;  %v14523_v23 = vpack.c.bf16 %v1317_v30, %v1316_v19  ;;  %v16818_v19 = vld [vmem:[#allocation2 + $0x140] sm:$0xff]  ;;  %v16820_v30 = vld [vmem:[#allocation2 + $0x150] sm:$0xff] }
  0xd5   :  { %12202 = vmatprep.mubr.f32.mxu0 %v16522_v24  ;;  %14510 = vmatpush3.bf16.msra.mxu0 %v14507_v13  ;;  %v432_v24 = vld [vmem:[#allocation2 + $0x1b1] sm:$0xff]  ;;  %v16787_v13 = vld [vmem:[#allocation2 + $0xc8] sm:$0xff] }
  0xd6   :  { %14512 = vmatprep.subr.bf16.mxu0 %v14511_v14 }
  0xd8   :  { %12203 = vmatmul.mubr.f32.gmra.mrb[10].mxu0 %v16524_v25  ;;  %v433_v25 = vld [vmem:[#allocation2 + $0x1b9] sm:$0xff] }
  0xd9   :  { %12205 = vmatprep.mubr.f32.mxu0 %v16526_v26  ;;  %14514 = vmatpush3.bf16.msra.mxu0 %v14511_v14  ;;  %v20816_v26 = vld [vmem:[#allocation21_spill] sm:$0xff]  ;;  %v16796_v14 = vld [vmem:[#allocation2 + $0xf0] sm:$0xff] }
  0xda   :  { %14516 = vmatprep.subr.bf16.mxu0 %v14515_v16 }
  0xdc   :  { %12206 = vmatmul.mubr.f32.gmra.mrb[12].mxu0 %v16531_v27  ;;  %v20817_v27 = vld [vmem:[#allocation22_spill] sm:$0xff] }
  0xdd   :  { %12208 = vmatprep.mubr.f32.mxu0 %v16533_v28  ;;  %14518 = vmatpush3.bf16.msra.mxu0 %v14515_v16  ;;  %v20818_v28 = vld [vmem:[#allocation23_spill] sm:$0xff]  ;;  %v16806_v16 = vld [vmem:[#allocation2 + $0x110] sm:$0xff] }
  0xde   :  { %14520 = vmatprep.subr.bf16.mxu0 %v14519_v18 }
  0xe0   :  { %12209 = vmatmul.mubr.f32.gmra.mrb[14].mxu0 %v16535_v29  ;;  %v20819_v29 = vld [vmem:[#allocation24_spill] sm:$0xff] }
  0xe1   :  { %12211 = vmatprep.mubr.f32.mxu0 %v16540_v31  ;;  %14522 = vmatpush3.bf16.msra.mxu0 %v14519_v18  ;;  %v20820_v31 = vld [vmem:[#allocation25_spill] sm:$0xff]  ;;  %v16814_v18 = vld [vmem:[#allocation2 + $0x138] sm:$0xff] }
  0xe2   :  { %14524 = vmatprep.subr.bf16.mxu0 %v14523_v23 }
  0xe4   :  { %12212 = vmatmul.mubr.f32.gmra.mrb[16].mxu0 %v16542_v32  ;;  %v20821_v32 = vld [vmem:[#allocation26_spill] sm:$0xff] }
  0xe5   :  { %12214 = vmatprep.mubr.f32.mxu0 %v16546_v35  ;;  %v20822_v35 = vld [vmem:[#allocation27_spill] sm:$0xff] }
  0xe8   :  { %12215 = vmatmul.mubr.f32.gmra.mrb[18].mxu0 %v16548_v36  ;;  %v20823_v36 = vld [vmem:[#allocation28_spill] sm:$0xff] }
  0xe9   :  { %12217 = vmatprep.mubr.f32.mxu0 %v16552_v37  ;;  %v1318_v37 = vld [vmem:[#allocation6 + $0x110] sm:$0xff] }
  0xec   :  { %12218 = vmatmul.mubr.f32.gmra.mrb[20].mxu0 %v16554_v38  ;;  %v1319_v38 = vld [vmem:[#allocation6 + $0x118] sm:$0xff] }
  0xed   :  { %12220 = vmatprep.mubr.f32.mxu0 %v16556_v39  ;;  %v20824_v39 = vld [vmem:[#allocation29_spill] sm:$0xff] }
  0xf0   :  { %12221 = vmatmul.mubr.f32.gmra.mrb[22].mxu0 %v16561_v40  ;;  %v20825_v40 = vmov 0.0  }
  0xf1   :  { %12223 = vmatprep.mubr.f32.mxu0 %v16563_v41  ;;  %v16739_v41 = vld [vmem:[#allocation2 + $0x18] sm:$0xff] }
  0xf4   :  { %12224 = vmatmul.mubr.f32.gmra.mrb[24].mxu0 %v16565_v42  ;;  %v14527_v42 = vpack.c.bf16 %v1319_v38, %v1318_v37  ;;  %v16858_v37 = vld [vmem:[#allocation2 + $0x228] sm:$0xff]  ;;  %v16862_v38 = vld [vmem:[#allocation2 + $0x230] sm:$0xff] }
  0xf5   :  { %12226 = vmatprep.mubr.f32.mxu0 %v16570_v44  ;;  %v1320_v44 = vld [vmem:[#allocation6 + $0x120] sm:$0xff] }
  0xf8   :  { %12227 = vmatmul.mubr.f32.gmra.mrb[26].mxu0 %v16573_v46  ;;  %v1321_v46 = vld [vmem:[#allocation6 + $0x128] sm:$0xff] }
  0xf9   :  { %12229 = vmatprep.mubr.f32.mxu0 %v16575_v47  ;;  %v16743_v47 = vld [vmem:[#allocation2 + $0x20] sm:$0xff] }
  0xfc   :  { %12230 = vmatmul.mubr.f32.gmra.mrb[28].mxu0 %v16577_v48  ;;  %v16745_v48 = vld [vmem:[#allocation2 + $0x30] sm:$0xff] }
  0xfd   :  { %12232 = vmatprep.mubr.f32.mxu0 %v16582_v50  ;;  %v14531_v50 = vpack.c.bf16 %v1321_v46, %v1320_v44  ;;  %v16874_v44 = vld [vmem:[#allocation2 + $0x260] sm:$0xff]  ;;  %v16876_v46 = vld [vmem:[#allocation2 + $0x270] sm:$0xff] }
 0x100   :  { %12233 = vmatmul.mubr.f32.gmra.mrb[30].mxu0 %v16584_v51  ;;  %v1322_v51 = vld [vmem:[#allocation6 + $0x130] sm:$0xff] }
 0x101   :  { %12235 = vmatprep.mubr.f32.mxu0 %v432_v24  ;;  %v16826_v24 = vld [vmem:[#allocation2 + $0x168] sm:$0xff] }
 0x104   :  { %12236 = vmatmul.mubr.f32.gmra.mrb[32].mxu0 %v433_v25  ;;  %v16830_v25 = vld [vmem:[#allocation2 + $0x170] sm:$0xff] }
 0x105   :  { %12238 = vmatprep.mubr.f32.mxu0 %v16588_v53  ;;  %v1323_v53 = vld [vmem:[#allocation6 + $0x138] sm:$0xff] }
 0x108   :  { %12239 = vmatmul.mubr.f32.gmra.mrb[34].mxu0 %v16590_v54  ;;  %v16749_v54 = vld [vmem:[#allocation2 + $0x38] sm:$0xff] }
 0x109   :  { %12241 = vmatprep.mubr.f32.mxu0 %v16592_v55  ;;  %v16751_v55 = vld [vmem:[#allocation2 + $0x48] sm:$0xff] }
 0x10c   :  { %12242 = vmatmul.mubr.f32.gmra.mrb[36].mxu0 %v16597_v57  ;;  %v14535_v57 = vpack.c.bf16 %v1323_v53, %v1322_v51  ;;  %v16882_v51 = vld [vmem:[#allocation2 + $0x288] sm:$0xff]  ;;  %v16886_v53 = vld [vmem:[#allocation2 + $0x290] sm:$0xff] }
 0x10d   :  { %12244 = vmatprep.mubr.f32.mxu0 %v16599_v58  ;;  %v1324_v58 = vld [vmem:[#allocation6 + $0x140] sm:$0xff] }
 0x110   :  { %12245 = vmatmul.mubr.f32.gmra.mrb[38].mxu0 %v16601_v59  ;;  %v1325_v59 = vld [vmem:[#allocation6 + $0x148] sm:$0xff] }
 0x111   :  { %12247 = vmatprep.mubr.f32.mxu0 %v16606_v61  ;;  %v16755_v61 = vld [vmem:[#allocation2 + $0x50] sm:$0xff] }
 0x114   :  { %12248 = vmatmul.mubr.f32.gmra.mrb[40].mxu0 %v16608_v62  ;;  %v16757_v62 = vld [vmem:[#allocation2 + $0x60] sm:$0xff] }
 0x115   :  { %12250 = vmatprep.mubr.f32.mxu0 %v16612_v63  ;;  %v14539_v63 = vpack.c.bf16 %v1325_v59, %v1324_v58  ;;  %v16892_v58 = vld [vmem:[#allocation2 + $0x2a8] sm:$0xff]  ;;  %v16894_v59 = vld [vmem:[#allocation2 + $0x2b8] sm:$0xff] }
 0x116   :  { %20826 = vst [vmem:[#allocation21_spill] sm:$0xff] %v16894_v59 }
 0x118   :  { %12251 = vmatmul.mubr.f32.gmra.mrb[42].mxu0 %v16614_v1  ;;  %v1326_v1 = vld [vmem:[#allocation6 + $0x150] sm:$0xff] }
 0x119   :  { %12253 = vmatprep.mubr.f32.mxu0 %v16618_v2  ;;  %v1327_v2 = vld [vmem:[#allocation6 + $0x158] sm:$0xff] }
 0x11c   :  { %12254 = vmatmul.mubr.f32.gmra.mrb[44].mxu0 %v16620_v3  ;;  %v16761_v3 = vld [vmem:[#allocation2 + $0x68] sm:$0xff] }
 0x11d   :  { %12256 = vmatprep.mubr.f32.mxu0 %v16622_v4  ;;  %v16763_v4 = vld [vmem:[#allocation2 + $0x78] sm:$0xff] }
 0x120   :  { %12257 = vmatmul.mubr.f32.gmra.mrb[46].mxu0 %v16627_v6  ;;  %v14543_v6 = vpack.c.bf16 %v1327_v2, %v1326_v1  ;;  %v16900_v1 = vld [vmem:[#allocation2 + $0x2d0] sm:$0xff]  ;;  %v16904_v2 = vld [vmem:[#allocation2 + $0x2d8] sm:$0xff] }
 0x121   :  { %12259 = vmatprep.mubr.f32.mxu0 %v16629_v7  ;;  %v1328_v7 = vld [vmem:[#allocation6 + $0x160] sm:$0xff]  ;;  %20828 = vst [vmem:[#allocation23_spill] sm:$0xff] %v16900_v1  ;;  %20829 = vst [vmem:[#allocation24_spill] sm:$0xff] %v16904_v2 }
 0x124   :  { %12260 = vmatmul.mubr.f32.gmra.mrb[48].mxu0 %v16631_v8  ;;  %v1329_v8 = vld [vmem:[#allocation6 + $0x168] sm:$0xff] }
 0x125   :  { %12262 = vmatprep.mubr.f32.mxu0 %v16636_v11  ;;  %v16767_v11 = vld [vmem:[#allocation2 + $0x80] sm:$0xff] }
 0x128   :  { %12263 = vmatmul.mubr.f32.gmra.mrb[50].mxu0 %v16639_v12  ;;  %v16769_v12 = vld [vmem:[#allocation2 + $0x90] sm:$0xff] }
 0x129   :  { %12265 = vmatprep.mubr.f32.mxu0 %v16641_v20  ;;  %v14547_v20 = vpack.c.bf16 %v1329_v8, %v1328_v7  ;;  %v16910_v7 = vld [vmem:[#allocation2 + $0x2f0] sm:$0xff]  ;;  %v16912_v8 = vld [vmem:[#allocation2 + $0x300] sm:$0xff] }
 0x12a   :  { %20831 = vst [vmem:[#allocation26_spill] sm:$0xff] %v16910_v7  ;;  %20832 = vst [vmem:[#allocation27_spill] sm:$0xff] %v16912_v8 }
 0x12c   :  { %12266 = vmatmul.mubr.f32.gmra.mrb[52].mxu0 %v16643_v21  ;;  %v1330_v21 = vld [vmem:[#allocation6 + $0x170] sm:$0xff] }
 0x12d   :  { %12268 = vmatprep.mubr.f32.mxu0 %v20816_v26  ;;  %v14551_v52 = vpack.c.bf16 %v1331_v43, %v1330_v21  ;;  %v16834_v26 = vld [vmem:[#allocation2 + $0x1c8] sm:$0xff]  ;;  %v16918_v21 = vld [vmem:[#allocation2 + $0x318] sm:$0xff]  ;;  %v16922_v43 = vld [vmem:[#allocation2 + $0x320] sm:$0xff] }
 0x12e   :  { %20834 = vst [vmem:[#allocation29_spill] sm:$0xff] %v16918_v21  ;;  %20835 = vst [vmem:[#allocation30_spill] sm:$0xff] %v16922_v43 }
 0x130   :  { %12269 = vmatmul.mubr.f32.gmra.mrb[54].mxu0 %v20817_v27  ;;  %v16838_v27 = vld [vmem:[#allocation2 + $0x1d0] sm:$0xff] }
 0x131   :  { %12271 = vmatprep.mubr.f32.mxu0 %v20818_v28  ;;  %v16840_v28 = vld [vmem:[#allocation2 + $0x1e0] sm:$0xff] }
 0x134   :  { %12272 = vmatmul.mubr.f32.gmra.mrb[56].mxu0 %v20819_v29  ;;  %v16844_v29 = vld [vmem:[#allocation2 + $0x1e8] sm:$0xff] }
 0x135   :  { %12274 = vmatprep.mubr.f32.mxu0 %v20820_v31  ;;  %v16846_v31 = vld [vmem:[#allocation2 + $0x1f8] sm:$0xff] }
 0x138   :  { %12275 = vmatmul.mubr.f32.gmra.mrb[58].mxu0 %v20821_v32  ;;  %v16850_v32 = vld [vmem:[#allocation2 + $0x200] sm:$0xff] }
 0x139   :  { %12277 = vmatprep.mubr.f32.mxu0 %v20822_v35  ;;  %v16852_v35 = vld [vmem:[#allocation2 + $0x210] sm:$0xff] }
 0x13c   :  { %12278 = vmatmul.mubr.f32.gmra.mrb[60].mxu0 %v16669_v9  ;;  %v16779_v9 = vld [vmem:[#allocation2 + $0xb0] sm:$0xff] }
 0x13d   :  { %12280 = vmatprep.mubr.f32.mxu0 %v20823_v36  ;;  %v16856_v36 = vld [vmem:[#allocation2 + $0x218] sm:$0xff] }
 0x140   :  { %12281 = vmatmul.mubr.f32.gmra.mrb[62].mxu0 %v20824_v39  ;;  %v16864_v39 = vld [vmem:[#allocation2 + $0x240] sm:$0xff] }
 0x141   :  { %12315 = vmatprep.mubr.f32.mxu0 %v20825_v40 }
 0x144   :  { %12316 = vmatmul.mubr.f32.vlgmr.msra.gmra.mrb[0].mxu0 %v20825_v40 }
 0x145   :  { %14526 = vmatpush3.bf16.msra.mxu0 %v14523_v23  ;;  %12318 = vmatprep.mubr.f32.mxu0 %v16739_v41  ;;  %v16824_v23 = vld [vmem:[#allocation2 + $0x158] sm:$0xff] }
 0x146   :  { %14528 = vmatprep.subr.bf16.mxu0 %v14527_v42 }
 0x148   :  { %12319 = vmatmul.mubr.f32.gmra.mrb[2].mxu0 %v16743_v47 }
 0x149   :  { %12321 = vmatprep.mubr.f32.mxu0 %v16745_v48  ;;  %14530 = vmatpush3.bf16.msra.mxu0 %v14527_v42  ;;  %v16870_v42 = vld [vmem:[#allocation2 + $0x258] sm:$0xff] }
 0x14a   :  { %14532 = vmatprep.subr.bf16.mxu0 %v14531_v50 }
 0x14c   :  { %12322 = vmatmul.mubr.f32.gmra.mrb[4].mxu0 %v16749_v54 }
 0x14d   :  { %12324 = vmatprep.mubr.f32.mxu0 %v16751_v55  ;;  %14534 = vmatpush3.bf16.msra.mxu0 %v14531_v50  ;;  %v16880_v50 = vld [vmem:[#allocation2 + $0x278] sm:$0xff] }
 0x14e   :  { %14536 = vmatprep.subr.bf16.mxu0 %v14535_v57 }
 0x150   :  { %12325 = vmatmul.mubr.f32.gmra.mrb[6].mxu0 %v16755_v61 }
 0x151   :  { %12327 = vmatprep.mubr.f32.mxu0 %v16757_v62  ;;  %14538 = vmatpush3.bf16.msra.mxu0 %v14535_v57  ;;  %v16888_v57 = vld [vmem:[#allocation2 + $0x2a0] sm:$0xff] }
 0x152   :  { %14540 = vmatprep.subr.bf16.mxu0 %v14539_v63 }
 0x154   :  { %12328 = vmatmul.mubr.f32.gmra.mrb[8].mxu0 %v16761_v3 }
 0x155   :  { %12330 = vmatprep.mubr.f32.mxu0 %v16763_v4  ;;  %14542 = vmatpush3.bf16.msra.mxu0 %v14539_v63  ;;  %v16898_v63 = vld [vmem:[#allocation2 + $0x2c0] sm:$0xff] }
 0x156   :  { %14544 = vmatprep.subr.bf16.mxu0 %v14543_v6  ;;  %20827 = vst [vmem:[#allocation22_spill] sm:$0xff] %v16898_v63 }
 0x158   :  { %12331 = vmatmul.mubr.f32.gmra.mrb[10].mxu0 %v16767_v11 }
 0x159   :  { %12333 = vmatprep.mubr.f32.mxu0 %v16769_v12  ;;  %14546 = vmatpush3.bf16.msra.mxu0 %v14543_v6  ;;  %v16906_v6 = vld [vmem:[#allocation2 + $0x2e8] sm:$0xff] }
 0x15a   :  { %14548 = vmatprep.subr.bf16.mxu0 %v14547_v20  ;;  %20830 = vst [vmem:[#allocation25_spill] sm:$0xff] %v16906_v6 }
 0x15c   :  { %12334 = vmatmul.mubr.f32.gmra.mrb[12].mxu0 %v16773_v45 }
 0x15d   :  { %12336 = vmatprep.mubr.f32.mxu0 %v16775_v49  ;;  %14550 = vmatpush3.bf16.msra.mxu0 %v14547_v20  ;;  %v16916_v20 = vld [vmem:[#allocation2 + $0x308] sm:$0xff] }
 0x15e   :  { %14552 = vmatprep.subr.bf16.mxu0 %v14551_v52  ;;  %20833 = vst [vmem:[#allocation28_spill] sm:$0xff] %v16916_v20 }
 0x160   :  { %12337 = vmatmul.mubr.f32.gmra.mrb[14].mxu0 %v16779_v9 }
 0x161   :  { %12339 = vmatprep.mubr.f32.mxu0 %v16781_v10  ;;  %14554 = vmatpush3.bf16.msra.mxu0 %v14551_v52  ;;  %v1251_v52 = vld [vmem:[#allocation2 + $0x2] sm:$0xff] }
 0x162   :  { %14556 = vmatprep.subr.bf16.mxu0 %v16783_v5 }
 0x164   :  { %12340 = vmatmul.mubr.f32.gmra.mrb[16].mxu0 %v16787_v13 }
 0x165   :  { %12342 = vmatprep.mubr.f32.mxu0 %v16789_v34 }
 0x168   :  { %12343 = vmatmul.mubr.f32.gmra.mrb[18].mxu0 %v16794_v33 }
 0x169   :  { %12345 = vmatprep.mubr.f32.mxu0 %v16796_v14 }
 0x16c   :  { %12346 = vmatmul.mubr.f32.gmra.mrb[20].mxu0 %v16800_v15 }
 0x16d   :  { %12348 = vmatprep.mubr.f32.mxu0 %v16802_v22 }
 0x170   :  { %12349 = vmatmul.mubr.f32.gmra.mrb[22].mxu0 %v16806_v16 }
 0x171   :  { %12351 = vmatprep.mubr.f32.mxu0 %v16808_v17 }
 0x174   :  { %12352 = vmatmul.mubr.f32.gmra.mrb[24].mxu0 %v16812_v0 }
 0x175   :  { %12354 = vmatprep.mubr.f32.mxu0 %v16814_v18 }
 0x178   :  { %12355 = vmatmul.mubr.f32.gmra.mrb[26].mxu0 %v16818_v19 }
 0x179   :  { %12357 = vmatprep.mubr.f32.mxu0 %v16820_v30 }
 0x17c   :  { %12358 = vmatmul.mubr.f32.gmra.mrb[28].mxu0 %v16824_v23 }
 0x17d   :  { %12360 = vmatprep.mubr.f32.mxu0 %v16826_v24 }
 0x180   :  { %12361 = vmatmul.mubr.f32.gmra.mrb[30].mxu0 %v16830_v25 }
 0x181   :  { %12363 = vmatprep.mubr.f32.mxu0 %v20825_v40 }
 0x184   :  { %12364 = vmatmul.mubr.f32.gmra.mrb[32].mxu0 %v20825_v40  ;;  %v16868_v40 = vld [vmem:[#allocation2 + $0x248] sm:$0xff] }
 0x185   :  { %12366 = vmatprep.mubr.f32.mxu0 %v16834_v26 }
 0x188   :  { %12367 = vmatmul.mubr.f32.gmra.mrb[34].mxu0 %v16838_v27 }
 0x189   :  { %12369 = vmatprep.mubr.f32.mxu0 %v16840_v28 }
 0x18c   :  { %12370 = vmatmul.mubr.f32.gmra.mrb[36].mxu0 %v16844_v29 }
 0x18d   :  { %12372 = vmatprep.mubr.f32.mxu0 %v16846_v31 }
 0x190   :  { %12373 = vmatmul.mubr.f32.gmra.mrb[38].mxu0 %v16850_v32 }
 0x191   :  { %12375 = vmatprep.mubr.f32.mxu0 %v16852_v35 }
 0x194   :  { %12376 = vmatmul.mubr.f32.gmra.mrb[40].mxu0 %v16856_v36 }
 0x195   :  { %12378 = vmatprep.mubr.f32.mxu0 %v16858_v37 }
 0x198   :  { %12379 = vmatmul.mubr.f32.gmra.mrb[42].mxu0 %v16862_v38 }
 0x199   :  { %12381 = vmatprep.mubr.f32.mxu0 %v16864_v39 }
 0x19c   :  { %12382 = vmatmul.mubr.f32.gmra.mrb[44].mxu0 %v16868_v40 }
 0x19d   :  { %12384 = vmatprep.mubr.f32.mxu0 %v16870_v42 }
 0x1a0   :  { %12385 = vmatmul.mubr.f32.gmra.mrb[46].mxu0 %v16874_v44 }
 0x1a1   :  { %12387 = vmatprep.mubr.f32.mxu0 %v16876_v46 }
 0x1a4   :  { %12388 = vmatmul.mubr.f32.gmra.mrb[48].mxu0 %v16880_v50 }
 0x1a5   :  { %12390 = vmatprep.mubr.f32.mxu0 %v16882_v51 }
 0x1a8   :  { %12391 = vmatmul.mubr.f32.gmra.mrb[50].mxu0 %v16886_v53 }
 0x1a9   :  { %12393 = vmatprep.mubr.f32.mxu0 %v16888_v57 }
 0x1ac   :  { %12394 = vmatmul.mubr.f32.gmra.mrb[52].mxu0 %v16892_v58 }
 0x1ad   :  { %12396 = vmatprep.mubr.f32.mxu0 %v16894_v59  ;;  %v1852_v59 = vld [vmem:[#allocation6 + $0x1b0] sm:$0xff] }
 0x1b0   :  { %12397 = vmatmul.mubr.f32.gmra.mrb[54].mxu0 %v16898_v63 }
 0x1b1   :  { %12399 = vmatprep.mubr.f32.mxu0 %v16900_v1  ;;  %v1851_v1 = vld [vmem:[#allocation6 + $0x1a8] sm:$0xff] }
 0x1b4   :  { %12400 = vmatmul.mubr.f32.gmra.mrb[56].mxu0 %v16904_v2  ;;  %v1850_v2 = vld [vmem:[#allocation6 + $0x1a0] sm:$0xff] }
 0x1b5   :  { %12402 = vmatprep.mubr.f32.mxu0 %v16906_v6  ;;  %v1252_v6 = vld [vmem:[#allocation2 + $0xa] sm:$0xff]  ;;  %v14563_v63 = vpack.c.bf16 %v1851_v1, %v1850_v2  ;;  %v16941_v1 = vld [vmem:[#allocation2 + $0x52] sm:$0xff]  ;;  %v16943_v2 = vld [vmem:[#allocation2 + $0x62] sm:$0xff] }
 0x1b6   :  { %20841 = vst [vmem:[#allocation36_spill] sm:$0xff] %v16941_v1  ;;  %20842 = vst [vmem:[#allocation37_spill] sm:$0xff] %v16943_v2 }
 0x1b8   :  { %12403 = vmatmul.mubr.f32.gmra.mrb[58].mxu0 %v16910_v7  ;;  %v16925_v7 = vld [vmem:[#allocation2 + $0x1a] sm:$0xff] }
 0x1b9   :  { %12405 = vmatprep.mubr.f32.mxu0 %v16912_v8  ;;  %20836 = vst [vmem:[#allocation31_spill] sm:$0xff] %v16925_v7  ;;  %v14559_v8 = vpack.c.bf16 %v1849_v60, %v1848_v56  ;;  %v1854_v56 = vld [vmem:[#allocation6 + $0x1c0] sm:$0xff]  ;;  %v1855_v60 = vld [vmem:[#allocation6 + $0x1c8] sm:$0xff] }
 0x1bc   :  { %12406 = vmatmul.mubr.f32.gmra.mrb[60].mxu0 %v16916_v20  ;;  %v16931_v20 = vld [vmem:[#allocation2 + $0x32] sm:$0xff] }
 0x1bd   :  { %12408 = vmatprep.mubr.f32.mxu0 %v16918_v21  ;;  %v16929_v21 = vld [vmem:[#allocation2 + $0x22] sm:$0xff]  ;;  %20838 = vst [vmem:[#allocation33_spill] sm:$0xff] %v16931_v20 }
 0x1be   :  { %20837 = vst [vmem:[#allocation32_spill] sm:$0xff] %v16929_v21 }
 0x1c0   :  { %12409 = vmatmul.mubr.f32.gmra.mrb[62].mxu0 %v16922_v43  ;;  %v1853_v43 = vld [vmem:[#allocation6 + $0x1b8] sm:$0xff] }
 0x1c1   :  { %12443 = vmatprep.mubr.f32.mxu0 %v1251_v52  ;;  %v16935_v52 = vld [vmem:[#allocation2 + $0x3a] sm:$0xff] }
 0x1c2   :  { %20839 = vst [vmem:[#allocation34_spill] sm:$0xff] %v16935_v52 }
 0x1c4   :  { %12444 = vmatmul.mubr.f32.vlgmr.msra.gmra.mrb[0].mxu0 %v1252_v6  ;;  %v16937_v6 = vld [vmem:[#allocation2 + $0x4a] sm:$0xff] }
 0x1c5   :  { %14558 = vmatpush3.bf16.msra.mxu0 %v16783_v5  ;;  %12446 = vmatprep.mubr.f32.mxu0 %v16925_v7  ;;  %20840 = vst [vmem:[#allocation35_spill] sm:$0xff] %v16937_v6  ;;  %v14567_v5 = vpack.c.bf16 %v1853_v43, %v1852_v59  ;;  %v1857_v7 = vld [vmem:[#allocation6 + $0x1d8] sm:$0xff]  ;;  %v16947_v59 = vld [vmem:[#allocation2 + $0x6a] sm:$0xff] }
 0x1c6   :  { %14560 = vmatprep.subr.bf16.mxu0 %v14559_v8  ;;  %20843 = vst [vmem:[#allocation38_spill] sm:$0xff] %v16947_v59 }
 0x1c8   :  { %12447 = vmatmul.mubr.f32.gmra.mrb[2].mxu0 %v16929_v21  ;;  %v1856_v21 = vld [vmem:[#allocation6 + $0x1d0] sm:$0xff] }
 0x1c9   :  { %12449 = vmatprep.mubr.f32.mxu0 %v16931_v20  ;;  %14562 = vmatpush3.bf16.msra.mxu0 %v14559_v8  ;;  %v14571_v20 = vpack.c.bf16 %v1855_v60, %v1854_v56  ;;  %v16949_v8 = vld [vmem:[#allocation2 + $0x7a] sm:$0xff]  ;;  %v14575_v43 = vpack.c.bf16 %v1857_v7, %v1856_v21  ;;  %v16955_v56 = vld [vmem:[#allocation2 + $0x92] sm:$0xff]  ;;  %v16961_v21 = vld [vmem:[#allocation2 + $0xaa] sm:$0xff] }
 0x1ca   :  { %14564 = vmatprep.subr.bf16.mxu0 %v14563_v63  ;;  %20844 = vst [vmem:[#allocation39_spill] sm:$0xff] %v16949_v8  ;;  %20846 = vst [vmem:[#allocation41_spill] sm:$0xff] %v16955_v56  ;;  %v16959_v7 = vld [vmem:[#allocation2 + $0x9a] sm:$0xff] }
 0x1cb   :  { %20847 = vst [vmem:[#allocation42_spill] sm:$0xff] %v16959_v7  ;;  %20848 = vst [vmem:[#allocation43_spill] sm:$0xff] %v16961_v21 }
 0x1cc   :  { %12450 = vmatmul.mubr.f32.gmra.mrb[4].mxu0 %v16935_v52  ;;  %v1859_v52 = vld [vmem:[#allocation6 + $0x1e8] sm:$0xff] }
 0x1cd   :  { %12452 = vmatprep.mubr.f32.mxu0 %v16937_v6  ;;  %14566 = vmatpush3.bf16.msra.mxu0 %v14563_v63  ;;  %v1858_v6 = vld [vmem:[#allocation6 + $0x1e0] sm:$0xff] }
 0x1ce   :  { %14568 = vmatprep.subr.bf16.mxu0 %v14567_v5  ;;  %v16953_v63 = vld [vmem:[#allocation2 + $0x82] sm:$0xff]  ;;  %v14579_v60 = vpack.c.bf16 %v1859_v52, %v1858_v6 }
 0x1cf   :  { %20845 = vst [vmem:[#allocation40_spill] sm:$0xff] %v16953_v63  ;;  %v16967_v52 = vld [vmem:[#allocation2 + $0xc2] sm:$0xff] }
 0x1d0   :  { %12453 = vmatmul.mubr.f32.gmra.mrb[6].mxu0 %v16941_v1  ;;  %v1861_v1 = vld [vmem:[#allocation6 + $0x1f8] sm:$0xff]  ;;  %20850 = vst [vmem:[#allocation45_spill] sm:$0xff] %v16967_v52 }
 0x1d1   :  { %12455 = vmatprep.mubr.f32.mxu0 %v16943_v2  ;;  %14570 = vmatpush3.bf16.msra.mxu0 %v14567_v5  ;;  %v1860_v2 = vld [vmem:[#allocation6 + $0x1f0] sm:$0xff] }
 0x1d2   :  { %14572 = vmatprep.subr.bf16.mxu0 %v14571_v20  ;;  %v14583_v5 = vpack.c.bf16 %v1861_v1, %v1860_v2  ;;  %v16975_v1 = vld [vmem:[#allocation2 + $0xda] sm:$0xff]  ;;  %v16980_v2 = vld [vmem:[#allocation2 + $0xe2] sm:$0xff] }
 0x1d3   :  { %20852 = vst [vmem:[#allocation47_spill] sm:$0xff] %v16975_v1  ;;  %20853 = vst [vmem:[#allocation48_spill] sm:$0xff] %v16980_v2 }
 0x1d4   :  { %12456 = vmatmul.mubr.f32.gmra.mrb[8].mxu0 %v16947_v59  ;;  %v2377_v59 = vld [vmem:[#allocation6 + $0x208] sm:$0xff] }
 0x1d5   :  { %12458 = vmatprep.mubr.f32.mxu0 %v16949_v8  ;;  %14574 = vmatpush3.bf16.msra.mxu0 %v14571_v20  ;;  %v2376_v8 = vld [vmem:[#allocation6 + $0x200] sm:$0xff]  ;;  %v16965_v20 = vld [vmem:[#allocation2 + $0xb2] sm:$0xff] }
 0x1d6   :  { %14576 = vmatprep.subr.bf16.mxu0 %v14575_v43  ;;  %20849 = vst [vmem:[#allocation44_spill] sm:$0xff] %v16965_v20  ;;  %v16969_v6 = vpack.c.bf16 %v2377_v59, %v2376_v8  ;;  %v16986_v59 = vld [vmem:[#allocation2 + $0xfa] sm:$0xff]  ;;  %v16988_v8 = vld [vmem:[#allocation2 + $0x10a] sm:$0xff] }
 0x1d7   :  { %20855 = vst [vmem:[#allocation50_spill] sm:$0xff] %v16986_v59  ;;  %20856 = vst [vmem:[#allocation51_spill] sm:$0xff] %v16988_v8 }
 0x1d8   :  { %12459 = vmatmul.mubr.f32.gmra.mrb[10].mxu0 %v16953_v63  ;;  %v2381_v63 = vld [vmem:[#allocation6 + $0x228] sm:$0xff] }
 0x1d9   :  { %12461 = vmatprep.mubr.f32.mxu0 %v16955_v56  ;;  %14578 = vmatpush3.bf16.msra.mxu0 %v14575_v43  ;;  %v16973_v43 = vld [vmem:[#allocation2 + $0xca] sm:$0xff]  ;;  %v2380_v56 = vld [vmem:[#allocation6 + $0x220] sm:$0xff] }
 0x1da   :  { %14580 = vmatprep.subr.bf16.mxu0 %v14579_v60  ;;  %20851 = vst [vmem:[#allocation46_spill] sm:$0xff] %v16973_v43 }
 0x1dc   :  { %12462 = vmatmul.mubr.f32.gmra.mrb[12].mxu0 %v16959_v7  ;;  %v2379_v7 = vld [vmem:[#allocation6 + $0x218] sm:$0xff] }
 0x1dd   :  { %12464 = vmatprep.mubr.f32.mxu0 %v16961_v21  ;;  %14582 = vmatpush3.bf16.msra.mxu0 %v14579_v60  ;;  %v16982_v60 = vld [vmem:[#allocation2 + $0xf2] sm:$0xff]  ;;  %v17030_v21 = vld [vmem:[#allocation2 + $0x1e2] sm:$0xff] }
 0x1de   :  { %14584 = vmatprep.subr.bf16.mxu0 %v14583_v5  ;;  %20854 = vst [vmem:[#allocation49_spill] sm:$0xff] %v16982_v60  ;;  %20868 = vst [vmem:[#allocation63_spill] sm:$0xff] %v17030_v21 }
 0x1e0   :  { %12465 = vmatmul.mubr.f32.gmra.mrb[14].mxu0 %v16965_v20  ;;  %v1284_v20 = vld [vmem:[#allocation2 + $0x1ba] sm:$0xff] }
 0x1e1   :  { %12467 = vmatprep.mubr.f32.mxu0 %v16967_v52  ;;  %14586 = vmatpush3.bf16.msra.mxu0 %v14583_v5  ;;  %v16992_v5 = vld [vmem:[#allocation2 + $0x112] sm:$0xff] }
 0x1e2   :  { %14588 = vmatprep.subr.bf16.mxu0 %v16969_v6  ;;  %20857 = vst [vmem:[#allocation52_spill] sm:$0xff] %v16992_v5  ;;  %v17011_v52 = vld [vmem:[#allocation3 + $0xf8] sm:$0xff] }
 0x1e3   :  { %287 = vst [vmem:[#allocation2 + $0x189] sm:$0xff] %v17011_v52 }
 0x1e4   :  { %12468 = vmatmul.mubr.f32.gmra.mrb[16].mxu0 %v16973_v43  ;;  %v16994_v43 = vld [vmem:[#allocation2 + $0x122] sm:$0xff] }
 0x1e5   :  { %12470 = vmatprep.mubr.f32.mxu0 %v16975_v1  ;;  %20858 = vst [vmem:[#allocation53_spill] sm:$0xff] %v16994_v43  ;;  %v16998_v1 = vld [vmem:[#allocation2 + $0x12a] sm:$0xff] }
 0x1e6   :  { %20859 = vst [vmem:[#allocation54_spill] sm:$0xff] %v16998_v1 }
 0x1e8   :  { %12471 = vmatmul.mubr.f32.gmra.mrb[18].mxu0 %v16980_v2  ;;  %v17000_v2 = vld [vmem:[#allocation2 + $0x13a] sm:$0xff] }
 0x1e9   :  { %12473 = vmatprep.mubr.f32.mxu0 %v16982_v60  ;;  %20860 = vst [vmem:[#allocation55_spill] sm:$0xff] %v17000_v2  ;;  %v17004_v60 = vld [vmem:[#allocation2 + $0x142] sm:$0xff] }
 0x1ea   :  { %20861 = vst [vmem:[#allocation56_spill] sm:$0xff] %v17004_v60 }
 0x1ec   :  { %12474 = vmatmul.mubr.f32.gmra.mrb[20].mxu0 %v16986_v59  ;;  %v17006_v59 = vld [vmem:[#allocation2 + $0x152] sm:$0xff] }
 0x1ed   :  { %12476 = vmatprep.mubr.f32.mxu0 %v16988_v8  ;;  %20862 = vst [vmem:[#allocation57_spill] sm:$0xff] %v17006_v59  ;;  %v17008_v8 = vld [vmem:[#allocation3 + $0xf0] sm:$0xff] }
 0x1ee   :  { %286 = vst [vmem:[#allocation2 + $0x181] sm:$0xff] %v17008_v8 }
 0x1f0   :  { %12477 = vmatmul.mubr.f32.gmra.mrb[22].mxu0 %v16992_v5  ;;  %v1283_v5 = vld [vmem:[#allocation2 + $0x1b2] sm:$0xff] }
 0x1f1   :  { %12479 = vmatprep.mubr.f32.mxu0 %v16994_v43  ;;  %v17016_v43 = vld [vmem:[#allocation2 + $0x15a] sm:$0xff] }
 0x1f2   :  { %20863 = vst [vmem:[#allocation58_spill] sm:$0xff] %v17016_v43 }
 0x1f4   :  { %12480 = vmatmul.mubr.f32.gmra.mrb[24].mxu0 %v16998_v1  ;;  %v17018_v1 = vld [vmem:[#allocation2 + $0x16a] sm:$0xff] }
 0x1f5   :  { %12482 = vmatprep.mubr.f32.mxu0 %v17000_v2  ;;  %20864 = vst [vmem:[#allocation59_spill] sm:$0xff] %v17018_v1  ;;  %v17022_v2 = vld [vmem:[#allocation2 + $0x172] sm:$0xff] }
 0x1f6   :  { %20865 = vst [vmem:[#allocation60_spill] sm:$0xff] %v17022_v2 }
 0x1f8   :  { %12483 = vmatmul.mubr.f32.gmra.mrb[26].mxu0 %v17004_v60  ;;  %v17025_v60 = vld [vmem:[#allocation2 + $0x1ca] sm:$0xff] }
 0x1f9   :  { %12485 = vmatprep.mubr.f32.mxu0 %v17006_v59  ;;  %20866 = vst [vmem:[#allocation61_spill] sm:$0xff] %v17025_v60  ;;  %v17028_v59 = vld [vmem:[#allocation2 + $0x1d2] sm:$0xff] }
 0x1fa   :  { %20867 = vst [vmem:[#allocation62_spill] sm:$0xff] %v17028_v59 }
 0x1fc   :  { %12486 = vmatmul.mubr.f32.gmra.mrb[28].mxu0 %v17016_v43  ;;  %v17036_v43 = vld [vmem:[#allocation2 + $0x1fa] sm:$0xff] }
 0x1fd   :  { %12488 = vmatprep.mubr.f32.mxu0 %v17018_v1  ;;  %v17034_v1 = vld [vmem:[#allocation2 + $0x1ea] sm:$0xff]  ;;  %20870 = vst [vmem:[#allocation65_spill] sm:$0xff] %v17036_v43 }
 0x1fe   :  { %20869 = vst [vmem:[#allocation64_spill] sm:$0xff] %v17034_v1 }
 0x200   :  { %12489 = vmatmul.mubr.f32.gmra.mrb[30].mxu0 %v17022_v2  ;;  %v17107_v2 = vld [vmem:[#allocation3 + $0x1f8] sm:$0xff] }
 0x201   :  { %12491 = vmatprep.mubr.f32.mxu0 %v1283_v5  ;;  %v17040_v5 = vld [vmem:[#allocation2 + $0x202] sm:$0xff]  ;;  %319 = vst [vmem:[#allocation2 + $0x339] sm:$0xff] %v17107_v2 }
 0x202   :  { %20871 = vst [vmem:[#allocation66_spill] sm:$0xff] %v17040_v5 }
 0x204   :  { %12492 = vmatmul.mubr.f32.gmra.mrb[32].mxu0 %v1284_v20  ;;  %v17042_v20 = vld [vmem:[#allocation2 + $0x212] sm:$0xff] }
 0x205   :  { %12494 = vmatprep.mubr.f32.mxu0 %v17025_v60  ;;  %20872 = vst [vmem:[#allocation67_spill] sm:$0xff] %v17042_v20  ;;  %v17046_v60 = vld [vmem:[#allocation2 + $0x21a] sm:$0xff] }
 0x206   :  { %20873 = vst [vmem:[#allocation68_spill] sm:$0xff] %v17046_v60 }
 0x208   :  { %12495 = vmatmul.mubr.f32.gmra.mrb[34].mxu0 %v17028_v59  ;;  %v17048_v59 = vld [vmem:[#allocation2 + $0x22a] sm:$0xff] }
 0x209   :  { %12497 = vmatprep.mubr.f32.mxu0 %v17030_v21  ;;  %20874 = vst [vmem:[#allocation69_spill] sm:$0xff] %v17048_v59  ;;  %v17052_v21 = vld [vmem:[#allocation2 + $0x232] sm:$0xff] }
 0x20a   :  { %20875 = vst [vmem:[#allocation70_spill] sm:$0xff] %v17052_v21 }
 0x20c   :  { %12498 = vmatmul.mubr.f32.gmra.mrb[36].mxu0 %v17034_v1  ;;  %v17054_v1 = vld [vmem:[#allocation2 + $0x242] sm:$0xff] }
 0x20d   :  { %12500 = vmatprep.mubr.f32.mxu0 %v17036_v43  ;;  %20876 = vst [vmem:[#allocation71_spill] sm:$0xff] %v17054_v1  ;;  %v17058_v43 = vld [vmem:[#allocation2 + $0x24a] sm:$0xff] }
 0x20e   :  { %20877 = vst [vmem:[#allocation72_spill] sm:$0xff] %v17058_v43 }
 0x210   :  { %12501 = vmatmul.mubr.f32.gmra.mrb[38].mxu0 %v17040_v5  ;;  %v17060_v5 = vld [vmem:[#allocation2 + $0x25a] sm:$0xff] }
 0x211   :  { %12503 = vmatprep.mubr.f32.mxu0 %v17042_v20  ;;  %20878 = vst [vmem:[#allocation73_spill] sm:$0xff] %v17060_v5  ;;  %v17064_v20 = vld [vmem:[#allocation2 + $0x262] sm:$0xff] }
 0x212   :  { %20879 = vst [vmem:[#allocation74_spill] sm:$0xff] %v17064_v20 }
 0x214   :  { %12504 = vmatmul.mubr.f32.gmra.mrb[40].mxu0 %v17046_v60  ;;  %v17066_v60 = vld [vmem:[#allocation2 + $0x272] sm:$0xff] }
 0x215   :  { %12506 = vmatprep.mubr.f32.mxu0 %v17048_v59  ;;  %20880 = vst [vmem:[#allocation75_spill] sm:$0xff] %v17066_v60  ;;  %v17070_v59 = vld [vmem:[#allocation2 + $0x27a] sm:$0xff] }
 0x216   :  { %20881 = vst [vmem:[#allocation76_spill] sm:$0xff] %v17070_v59 }
 0x218   :  { %12507 = vmatmul.mubr.f32.gmra.mrb[42].mxu0 %v17052_v21  ;;  %v17072_v21 = vld [vmem:[#allocation2 + $0x28a] sm:$0xff] }
 0x219   :  { %12509 = vmatprep.mubr.f32.mxu0 %v17054_v1  ;;  %20882 = vst [vmem:[#allocation77_spill] sm:$0xff] %v17072_v21  ;;  %v17076_v1 = vld [vmem:[#allocation2 + $0x292] sm:$0xff] }
 0x21a   :  { %20883 = vst [vmem:[#allocation78_spill] sm:$0xff] %v17076_v1 }
 0x21c   :  { %12510 = vmatmul.mubr.f32.gmra.mrb[44].mxu0 %v17058_v43  ;;  %v17078_v43 = vld [vmem:[#allocation2 + $0x2a2] sm:$0xff] }
 0x21d   :  { %12512 = vmatprep.mubr.f32.mxu0 %v17060_v5  ;;  %20884 = vst [vmem:[#allocation79_spill] sm:$0xff] %v17078_v43  ;;  %v17082_v5 = vld [vmem:[#allocation2 + $0x2aa] sm:$0xff] }
 0x21e   :  { %20885 = vst [vmem:[#allocation80_spill] sm:$0xff] %v17082_v5 }
 0x220   :  { %12513 = vmatmul.mubr.f32.gmra.mrb[46].mxu0 %v17064_v20  ;;  %v17084_v20 = vld [vmem:[#allocation2 + $0x2ba] sm:$0xff] }
 0x221   :  { %12515 = vmatprep.mubr.f32.mxu0 %v17066_v60  ;;  %20886 = vst [vmem:[#allocation81_spill] sm:$0xff] %v17084_v20  ;;  %v17088_v60 = vld [vmem:[#allocation2 + $0x2c2] sm:$0xff] }
 0x222   :  { %20887 = vst [vmem:[#allocation82_spill] sm:$0xff] %v17088_v60 }
 0x224   :  { %12516 = vmatmul.mubr.f32.gmra.mrb[48].mxu0 %v17070_v59  ;;  %v17090_v59 = vld [vmem:[#allocation2 + $0x2d2] sm:$0xff] }
 0x225   :  { %12518 = vmatprep.mubr.f32.mxu0 %v17072_v21  ;;  %20888 = vst [vmem:[#allocation83_spill] sm:$0xff] %v17090_v59  ;;  %v17094_v21 = vld [vmem:[#allocation2 + $0x2da] sm:$0xff] }
 0x226   :  { %20889 = vst [vmem:[#allocation84_spill] sm:$0xff] %v17094_v21 }
 0x228   :  { %12519 = vmatmul.mubr.f32.gmra.mrb[50].mxu0 %v17076_v1  ;;  %v17096_v1 = vld [vmem:[#allocation2 + $0x2ea] sm:$0xff] }
 0x229   :  { %12521 = vmatprep.mubr.f32.mxu0 %v17078_v43  ;;  %20890 = vst [vmem:[#allocation85_spill] sm:$0xff] %v17096_v1  ;;  %v17100_v43 = vld [vmem:[#allocation2 + $0x2f2] sm:$0xff] }
 0x22a   :  { %20891 = vst [vmem:[#allocation86_spill] sm:$0xff] %v17100_v43 }
 0x22c   :  { %12522 = vmatmul.mubr.f32.gmra.mrb[52].mxu0 %v17082_v5  ;;  %v17102_v5 = vld [vmem:[#allocation2 + $0x302] sm:$0xff] }
 0x22d   :  { %12524 = vmatprep.mubr.f32.mxu0 %v17084_v20  ;;  %20892 = vst [vmem:[#allocation87_spill] sm:$0xff] %v17102_v5  ;;  %v17104_v20 = vld [vmem:[#allocation3 + $0x1f0] sm:$0xff] }
 0x22e   :  { %318 = vst [vmem:[#allocation2 + $0x331] sm:$0xff] %v17104_v20 }
 0x230   :  { %12525 = vmatmul.mubr.f32.gmra.mrb[54].mxu0 %v17088_v60  ;;  %v2378_v60 = vld [vmem:[#allocation6 + $0x210] sm:$0xff] }
 0x231   :  { %12527 = vmatprep.mubr.f32.mxu0 %v17090_v59  ;;  %v17112_v59 = vld [vmem:[#allocation2 + $0x30a] sm:$0xff] }
 0x232   :  { %20893 = vst [vmem:[#allocation88_spill] sm:$0xff] %v17112_v59 }
 0x234   :  { %12528 = vmatmul.mubr.f32.gmra.mrb[56].mxu0 %v17094_v21  ;;  %v17114_v21 = vld [vmem:[#allocation2 + $0x31a] sm:$0xff] }
 0x235   :  { %12530 = vmatprep.mubr.f32.mxu0 %v17096_v1  ;;  %20894 = vst [vmem:[#allocation89_spill] sm:$0xff] %v17114_v21  ;;  %v17118_v1 = vld [vmem:[#allocation2 + $0x322] sm:$0xff] }
 0x238   :  { %12531 = vmatmul.mubr.f32.gmra.mrb[58].mxu0 %v17100_v43  ;;  %v14591_v43 = vpack.c.bf16 %v2379_v7, %v2378_v60  ;;  %v2384_v7 = vld [vmem:[#allocation6 + $0x240] sm:$0xff]  ;;  %v2385_v60 = vld [vmem:[#allocation6 + $0x248] sm:$0xff] }
 0x239   :  { %12533 = vmatprep.mubr.f32.mxu0 %v17102_v5  ;;  %v2383_v5 = vld [vmem:[#allocation6 + $0x238] sm:$0xff] }
 0x23c   :  { %12534 = vmatmul.mubr.f32.gmra.mrb[60].mxu0 %v17112_v59  ;;  %v14595_v59 = vpack.c.bf16 %v2381_v63, %v2380_v56  ;;  %v2387_v63 = vld [vmem:[#allocation6 + $0x258] sm:$0xff]  ;;  %v2389_v56 = vld [vmem:[#allocation6 + $0x268] sm:$0xff] }
 0x23d   :  { %12536 = vmatprep.mubr.f32.mxu0 %v17114_v21  ;;  %v2382_v21 = vld [vmem:[#allocation6 + $0x230] sm:$0xff] }
 0x240   :  { %12537 = vmatmul.mubr.f32.gmra.mrb[62].mxu0 %v17118_v1 }
 0x241   :  { %12571 = vmatprep.mubr.f32.mxu0 %v16739_v41  ;;  %v14599_v41 = vpack.c.bf16 %v2383_v5, %v2382_v21  ;;  %v2391_v21 = vld [vmem:[#allocation6 + $0x278] sm:$0xff] }
 0x242   :  { %v17225_v5 = vld [vmem:[#allocation2 + $0x99] sm:$0xff] }
 0x244   :  { %12572 = vmatmul.mubr.f32.vlgmr.msra.gmra.mrb[0].mxu0 %v16743_v47  ;;  %v14603_v47 = vpack.c.bf16 %v2385_v60, %v2384_v7  ;;  %v2920_v60 = vld [vmem:[#allocation6 + $0x2f0] sm:$0xff] }
 0x245   :  { %14590 = vmatpush3.bf16.msra.mxu0 %v16969_v6  ;;  %12574 = vmatprep.mubr.f32.mxu0 %v16745_v48  ;;  %v2386_v48 = vld [vmem:[#allocation6 + $0x250] sm:$0xff]  ;;  %v2907_v6 = vld [vmem:[#allocation6 + $0x288] sm:$0xff] }
 0x246   :  { %14592 = vmatprep.subr.bf16.mxu0 %v14591_v43 }
 0x248   :  { %12575 = vmatmul.mubr.f32.gmra.mrb[2].mxu0 %v16749_v54  ;;  %v14607_v54 = vpack.c.bf16 %v2387_v63, %v2386_v48  ;;  %v17231_v48 = vld [vmem:[#allocation2 + $0xb1] sm:$0xff]  ;;  %v17233_v63 = vld [vmem:[#allocation2 + $0xc1] sm:$0xff] }
 0x249   :  { %12577 = vmatprep.mubr.f32.mxu0 %v16751_v55  ;;  %14594 = vmatpush3.bf16.msra.mxu0 %v14591_v43  ;;  %v2388_v55 = vld [vmem:[#allocation6 + $0x260] sm:$0xff] }
 0x24a   :  { %14596 = vmatprep.subr.bf16.mxu0 %v14595_v59  ;;  %v2918_v43 = vld [vmem:[#allocation6 + $0x2e0] sm:$0xff] }
 0x24c   :  { %12578 = vmatmul.mubr.f32.gmra.mrb[4].mxu0 %v16755_v61  ;;  %v14611_v61 = vpack.c.bf16 %v2389_v56, %v2388_v55  ;;  %v3437_v55 = vld [vmem:[#allocation6 + $0x300] sm:$0xff]  ;;  %v3438_v56 = vld [vmem:[#allocation6 + $0x308] sm:$0xff] }
 0x24d   :  { %12580 = vmatprep.mubr.f32.mxu0 %v16757_v62  ;;  %14598 = vmatpush3.bf16.msra.mxu0 %v14595_v59  ;;  %v2390_v62 = vld [vmem:[#allocation6 + $0x270] sm:$0xff]  ;;  %v2919_v59 = vld [vmem:[#allocation6 + $0x2e8] sm:$0xff] }
 0x24e   :  { %14600 = vmatprep.subr.bf16.mxu0 %v14599_v41  ;;  %v14643_v7 = vpack.c.bf16 %v2919_v59, %v2918_v43  ;;  %v17340_v43 = vld [vmem:[#allocation2 + $0x2b9] sm:$0xff]  ;;  %v17344_v59 = vld [vmem:[#allocation2 + $0x2c1] sm:$0xff] }
 0x250   :  { %12581 = vmatmul.mubr.f32.gmra.mrb[6].mxu0 %v16761_v3  ;;  %v14615_v3 = vpack.c.bf16 %v2391_v21, %v2390_v62  ;;  %v17239_v62 = vld [vmem:[#allocation2 + $0xd9] sm:$0xff]  ;;  %v17241_v21 = vpack.c.bf16 %v3438_v56, %v3437_v55  ;;  %v17358_v55 = vld [vmem:[#allocation2 + $0x301] sm:$0xff]  ;;  %v17362_v56 = vld [vmem:[#allocation2 + $0x309] sm:$0xff] }
 0x251   :  { %12583 = vmatprep.mubr.f32.mxu0 %v16763_v4  ;;  %14602 = vmatpush3.bf16.msra.mxu0 %v14599_v41  ;;  %v2906_v4 = vld [vmem:[#allocation6 + $0x280] sm:$0xff]  ;;  %v17227_v41 = vld [vmem:[#allocation2 + $0xa9] sm:$0xff]  ;;  %20915 = vst [vmem:[#allocation90_spill] sm:$0xff] %v17362_v56 }
 0x252   :  { %14604 = vmatprep.subr.bf16.mxu0 %v14603_v47 }
 0x254   :  { %12584 = vmatmul.mubr.f32.gmra.mrb[8].mxu0 %v16767_v11  ;;  %v17137_v11 = vpack.c.bf16 %v2907_v6, %v2906_v4  ;;  %v17247_v4 = vld [vmem:[#allocation2 + $0xf1] sm:$0xff]  ;;  %v17252_v6 = vld [vmem:[#allocation2 + $0xf9] sm:$0xff] }
 0x255   :  { %12586 = vmatprep.mubr.f32.mxu0 %v16769_v12  ;;  %14606 = vmatpush3.bf16.msra.mxu0 %v14603_v47  ;;  %v17154_v12 = vld [vmem:[#allocation2 + $0x180] sm:$0xff]  ;;  %v2921_v47 = vld [vmem:[#allocation6 + $0x2f8] sm:$0xff] }
 0x256   :  { %14608 = vmatprep.subr.bf16.mxu0 %v14607_v54 }
 0x258   :  { %12587 = vmatmul.mubr.f32.gmra.mrb[10].mxu0 %v16773_v45  ;;  %v17158_v45 = vld [vmem:[#allocation2 + $0x188] sm:$0xff] }
 0x259   :  { %12589 = vmatprep.mubr.f32.mxu0 %v16775_v49  ;;  %14610 = vmatpush3.bf16.msra.mxu0 %v14607_v54  ;;  %v20895_v49 = vld [vmem:[#allocation21_spill] sm:$0xff]  ;;  %v14647_v54 = vpack.c.bf16 %v2921_v47, %v2920_v60  ;;  %v17350_v60 = vld [vmem:[#allocation2 + $0x2d9] sm:$0xff] }
 0x25a   :  { %14612 = vmatprep.subr.bf16.mxu0 %v14611_v61  ;;  %v17352_v47 = vld [vmem:[#allocation2 + $0x2e9] sm:$0xff] }
 0x25c   :  { %12590 = vmatmul.mubr.f32.gmra.mrb[12].mxu0 %v16779_v9  ;;  %v20896_v9 = vld [vmem:[#allocation22_spill] sm:$0xff] }
 0x25d   :  { %12592 = vmatprep.mubr.f32.mxu0 %v16781_v10  ;;  %14614 = vmatpush3.bf16.msra.mxu0 %v14611_v61  ;;  %v20897_v10 = vld [vmem:[#allocation23_spill] sm:$0xff]  ;;  %v17237_v61 = vld [vmem:[#allocation2 + $0xc9] sm:$0xff] }
 0x25e   :  { %14616 = vmatprep.subr.bf16.mxu0 %v14615_v3 }
 0x260   :  { %12593 = vmatmul.mubr.f32.gmra.mrb[14].mxu0 %v16787_v13  ;;  %v20898_v13 = vld [vmem:[#allocation24_spill] sm:$0xff] }
 0x261   :  { %12595 = vmatprep.mubr.f32.mxu0 %v16789_v34  ;;  %14618 = vmatpush3.bf16.msra.mxu0 %v14615_v3  ;;  %v20899_v34 = vld [vmem:[#allocation25_spill] sm:$0xff]  ;;  %20908 = vst [vmem:[#allocation24_spill] sm:$0xff] %v17340_v43 }
 0x262   :  { %14620 = vmatprep.subr.bf16.mxu0 %v17137_v11  ;;  %v17245_v3 = vld [vmem:[#allocation2 + $0xe1] sm:$0xff]  ;;  %20909 = vst [vmem:[#allocation25_spill] sm:$0xff] %v17344_v59 }
 0x264   :  { %12596 = vmatmul.mubr.f32.gmra.mrb[16].mxu0 %v16794_v33  ;;  %v20900_v33 = vld [vmem:[#allocation26_spill] sm:$0xff] }
 0x265   :  { %12598 = vmatprep.mubr.f32.mxu0 %v16796_v14  ;;  %v20901_v14 = vld [vmem:[#allocation27_spill] sm:$0xff] }
 0x266   :  { %20911 = vst [vmem:[#allocation27_spill] sm:$0xff] %v17350_v60 }
 0x268   :  { %12599 = vmatmul.mubr.f32.gmra.mrb[18].mxu0 %v16800_v15  ;;  %v20902_v15 = vld [vmem:[#allocation28_spill] sm:$0xff] }
 0x269   :  { %12601 = vmatprep.mubr.f32.mxu0 %v16802_v22  ;;  %v20903_v22 = vld [vmem:[#allocation29_spill] sm:$0xff]  ;;  %20912 = vst [vmem:[#allocation28_spill] sm:$0xff] %v17352_v47 }
 0x26c   :  { %12602 = vmatmul.mubr.f32.gmra.mrb[20].mxu0 %v16806_v16  ;;  %v17190_v16 = vld [vmem:[#allocation2 + $0x330] sm:$0xff] }
 0x26d   :  { %12604 = vmatprep.mubr.f32.mxu0 %v16808_v17  ;;  %v20904_v17 = vld [vmem:[#allocation30_spill] sm:$0xff] }
 0x26e   :  { %20914 = vst [vmem:[#allocation30_spill] sm:$0xff] %v17358_v55 }
 0x270   :  { %12605 = vmatmul.mubr.f32.gmra.mrb[22].mxu0 %v16812_v0  ;;  %v17194_v0 = vld [vmem:[#allocation2 + $0x338] sm:$0xff] }
 0x271   :  { %12607 = vmatprep.mubr.f32.mxu0 %v16814_v18  ;;  %v2311_v18 = vld [vmem:[#allocation2 + $0x19] sm:$0xff] }
 0x274   :  { %12608 = vmatmul.mubr.f32.gmra.mrb[24].mxu0 %v16818_v19  ;;  %v2908_v19 = vld [vmem:[#allocation6 + $0x290] sm:$0xff] }
 0x275   :  { %12610 = vmatprep.mubr.f32.mxu0 %v16820_v30  ;;  %v2909_v30 = vld [vmem:[#allocation6 + $0x298] sm:$0xff] }
 0x278   :  { %12611 = vmatmul.mubr.f32.gmra.mrb[26].mxu0 %v16824_v23  ;;  %v2312_v23 = vld [vmem:[#allocation2 + $0x21] sm:$0xff] }
 0x279   :  { %12613 = vmatprep.mubr.f32.mxu0 %v16826_v24  ;;  %v17197_v24 = vld [vmem:[#allocation2 + $0x31] sm:$0xff] }
 0x27c   :  { %12614 = vmatmul.mubr.f32.gmra.mrb[28].mxu0 %v16830_v25  ;;  %v14623_v25 = vpack.c.bf16 %v2909_v30, %v2908_v19  ;;  %v17287_v19 = vld [vmem:[#allocation2 + $0x1e1] sm:$0xff]  ;;  %v17290_v30 = vld [vmem:[#allocation2 + $0x1e9] sm:$0xff] }
 0x27d   :  { %12616 = vmatprep.mubr.f32.mxu0 %v17154_v12 }
 0x280   :  { %12617 = vmatmul.mubr.f32.gmra.mrb[30].mxu0 %v17158_v45 }
 0x281   :  { %12619 = vmatprep.mubr.f32.mxu0 %v16834_v26  ;;  %v2910_v26 = vld [vmem:[#allocation6 + $0x2a0] sm:$0xff] }
 0x284   :  { %12620 = vmatmul.mubr.f32.gmra.mrb[32].mxu0 %v16838_v27  ;;  %v2911_v27 = vld [vmem:[#allocation6 + $0x2a8] sm:$0xff] }
 0x285   :  { %12622 = vmatprep.mubr.f32.mxu0 %v16840_v28  ;;  %v17201_v28 = vld [vmem:[#allocation2 + $0x39] sm:$0xff] }
 0x288   :  { %12623 = vmatmul.mubr.f32.gmra.mrb[34].mxu0 %v16844_v29  ;;  %v17203_v29 = vld [vmem:[#allocation2 + $0x49] sm:$0xff] }
 0x289   :  { %12625 = vmatprep.mubr.f32.mxu0 %v16846_v31  ;;  %v14627_v31 = vpack.c.bf16 %v2911_v27, %v2910_v26  ;;  %v17304_v26 = vld [vmem:[#allocation2 + $0x229] sm:$0xff]  ;;  %v17308_v27 = vld [vmem:[#allocation2 + $0x231] sm:$0xff] }
 0x28c   :  { %12626 = vmatmul.mubr.f32.gmra.mrb[36].mxu0 %v16850_v32  ;;  %v2912_v32 = vld [vmem:[#allocation6 + $0x2b0] sm:$0xff] }
 0x28d   :  { %12628 = vmatprep.mubr.f32.mxu0 %v16852_v35  ;;  %v2913_v35 = vld [vmem:[#allocation6 + $0x2b8] sm:$0xff] }
 0x290   :  { %12629 = vmatmul.mubr.f32.gmra.mrb[38].mxu0 %v16856_v36  ;;  %v17207_v36 = vld [vmem:[#allocation2 + $0x51] sm:$0xff] }
 0x291   :  { %12631 = vmatprep.mubr.f32.mxu0 %v16858_v37  ;;  %v17209_v37 = vld [vmem:[#allocation2 + $0x61] sm:$0xff] }
 0x294   :  { %12632 = vmatmul.mubr.f32.gmra.mrb[40].mxu0 %v16862_v38  ;;  %v14631_v38 = vpack.c.bf16 %v2913_v35, %v2912_v32  ;;  %v17314_v32 = vld [vmem:[#allocation2 + $0x249] sm:$0xff]  ;;  %v17316_v35 = vld [vmem:[#allocation2 + $0x259] sm:$0xff] }
 0x295   :  { %12634 = vmatprep.mubr.f32.mxu0 %v16864_v39  ;;  %v2914_v39 = vld [vmem:[#allocation6 + $0x2c0] sm:$0xff] }
 0x298   :  { %12635 = vmatmul.mubr.f32.gmra.mrb[42].mxu0 %v16868_v40  ;;  %v2915_v40 = vld [vmem:[#allocation6 + $0x2c8] sm:$0xff] }
 0x299   :  { %12637 = vmatprep.mubr.f32.mxu0 %v16870_v42  ;;  %v17213_v42 = vld [vmem:[#allocation2 + $0x69] sm:$0xff] }
 0x29c   :  { %12638 = vmatmul.mubr.f32.gmra.mrb[44].mxu0 %v16874_v44  ;;  %v17215_v44 = vld [vmem:[#allocation2 + $0x79] sm:$0xff] }
 0x29d   :  { %12640 = vmatprep.mubr.f32.mxu0 %v16876_v46  ;;  %v14635_v46 = vpack.c.bf16 %v2915_v40, %v2914_v39  ;;  %v17322_v39 = vld [vmem:[#allocation2 + $0x271] sm:$0xff]  ;;  %v17326_v40 = vld [vmem:[#allocation2 + $0x279] sm:$0xff] }
 0x2a0   :  { %12641 = vmatmul.mubr.f32.gmra.mrb[46].mxu0 %v16880_v50  ;;  %v2916_v50 = vld [vmem:[#allocation6 + $0x2d0] sm:$0xff] }
 0x2a1   :  { %12643 = vmatprep.mubr.f32.mxu0 %v16882_v51  ;;  %v2917_v51 = vld [vmem:[#allocation6 + $0x2d8] sm:$0xff] }
 0x2a4   :  { %12644 = vmatmul.mubr.f32.gmra.mrb[48].mxu0 %v16886_v53  ;;  %v17219_v53 = vld [vmem:[#allocation2 + $0x81] sm:$0xff] }
 0x2a5   :  { %12646 = vmatprep.mubr.f32.mxu0 %v16888_v57  ;;  %v17221_v57 = vld [vmem:[#allocation2 + $0x91] sm:$0xff] }
 0x2a8   :  { %12647 = vmatmul.mubr.f32.gmra.mrb[50].mxu0 %v16892_v58  ;;  %v14639_v58 = vpack.c.bf16 %v2917_v51, %v2916_v50  ;;  %v17332_v50 = vld [vmem:[#allocation2 + $0x291] sm:$0xff]  ;;  %v17334_v51 = vld [vmem:[#allocation2 + $0x2a1] sm:$0xff] }
 0x2a9   :  { %12649 = vmatprep.mubr.f32.mxu0 %v20895_v49  ;;  %v17258_v49 = vld [vmem:[#allocation2 + $0x111] sm:$0xff]  ;;  %20905 = vst [vmem:[#allocation21_spill] sm:$0xff] %v17332_v50  ;;  %20906 = vst [vmem:[#allocation22_spill] sm:$0xff] %v17334_v51 }
 0x2ac   :  { %12650 = vmatmul.mubr.f32.gmra.mrb[52].mxu0 %v20896_v9  ;;  %v17260_v9 = vld [vmem:[#allocation2 + $0x121] sm:$0xff] }
 0x2ad   :  { %12652 = vmatprep.mubr.f32.mxu0 %v20897_v10  ;;  %v17264_v10 = vld [vmem:[#allocation2 + $0x129] sm:$0xff] }
 0x2b0   :  { %12653 = vmatmul.mubr.f32.gmra.mrb[54].mxu0 %v20898_v13  ;;  %v17266_v13 = vld [vmem:[#allocation2 + $0x139] sm:$0xff] }
 0x2b1   :  { %12655 = vmatprep.mubr.f32.mxu0 %v20899_v34  ;;  %v17270_v34 = vld [vmem:[#allocation2 + $0x141] sm:$0xff] }
 0x2b4   :  { %12656 = vmatmul.mubr.f32.gmra.mrb[56].mxu0 %v20900_v33  ;;  %v17272_v33 = vld [vmem:[#allocation2 + $0x151] sm:$0xff] }
 0x2b5   :  { %12658 = vmatprep.mubr.f32.mxu0 %v20901_v14  ;;  %v17276_v14 = vld [vmem:[#allocation2 + $0x159] sm:$0xff] }
 0x2b8   :  { %12659 = vmatmul.mubr.f32.gmra.mrb[58].mxu0 %v20902_v15  ;;  %v17278_v15 = vld [vmem:[#allocation2 + $0x169] sm:$0xff] }
 0x2b9   :  { %12661 = vmatprep.mubr.f32.mxu0 %v20903_v22  ;;  %v17282_v22 = vld [vmem:[#allocation2 + $0x171] sm:$0xff] }
 0x2bc   :  { %12662 = vmatmul.mubr.f32.gmra.mrb[60].mxu0 %v20904_v17  ;;  %v2343_v17 = vld [vmem:[#allocation2 + $0x1c9] sm:$0xff] }
 0x2bd   :  { %12664 = vmatprep.mubr.f32.mxu0 %v17190_v16 }
 0x2c0   :  { %12665 = vmatmul.mubr.f32.gmra.mrb[62].mxu0 %v17194_v0 }
 0x2c1   :  { %12699 = vmatprep.mubr.f32.mxu0 %v2311_v18  ;;  %v2344_v18 = vld [vmem:[#allocation2 + $0x1d1] sm:$0xff] }
 0x2c4   :  { %12700 = vmatmul.mubr.f32.vlgmr.msra.gmra.mrb[0].mxu0 %v2312_v23  ;;  %v17292_v23 = vld [vmem:[#allocation2 + $0x1f9] sm:$0xff] }
 0x2c5   :  { %14622 = vmatpush3.bf16.msra.mxu0 %v17137_v11  ;;  %12702 = vmatprep.mubr.f32.mxu0 %v17197_v24  ;;  %v17254_v11 = vld [vmem:[#allocation2 + $0x109] sm:$0xff] }
 0x2c6   :  { %14624 = vmatprep.subr.bf16.mxu0 %v14623_v25 }
 0x2c8   :  { %12703 = vmatmul.mubr.f32.gmra.mrb[2].mxu0 %v17201_v28 }
 0x2c9   :  { %12705 = vmatprep.mubr.f32.mxu0 %v17203_v29  ;;  %14626 = vmatpush3.bf16.msra.mxu0 %v14623_v25  ;;  %v17296_v25 = vld [vmem:[#allocation2 + $0x201] sm:$0xff] }
 0x2ca   :  { %14628 = vmatprep.subr.bf16.mxu0 %v14627_v31 }
 0x2cc   :  { %12706 = vmatmul.mubr.f32.gmra.mrb[4].mxu0 %v17207_v36 }
 0x2cd   :  { %12708 = vmatprep.mubr.f32.mxu0 %v17209_v37  ;;  %14630 = vmatpush3.bf16.msra.mxu0 %v14627_v31  ;;  %v17310_v31 = vld [vmem:[#allocation2 + $0x241] sm:$0xff] }
 0x2ce   :  { %14632 = vmatprep.subr.bf16.mxu0 %v14631_v38 }
 0x2d0   :  { %12709 = vmatmul.mubr.f32.gmra.mrb[6].mxu0 %v17213_v42 }
 0x2d1   :  { %12711 = vmatprep.mubr.f32.mxu0 %v17215_v44  ;;  %14634 = vmatpush3.bf16.msra.mxu0 %v14631_v38  ;;  %v17320_v38 = vld [vmem:[#allocation2 + $0x261] sm:$0xff] }
 0x2d2   :  { %14636 = vmatprep.subr.bf16.mxu0 %v14635_v46 }
 0x2d4   :  { %12712 = vmatmul.mubr.f32.gmra.mrb[8].mxu0 %v17219_v53 }
 0x2d5   :  { %12714 = vmatprep.mubr.f32.mxu0 %v17221_v57  ;;  %14638 = vmatpush3.bf16.msra.mxu0 %v14635_v46  ;;  %v17328_v46 = vld [vmem:[#allocation2 + $0x289] sm:$0xff] }
 0x2d6   :  { %14640 = vmatprep.subr.bf16.mxu0 %v14639_v58 }
 0x2d8   :  { %12715 = vmatmul.mubr.f32.gmra.mrb[10].mxu0 %v17225_v5 }
 0x2d9   :  { %12717 = vmatprep.mubr.f32.mxu0 %v17227_v41  ;;  %14642 = vmatpush3.bf16.msra.mxu0 %v14639_v58  ;;  %v17338_v58 = vld [vmem:[#allocation2 + $0x2a9] sm:$0xff] }
 0x2da   :  { %14644 = vmatprep.subr.bf16.mxu0 %v14643_v7  ;;  %20907 = vst [vmem:[#allocation23_spill] sm:$0xff] %v17338_v58 }
 0x2dc   :  { %12718 = vmatmul.mubr.f32.gmra.mrb[12].mxu0 %v17231_v48 }
 0x2dd   :  { %12720 = vmatprep.mubr.f32.mxu0 %v17233_v63  ;;  %14646 = vmatpush3.bf16.msra.mxu0 %v14643_v7  ;;  %v17346_v7 = vld [vmem:[#allocation2 + $0x2d1] sm:$0xff] }
 0x2de   :  { %14648 = vmatprep.subr.bf16.mxu0 %v14647_v54  ;;  %20910 = vst [vmem:[#allocation26_spill] sm:$0xff] %v17346_v7 }
 0x2e0   :  { %12721 = vmatmul.mubr.f32.gmra.mrb[14].mxu0 %v17237_v61 }
 0x2e1   :  { %12723 = vmatprep.mubr.f32.mxu0 %v17239_v62  ;;  %14650 = vmatpush3.bf16.msra.mxu0 %v14647_v54  ;;  %v17356_v54 = vld [vmem:[#allocation2 + $0x2f1] sm:$0xff] }
 0x2e2   :  { %14652 = vmatprep.subr.bf16.mxu0 %v17241_v21  ;;  %20913 = vst [vmem:[#allocation29_spill] sm:$0xff] %v17356_v54 }
 0x2e4   :  { %12724 = vmatmul.mubr.f32.gmra.mrb[16].mxu0 %v17245_v3 }
 0x2e5   :  { %12726 = vmatprep.mubr.f32.mxu0 %v17247_v4 }
 0x2e8   :  { %12727 = vmatmul.mubr.f32.gmra.mrb[18].mxu0 %v17252_v6 }
 0x2e9   :  { %12729 = vmatprep.mubr.f32.mxu0 %v17254_v11 }
 0x2ec   :  { %12730 = vmatmul.mubr.f32.gmra.mrb[20].mxu0 %v17258_v49 }
 0x2ed   :  { %12732 = vmatprep.mubr.f32.mxu0 %v17260_v9 }
 0x2f0   :  { %12733 = vmatmul.mubr.f32.gmra.mrb[22].mxu0 %v17264_v10 }
 0x2f1   :  { %12735 = vmatprep.mubr.f32.mxu0 %v17266_v13 }
 0x2f4   :  { %12736 = vmatmul.mubr.f32.gmra.mrb[24].mxu0 %v17270_v34 }
 0x2f5   :  { %12738 = vmatprep.mubr.f32.mxu0 %v17272_v33 }
 0x2f8   :  { %12739 = vmatmul.mubr.f32.gmra.mrb[26].mxu0 %v17276_v14 }
 0x2f9   :  { %12741 = vmatprep.mubr.f32.mxu0 %v17278_v15 }
 0x2fc   :  { %12742 = vmatmul.mubr.f32.gmra.mrb[28].mxu0 %v17282_v22 }
 0x2fd   :  { %12744 = vmatprep.mubr.f32.mxu0 %v17008_v8  ;;  %v17298_v8 = vld [vmem:[#allocation2 + $0x211] sm:$0xff] }
 0x300   :  { %12745 = vmatmul.mubr.f32.gmra.mrb[30].mxu0 %v17011_v52  ;;  %v17302_v52 = vld [vmem:[#allocation2 + $0x219] sm:$0xff] }
 0x301   :  { %12747 = vmatprep.mubr.f32.mxu0 %v2343_v17  ;;  %v17364_v17 = vld [vmem:[#allocation2 + $0x319] sm:$0xff] }
 0x302   :  { %20916 = vst [vmem:[#allocation91_spill] sm:$0xff] %v17364_v17 }
 0x304   :  { %12748 = vmatmul.mubr.f32.gmra.mrb[32].mxu0 %v2344_v18  ;;  %v17368_v18 = vld [vmem:[#allocation2 + $0x321] sm:$0xff] }
 0x305   :  { %12750 = vmatprep.mubr.f32.mxu0 %v17287_v19  ;;  %20917 = vst [vmem:[#allocation92_spill] sm:$0xff] %v17368_v18 }
 0x308   :  { %12751 = vmatmul.mubr.f32.gmra.mrb[34].mxu0 %v17290_v30 }
 0x309   :  { %12753 = vmatprep.mubr.f32.mxu0 %v17292_v23 }
 0x30c   :  { %12754 = vmatmul.mubr.f32.gmra.mrb[36].mxu0 %v17296_v25 }
 0x30d   :  { %12756 = vmatprep.mubr.f32.mxu0 %v17298_v8 }
 0x310   :  { %12757 = vmatmul.mubr.f32.gmra.mrb[38].mxu0 %v17302_v52 }
 0x311   :  { %12759 = vmatprep.mubr.f32.mxu0 %v17304_v26 }
 0x314   :  { %12760 = vmatmul.mubr.f32.gmra.mrb[40].mxu0 %v17308_v27 }
 0x315   :  { %12762 = vmatprep.mubr.f32.mxu0 %v17310_v31 }
 0x318   :  { %12763 = vmatmul.mubr.f32.gmra.mrb[42].mxu0 %v17314_v32 }
 0x319   :  { %12765 = vmatprep.mubr.f32.mxu0 %v17316_v35 }
 0x31c   :  { %12766 = vmatmul.mubr.f32.gmra.mrb[44].mxu0 %v17320_v38 }
 0x31d   :  { %12768 = vmatprep.mubr.f32.mxu0 %v17322_v39 }
 0x320   :  { %12769 = vmatmul.mubr.f32.gmra.mrb[46].mxu0 %v17326_v40 }
 0x321   :  { %12771 = vmatprep.mubr.f32.mxu0 %v17328_v46 }
 0x324   :  { %12772 = vmatmul.mubr.f32.gmra.mrb[48].mxu0 %v17332_v50  ;;  %v20926_v50 = vld [vmem:[#allocation39_spill] sm:$0xff] }
 0x325   :  { %12774 = vmatprep.mubr.f32.mxu0 %v17334_v51  ;;  %v20922_v51 = vld [vmem:[#allocation35_spill] sm:$0xff] }
 0x328   :  { %12775 = vmatmul.mubr.f32.gmra.mrb[50].mxu0 %v17338_v58  ;;  %v3444_v58 = vld [vmem:[#allocation6 + $0x338] sm:$0xff] }
 0x329   :  { %12777 = vmatprep.mubr.f32.mxu0 %v17340_v43  ;;  %v20919_v43 = vld [vmem:[#allocation32_spill] sm:$0xff] }
 0x32c   :  { %12778 = vmatmul.mubr.f32.gmra.mrb[52].mxu0 %v17344_v59  ;;  %v3442_v59 = vld [vmem:[#allocation6 + $0x328] sm:$0xff] }
 0x32d   :  { %12780 = vmatprep.mubr.f32.mxu0 %v17346_v7  ;;  %v3441_v7 = vld [vmem:[#allocation6 + $0x320] sm:$0xff] }
 0x330   :  { %12781 = vmatmul.mubr.f32.gmra.mrb[54].mxu0 %v17350_v60  ;;  %v3440_v60 = vld [vmem:[#allocation6 + $0x318] sm:$0xff] }
 0x331   :  { %12783 = vmatprep.mubr.f32.mxu0 %v17352_v47  ;;  %v3439_v47 = vld [vmem:[#allocation6 + $0x310] sm:$0xff] }
 0x334   :  { %12784 = vmatmul.mubr.f32.gmra.mrb[56].mxu0 %v17356_v54  ;;  %v20918_v54 = vld [vmem:[#allocation31_spill] sm:$0xff] }
 0x335   :  { %12786 = vmatprep.mubr.f32.mxu0 %v17358_v55  ;;  %v14655_v55 = vpack.c.bf16 %v3440_v60, %v3439_v47  ;;  %v3445_v60 = vld [vmem:[#allocation6 + $0x340] sm:$0xff]  ;;  %v3446_v47 = vld [vmem:[#allocation6 + $0x348] sm:$0xff] }
 0x338   :  { %12787 = vmatmul.mubr.f32.gmra.mrb[58].mxu0 %v17362_v56  ;;  %v14659_v56 = vpack.c.bf16 %v3442_v59, %v3441_v7  ;;  %v3448_v59 = vld [vmem:[#allocation6 + $0x358] sm:$0xff]  ;;  %v20925_v7 = vld [vmem:[#allocation38_spill] sm:$0xff] }
 0x339   :  { %12789 = vmatprep.mubr.f32.mxu0 %v17364_v17  ;;  %v20920_v17 = vld [vmem:[#allocation33_spill] sm:$0xff] }
 0x33c   :  { %12790 = vmatmul.mubr.f32.gmra.mrb[60].mxu0 %v17368_v18  ;;  %v3443_v18 = vld [vmem:[#allocation6 + $0x330] sm:$0xff] }
 0x33d   :  { %12792 = vmatprep.mubr.f32.mxu0 %v17104_v20  ;;  %v20921_v20 = vld [vmem:[#allocation34_spill] sm:$0xff] }
 0x340   :  { %12793 = vmatmul.mubr.f32.gmra.mrb[62].mxu0 %v17107_v2  ;;  %v14663_v2 = vpack.c.bf16 %v3444_v58, %v3443_v18  ;;  %v3450_v58 = vld [vmem:[#allocation6 + $0x368] sm:$0xff]  ;;  %v20927_v18 = vld [vmem:[#allocation40_spill] sm:$0xff] }
 0x341   :  { %12827 = vmatprep.mubr.f32.mxu0 %v20918_v54  ;;  %v20923_v54 = vld [vmem:[#allocation36_spill] sm:$0xff] }
 0x344   :  { %12828 = vmatmul.mubr.f32.vlgmr.msra.gmra.mrb[0].mxu0 %v20919_v43  ;;  %v20924_v43 = vld [vmem:[#allocation37_spill] sm:$0xff] }
 0x345   :  { %14654 = vmatpush3.bf16.msra.mxu0 %v17241_v21  ;;  %12830 = vmatprep.mubr.f32.mxu0 %v20920_v17  ;;  %v14667_v21 = vpack.c.bf16 %v3446_v47, %v3445_v60  ;;  %v3447_v17 = vld [vmem:[#allocation6 + $0x350] sm:$0xff]  ;;  %v3452_v60 = vld [vmem:[#allocation6 + $0x378] sm:$0xff] }
 0x346   :  { %14656 = vmatprep.subr.bf16.mxu0 %v14655_v55  ;;  %v20929_v47 = vld [vmem:[#allocation42_spill] sm:$0xff] }
 0x348   :  { %12831 = vmatmul.mubr.f32.gmra.mrb[2].mxu0 %v20921_v20  ;;  %v20928_v20 = vld [vmem:[#allocation41_spill] sm:$0xff] }
 0x349   :  { %12833 = vmatprep.mubr.f32.mxu0 %v20922_v51  ;;  %14658 = vmatpush3.bf16.msra.mxu0 %v14655_v55  ;;  %v14671_v51 = vpack.c.bf16 %v3448_v59, %v3447_v17  ;;  %v3449_v55 = vld [vmem:[#allocation6 + $0x360] sm:$0xff]  ;;  %v3968_v17 = vld [vmem:[#allocation6 + $0x388] sm:$0xff] }
 0x34a   :  { %14660 = vmatprep.subr.bf16.mxu0 %v14659_v56  ;;  %v20931_v59 = vld [vmem:[#allocation44_spill] sm:$0xff] }
 0x34c   :  { %12834 = vmatmul.mubr.f32.gmra.mrb[4].mxu0 %v20923_v54  ;;  %v3451_v54 = vld [vmem:[#allocation6 + $0x370] sm:$0xff] }
 0x34d   :  { %12836 = vmatprep.mubr.f32.mxu0 %v20924_v43  ;;  %14662 = vmatpush3.bf16.msra.mxu0 %v14659_v56  ;;  %v14675_v56 = vpack.c.bf16 %v3450_v58, %v3449_v55  ;;  %v20930_v43 = vld [vmem:[#allocation43_spill] sm:$0xff]  ;;  %v20933_v55 = vld [vmem:[#allocation46_spill] sm:$0xff] }
 0x34e   :  { %14664 = vmatprep.subr.bf16.mxu0 %v14663_v2  ;;  %v20934_v58 = vld [vmem:[#allocation47_spill] sm:$0xff] }
 0x350   :  { %12837 = vmatmul.mubr.f32.gmra.mrb[6].mxu0 %v20925_v7  ;;  %v20932_v7 = vld [vmem:[#allocation45_spill] sm:$0xff] }
 0x351   :  { %12839 = vmatprep.mubr.f32.mxu0 %v20926_v50  ;;  %14666 = vmatpush3.bf16.msra.mxu0 %v14663_v2  ;;  %v14679_v50 = vpack.c.bf16 %v3452_v60, %v3451_v54  ;;  %v3967_v2 = vld [vmem:[#allocation6 + $0x380] sm:$0xff]  ;;  %v20938_v54 = vld [vmem:[#allocation51_spill] sm:$0xff] }
 0x352   :  { %14668 = vmatprep.subr.bf16.mxu0 %v14667_v21  ;;  %v20939_v60 = vld [vmem:[#allocation52_spill] sm:$0xff] }
 0x354   :  { %12840 = vmatmul.mubr.f32.gmra.mrb[8].mxu0 %v20927_v18  ;;  %v20936_v18 = vld [vmem:[#allocation49_spill] sm:$0xff] }
 0x355   :  { %12842 = vmatprep.mubr.f32.mxu0 %v20928_v20  ;;  %14670 = vmatpush3.bf16.msra.mxu0 %v14667_v21  ;;  %v17389_v21 = vpack.c.bf16 %v3968_v17, %v3967_v2  ;;  %v20937_v20 = vld [vmem:[#allocation50_spill] sm:$0xff]  ;;  %v20943_v2 = vld [vmem:[#allocation56_spill] sm:$0xff] }
 0x356   :  { %14672 = vmatprep.subr.bf16.mxu0 %v14671_v51  ;;  %v20945_v17 = vld [vmem:[#allocation58_spill] sm:$0xff] }
 0x358   :  { %12843 = vmatmul.mubr.f32.gmra.mrb[10].mxu0 %v20929_v47  ;;  %v20941_v47 = vld [vmem:[#allocation54_spill] sm:$0xff] }
 0x359   :  { %12845 = vmatprep.mubr.f32.mxu0 %v20930_v43  ;;  %14674 = vmatpush3.bf16.msra.mxu0 %v14671_v51  ;;  %v20935_v51 = vld [vmem:[#allocation48_spill] sm:$0xff]  ;;  %v20942_v43 = vld [vmem:[#allocation55_spill] sm:$0xff] }
 0x35a   :  { %14676 = vmatprep.subr.bf16.mxu0 %v14675_v56 }
 0x35c   :  { %12846 = vmatmul.mubr.f32.gmra.mrb[12].mxu0 %v20931_v59  ;;  %v20946_v59 = vld [vmem:[#allocation59_spill] sm:$0xff] }
 0x35d   :  { %12848 = vmatprep.mubr.f32.mxu0 %v20932_v7  ;;  %14678 = vmatpush3.bf16.msra.mxu0 %v14675_v56  ;;  %v20940_v56 = vld [vmem:[#allocation53_spill] sm:$0xff] }
 0x35e   :  { %14680 = vmatprep.subr.bf16.mxu0 %v14679_v50  ;;  %v17406_v7 = vld [vmem:[#allocation2 + $0x182] sm:$0xff] }
 0x35f   :  { %20947 = vst [vmem:[#allocation31_spill] sm:$0xff] %v17406_v7 }
 0x360   :  { %12849 = vmatmul.mubr.f32.gmra.mrb[14].mxu0 %v20933_v55  ;;  %v20948_v55 = vld [vmem:[#allocation60_spill] sm:$0xff] }
 0x361   :  { %12851 = vmatprep.mubr.f32.mxu0 %v20934_v58  ;;  %14682 = vmatpush3.bf16.msra.mxu0 %v14679_v50  ;;  %v20944_v50 = vld [vmem:[#allocation57_spill] sm:$0xff] }
 0x362   :  { %14684 = vmatprep.subr.bf16.mxu0 %v17389_v21  ;;  %v17410_v58 = vld [vmem:[#allocation2 + $0x18a] sm:$0xff] }
 0x363   :  { %20949 = vst [vmem:[#allocation32_spill] sm:$0xff] %v17410_v58 }
 0x364   :  { %12852 = vmatmul.mubr.f32.gmra.mrb[16].mxu0 %v20935_v51  ;;  %v20950_v51 = vld [vmem:[#allocation61_spill] sm:$0xff] }
 0x365   :  { %12854 = vmatprep.mubr.f32.mxu0 %v20936_v18  ;;  %v20951_v18 = vld [vmem:[#allocation62_spill] sm:$0xff] }
 0x368   :  { %12855 = vmatmul.mubr.f32.gmra.mrb[18].mxu0 %v20937_v20  ;;  %v20952_v20 = vld [vmem:[#allocation63_spill] sm:$0xff] }
 0x369   :  { %12857 = vmatprep.mubr.f32.mxu0 %v20938_v54  ;;  %v20953_v54 = vld [vmem:[#allocation64_spill] sm:$0xff] }
 0x36c   :  { %12858 = vmatmul.mubr.f32.gmra.mrb[20].mxu0 %v20939_v60  ;;  %v20954_v60 = vld [vmem:[#allocation65_spill] sm:$0xff] }
 0x36d   :  { %12860 = vmatprep.mubr.f32.mxu0 %v20940_v56  ;;  %v20955_v56 = vld [vmem:[#allocation66_spill] sm:$0xff] }
 0x370   :  { %12861 = vmatmul.mubr.f32.gmra.mrb[22].mxu0 %v20941_v47  ;;  %v20956_v47 = vld [vmem:[#allocation67_spill] sm:$0xff] }
 0x371   :  { %12863 = vmatprep.mubr.f32.mxu0 %v20942_v43  ;;  %v20957_v43 = vld [vmem:[#allocation68_spill] sm:$0xff] }
 0x374   :  { %12864 = vmatmul.mubr.f32.gmra.mrb[24].mxu0 %v20943_v2  ;;  %v20958_v2 = vld [vmem:[#allocation69_spill] sm:$0xff] }
 0x375   :  { %12866 = vmatprep.mubr.f32.mxu0 %v20944_v50  ;;  %v20959_v50 = vld [vmem:[#allocation70_spill] sm:$0xff] }
 0x378   :  { %12867 = vmatmul.mubr.f32.gmra.mrb[26].mxu0 %v20945_v17  ;;  %v20960_v17 = vld [vmem:[#allocation71_spill] sm:$0xff] }
 0x379   :  { %12869 = vmatprep.mubr.f32.mxu0 %v20946_v59  ;;  %v20961_v59 = vld [vmem:[#allocation72_spill] sm:$0xff] }
 0x37c   :  { %12870 = vmatmul.mubr.f32.gmra.mrb[28].mxu0 %v20948_v55  ;;  %v20962_v55 = vld [vmem:[#allocation73_spill] sm:$0xff] }
 0x37d   :  { %12872 = vmatprep.mubr.f32.mxu0 %v17406_v7  ;;  %v3977_v7 = vld [vmem:[#allocation6 + $0x3d0] sm:$0xff] }
 0x380   :  { %12873 = vmatmul.mubr.f32.gmra.mrb[30].mxu0 %v17410_v58  ;;  %v3377_v58 = vld [vmem:[#allocation2 + $0x68] sm:$0xff] }
 0x381   :  { %12875 = vmatprep.mubr.f32.mxu0 %v20950_v51  ;;  %v20963_v51 = vld [vmem:[#allocation74_spill] sm:$0xff] }
 0x384   :  { %12876 = vmatmul.mubr.f32.gmra.mrb[32].mxu0 %v20951_v18  ;;  %v20964_v18 = vld [vmem:[#allocation75_spill] sm:$0xff] }
 0x385   :  { %12878 = vmatprep.mubr.f32.mxu0 %v20952_v20  ;;  %v20965_v20 = vld [vmem:[#allocation76_spill] sm:$0xff] }
 0x388   :  { %12879 = vmatmul.mubr.f32.gmra.mrb[34].mxu0 %v20953_v54  ;;  %v20966_v54 = vld [vmem:[#allocation77_spill] sm:$0xff] }
 0x389   :  { %12881 = vmatprep.mubr.f32.mxu0 %v20954_v60  ;;  %v20967_v60 = vld [vmem:[#allocation78_spill] sm:$0xff] }
 0x38c   :  { %12882 = vmatmul.mubr.f32.gmra.mrb[36].mxu0 %v20955_v56  ;;  %v20968_v56 = vld [vmem:[#allocation79_spill] sm:$0xff] }
 0x38d   :  { %12884 = vmatprep.mubr.f32.mxu0 %v20956_v47  ;;  %v20969_v47 = vld [vmem:[#allocation80_spill] sm:$0xff] }
 0x390   :  { %12885 = vmatmul.mubr.f32.gmra.mrb[38].mxu0 %v20957_v43  ;;  %v20970_v43 = vld [vmem:[#allocation81_spill] sm:$0xff] }
 0x391   :  { %12887 = vmatprep.mubr.f32.mxu0 %v20958_v2  ;;  %v20971_v2 = vld [vmem:[#allocation82_spill] sm:$0xff] }
 0x394   :  { %12888 = vmatmul.mubr.f32.gmra.mrb[40].mxu0 %v20959_v50  ;;  %v20972_v50 = vld [vmem:[#allocation83_spill] sm:$0xff] }
 0x395   :  { %12890 = vmatprep.mubr.f32.mxu0 %v20960_v17  ;;  %v20973_v17 = vld [vmem:[#allocation84_spill] sm:$0xff] }
 0x398   :  { %12891 = vmatmul.mubr.f32.gmra.mrb[42].mxu0 %v20961_v59  ;;  %v20974_v59 = vld [vmem:[#allocation85_spill] sm:$0xff] }
 0x399   :  { %12893 = vmatprep.mubr.f32.mxu0 %v20962_v55  ;;  %v20975_v55 = vld [vmem:[#allocation86_spill] sm:$0xff] }
 0x39c   :  { %12894 = vmatmul.mubr.f32.gmra.mrb[44].mxu0 %v20963_v51  ;;  %v20976_v51 = vld [vmem:[#allocation87_spill] sm:$0xff] }
 0x39d   :  { %12896 = vmatprep.mubr.f32.mxu0 %v20964_v18  ;;  %v20977_v18 = vld [vmem:[#allocation88_spill] sm:$0xff] }
 0x3a0   :  { %12897 = vmatmul.mubr.f32.gmra.mrb[46].mxu0 %v20965_v20  ;;  %v20978_v20 = vld [vmem:[#allocation89_spill] sm:$0xff] }
 0x3a1   :  { %12899 = vmatprep.mubr.f32.mxu0 %v20966_v54  ;;  %v17442_v54 = vld [vmem:[#allocation2 + $0x332] sm:$0xff] }
 0x3a2   :  { %20979 = vst [vmem:[#allocation33_spill] sm:$0xff] %v17442_v54 }
 0x3a4   :  { %12900 = vmatmul.mubr.f32.gmra.mrb[48].mxu0 %v20967_v60  ;;  %v17446_v60 = vld [vmem:[#allocation2 + $0x33a] sm:$0xff] }
 0x3a5   :  { %12902 = vmatprep.mubr.f32.mxu0 %v20968_v56  ;;  %20980 = vst [vmem:[#allocation34_spill] sm:$0xff] %v17446_v60  ;;  %v3372_v56 = vld [vmem:[#allocation2 + $0x30] sm:$0xff] }
 0x3a8   :  { %12903 = vmatmul.mubr.f32.gmra.mrb[50].mxu0 %v20969_v47  ;;  %v3969_v47 = vld [vmem:[#allocation6 + $0x390] sm:$0xff] }
 0x3a9   :  { %12905 = vmatprep.mubr.f32.mxu0 %v20970_v43  ;;  %v3970_v43 = vld [vmem:[#allocation6 + $0x398] sm:$0xff] }
 0x3ac   :  { %12906 = vmatmul.mubr.f32.gmra.mrb[52].mxu0 %v20971_v2  ;;  %v3373_v2 = vld [vmem:[#allocation2 + $0x38] sm:$0xff] }
 0x3ad   :  { %12908 = vmatprep.mubr.f32.mxu0 %v20972_v50  ;;  %v3374_v50 = vld [vmem:[#allocation2 + $0x48] sm:$0xff] }
 0x3b0   :  { %12909 = vmatmul.mubr.f32.gmra.mrb[54].mxu0 %v20973_v17  ;;  %v14687_v17 = vpack.c.bf16 %v3970_v43, %v3969_v47  ;;  %v3975_v47 = vld [vmem:[#allocation6 + $0x3c0] sm:$0xff]  ;;  %v3976_v43 = vld [vmem:[#allocation6 + $0x3c8] sm:$0xff] }
 0x3b1   :  { %12911 = vmatprep.mubr.f32.mxu0 %v20974_v59  ;;  %v3971_v59 = vld [vmem:[#allocation6 + $0x3a0] sm:$0xff] }
 0x3b4   :  { %12912 = vmatmul.mubr.f32.gmra.mrb[56].mxu0 %v20975_v55  ;;  %v3972_v55 = vld [vmem:[#allocation6 + $0x3a8] sm:$0xff] }
 0x3b5   :  { %12914 = vmatprep.mubr.f32.mxu0 %v20976_v51  ;;  %v3376_v51 = vld [vmem:[#allocation2 + $0x60] sm:$0xff] }
 0x3b8   :  { %12915 = vmatmul.mubr.f32.gmra.mrb[58].mxu0 %v20977_v18  ;;  %v14691_v18 = vpack.c.bf16 %v3972_v55, %v3971_v59  ;;  %v3978_v59 = vld [vmem:[#allocation6 + $0x3d8] sm:$0xff] }
 0x3b9   :  { %12917 = vmatprep.mubr.f32.mxu0 %v20978_v20  ;;  %v3973_v20 = vld [vmem:[#allocation6 + $0x3b0] sm:$0xff]  ;;  %v3381_v55 = vld [vmem:[#allocation2 + $0x98] sm:$0xff] }
 0x3bc   :  { %12918 = vmatmul.mubr.f32.gmra.mrb[60].mxu0 %v17118_v1  ;;  %v3375_v1 = vld [vmem:[#allocation2 + $0x50] sm:$0xff] }
 0x3bd   :  { %12920 = vmatprep.mubr.f32.mxu0 %v17442_v54  ;;  %v3974_v54 = vld [vmem:[#allocation6 + $0x3b8] sm:$0xff] }
 0x3c0   :  { %12921 = vmatmul.mubr.f32.gmra.mrb[62].mxu0 %v17446_v60  ;;  %v14695_v60 = vpack.c.bf16 %v3974_v54, %v3973_v20  ;;  %v3980_v54 = vld [vmem:[#allocation6 + $0x3e8] sm:$0xff]  ;;  %v3384_v20 = vld [vmem:[#allocation2 + $0xc0] sm:$0xff] }
 0x3c1   :  { %12955 = vmatprep.mubr.f32.mxu0 %v3372_v56  ;;  %v3378_v56 = vld [vmem:[#allocation2 + $0x78] sm:$0xff] }
 0x3c4   :  { %12956 = vmatmul.mubr.f32.vlgmr.msra.gmra.mrb[0].mxu0 %v3373_v2  ;;  %v3379_v2 = vld [vmem:[#allocation2 + $0x80] sm:$0xff] }
 0x3c5   :  { %14686 = vmatpush3.bf16.msra.mxu0 %v17389_v21  ;;  %12958 = vmatprep.mubr.f32.mxu0 %v3374_v50  ;;  %v3380_v21 = vld [vmem:[#allocation2 + $0x90] sm:$0xff]  ;;  %v14699_v50 = vpack.c.bf16 %v3976_v43, %v3975_v47  ;;  %v3982_v47 = vld [vmem:[#allocation6 + $0x3f8] sm:$0xff]  ;;  %v3385_v43 = vld [vmem:[#allocation2 + $0xc8] sm:$0xff] }
 0x3c6   :  { %14688 = vmatprep.subr.bf16.mxu0 %v14687_v17 }
 0x3c8   :  { %12959 = vmatmul.mubr.f32.gmra.mrb[2].mxu0 %v3375_v1  ;;  %v3382_v1 = vld [vmem:[#allocation2 + $0xa8] sm:$0xff] }
 0x3c9   :  { %12961 = vmatprep.mubr.f32.mxu0 %v3376_v51  ;;  %14690 = vmatpush3.bf16.msra.mxu0 %v14687_v17  ;;  %v14703_v17 = vpack.c.bf16 %v3978_v59, %v3977_v7  ;;  %v3979_v51 = vld [vmem:[#allocation6 + $0x3e0] sm:$0xff]  ;;  %v4498_v7 = vld [vmem:[#allocation6 + $0x408] sm:$0xff] }
 0x3ca   :  { %14692 = vmatprep.subr.bf16.mxu0 %v14691_v18  ;;  %v3387_v59 = vld [vmem:[#allocation2 + $0xe0] sm:$0xff] }
 0x3cc   :  { %12962 = vmatmul.mubr.f32.gmra.mrb[4].mxu0 %v3377_v58  ;;  %v3383_v58 = vld [vmem:[#allocation2 + $0xb0] sm:$0xff] }
 0x3cd   :  { %12964 = vmatprep.mubr.f32.mxu0 %v3378_v56  ;;  %14694 = vmatpush3.bf16.msra.mxu0 %v14691_v18  ;;  %v14707_v18 = vpack.c.bf16 %v3980_v54, %v3979_v51  ;;  %v3981_v56 = vld [vmem:[#allocation6 + $0x3f0] sm:$0xff]  ;;  %v3390_v51 = vld [vmem:[#allocation2 + $0x108] sm:$0xff]  ;;  %v3392_v54 = vld [vmem:[#allocation2 + $0x120] sm:$0xff] }
 0x3ce   :  { %14696 = vmatprep.subr.bf16.mxu0 %v14695_v60 }
 0x3d0   :  { %12965 = vmatmul.mubr.f32.gmra.mrb[6].mxu0 %v3379_v2  ;;  %v3386_v2 = vld [vmem:[#allocation2 + $0xd8] sm:$0xff] }
 0x3d1   :  { %12967 = vmatprep.mubr.f32.mxu0 %v3380_v21  ;;  %14698 = vmatpush3.bf16.msra.mxu0 %v14695_v60  ;;  %v14711_v60 = vpack.c.bf16 %v3982_v47, %v3981_v56  ;;  %v4497_v21 = vld [vmem:[#allocation6 + $0x400] sm:$0xff]  ;;  %v3396_v56 = vld [vmem:[#allocation2 + $0x150] sm:$0xff]  ;;  %v3397_v47 = vld [vmem:[#allocation2 + $0x158] sm:$0xff] }
 0x3d2   :  { %14700 = vmatprep.subr.bf16.mxu0 %v14699_v50 }
 0x3d4   :  { %12968 = vmatmul.mubr.f32.gmra.mrb[8].mxu0 %v3381_v55  ;;  %v3388_v55 = vld [vmem:[#allocation2 + $0xf0] sm:$0xff] }
 0x3d5   :  { %12970 = vmatprep.mubr.f32.mxu0 %v3382_v1  ;;  %14702 = vmatpush3.bf16.msra.mxu0 %v14699_v50  ;;  %v17450_v50 = vpack.c.bf16 %v4498_v7, %v4497_v21  ;;  %v3389_v1 = vld [vmem:[#allocation2 + $0xf8] sm:$0xff]  ;;  %v3404_v21 = vld [vmem:[#allocation2 + $0x1e0] sm:$0xff]  ;;  %v3405_v7 = vld [vmem:[#allocation2 + $0x1e8] sm:$0xff] }
 0x3d6   :  { %14704 = vmatprep.subr.bf16.mxu0 %v14703_v17 }
 0x3d8   :  { %12971 = vmatmul.mubr.f32.gmra.mrb[10].mxu0 %v3383_v58  ;;  %v3393_v58 = vld [vmem:[#allocation2 + $0x128] sm:$0xff] }
 0x3d9   :  { %12973 = vmatprep.mubr.f32.mxu0 %v3384_v20  ;;  %14706 = vmatpush3.bf16.msra.mxu0 %v14703_v17  ;;  %v3391_v17 = vld [vmem:[#allocation2 + $0x110] sm:$0xff]  ;;  %v3394_v20 = vld [vmem:[#allocation2 + $0x138] sm:$0xff] }
 0x3da   :  { %14708 = vmatprep.subr.bf16.mxu0 %v14707_v18 }
 0x3dc   :  { %12974 = vmatmul.mubr.f32.gmra.mrb[12].mxu0 %v3385_v43  ;;  %v3398_v43 = vld [vmem:[#allocation2 + $0x168] sm:$0xff] }
 0x3dd   :  { %12976 = vmatprep.mubr.f32.mxu0 %v3386_v2  ;;  %14710 = vmatpush3.bf16.msra.mxu0 %v14707_v18  ;;  %v3395_v18 = vld [vmem:[#allocation2 + $0x140] sm:$0xff]  ;;  %v3399_v2 = vld [vmem:[#allocation2 + $0x170] sm:$0xff] }
 0x3de   :  { %14712 = vmatprep.subr.bf16.mxu0 %v14711_v60 }
 0x3e0   :  { %12977 = vmatmul.mubr.f32.gmra.mrb[14].mxu0 %v3387_v59  ;;  %v3406_v59 = vld [vmem:[#allocation2 + $0x1f8] sm:$0xff] }
 0x3e1   :  { %12979 = vmatprep.mubr.f32.mxu0 %v3388_v55  ;;  %14714 = vmatpush3.bf16.msra.mxu0 %v14711_v60  ;;  %v17455_v60 = vld [vmem:[#allocation2] sm:$0xff] }
 0x3e2   :  { %14716 = vmatprep.subr.bf16.mxu0 %v17450_v50  ;;  %v3407_v55 = vld [vmem:[#allocation2 + $0x200] sm:$0xff] }
 0x3e4   :  { %12980 = vmatmul.mubr.f32.gmra.mrb[16].mxu0 %v3389_v1  ;;  %v3408_v1 = vld [vmem:[#allocation2 + $0x210] sm:$0xff] }
 0x3e5   :  { %12982 = vmatprep.mubr.f32.mxu0 %v3390_v51  ;;  %v3409_v51 = vld [vmem:[#allocation2 + $0x218] sm:$0xff] }
 0x3e8   :  { %12983 = vmatmul.mubr.f32.gmra.mrb[18].mxu0 %v3391_v17  ;;  %v3412_v17 = vld [vmem:[#allocation2 + $0x240] sm:$0xff] }
 0x3e9   :  { %12985 = vmatprep.mubr.f32.mxu0 %v3392_v54  ;;  %v3413_v54 = vld [vmem:[#allocation2 + $0x248] sm:$0xff] }
 0x3ec   :  { %12986 = vmatmul.mubr.f32.gmra.mrb[20].mxu0 %v3393_v58  ;;  %v3414_v58 = vld [vmem:[#allocation2 + $0x258] sm:$0xff] }
 0x3ed   :  { %12988 = vmatprep.mubr.f32.mxu0 %v3394_v20  ;;  %v3415_v20 = vld [vmem:[#allocation2 + $0x260] sm:$0xff] }
 0x3f0   :  { %12989 = vmatmul.mubr.f32.gmra.mrb[22].mxu0 %v3395_v18  ;;  %v3416_v18 = vld [vmem:[#allocation2 + $0x270] sm:$0xff] }
 0x3f1   :  { %12991 = vmatprep.mubr.f32.mxu0 %v3396_v56  ;;  %v3417_v56 = vld [vmem:[#allocation2 + $0x278] sm:$0xff] }
 0x3f4   :  { %12992 = vmatmul.mubr.f32.gmra.mrb[24].mxu0 %v3397_v47  ;;  %v3418_v47 = vld [vmem:[#allocation2 + $0x288] sm:$0xff] }
 0x3f5   :  { %12994 = vmatprep.mubr.f32.mxu0 %v3398_v43  ;;  %v3419_v43 = vld [vmem:[#allocation2 + $0x290] sm:$0xff] }
 0x3f8   :  { %12995 = vmatmul.mubr.f32.gmra.mrb[26].mxu0 %v3399_v2  ;;  %v3420_v2 = vld [vmem:[#allocation2 + $0x2a0] sm:$0xff] }
 0x3f9   :  { %12997 = vmatprep.mubr.f32.mxu0 %v17154_v12  ;;  %v3410_v12 = vld [vmem:[#allocation2 + $0x228] sm:$0xff] }
 0x3fc   :  { %12998 = vmatmul.mubr.f32.gmra.mrb[28].mxu0 %v17158_v45  ;;  %v3411_v45 = vld [vmem:[#allocation2 + $0x230] sm:$0xff] }
 0x3fd   :  { %13000 = vmatprep.mubr.f32.mxu0 %v17455_v60 }
 0x400   :  { %13001 = vmatmul.mubr.f32.gmra.mrb[30].mxu0 %v17455_v60 }
 0x401   :  { %13003 = vmatprep.mubr.f32.mxu0 %v3404_v21  ;;  %v3421_v21 = vld [vmem:[#allocation2 + $0x2a8] sm:$0xff] }
 0x404   :  { %13004 = vmatmul.mubr.f32.gmra.mrb[32].mxu0 %v3405_v7  ;;  %v3422_v7 = vld [vmem:[#allocation2 + $0x2b8] sm:$0xff] }
 0x405   :  { %13006 = vmatprep.mubr.f32.mxu0 %v3406_v59  ;;  %v3423_v59 = vld [vmem:[#allocation2 + $0x2c0] sm:$0xff] }
 0x408   :  { %13007 = vmatmul.mubr.f32.gmra.mrb[34].mxu0 %v3407_v55  ;;  %v3424_v55 = vld [vmem:[#allocation2 + $0x2d0] sm:$0xff] }
 0x409   :  { %13009 = vmatprep.mubr.f32.mxu0 %v3408_v1  ;;  %v3425_v1 = vld [vmem:[#allocation2 + $0x2d8] sm:$0xff] }
 0x40c   :  { %13010 = vmatmul.mubr.f32.gmra.mrb[36].mxu0 %v3409_v51  ;;  %v3426_v51 = vld [vmem:[#allocation2 + $0x2e8] sm:$0xff] }
 0x40d   :  { %13012 = vmatprep.mubr.f32.mxu0 %v3410_v12  ;;  %v3427_v12 = vld [vmem:[#allocation2 + $0x2f0] sm:$0xff] }
 0x410   :  { %13013 = vmatmul.mubr.f32.gmra.mrb[38].mxu0 %v3411_v45  ;;  %v3428_v45 = vld [vmem:[#allocation2 + $0x300] sm:$0xff] }
 0x411   :  { %13015 = vmatprep.mubr.f32.mxu0 %v3412_v17  ;;  %v3429_v17 = vld [vmem:[#allocation2 + $0x308] sm:$0xff] }
 0x414   :  { %13016 = vmatmul.mubr.f32.gmra.mrb[40].mxu0 %v3413_v54  ;;  %v3430_v54 = vld [vmem:[#allocation2 + $0x318] sm:$0xff] }
 0x415   :  { %13018 = vmatprep.mubr.f32.mxu0 %v3414_v58  ;;  %v3431_v58 = vld [vmem:[#allocation2 + $0x320] sm:$0xff] }
 0x418   :  { %13019 = vmatmul.mubr.f32.gmra.mrb[42].mxu0 %v3415_v20  ;;  %v4499_v20 = vld [vmem:[#allocation6 + $0x410] sm:$0xff] }
 0x419   :  { %13021 = vmatprep.mubr.f32.mxu0 %v3416_v18  ;;  %v4500_v18 = vld [vmem:[#allocation6 + $0x418] sm:$0xff] }
 0x41c   :  { %13022 = vmatmul.mubr.f32.gmra.mrb[44].mxu0 %v3417_v56  ;;  %v14719_v56 = vpack.c.bf16 %v4500_v18, %v4499_v20  ;;  %v4454_v20 = vld [vmem:[#allocation2 + $0x13a] sm:$0xff]  ;;  %v4455_v18 = vld [vmem:[#allocation2 + $0x142] sm:$0xff] }
 0x41d   :  { %13024 = vmatprep.mubr.f32.mxu0 %v3418_v47  ;;  %v4501_v47 = vld [vmem:[#allocation6 + $0x420] sm:$0xff] }
 0x420   :  { %13025 = vmatmul.mubr.f32.gmra.mrb[46].mxu0 %v3419_v43  ;;  %v4502_v43 = vld [vmem:[#allocation6 + $0x428] sm:$0xff] }
 0x421   :  { %13027 = vmatprep.mubr.f32.mxu0 %v3420_v2  ;;  %v4504_v2 = vld [vmem:[#allocation6 + $0x438] sm:$0xff] }
 0x424   :  { %13028 = vmatmul.mubr.f32.gmra.mrb[48].mxu0 %v3421_v21  ;;  %v4506_v21 = vld [vmem:[#allocation6 + $0x448] sm:$0xff] }
 0x425   :  { %13030 = vmatprep.mubr.f32.mxu0 %v3422_v7  ;;  %v4510_v7 = vld [vmem:[#allocation6 + $0x468] sm:$0xff] }
 0x428   :  { %13031 = vmatmul.mubr.f32.gmra.mrb[50].mxu0 %v3423_v59  ;;  %v4512_v59 = vld [vmem:[#allocation6 + $0x478] sm:$0xff] }
 0x429   :  { %13033 = vmatprep.mubr.f32.mxu0 %v3424_v55  ;;  %v4446_v55 = vld [vmem:[#allocation2 + $0xda] sm:$0xff] }
 0x42c   :  { %13034 = vmatmul.mubr.f32.gmra.mrb[52].mxu0 %v3425_v1  ;;  %v4447_v1 = vld [vmem:[#allocation2 + $0xe2] sm:$0xff] }
 0x42d   :  { %13036 = vmatprep.mubr.f32.mxu0 %v3426_v51  ;;  %v4448_v51 = vld [vmem:[#allocation2 + $0xf2] sm:$0xff] }
 0x430   :  { %13037 = vmatmul.mubr.f32.gmra.mrb[54].mxu0 %v3427_v12  ;;  %v4449_v12 = vld [vmem:[#allocation2 + $0xfa] sm:$0xff] }
 0x431   :  { %13039 = vmatprep.mubr.f32.mxu0 %v3428_v45  ;;  %v4450_v45 = vld [vmem:[#allocation2 + $0x10a] sm:$0xff] }
 0x434   :  { %13040 = vmatmul.mubr.f32.gmra.mrb[56].mxu0 %v3429_v17  ;;  %v4451_v17 = vld [vmem:[#allocation2 + $0x112] sm:$0xff] }
 0x435   :  { %13042 = vmatprep.mubr.f32.mxu0 %v3430_v54  ;;  %v4452_v54 = vld [vmem:[#allocation2 + $0x122] sm:$0xff] }
 0x438   :  { %13043 = vmatmul.mubr.f32.gmra.mrb[58].mxu0 %v3431_v58  ;;  %v4453_v58 = vld [vmem:[#allocation2 + $0x12a] sm:$0xff] }
 0x439   :  { %13045 = vmatprep.mubr.f32.mxu0 %v17190_v16  ;;  %v14723_v16 = vpack.c.bf16 %v4502_v43, %v4501_v47  ;;  %v4457_v47 = vld [vmem:[#allocation2 + $0x15a] sm:$0xff]  ;;  %v4458_v43 = vld [vmem:[#allocation2 + $0x16a] sm:$0xff] }
 0x43c   :  { %13046 = vmatmul.mubr.f32.gmra.mrb[60].mxu0 %v17194_v0  ;;  %v4503_v0 = vld [vmem:[#allocation6 + $0x430] sm:$0xff] }
 0x43d   :  { %13048 = vmatprep.mubr.f32.mxu0 %v17455_v60 }
 0x440   :  { %13049 = vmatmul.mubr.f32.gmra.mrb[62].mxu0 %v17455_v60  ;;  %v4505_v60 = vld [vmem:[#allocation6 + $0x440] sm:$0xff] }
 0x441   :  { %13083 = vmatprep.mubr.f32.mxu0 %v17197_v24  ;;  %v14727_v24 = vpack.c.bf16 %v4504_v2, %v4503_v0  ;;  %v20994_v0 = vld [vmem:[#allocation31_spill] sm:$0xff] }
 0x442   :  { %v4462_v2 = vld [vmem:[#allocation2 + $0x19a] sm:$0xff] }
 0x444   :  { %13084 = vmatmul.mubr.f32.vlgmr.msra.gmra.mrb[0].mxu0 %v17201_v28  ;;  %v14731_v28 = vpack.c.bf16 %v4506_v21, %v4505_v60  ;;  %v4463_v60 = vld [vmem:[#allocation2 + $0x1a2] sm:$0xff] }
 0x445   :  { %14718 = vmatpush3.bf16.msra.mxu0 %v17450_v50  ;;  %13086 = vmatprep.mubr.f32.mxu0 %v17203_v29  ;;  %v4507_v29 = vld [vmem:[#allocation6 + $0x450] sm:$0xff]  ;;  %v4508_v50 = vld [vmem:[#allocation6 + $0x458] sm:$0xff]  ;;  %v4464_v21 = vld [vmem:[#allocation2 + $0x1e2] sm:$0xff] }
 0x446   :  { %14720 = vmatprep.subr.bf16.mxu0 %v14719_v56 }
 0x448   :  { %13087 = vmatmul.mubr.f32.gmra.mrb[2].mxu0 %v17207_v36  ;;  %v14735_v36 = vpack.c.bf16 %v4508_v50, %v4507_v29  ;;  %v4466_v29 = vld [vmem:[#allocation2 + $0x1fa] sm:$0xff]  ;;  %v4467_v50 = vld [vmem:[#allocation2 + $0x202] sm:$0xff] }
 0x449   :  { %13089 = vmatprep.mubr.f32.mxu0 %v17209_v37  ;;  %14722 = vmatpush3.bf16.msra.mxu0 %v14719_v56  ;;  %v4509_v37 = vld [vmem:[#allocation6 + $0x460] sm:$0xff]  ;;  %v4456_v56 = vld [vmem:[#allocation2 + $0x152] sm:$0xff] }
 0x44a   :  { %14724 = vmatprep.subr.bf16.mxu0 %v14723_v16 }
 0x44c   :  { %13090 = vmatmul.mubr.f32.gmra.mrb[4].mxu0 %v17213_v42  ;;  %v14739_v42 = vpack.c.bf16 %v4510_v7, %v4509_v37  ;;  %v4469_v37 = vld [vmem:[#allocation2 + $0x21a] sm:$0xff]  ;;  %v4470_v7 = vld [vmem:[#allocation2 + $0x22a] sm:$0xff] }
 0x44d   :  { %13092 = vmatprep.mubr.f32.mxu0 %v17215_v44  ;;  %14726 = vmatpush3.bf16.msra.mxu0 %v14723_v16  ;;  %v4511_v44 = vld [vmem:[#allocation6 + $0x470] sm:$0xff] }
 0x44e   :  { %14728 = vmatprep.subr.bf16.mxu0 %v14727_v24  ;;  %v4459_v16 = vld [vmem:[#allocation2 + $0x172] sm:$0xff] }
 0x450   :  { %13093 = vmatmul.mubr.f32.gmra.mrb[6].mxu0 %v17219_v53  ;;  %v14743_v53 = vpack.c.bf16 %v4512_v59, %v4511_v44  ;;  %v4472_v44 = vld [vmem:[#allocation2 + $0x242] sm:$0xff]  ;;  %v4473_v59 = vld [vmem:[#allocation2 + $0x24a] sm:$0xff] }
 0x451   :  { %13095 = vmatprep.mubr.f32.mxu0 %v17221_v57  ;;  %14730 = vmatpush3.bf16.msra.mxu0 %v14727_v24  ;;  %v3930_v57 = vld [vmem:[#allocation2 + $0x181] sm:$0xff] }
 0x452   :  { %14732 = vmatprep.subr.bf16.mxu0 %v14731_v28  ;;  %v20995_v24 = vld [vmem:[#allocation32_spill] sm:$0xff] }
 0x454   :  { %13096 = vmatmul.mubr.f32.gmra.mrb[8].mxu0 %v17225_v5  ;;  %v3931_v5 = vld [vmem:[#allocation2 + $0x189] sm:$0xff] }
 0x455   :  { %13098 = vmatprep.mubr.f32.mxu0 %v17227_v41  ;;  %14734 = vmatpush3.bf16.msra.mxu0 %v14731_v28  ;;  %v3932_v41 = vld [vmem:[#allocation2 + $0x199] sm:$0xff]  ;;  %v4465_v28 = vld [vmem:[#allocation2 + $0x1ea] sm:$0xff] }
 0x456   :  { %14736 = vmatprep.subr.bf16.mxu0 %v14735_v36 }
 0x458   :  { %13099 = vmatmul.mubr.f32.gmra.mrb[10].mxu0 %v17231_v48  ;;  %v3933_v48 = vld [vmem:[#allocation2 + $0x1a1] sm:$0xff] }
 0x459   :  { %13101 = vmatprep.mubr.f32.mxu0 %v17233_v63  ;;  %14738 = vmatpush3.bf16.msra.mxu0 %v14735_v36  ;;  %v20981_v63 = vld [vmem:[#allocation21_spill] sm:$0xff]  ;;  %v4468_v36 = vld [vmem:[#allocation2 + $0x212] sm:$0xff] }
 0x45a   :  { %14740 = vmatprep.subr.bf16.mxu0 %v14739_v42 }
 0x45c   :  { %13102 = vmatmul.mubr.f32.gmra.mrb[12].mxu0 %v17237_v61  ;;  %v20982_v61 = vld [vmem:[#allocation22_spill] sm:$0xff] }
 0x45d   :  { %13104 = vmatprep.mubr.f32.mxu0 %v17239_v62  ;;  %14742 = vmatpush3.bf16.msra.mxu0 %v14739_v42  ;;  %v20983_v62 = vld [vmem:[#allocation23_spill] sm:$0xff] }
 0x45e   :  { %14744 = vmatprep.subr.bf16.mxu0 %v14743_v53  ;;  %v4471_v42 = vld [vmem:[#allocation2 + $0x232] sm:$0xff] }
 0x460   :  { %13105 = vmatmul.mubr.f32.gmra.mrb[14].mxu0 %v17245_v3  ;;  %v20984_v3 = vld [vmem:[#allocation24_spill] sm:$0xff] }
 0x461   :  { %13107 = vmatprep.mubr.f32.mxu0 %v17247_v4  ;;  %14746 = vmatpush3.bf16.msra.mxu0 %v14743_v53  ;;  %v20985_v4 = vld [vmem:[#allocation25_spill] sm:$0xff]  ;;  %v4474_v53 = vld [vmem:[#allocation2 + $0x25a] sm:$0xff] }
 0x464   :  { %13108 = vmatmul.mubr.f32.gmra.mrb[16].mxu0 %v17252_v6  ;;  %v20986_v6 = vld [vmem:[#allocation26_spill] sm:$0xff] }
 0x465   :  { %13110 = vmatprep.mubr.f32.mxu0 %v17254_v11  ;;  %v20987_v11 = vld [vmem:[#allocation27_spill] sm:$0xff] }
 0x468   :  { %13111 = vmatmul.mubr.f32.gmra.mrb[18].mxu0 %v17258_v49  ;;  %v20988_v49 = vld [vmem:[#allocation28_spill] sm:$0xff] }
 0x469   :  { %13113 = vmatprep.mubr.f32.mxu0 %v17260_v9  ;;  %v20989_v9 = vld [vmem:[#allocation29_spill] sm:$0xff] }
 0x46c   :  { %13114 = vmatmul.mubr.f32.gmra.mrb[20].mxu0 %v17264_v10  ;;  %v20990_v10 = vld [vmem:[#allocation30_spill] sm:$0xff] }
 0x46d   :  { %13116 = vmatprep.mubr.f32.mxu0 %v17266_v13  ;;  %v20991_v13 = vld [vmem:[#allocation90_spill] sm:$0xff] }
 0x470   :  { %13117 = vmatmul.mubr.f32.gmra.mrb[22].mxu0 %v17270_v34  ;;  %v20992_v34 = vld [vmem:[#allocation91_spill] sm:$0xff] }
 0x471   :  { %13119 = vmatprep.mubr.f32.mxu0 %v17272_v33  ;;  %v3962_v33 = vld [vmem:[#allocation2 + $0x331] sm:$0xff] }
 0x474   :  { %13120 = vmatmul.mubr.f32.gmra.mrb[24].mxu0 %v17276_v14  ;;  %v20993_v14 = vld [vmem:[#allocation92_spill] sm:$0xff] }
 0x475   :  { %13122 = vmatprep.mubr.f32.mxu0 %v17278_v15  ;;  %v3963_v15 = vld [vmem:[#allocation2 + $0x339] sm:$0xff] }
 0x478   :  { %13123 = vmatmul.mubr.f32.gmra.mrb[26].mxu0 %v17282_v22  ;;  %v3964_v22 = vld [vmem:[#allocation2 + $0x349] sm:$0xff] }
 0x479   :  { %13125 = vmatprep.mubr.f32.mxu0 %v3930_v57  ;;  %v4475_v57 = vld [vmem:[#allocation2 + $0x262] sm:$0xff] }
 0x47c   :  { %13126 = vmatmul.mubr.f32.gmra.mrb[28].mxu0 %v3931_v5  ;;  %v4476_v5 = vld [vmem:[#allocation2 + $0x272] sm:$0xff] }
 0x47d   :  { %13128 = vmatprep.mubr.f32.mxu0 %v3932_v41  ;;  %v4477_v41 = vld [vmem:[#allocation2 + $0x27a] sm:$0xff] }
 0x480   :  { %13129 = vmatmul.mubr.f32.gmra.mrb[30].mxu0 %v3933_v48  ;;  %v4478_v48 = vld [vmem:[#allocation2 + $0x28a] sm:$0xff] }
 0x481   :  { %13131 = vmatprep.mubr.f32.mxu0 %v17287_v19  ;;  %v3965_v19 = vld [vmem:[#allocation2 + $0x351] sm:$0xff] }
 0x484   :  { %13132 = vmatmul.mubr.f32.gmra.mrb[32].mxu0 %v17290_v30  ;;  %v4432_v30 = vld [vmem:[#allocation2 + $0x32] sm:$0xff] }
 0x485   :  { %13134 = vmatprep.mubr.f32.mxu0 %v17292_v23  ;;  %v4433_v23 = vld [vmem:[#allocation2 + $0x3a] sm:$0xff] }
 0x488   :  { %13135 = vmatmul.mubr.f32.gmra.mrb[34].mxu0 %v17296_v25  ;;  %v4434_v25 = vld [vmem:[#allocation2 + $0x4a] sm:$0xff] }
 0x489   :  { %13137 = vmatprep.mubr.f32.mxu0 %v17298_v8  ;;  %v4435_v8 = vld [vmem:[#allocation2 + $0x52] sm:$0xff] }
 0x48c   :  { %13138 = vmatmul.mubr.f32.gmra.mrb[36].mxu0 %v17302_v52  ;;  %v4436_v52 = vld [vmem:[#allocation2 + $0x62] sm:$0xff] }
 0x48d   :  { %13140 = vmatprep.mubr.f32.mxu0 %v17304_v26  ;;  %v4437_v26 = vld [vmem:[#allocation2 + $0x6a] sm:$0xff] }
 0x490   :  { %13141 = vmatmul.mubr.f32.gmra.mrb[38].mxu0 %v17308_v27  ;;  %v4438_v27 = vld [vmem:[#allocation2 + $0x7a] sm:$0xff] }
 0x491   :  { %13143 = vmatprep.mubr.f32.mxu0 %v17310_v31  ;;  %v4439_v31 = vld [vmem:[#allocation2 + $0x82] sm:$0xff] }
 0x494   :  { %13144 = vmatmul.mubr.f32.gmra.mrb[40].mxu0 %v17314_v32  ;;  %v4440_v32 = vld [vmem:[#allocation2 + $0x92] sm:$0xff] }
 0x495   :  { %13146 = vmatprep.mubr.f32.mxu0 %v17316_v35  ;;  %v4441_v35 = vld [vmem:[#allocation2 + $0x9a] sm:$0xff] }
 0x498   :  { %13147 = vmatmul.mubr.f32.gmra.mrb[42].mxu0 %v17320_v38  ;;  %v4442_v38 = vld [vmem:[#allocation2 + $0xaa] sm:$0xff] }
 0x499   :  { %13149 = vmatprep.mubr.f32.mxu0 %v17322_v39  ;;  %v4443_v39 = vld [vmem:[#allocation2 + $0xb2] sm:$0xff] }
 0x49c   :  { %13150 = vmatmul.mubr.f32.gmra.mrb[44].mxu0 %v17326_v40  ;;  %v4444_v40 = vld [vmem:[#allocation2 + $0xc2] sm:$0xff] }
 0x49d   :  { %13152 = vmatprep.mubr.f32.mxu0 %v17328_v46  ;;  %v4445_v46 = vld [vmem:[#allocation2 + $0xca] sm:$0xff] }
 0x4a0   :  { %13153 = vmatmul.mubr.f32.gmra.mrb[46].mxu0 %v20981_v63  ;;  %v4479_v63 = vld [vmem:[#allocation2 + $0x292] sm:$0xff] }
 0x4a1   :  { %13155 = vmatprep.mubr.f32.mxu0 %v20982_v61  ;;  %v4480_v61 = vld [vmem:[#allocation2 + $0x2a2] sm:$0xff] }
 0x4a4   :  { %13156 = vmatmul.mubr.f32.gmra.mrb[48].mxu0 %v20983_v62  ;;  %v4481_v62 = vld [vmem:[#allocation2 + $0x2aa] sm:$0xff] }
 0x4a5   :  { %13158 = vmatprep.mubr.f32.mxu0 %v20984_v3  ;;  %v4482_v3 = vld [vmem:[#allocation2 + $0x2ba] sm:$0xff] }
 0x4a8   :  { %13159 = vmatmul.mubr.f32.gmra.mrb[50].mxu0 %v20985_v4  ;;  %v4483_v4 = vld [vmem:[#allocation2 + $0x2c2] sm:$0xff] }
 0x4a9   :  { %13161 = vmatprep.mubr.f32.mxu0 %v20986_v6  ;;  %v4484_v6 = vld [vmem:[#allocation2 + $0x2d2] sm:$0xff] }
 0x4ac   :  { %13162 = vmatmul.mubr.f32.gmra.mrb[52].mxu0 %v20987_v11  ;;  %v4485_v11 = vld [vmem:[#allocation2 + $0x2da] sm:$0xff] }
 0x4ad   :  { %13164 = vmatprep.mubr.f32.mxu0 %v20988_v49  ;;  %v4486_v49 = vld [vmem:[#allocation2 + $0x2ea] sm:$0xff] }
 0x4b0   :  { %13165 = vmatmul.mubr.f32.gmra.mrb[54].mxu0 %v20989_v9  ;;  %v4487_v9 = vld [vmem:[#allocation2 + $0x2f2] sm:$0xff] }
 0x4b1   :  { %13167 = vmatprep.mubr.f32.mxu0 %v20990_v10  ;;  %v4488_v10 = vld [vmem:[#allocation2 + $0x302] sm:$0xff] }
 0x4b4   :  { %13168 = vmatmul.mubr.f32.gmra.mrb[56].mxu0 %v20991_v13  ;;  %v4489_v13 = vld [vmem:[#allocation2 + $0x30a] sm:$0xff] }
 0x4b5   :  { %13170 = vmatprep.mubr.f32.mxu0 %v20992_v34  ;;  %v4490_v34 = vld [vmem:[#allocation2 + $0x31a] sm:$0xff] }
 0x4b8   :  { %13171 = vmatmul.mubr.f32.gmra.mrb[58].mxu0 %v20993_v14  ;;  %v20996_v14 = vld [vmem:[#allocation33_spill] sm:$0xff] }
 0x4b9   :  { %13173 = vmatprep.mubr.f32.mxu0 %v3962_v33  ;;  %v4491_v33 = vld [vmem:[#allocation2 + $0x322] sm:$0xff] }
 0x4bc   :  { %13174 = vmatmul.mubr.f32.gmra.mrb[60].mxu0 %v3963_v15  ;;  %v4494_v15 = vld [vmem:[#allocation2 + $0x34a] sm:$0xff] }
 0x4bd   :  { %13176 = vmatprep.mubr.f32.mxu0 %v3964_v22  ;;  %v20997_v22 = vld [vmem:[#allocation34_spill] sm:$0xff] }
 0x4c0   :  { %13177 = vmatmul.mubr.f32.gmra.mrb[62].mxu0 %v3965_v19  ;;  %v4495_v19 = vld [vmem:[#allocation2 + $0x352] sm:$0xff] }
 0x4c1   :  { %13211 = vmatprep.mubr.f32.mxu0 %v4432_v30 }
 0x4c4   :  { %13212 = vmatmul.mubr.f32.vlgmr.msra.gmra.mrb[0].mxu0 %v4433_v23 }
 0x4c5   :  { %13214 = vmatprep.mubr.f32.mxu0 %v4434_v25 }
 0x4c8   :  { %13215 = vmatmul.mubr.f32.gmra.mrb[2].mxu0 %v4435_v8 }
 0x4c9   :  { %13217 = vmatprep.mubr.f32.mxu0 %v4436_v52 }
 0x4cc   :  { %13218 = vmatmul.mubr.f32.gmra.mrb[4].mxu0 %v4437_v26 }
 0x4cd   :  { %13220 = vmatprep.mubr.f32.mxu0 %v4438_v27 }
 0x4d0   :  { %13221 = vmatmul.mubr.f32.gmra.mrb[6].mxu0 %v4439_v31 }
 0x4d1   :  { %13223 = vmatprep.mubr.f32.mxu0 %v4440_v32 }
 0x4d4   :  { %13224 = vmatmul.mubr.f32.gmra.mrb[8].mxu0 %v4441_v35 }
 0x4d5   :  { %13226 = vmatprep.mubr.f32.mxu0 %v4442_v38 }
 0x4d8   :  { %13227 = vmatmul.mubr.f32.gmra.mrb[10].mxu0 %v4443_v39 }
 0x4d9   :  { %13229 = vmatprep.mubr.f32.mxu0 %v4444_v40 }
 0x4dc   :  { %13230 = vmatmul.mubr.f32.gmra.mrb[12].mxu0 %v4445_v46 }
 0x4dd   :  { %13232 = vmatprep.mubr.f32.mxu0 %v4446_v55 }
 0x4e0   :  { %13233 = vmatmul.mubr.f32.gmra.mrb[14].mxu0 %v4447_v1 }
 0x4e1   :  { %13235 = vmatprep.mubr.f32.mxu0 %v4448_v51 }
 0x4e4   :  { %13236 = vmatmul.mubr.f32.gmra.mrb[16].mxu0 %v4449_v12 }
 0x4e5   :  { %13238 = vmatprep.mubr.f32.mxu0 %v4450_v45 }
 0x4e8   :  { %13239 = vmatmul.mubr.f32.gmra.mrb[18].mxu0 %v4451_v17 }
 0x4e9   :  { %13241 = vmatprep.mubr.f32.mxu0 %v4452_v54 }
 0x4ec   :  { %13242 = vmatmul.mubr.f32.gmra.mrb[20].mxu0 %v4453_v58 }
 0x4ed   :  { %13244 = vmatprep.mubr.f32.mxu0 %v4454_v20 }
 0x4f0   :  { %13245 = vmatmul.mubr.f32.gmra.mrb[22].mxu0 %v4455_v18 }
 0x4f1   :  { %13247 = vmatprep.mubr.f32.mxu0 %v4456_v56 }
 0x4f4   :  { %13248 = vmatmul.mubr.f32.gmra.mrb[24].mxu0 %v4457_v47 }
 0x4f5   :  { %13250 = vmatprep.mubr.f32.mxu0 %v4458_v43 }
 0x4f8   :  { %13251 = vmatmul.mubr.f32.gmra.mrb[26].mxu0 %v4459_v16 }
 0x4f9   :  { %13253 = vmatprep.mubr.f32.mxu0 %v20994_v0 }
 0x4fc   :  { %13254 = vmatmul.mubr.f32.gmra.mrb[28].mxu0 %v20995_v24 }
 0x4fd   :  { %13256 = vmatprep.mubr.f32.mxu0 %v4462_v2 }
 0x500   :  { %13257 = vmatmul.mubr.f32.gmra.mrb[30].mxu0 %v4463_v60 }
 0x501   :  { %13259 = vmatprep.mubr.f32.mxu0 %v4464_v21 }
 0x504   :  { %13260 = vmatmul.mubr.f32.gmra.mrb[32].mxu0 %v4465_v28 }
 0x505   :  { %13262 = vmatprep.mubr.f32.mxu0 %v4466_v29 }
 0x508   :  { %13263 = vmatmul.mubr.f32.gmra.mrb[34].mxu0 %v4467_v50 }
 0x509   :  { %13265 = vmatprep.mubr.f32.mxu0 %v4468_v36 }
 0x50c   :  { %13266 = vmatmul.mubr.f32.gmra.mrb[36].mxu0 %v4469_v37 }
 0x50d   :  { %13268 = vmatprep.mubr.f32.mxu0 %v4470_v7 }
 0x510   :  { %13269 = vmatmul.mubr.f32.gmra.mrb[38].mxu0 %v4471_v42 }
 0x511   :  { %13271 = vmatprep.mubr.f32.mxu0 %v4472_v44 }
 0x514   :  { %13272 = vmatmul.mubr.f32.gmra.mrb[40].mxu0 %v4473_v59 }
 0x515   :  { %13274 = vmatprep.mubr.f32.mxu0 %v4474_v53 }
 0x518   :  { %13275 = vmatmul.mubr.f32.gmra.mrb[42].mxu0 %v4475_v57 }
 0x519   :  { %13277 = vmatprep.mubr.f32.mxu0 %v4476_v5 }
 0x51c   :  { %13278 = vmatmul.mubr.f32.gmra.mrb[44].mxu0 %v4477_v41 }
 0x51d   :  { %13280 = vmatprep.mubr.f32.mxu0 %v4478_v48 }
 0x520   :  { %13281 = vmatmul.mubr.f32.gmra.mrb[46].mxu0 %v4479_v63 }
 0x521   :  { %13283 = vmatprep.mubr.f32.mxu0 %v4480_v61 }
 0x524   :  { %13284 = vmatmul.mubr.f32.gmra.mrb[48].mxu0 %v4481_v62 }
 0x525   :  { %13286 = vmatprep.mubr.f32.mxu0 %v4482_v3 }
 0x528   :  { %13287 = vmatmul.mubr.f32.gmra.mrb[50].mxu0 %v4483_v4 }
 0x529   :  { %13289 = vmatprep.mubr.f32.mxu0 %v4484_v6 }
 0x52c   :  { %13290 = vmatmul.mubr.f32.gmra.mrb[52].mxu0 %v4485_v11 }
 0x52d   :  { %13292 = vmatprep.mubr.f32.mxu0 %v4486_v49 }
 0x530   :  { %13293 = vmatmul.mubr.f32.gmra.mrb[54].mxu0 %v4487_v9 }
 0x531   :  { %13295 = vmatprep.mubr.f32.mxu0 %v4488_v10 }
 0x534   :  { %13296 = vmatmul.mubr.f32.gmra.mrb[56].mxu0 %v4489_v13 }
 0x535   :  { %13298 = vmatprep.mubr.f32.mxu0 %v4490_v34 }
 0x538   :  { %13299 = vmatmul.mubr.f32.gmra.mrb[58].mxu0 %v4491_v33 }
 0x539   :  { %13301 = vmatprep.mubr.f32.mxu0 %v20996_v14 }
 0x53c   :  { %13302 = vmatmul.mubr.f32.gmra.mrb[60].mxu0 %v20997_v22 }
 0x53d   :  { %13304 = vmatprep.mubr.f32.mxu0 %v4494_v15 }
 0x540   :  { %13305 = vmatmul.mubr.f32.gmra.mrb[62].mxu0 %v4495_v19 }
 0x597   :  { %v17524_v30 = vpop.f32.mrb[0].mxu0 }
 0x598   :  { %v5033_v23 = vmul.f32 %v17524_v30, %v17524_v30  ;;  %v17528_v25 = vpop.f32.mrb[1].mxu0 }
 0x599   :  { %v4962_v8 = vadd.f32 %v17524_v30, %v17528_v25  ;;  %v5032_v52 = vmul.f32 %v17528_v25, %v17528_v25 }
 0x59b   :  { %v5096_v26 = vadd.f32 %v5033_v23, %v5032_v52  ;;  %v17534_v27 = vpop.f32.mrb[2].mxu0 }
 0x59c   :  { %v17536_v31 = vpop.f32.mrb[3].mxu0  ;;  %v5035_v38 = vmul.f32 %v17534_v27, %v17534_v27 }
 0x59d   :  { %v4963_v32 = vadd.f32 %v4962_v8, %v17536_v31  ;;  %v5034_v35 = vmul.f32 %v17536_v31, %v17536_v31 }
 0x59f   :  { %v4964_v39 = vadd.f32 %v17534_v27, %v4963_v32  ;;  %v5097_v40 = vadd.f32 %v5096_v26, %v5034_v35  ;;  %v17544_v46 = vpop.f32.mrb[4].mxu0 }
 0x5a0   :  { %v17546_v55 = vpop.f32.mrb[5].mxu0  ;;  %v5037_v45 = vmul.f32 %v17544_v46, %v17544_v46 }
 0x5a1   :  { %v5098_v1 = vadd.f32 %v5097_v40, %v5035_v38  ;;  %v4965_v51 = vadd.f32 %v4964_v39, %v17546_v55  ;;  %v5036_v12 = vmul.f32 %v17546_v55, %v17546_v55 }
 0x5a3   :  { %v5099_v17 = vadd.f32 %v5098_v1, %v5036_v12  ;;  %v17553_v54 = vpop.f32.mrb[6].mxu0  ;;  %v4966_v58 = vadd.f32 %v17544_v46, %v4965_v51 }
 0x5a4   :  { %v17556_v20 = vpop.f32.mrb[7].mxu0  ;;  %v5039_v43 = vmul.f32 %v17553_v54, %v17553_v54 }
 0x5a5   :  { %v4967_v18 = vadd.f32 %v4966_v58, %v17556_v20  ;;  %v5038_v56 = vmul.f32 %v17556_v20, %v17556_v20  ;;  %v5100_v47 = vadd.f32 %v5099_v17, %v5037_v45 }
 0x5a7   :  { %v5101_v16 = vadd.f32 %v5100_v47, %v5038_v56  ;;  %v17563_v0 = vpop.f32.mrb[8].mxu0  ;;  %v4968_v2 = vadd.f32 %v17553_v54, %v4967_v18 }
 0x5a8   :  { %v17566_v24 = vpop.f32.mrb[9].mxu0  ;;  %v5041_v29 = vmul.f32 %v17563_v0, %v17563_v0 }
 0x5a9   :  { %v4969_v60 = vadd.f32 %v4968_v2, %v17566_v24  ;;  %v5040_v21 = vmul.f32 %v17566_v24, %v17566_v24  ;;  %v5102_v28 = vadd.f32 %v5101_v16, %v5039_v43 }
 0x5ab   :  { %v5103_v50 = vadd.f32 %v5102_v28, %v5040_v21  ;;  %v17573_v36 = vpop.f32.mrb[10].mxu0  ;;  %v4970_v37 = vadd.f32 %v17563_v0, %v4969_v60 }
 0x5ac   :  { %v17576_v7 = vpop.f32.mrb[11].mxu0  ;;  %v5043_v53 = vmul.f32 %v17573_v36, %v17573_v36 }
 0x5ad   :  { %v4971_v42 = vadd.f32 %v4970_v37, %v17576_v7  ;;  %v5042_v44 = vmul.f32 %v17576_v7, %v17576_v7  ;;  %v5104_v59 = vadd.f32 %v5103_v50, %v5041_v29 }
 0x5af   :  { %v5105_v57 = vadd.f32 %v5104_v59, %v5042_v44  ;;  %v17583_v5 = vpop.f32.mrb[12].mxu0  ;;  %v4972_v41 = vadd.f32 %v17573_v36, %v4971_v42 }
 0x5b0   :  { %v17586_v48 = vpop.f32.mrb[13].mxu0  ;;  %v5045_v3 = vmul.f32 %v17583_v5, %v17583_v5 }
 0x5b1   :  { %v4973_v63 = vadd.f32 %v4972_v41, %v17586_v48  ;;  %v5044_v61 = vmul.f32 %v17586_v48, %v17586_v48  ;;  %v5106_v62 = vadd.f32 %v5105_v57, %v5043_v53 }
 0x5b3   :  { %v5107_v4 = vadd.f32 %v5106_v62, %v5044_v61  ;;  %v17593_v6 = vpop.f32.mrb[14].mxu0  ;;  %v4974_v11 = vadd.f32 %v17583_v5, %v4973_v63  ;;  %v5589_v61 = vld [vmem:[#allocation8 + $0x80] sm:$0xff]  ;;  %v5590_v62 = vld [vmem:[#allocation8 + $0x88] sm:$0xff] }
 0x5b4   :  { %v17596_v49 = vpop.f32.mrb[15].mxu0  ;;  %v5047_v34 = vmul.f32 %v17593_v6, %v17593_v6 }
 0x5b5   :  { %v4975_v9 = vadd.f32 %v4974_v11, %v17596_v49  ;;  %v5046_v10 = vmul.f32 %v17596_v49, %v17596_v49  ;;  %v5108_v13 = vadd.f32 %v5107_v4, %v5045_v3 }
 0x5b7   :  { %v5109_v33 = vadd.f32 %v5108_v13, %v5046_v10  ;;  %v17603_v14 = vpop.f32.mrb[16].mxu0  ;;  %v4976_v15 = vadd.f32 %v17593_v6, %v4975_v9  ;;  %v14747_v10 = vpack.c.bf16 %v5590_v62, %v5589_v61 }
 0x5b8   :  { %v17606_v22 = vpop.f32.mrb[17].mxu0  ;;  %v5049_v52 = vmul.f32 %v17603_v14, %v17603_v14 }
 0x5b9   :  { %v4977_v19 = vadd.f32 %v4976_v15, %v17606_v22  ;;  %v5048_v23 = vmul.f32 %v17606_v22, %v17606_v22  ;;  %v5110_v8 = vadd.f32 %v5109_v33, %v5047_v34  ;;  %14748 = vmatprep.subr.bf16.mxu1 %v14747_v10 }
 0x5ba   :  { %14750 = vmatpush3.bf16.msra.mxu1 %v14747_v10 }
 0x5bb   :  { %v5111_v26 = vadd.f32 %v5110_v8, %v5048_v23  ;;  %v17613_v32 = vpop.f32.mrb[18].mxu0  ;;  %v4978_v35 = vadd.f32 %v17603_v14, %v4977_v19  ;;  %v5591_v19 = vld [vmem:[#allocation8 + $0x90] sm:$0xff]  ;;  %v5592_v23 = vld [vmem:[#allocation8 + $0x98] sm:$0xff] }
 0x5bc   :  { %v17616_v38 = vpop.f32.mrb[19].mxu0  ;;  %v5051_v51 = vmul.f32 %v17613_v32, %v17613_v32 }
 0x5bd   :  { %v4979_v39 = vadd.f32 %v4978_v35, %v17616_v38  ;;  %v5050_v40 = vmul.f32 %v17616_v38, %v17616_v38  ;;  %v5112_v1 = vadd.f32 %v5111_v26, %v5049_v52 }
 0x5bf   :  { %v5113_v12 = vadd.f32 %v5112_v1, %v5050_v40  ;;  %v17623_v45 = vpop.f32.mrb[20].mxu0  ;;  %v4980_v17 = vadd.f32 %v17613_v32, %v4979_v39  ;;  %v14751_v39 = vpack.c.bf16 %v5592_v23, %v5591_v19 }
 0x5c0   :  { %v17626_v58 = vpop.f32.mrb[21].mxu0  ;;  %v5053_v43 = vmul.f32 %v17623_v45, %v17623_v45 }
 0x5c1   :  { %v4981_v18 = vadd.f32 %v4980_v17, %v17626_v58  ;;  %v5052_v56 = vmul.f32 %v17626_v58, %v17626_v58  ;;  %v5114_v47 = vadd.f32 %v5113_v12, %v5051_v51  ;;  %14752 = vmatprep.subr.bf16.mxu1 %v14751_v39  ;;  %v5593_v17 = vld [vmem:[#allocation8 + $0xa0] sm:$0xff] }
 0x5c2   :  { %14754 = vmatpush3.bf16.msra.mxu1 %v14751_v39 }
 0x5c3   :  { %v5115_v16 = vadd.f32 %v5114_v47, %v5052_v56  ;;  %v17633_v2 = vpop.f32.mrb[22].mxu0  ;;  %v4982_v60 = vadd.f32 %v17623_v45, %v4981_v18  ;;  %v5594_v18 = vld [vmem:[#allocation8 + $0xa8] sm:$0xff] }
 0x5c4   :  { %v17636_v21 = vpop.f32.mrb[23].mxu0  ;;  %v5055_v37 = vmul.f32 %v17633_v2, %v17633_v2 }
 0x5c5   :  { %v4983_v28 = vadd.f32 %v4982_v60, %v17636_v21  ;;  %v5054_v29 = vmul.f32 %v17636_v21, %v17636_v21  ;;  %v5116_v50 = vadd.f32 %v5115_v16, %v5053_v43  ;;  %v14755_v60 = vpack.c.bf16 %v5594_v18, %v5593_v17  ;;  %v5600_v17 = vld [vmem:[#allocation8 + $0xd8] sm:$0xff] }
 0x5c7   :  { %v5117_v42 = vadd.f32 %v5116_v50, %v5054_v29  ;;  %v17643_v44 = vpop.f32.mrb[24].mxu0  ;;  %v4984_v59 = vadd.f32 %v17633_v2, %v4983_v28  ;;  %14756 = vmatprep.subr.bf16.mxu1 %v14755_v60 }
 0x5c8   :  { %v17646_v53 = vpop.f32.mrb[25].mxu0  ;;  %v5057_v3 = vmul.f32 %v17643_v44, %v17643_v44  ;;  %14758 = vmatpush3.bf16.msra.mxu1 %v14755_v60 }
 0x5c9   :  { %v4985_v57 = vadd.f32 %v4984_v59, %v17646_v53  ;;  %v5056_v41 = vmul.f32 %v17646_v53, %v17646_v53  ;;  %v5118_v63 = vadd.f32 %v5117_v42, %v5055_v37  ;;  %v5595_v42 = vld [vmem:[#allocation8 + $0xb0] sm:$0xff]  ;;  %v5596_v59 = vld [vmem:[#allocation8 + $0xb8] sm:$0xff] }
 0x5ca   :  { %v14759_v62 = vpack.c.bf16 %v5596_v59, %v5595_v42  ;;  %v5601_v59 = vld [vmem:[#allocation8 + $0xe0] sm:$0xff] }
 0x5cb   :  { %v5119_v4 = vadd.f32 %v5118_v63, %v5056_v41  ;;  %v17653_v11 = vpop.f32.mrb[26].mxu0  ;;  %v4986_v9 = vadd.f32 %v17643_v44, %v4985_v57 }
 0x5cc   :  { %v17656_v13 = vpop.f32.mrb[27].mxu0  ;;  %v5059_v8 = vmul.f32 %v17653_v11, %v17653_v11  ;;  %14760 = vmatprep.subr.bf16.mxu1 %v14759_v62 }
 0x5cd   :  { %v4987_v34 = vadd.f32 %v4986_v9, %v17656_v13  ;;  %v5058_v33 = vmul.f32 %v17656_v13, %v17656_v13  ;;  %v5120_v15 = vadd.f32 %v5119_v4, %v5057_v3  ;;  %14762 = vmatpush3.bf16.msra.mxu1 %v14759_v62 }
 0x5cf   :  { %v5121_v52 = vadd.f32 %v5120_v15, %v5058_v33  ;;  %v17663_v26 = vpop.f32.mrb[28].mxu0  ;;  %v4988_v35 = vadd.f32 %v17653_v11, %v4987_v34  ;;  %v5597_v34 = vld [vmem:[#allocation8 + $0xc0] sm:$0xff]  ;;  %v5598_v33 = vld [vmem:[#allocation8 + $0xc8] sm:$0xff] }
 0x5d0   :  { %v17666_v40 = vpop.f32.mrb[29].mxu0  ;;  %v5061_v56 = vmul.f32 %v17663_v26, %v17663_v26 }
 0x5d1   :  { %v4989_v1 = vadd.f32 %v4988_v35, %v17666_v40  ;;  %v5060_v51 = vmul.f32 %v17666_v40, %v17666_v40  ;;  %v5122_v12 = vadd.f32 %v5121_v52, %v5059_v8  ;;  %v14763_v52 = vpack.c.bf16 %v5598_v33, %v5597_v34 }
 0x5d3   :  { %v5123_v47 = vadd.f32 %v5122_v12, %v5060_v51  ;;  %v17673_v43 = vpop.f32.mrb[30].mxu0  ;;  %v4990_v16 = vadd.f32 %v17663_v26, %v4989_v1  ;;  %14764 = vmatprep.subr.bf16.mxu1 %v14763_v52  ;;  %v5599_v12 = vld [vmem:[#allocation8 + $0xd0] sm:$0xff] }
 0x5d4   :  { %v17676_v28 = vpop.f32.mrb[31].mxu0  ;;  %v5063_v57 = vmul.f32 %v17673_v43, %v17673_v43  ;;  %14766 = vmatpush3.bf16.msra.mxu1 %v14763_v52  ;;  %v14767_v60 = vpack.c.bf16 %v5600_v17, %v5599_v12 }
 0x5d5   :  { %v4991_v29 = vadd.f32 %v4990_v16, %v17676_v28  ;;  %v5062_v50 = vmul.f32 %v17676_v28, %v17676_v28  ;;  %v5124_v37 = vadd.f32 %v5123_v47, %v5061_v56 }
 0x5d6   :  { %14768 = vmatprep.subr.bf16.mxu1 %v14767_v60 }
 0x5d7   :  { %v5125_v41 = vadd.f32 %v5124_v37, %v5062_v50  ;;  %v17683_v63 = vpop.f32.mrb[32].mxu0  ;;  %v4992_v61 = vadd.f32 %v17673_v43, %v4991_v29 }
 0x5d8   :  { %v17686_v3 = vpop.f32.mrb[33].mxu0  ;;  %v5065_v15 = vmul.f32 %v17683_v63, %v17683_v63  ;;  %14770 = vmatpush3.bf16.msra.mxu1 %v14767_v60 }
 0x5d9   :  { %v4993_v4 = vadd.f32 %v4992_v61, %v17686_v3  ;;  %v5064_v9 = vmul.f32 %v17686_v3, %v17686_v3  ;;  %v5126_v10 = vadd.f32 %v5125_v41, %v5063_v57  ;;  %v5602_v57 = vld [vmem:[#allocation8 + $0xe8] sm:$0xff] }
 0x5db   :  { %v5127_v19 = vadd.f32 %v5126_v10, %v5064_v9  ;;  %v17693_v23 = vpop.f32.mrb[34].mxu0  ;;  %v4994_v8 = vadd.f32 %v17683_v63, %v4993_v4  ;;  %v14771_v9 = vpack.c.bf16 %v5602_v57, %v5601_v59  ;;  %v5524_v59 = vld [vmem:[#allocation2 + $0x1] sm:$0xff] }
 0x5dc   :  { %v17696_v35 = vpop.f32.mrb[35].mxu0  ;;  %v5067_v18 = vmul.f32 %v17693_v23, %v17693_v23  ;;  %13339 = vmatprep.mubr.f32.mxu1 %v5524_v59 }
 0x5dd   :  { %v4995_v39 = vadd.f32 %v4994_v8, %v17696_v35  ;;  %v5066_v1 = vmul.f32 %v17696_v35, %v17696_v35  ;;  %v5128_v51 = vadd.f32 %v5127_v19, %v5065_v15  ;;  %14772 = vmatprep.subr.bf16.mxu1 %v14771_v9  ;;  %v5603_v19 = vld [vmem:[#allocation8 + $0xf0] sm:$0xff]  ;;  %v5604_v8 = vld [vmem:[#allocation8 + $0xf8] sm:$0xff] }
 0x5de   :  { %14774 = vmatpush3.bf16.msra.mxu1 %v14771_v9  ;;  %v14775_v12 = vpack.c.bf16 %v5604_v8, %v5603_v19 }
 0x5df   :  { %v5129_v56 = vadd.f32 %v5128_v51, %v5066_v1  ;;  %v17703_v47 = vpop.f32.mrb[36].mxu0  ;;  %v4996_v16 = vadd.f32 %v17693_v23, %v4995_v39 }
 0x5e0   :  { %v17706_v29 = vpop.f32.mrb[37].mxu0  ;;  %v5069_v41 = vmul.f32 %v17703_v47, %v17703_v47  ;;  %14776 = vmatprep.subr.bf16.mxu1 %v14775_v12 }
 0x5e1   :  { %v4997_v50 = vadd.f32 %v4996_v16, %v17706_v29  ;;  %v5068_v37 = vmul.f32 %v17706_v29, %v17706_v29  ;;  %v5130_v42 = vadd.f32 %v5129_v56, %v5067_v18 }
 0x5e2   :  { %14778 = vmatpush3.bf16.msra.mxu1 %v14775_v12 }
 0x5e3   :  { %v5131_v61 = vadd.f32 %v5130_v42, %v5068_v37  ;;  %v17713_v62 = vpop.f32.mrb[38].mxu0  ;;  %v4998_v4 = vadd.f32 %v17703_v47, %v4997_v50 }
 0x5e4   :  { %v17716_v10 = vpop.f32.mrb[39].mxu0  ;;  %v5071_v52 = vmul.f32 %v17713_v62, %v17713_v62 }
 0x5e5   :  { %v4999_v34 = vadd.f32 %v4998_v4, %v17716_v10  ;;  %v5070_v33 = vmul.f32 %v17716_v10, %v17716_v10  ;;  %v5132_v15 = vadd.f32 %v5131_v61, %v5069_v41  ;;  %v5525_v41 = vld [vmem:[#allocation2 + $0x9] sm:$0xff] }
 0x5e6   :  { %13340 = vmatmul.mubr.f32.vlgmr.msra.gmra.mrb[0].mxu1 %v5525_v41 }
 0x5e7   :  { %v5133_v39 = vadd.f32 %v5132_v15, %v5070_v33  ;;  %v17723_v1 = vpop.f32.mrb[40].mxu0  ;;  %v5000_v51 = vadd.f32 %v17713_v62, %v4999_v34 }
 0x5e8   :  { %20998 = vst [vmem:[#allocation35_spill] sm:$0xff] %v17723_v1  ;;  %v17726_v17 = vpop.f32.mrb[41].mxu0  ;;  %v5073_v60 = vmul.f32 %v17723_v1, %v17723_v1 }
 0x5e9   :  { %20999 = vst [vmem:[#allocation36_spill] sm:$0xff] %v17726_v17  ;;  %v5001_v18 = vadd.f32 %v5000_v51, %v17726_v17  ;;  %v5072_v56 = vmul.f32 %v17726_v17, %v17726_v17  ;;  %v5134_v16 = vadd.f32 %v5133_v39, %v5071_v52  ;;  %v5508_v52 = vld [vmem:[#allocation8] sm:$0xff]  ;;  %v5509_v39 = vld [vmem:[#allocation8 + $0x8] sm:$0xff]  ;;  %v5510_v51 = vld [vmem:[#allocation8 + $0x10] sm:$0xff] }
 0x5eb   :  { %v5135_v50 = vadd.f32 %v5134_v16, %v5072_v56  ;;  %v17733_v37 = vpop.f32.mrb[42].mxu0  ;;  %v5002_v42 = vadd.f32 %v17723_v1, %v5001_v18  ;;  %v14779_v16 = vpack.c.bf16 %v5509_v39, %v5508_v52 }
 0x5ec   :  { %21000 = vst [vmem:[#allocation37_spill] sm:$0xff] %v17733_v37  ;;  %v17736_v57 = vpop.f32.mrb[43].mxu0  ;;  %v5075_v34 = vmul.f32 %v17733_v37, %v17733_v37 }
 0x5ed   :  { %21001 = vst [vmem:[#allocation38_spill] sm:$0xff] %v17736_v57  ;;  %v5003_v61 = vadd.f32 %v5002_v42, %v17736_v57  ;;  %v5074_v4 = vmul.f32 %v17736_v57, %v17736_v57  ;;  %v5136_v9 = vadd.f32 %v5135_v50, %v5073_v60  ;;  %v5511_v60 = vld [vmem:[#allocation8 + $0x18] sm:$0xff]  ;;  %14780 = vmatprep.subr.bf16.mxu1 %v14779_v16 }
 0x5ee   :  { %v14783_v50 = vpack.c.bf16 %v5511_v60, %v5510_v51  ;;  %14782 = vmatpush3.bf16.msra.mxu1 %v14779_v16 }
 0x5ef   :  { %v5137_v33 = vadd.f32 %v5136_v9, %v5074_v4  ;;  %v17743_v15 = vpop.f32.mrb[44].mxu0  ;;  %v5004_v19 = vadd.f32 %v17733_v37, %v5003_v61  ;;  %v5517_v37 = vld [vmem:[#allocation8 + $0x48] sm:$0xff] }
 0x5f0   :  { %21002 = vst [vmem:[#allocation39_spill] sm:$0xff] %v17743_v15  ;;  %v17746_v8 = vpop.f32.mrb[45].mxu0  ;;  %v5077_v42 = vmul.f32 %v17743_v15, %v17743_v15  ;;  %14784 = vmatprep.subr.bf16.mxu1 %v14783_v50 }
 0x5f1   :  { %21003 = vst [vmem:[#allocation40_spill] sm:$0xff] %v17746_v8  ;;  %v5005_v12 = vadd.f32 %v5004_v19, %v17746_v8  ;;  %v5076_v18 = vmul.f32 %v17746_v8, %v17746_v8  ;;  %v5138_v56 = vadd.f32 %v5137_v33, %v5075_v34 }
 0x5f2   :  { %14786 = vmatpush3.bf16.msra.mxu1 %v14783_v50 }
 0x5f3   :  { %v5139_v59 = vadd.f32 %v5138_v56, %v5076_v18  ;;  %v17753_v41 = vpop.f32.mrb[46].mxu0  ;;  %v5006_v61 = vadd.f32 %v17743_v15, %v5005_v12 }
 0x5f4   :  { %21004 = vst [vmem:[#allocation41_spill] sm:$0xff] %v17753_v41  ;;  %v17756_v4 = vpop.f32.mrb[47].mxu0  ;;  %v5079_v19 = vmul.f32 %v17753_v41, %v17753_v41 }
 0x5f5   :  { %21005 = vst [vmem:[#allocation42_spill] sm:$0xff] %v17756_v4  ;;  %v5007_v9 = vadd.f32 %v5006_v61, %v17756_v4  ;;  %v5078_v34 = vmul.f32 %v17756_v4, %v17756_v4  ;;  %v5140_v33 = vadd.f32 %v5139_v59, %v5077_v42 }
 0x5f7   :  { %v5141_v52 = vadd.f32 %v5140_v33, %v5078_v34  ;;  %v17763_v39 = vpop.f32.mrb[48].mxu0  ;;  %v5008_v51 = vadd.f32 %v17753_v41, %v5007_v9  ;;  %v5513_v41 = vld [vmem:[#allocation8 + $0x28] sm:$0xff] }
 0x5f8   :  { %21006 = vst [vmem:[#allocation43_spill] sm:$0xff] %v17763_v39  ;;  %v17766_v12 = vpop.f32.mrb[49].mxu0  ;;  %v5081_v60 = vmul.f32 %v17763_v39, %v17763_v39 }
 0x5f9   :  { %21007 = vst [vmem:[#allocation44_spill] sm:$0xff] %v17766_v12  ;;  %v5009_v18 = vadd.f32 %v5008_v51, %v17766_v12  ;;  %v5080_v56 = vmul.f32 %v17766_v12, %v17766_v12  ;;  %v5142_v16 = vadd.f32 %v5141_v52, %v5079_v19  ;;  %v5512_v51 = vld [vmem:[#allocation8 + $0x20] sm:$0xff] }
 0x5fa   :  { %v14787_v12 = vpack.c.bf16 %v5513_v41, %v5512_v51 }
 0x5fb   :  { %v5143_v42 = vadd.f32 %v5142_v16, %v5080_v56  ;;  %v17773_v59 = vpop.f32.mrb[50].mxu0  ;;  %v5010_v61 = vadd.f32 %v17763_v39, %v5009_v18  ;;  %v5515_v39 = vld [vmem:[#allocation8 + $0x38] sm:$0xff] }
 0x5fc   :  { %21008 = vst [vmem:[#allocation45_spill] sm:$0xff] %v17773_v59  ;;  %v17776_v34 = vpop.f32.mrb[51].mxu0  ;;  %v5083_v19 = vmul.f32 %v17773_v59, %v17773_v59  ;;  %14788 = vmatprep.subr.bf16.mxu1 %v14787_v12 }
 0x5fd   :  { %21009 = vst [vmem:[#allocation46_spill] sm:$0xff] %v17776_v34  ;;  %v5011_v9 = vadd.f32 %v5010_v61, %v17776_v34  ;;  %v5082_v50 = vmul.f32 %v17776_v34, %v17776_v34  ;;  %v5144_v33 = vadd.f32 %v5143_v42, %v5081_v60  ;;  %14790 = vmatpush3.bf16.msra.mxu1 %v14787_v12 }
 0x5ff   :  { %v5145_v52 = vadd.f32 %v5144_v33, %v5082_v50  ;;  %v17783_v56 = vpop.f32.mrb[52].mxu0  ;;  %v5012_v16 = vadd.f32 %v17773_v59, %v5011_v9 }
 0x600   :  { %21010 = vst [vmem:[#allocation47_spill] sm:$0xff] %v17783_v56  ;;  %v17786_v18 = vpop.f32.mrb[53].mxu0  ;;  %v5085_v41 = vmul.f32 %v17783_v56, %v17783_v56 }
 0x601   :  { %21011 = vst [vmem:[#allocation48_spill] sm:$0xff] %v17786_v18  ;;  %v5013_v61 = vadd.f32 %v5012_v16, %v17786_v18  ;;  %v5084_v34 = vmul.f32 %v17786_v18, %v17786_v18  ;;  %v5146_v60 = vadd.f32 %v5145_v52, %v5083_v19  ;;  %v5514_v18 = vld [vmem:[#allocation8 + $0x30] sm:$0xff] }
 0x603   :  { %v5147_v42 = vadd.f32 %v5146_v60, %v5084_v34  ;;  %v17793_v51 = vpop.f32.mrb[54].mxu0  ;;  %v5014_v50 = vadd.f32 %v17783_v56, %v5013_v61 }
 0x604   :  { %21012 = vst [vmem:[#allocation49_spill] sm:$0xff] %v17793_v51  ;;  %v17796_v33 = vpop.f32.mrb[55].mxu0  ;;  %v5087_v19 = vmul.f32 %v17793_v51, %v17793_v51 }
 0x605   :  { %21013 = vst [vmem:[#allocation50_spill] sm:$0xff] %v17796_v33  ;;  %v5015_v9 = vadd.f32 %v5014_v50, %v17796_v33  ;;  %v5086_v16 = vmul.f32 %v17796_v33, %v17796_v33  ;;  %v5148_v59 = vadd.f32 %v5147_v42, %v5085_v41 }
 0x607   :  { %v5149_v12 = vadd.f32 %v5148_v59, %v5086_v16  ;;  %v17803_v52 = vpop.f32.mrb[56].mxu0  ;;  %v5016_v34 = vadd.f32 %v17793_v51, %v5015_v9 }
 0x608   :  { %21014 = vst [vmem:[#allocation51_spill] sm:$0xff] %v17803_v52  ;;  %v17806_v60 = vpop.f32.mrb[57].mxu0  ;;  %v5089_v33 = vmul.f32 %v17803_v52, %v17803_v52 }
 0x609   :  { %21015 = vst [vmem:[#allocation52_spill] sm:$0xff] %v17806_v60  ;;  %v5017_v61 = vadd.f32 %v5016_v34, %v17806_v60  ;;  %v5088_v56 = vmul.f32 %v17806_v60, %v17806_v60  ;;  %v5150_v50 = vadd.f32 %v5149_v12, %v5087_v19  ;;  %v14791_v60 = vpack.c.bf16 %v5515_v39, %v5514_v18 }
 0x60b   :  { %v5151_v41 = vadd.f32 %v5150_v50, %v5088_v56  ;;  %v17813_v42 = vpop.f32.mrb[58].mxu0  ;;  %v5018_v59 = vadd.f32 %v17803_v52, %v5017_v61  ;;  %14792 = vmatprep.subr.bf16.mxu1 %v14791_v60 }
 0x60c   :  { %21016 = vst [vmem:[#allocation53_spill] sm:$0xff] %v17813_v42  ;;  %v17816_v16 = vpop.f32.mrb[59].mxu0  ;;  %v5091_v19 = vmul.f32 %v17813_v42, %v17813_v42  ;;  %14794 = vmatpush3.bf16.msra.mxu1 %v14791_v60 }
 0x60d   :  { %21017 = vst [vmem:[#allocation54_spill] sm:$0xff] %v17816_v16  ;;  %v5019_v9 = vadd.f32 %v5018_v59, %v17816_v16  ;;  %v5090_v51 = vmul.f32 %v17816_v16, %v17816_v16  ;;  %v5152_v34 = vadd.f32 %v5151_v41, %v5089_v33 }
 0x60f   :  { %v5153_v12 = vadd.f32 %v5152_v34, %v5090_v51  ;;  %v17823_v56 = vpop.f32.mrb[60].mxu0  ;;  %v5020_v50 = vadd.f32 %v17813_v42, %v5019_v9 }
 0x610   :  { %21018 = vst [vmem:[#allocation55_spill] sm:$0xff] %v17823_v56  ;;  %v17826_v61 = vpop.f32.mrb[61].mxu0  ;;  %v5093_v39 = vmul.f32 %v17823_v56, %v17823_v56 }
 0x611   :  { %21019 = vst [vmem:[#allocation56_spill] sm:$0xff] %v17826_v61  ;;  %v5021_v59 = vadd.f32 %v5020_v50, %v17826_v61  ;;  %v5092_v16 = vmul.f32 %v17826_v61, %v17826_v61  ;;  %v5154_v33 = vadd.f32 %v5153_v12, %v5091_v19 }
 0x613   :  { %v5155_v18 = vadd.f32 %v5154_v33, %v5092_v16  ;;  %v17833_v41 = vpop.f32.mrb[62].mxu0  ;;  %v5022_v51 = vadd.f32 %v17823_v56, %v5021_v59  ;;  %v5516_v33 = vld [vmem:[#allocation8 + $0x40] sm:$0xff] }
 0x614   :  { %v4889_v34 = vpop.f32.mrb[63].mxu0  ;;  %v5095_v50 = vmul.f32 %v17833_v41, %v17833_v41  ;;  %v14795_v57 = vpack.c.bf16 %v5517_v37, %v5516_v33  ;;  %v5177_v37 = vlaneseq  ;;  %v5173_v33 = vld [vmem:[#allocation11] sm:$0x1] }
 0x615   :  { %v5023_v9 = vadd.f32 %v5022_v51, %v4889_v34  ;;  %v5094_v42 = vmul.f32 %v4889_v34, %v4889_v34  ;;  %v5156_v52 = vadd.f32 %v5155_v18, %v5093_v39 }
 0x616   :  { %14796 = vmatprep.subr.bf16.mxu1 %v14795_v57 }
 0x617   :  { %v5024_v4 = vadd.f32 %v17833_v41, %v5023_v9  ;;  %v5157_v61 = vadd.f32 %v5156_v52, %v5094_v42  ;;  %14798 = vmatpush3.bf16.msra.mxu1 %v14795_v57 }
 0x619   :  { %v5025_v19 = vrot.slane %v5024_v4, 4  ;;  %v5158_v60 = vadd.f32 %v5157_v61, %v5095_v50 }
 0x61b   :  { %v5026_v12 = vadd.f32 %v5025_v19, %v5024_v4  ;;  %v5159_v15 = vrot.slane %v5158_v60, 4  ;;  %v5518_v19 = vld [vmem:[#allocation8 + $0x50] sm:$0xff] }
 0x61d   :  { %v5027_v8 = vrot.slane %v5026_v12, 2  ;;  %v5160_v16 = vadd.f32 %v5159_v15, %v5158_v60  ;;  %v5519_v15 = vld [vmem:[#allocation8 + $0x58] sm:$0xff] }
 0x61e   :  { %v14799_v60 = vpack.c.bf16 %v5519_v15, %v5518_v19  ;;  %v21022_v19 = vld [vmem:[#allocation35_spill] sm:$0xff]  ;;  %v21023_v15 = vld [vmem:[#allocation38_spill] sm:$0xff] }
 0x61f   :  { %v5028_v59 = vadd.f32 %v5027_v8, %v5026_v12  ;;  %v5161_v56 = vrot.slane %v5160_v16, 2  ;;  %v5178_v8 = vshrl.u32 %v5177_v37, 7  ;;  %v5169_v12 = vld [vmem:[#allocation9] sm:$0x1] }
 0x620   :  { %14800 = vmatprep.subr.bf16.mxu1 %v14799_v60  ;;  %v21025_v37 = vld [vmem:[#allocation40_spill] sm:$0xff] }
 0x621   :  { %v5029_v51 = vrot.slane %v5028_v59, 1  ;;  %v5162_v39 = vadd.f32 %v5161_v56, %v5160_v16  ;;  %14802 = vmatpush3.bf16.msra.mxu1 %v14799_v60  ;;  %v17839_v56 = vsub.s32 0, %v5178_v8  ;;  %v21024_v60 = vld [vmem:[#allocation37_spill] sm:$0xff]  ;;  %v21026_v8 = vld [vmem:[#allocation39_spill] sm:$0xff] }
 0x623   :  { %v5030_v18 = vadd.f32 %v5029_v51, %v5028_v59  ;;  %v5163_v1 = vrot.slane %v5162_v39, 1  ;;  %21020 = vst [vmem:[#allocation57_spill] sm:$0xff] %v17839_v56 }
 0x625   :  { %v5031_v17 = vmul.f32 0.001953125, %v5030_v18  ;;  %v5164_v9 = vadd.f32 %v5163_v1, %v5162_v39 }
 0x627   :  { %v5165_v52 = vmul.f32 0.001953125, %v5164_v9  ;;  %v5166_v42 = vmul.f32 %v5031_v17, %v5031_v17 }
 0x629   :  { %v5167_v61 = vsub.f32 %v5165_v52, %v5166_v42 }
 0x62b   :  { %v5168_v4 = vmax.f32 %v5167_v61, 0.0 }
 0x62d   :  { %v5170_v50 = vadd.f32 1e-05, %v5168_v4 }
 0x62f   :  { %16070 = vrsqrt.f32 %v5170_v50  ;;  %v21021_v50 = vld [vmem:[#allocation36_spill] sm:$0xff] }
 0x639   :  { %v16071_v57 = vpop.eup %16070 }
 0x63a   :  { %v5172_v16 = vmul.f32 %v16071_v57, %v5169_v12  ;;  %v21027_v57 = vld [vmem:[#allocation42_spill] sm:$0xff] }
 0x63c   :  { %v5174_v1 = vmul.f32 %v5172_v16, %v5031_v17  ;;  %v17842_v59 = vrot.slane %v5172_v16, %v17839_v56 }
 0x63e   :  { %v5175_v51 = vsub.f32 %v5173_v33, %v5174_v1  ;;  %v5244_v39 = vmul.f32 %v17842_v59, %v4889_v34  ;;  %v17847_v18 = vmul.f32 %v17842_v59, %v17528_v25  ;;  %v17851_v9 = vmul.f32 %v17524_v30, %v17842_v59  ;;  %v21028_v33 = vld [vmem:[#allocation41_spill] sm:$0xff] }
 0x63f   :  { %v17855_v52 = vmul.f32 %v17842_v59, %v17536_v31  ;;  %v17859_v17 = vmul.f32 %v17534_v27, %v17842_v59  ;;  %v17863_v42 = vmul.f32 %v17842_v59, %v17546_v55  ;;  %v17867_v25 = vmul.f32 %v17544_v46, %v17842_v59 }
 0x640   :  { %v17870_v34 = vrot.slane %v5175_v51, %v17839_v56  ;;  %v17874_v30 = vmul.f32 %v17842_v59, %v17556_v20  ;;  %v17878_v31 = vmul.f32 %v17553_v54, %v17842_v59  ;;  %v17882_v27 = vmul.f32 %v17842_v59, %v17566_v24  ;;  %v21029_v51 = vld [vmem:[#allocation44_spill] sm:$0xff]  ;;  %v21041_v56 = vld [vmem:[#allocation49_spill] sm:$0xff] }
 0x641   :  { %v17886_v55 = vmul.f32 %v17563_v0, %v17842_v59  ;;  %v17890_v46 = vmul.f32 %v17842_v59, %v17576_v7  ;;  %v17894_v20 = vmul.f32 %v17573_v36, %v17842_v59  ;;  %v17898_v54 = vmul.f32 %v17842_v59, %v17586_v48 }
 0x642   :  { %v5314_v61 = vadd.f32 %v17870_v34, %v5244_v39  ;;  %v17903_v24 = vmul.f32 %v17583_v5, %v17842_v59  ;;  %v17907_v0 = vmul.f32 %v17842_v59, %v17596_v49  ;;  %v17911_v7 = vmul.f32 %v17593_v6, %v17842_v59 }
 0x643   :  { %v17915_v36 = vmul.f32 %v17842_v59, %v17606_v22  ;;  %v17919_v48 = vmul.f32 %v17603_v14, %v17842_v59  ;;  %v17923_v5 = vmul.f32 %v17842_v59, %v17616_v38  ;;  %v17927_v49 = vmul.f32 %v17613_v32, %v17842_v59 }
 0x644   :  { %v5378_v4 = vmax.f32 %v5314_v61, 0.0  ;;  %v17931_v6 = vmul.f32 %v17842_v59, %v17626_v58  ;;  %v17935_v22 = vmul.f32 %v17623_v45, %v17842_v59  ;;  %v17939_v14 = vmul.f32 %v17842_v59, %v17636_v21  ;;  %v21030_v61 = vld [vmem:[#allocation43_spill] sm:$0xff] }
 0x645   :  { %v17943_v38 = vmul.f32 %v17633_v2, %v17842_v59  ;;  %v17947_v32 = vmul.f32 %v17842_v59, %v17646_v53  ;;  %v17951_v58 = vmul.f32 %v17643_v44, %v17842_v59  ;;  %v17955_v45 = vmul.f32 %v17842_v59, %v17656_v13 }
 0x646   :  { %v17959_v21 = vmul.f32 %v17653_v11, %v17842_v59  ;;  %v17963_v2 = vmul.f32 %v17842_v59, %v17666_v40  ;;  %v17967_v53 = vmul.f32 %v17663_v26, %v17842_v59  ;;  %v17971_v44 = vmul.f32 %v17842_v59, %v17676_v28  ;;  %5442 = vst [vmem:[#allocation2 + $0x331] sm:$0xff] %v5378_v4 }
 0x647   :  { %v17975_v13 = vmul.f32 %v17673_v43, %v17842_v59  ;;  %v17979_v11 = vmul.f32 %v17842_v59, %v17686_v3  ;;  %v17983_v40 = vmul.f32 %v17683_v63, %v17842_v59  ;;  %v17987_v26 = vmul.f32 %v17842_v59, %v17696_v35 }
 0x648   :  { %v17991_v28 = vmul.f32 %v17693_v23, %v17842_v59  ;;  %v17995_v43 = vmul.f32 %v17842_v59, %v17706_v29  ;;  %v17999_v3 = vmul.f32 %v17703_v47, %v17842_v59  ;;  %v18003_v63 = vmul.f32 %v17842_v59, %v17716_v10 }
 0x649   :  { %v18007_v35 = vmul.f32 %v17713_v62, %v17842_v59  ;;  %v18011_v23 = vmul.f32 %v17842_v59, %v21021_v50  ;;  %v18015_v29 = vmul.f32 %v21022_v19, %v17842_v59  ;;  %v18019_v47 = vmul.f32 %v17842_v59, %v21023_v15  ;;  %v21031_v50 = vld [vmem:[#allocation46_spill] sm:$0xff]  ;;  %v21033_v15 = vld [vmem:[#allocation45_spill] sm:$0xff] }
 0x64a   :  { %v18023_v10 = vmul.f32 %v21024_v60, %v17842_v59  ;;  %v18027_v62 = vmul.f32 %v17842_v59, %v21025_v37  ;;  %v18031_v12 = vmul.f32 %v21026_v8, %v17842_v59  ;;  %v18035_v16 = vmul.f32 %v17842_v59, %v21027_v57  ;;  %v21035_v37 = vld [vmem:[#allocation48_spill] sm:$0xff]  ;;  %v21037_v57 = vld [vmem:[#allocation47_spill] sm:$0xff] }
 0x64b   :  { %v18039_v1 = vmul.f32 %v21028_v33, %v17842_v59  ;;  %v18043_v39 = vmul.f32 %v17842_v59, %v21029_v51  ;;  %v18047_v4 = vmul.f32 %v21030_v61, %v17842_v59  ;;  %v18051_v19 = vmul.f32 %v17842_v59, %v21031_v50  ;;  %v21039_v51 = vld [vmem:[#allocation50_spill] sm:$0xff] }
 0x64c   :  { %v18055_v60 = vmul.f32 %v21033_v15, %v17842_v59  ;;  %v18059_v8 = vmul.f32 %v17842_v59, %v21035_v37  ;;  %v18063_v33 = vmul.f32 %v21037_v57, %v17842_v59  ;;  %v18067_v61 = vmul.f32 %v17842_v59, %v21039_v51 }
 0x64d   :  { %21032 = vst [vmem:[#allocation58_spill] sm:$0xff] %v18051_v19  ;;  %v18071_v50 = vmul.f32 %v21041_v56, %v17842_v59  ;;  %v21043_v19 = vld [vmem:[#allocation52_spill] sm:$0xff] }
 0x64e   :  { %21034 = vst [vmem:[#allocation59_spill] sm:$0xff] %v18055_v60  ;;  %21036 = vst [vmem:[#allocation60_spill] sm:$0xff] %v18059_v8  ;;  %v18075_v15 = vmul.f32 %v17842_v59, %v21043_v19  ;;  %v21044_v60 = vld [vmem:[#allocation51_spill] sm:$0xff]  ;;  %v21045_v8 = vld [vmem:[#allocation54_spill] sm:$0xff] }
 0x64f   :  { %21038 = vst [vmem:[#allocation61_spill] sm:$0xff] %v18063_v33  ;;  %21040 = vst [vmem:[#allocation62_spill] sm:$0xff] %v18067_v61  ;;  %v18079_v37 = vmul.f32 %v21044_v60, %v17842_v59  ;;  %v18083_v57 = vmul.f32 %v17842_v59, %v21045_v8  ;;  %v21046_v33 = vld [vmem:[#allocation53_spill] sm:$0xff]  ;;  %v21047_v61 = vld [vmem:[#allocation56_spill] sm:$0xff]  ;;  %v18099_v60 = vmul.f32 %v17833_v41, %v17842_v59 }
 0x650   :  { %21042 = vst [vmem:[#allocation63_spill] sm:$0xff] %v18071_v50  ;;  %v18087_v51 = vmul.f32 %v21046_v33, %v17842_v59  ;;  %v18091_v56 = vmul.f32 %v17842_v59, %v21047_v61  ;;  %v21048_v50 = vld [vmem:[#allocation55_spill] sm:$0xff]  ;;  %v18103_v8 = vadd.f32 %v17870_v34, %v17847_v18  ;;  %v18107_v33 = vadd.f32 %v17870_v34, %v17851_v9 }
 0x651   :  { %v18095_v19 = vmul.f32 %v21048_v50, %v17842_v59  ;;  %v18111_v61 = vadd.f32 %v17870_v34, %v17855_v52  ;;  %v18115_v50 = vadd.f32 %v17870_v34, %v17859_v17  ;;  %v18119_v41 = vadd.f32 %v17870_v34, %v17863_v42 }
 0x652   :  { %v18123_v59 = vadd.f32 %v17870_v34, %v17867_v25  ;;  %v18127_v18 = vadd.f32 %v17870_v34, %v17874_v30  ;;  %v18131_v9 = vadd.f32 %v17870_v34, %v17878_v31  ;;  %v18135_v52 = vadd.f32 %v17870_v34, %v17882_v27 }
 0x653   :  { %v18139_v17 = vadd.f32 %v17870_v34, %v17886_v55  ;;  %v18143_v42 = vadd.f32 %v17870_v34, %v17890_v46  ;;  %v18147_v25 = vadd.f32 %v17870_v34, %v17894_v20  ;;  %v18151_v30 = vadd.f32 %v17870_v34, %v17898_v54 }
 0x654   :  { %v18155_v31 = vadd.f32 %v17870_v34, %v17903_v24  ;;  %v18159_v27 = vadd.f32 %v17870_v34, %v17907_v0  ;;  %v18163_v55 = vadd.f32 %v17870_v34, %v17911_v7  ;;  %v18167_v46 = vadd.f32 %v17870_v34, %v17915_v36 }
 0x655   :  { %v18171_v20 = vadd.f32 %v17870_v34, %v17919_v48  ;;  %v18175_v54 = vadd.f32 %v17870_v34, %v17923_v5  ;;  %v18179_v24 = vadd.f32 %v17870_v34, %v17927_v49  ;;  %v18183_v0 = vadd.f32 %v17870_v34, %v17931_v6 }
 0x656   :  { %v18187_v7 = vadd.f32 %v17870_v34, %v17935_v22  ;;  %v18191_v36 = vadd.f32 %v17870_v34, %v17939_v14  ;;  %v18195_v48 = vadd.f32 %v17870_v34, %v17943_v38  ;;  %v18199_v5 = vadd.f32 %v17870_v34, %v17947_v32 }
 0x657   :  { %v18203_v49 = vadd.f32 %v17870_v34, %v17951_v58  ;;  %v18207_v6 = vadd.f32 %v17870_v34, %v17955_v45  ;;  %v18211_v22 = vadd.f32 %v17870_v34, %v17959_v21  ;;  %v18215_v14 = vadd.f32 %v17870_v34, %v17963_v2 }
 0x658   :  { %v18219_v38 = vadd.f32 %v17870_v34, %v17967_v53  ;;  %v18223_v32 = vadd.f32 %v17870_v34, %v17971_v44  ;;  %v18227_v58 = vadd.f32 %v17870_v34, %v17975_v13  ;;  %v18231_v45 = vadd.f32 %v17870_v34, %v17979_v11 }
 0x659   :  { %v18235_v21 = vadd.f32 %v17870_v34, %v17983_v40  ;;  %v18239_v2 = vadd.f32 %v17870_v34, %v17987_v26  ;;  %v18243_v53 = vadd.f32 %v17870_v34, %v17991_v28  ;;  %v18247_v44 = vadd.f32 %v17870_v34, %v17995_v43 }
 0x65a   :  { %v18251_v13 = vadd.f32 %v17870_v34, %v17999_v3  ;;  %v18255_v11 = vadd.f32 %v17870_v34, %v18003_v63  ;;  %v18259_v40 = vadd.f32 %v17870_v34, %v18007_v35  ;;  %v18263_v26 = vadd.f32 %v17870_v34, %v18011_v23 }
 0x65b   :  { %v18267_v28 = vadd.f32 %v17870_v34, %v18015_v29  ;;  %v18271_v43 = vadd.f32 %v17870_v34, %v18019_v47  ;;  %v18275_v3 = vadd.f32 %v17870_v34, %v18023_v10  ;;  %v18279_v63 = vadd.f32 %v17870_v34, %v18027_v62  ;;  %v21054_v62 = vld [vmem:[#allocation58_spill] sm:$0xff] }
 0x65c   :  { %v18283_v35 = vadd.f32 %v17870_v34, %v18031_v12  ;;  %v18287_v23 = vadd.f32 %v17870_v34, %v18035_v16  ;;  %v18291_v29 = vadd.f32 %v17870_v34, %v18039_v1  ;;  %v18295_v47 = vadd.f32 %v17870_v34, %v18043_v39 }
 0x65d   :  { %v18299_v10 = vadd.f32 %v17870_v34, %v18047_v4  ;;  %v18303_v12 = vadd.f32 %v17870_v34, %v21054_v62 }
 0x65e   :  { %21049 = vst [vmem:[#allocation64_spill] sm:$0xff] %v18283_v35  ;;  %21050 = vst [vmem:[#allocation65_spill] sm:$0xff] %v18287_v23  ;;  %v21055_v35 = vld [vmem:[#allocation59_spill] sm:$0xff]  ;;  %v21056_v23 = vld [vmem:[#allocation60_spill] sm:$0xff] }
 0x65f   :  { %21051 = vst [vmem:[#allocation66_spill] sm:$0xff] %v18291_v29  ;;  %21052 = vst [vmem:[#allocation67_spill] sm:$0xff] %v18295_v47  ;;  %v18307_v16 = vadd.f32 %v17870_v34, %v21055_v35  ;;  %v18311_v1 = vadd.f32 %v17870_v34, %v21056_v23  ;;  %v21057_v29 = vld [vmem:[#allocation61_spill] sm:$0xff]  ;;  %v21058_v47 = vld [vmem:[#allocation62_spill] sm:$0xff]  ;;  %v18327_v35 = vadd.f32 %v17870_v34, %v18075_v15 }
 0x660   :  { %21053 = vst [vmem:[#allocation68_spill] sm:$0xff] %v18299_v10  ;;  %v18315_v39 = vadd.f32 %v17870_v34, %v21057_v29  ;;  %v18319_v4 = vadd.f32 %v17870_v34, %v21058_v47  ;;  %v21059_v10 = vld [vmem:[#allocation63_spill] sm:$0xff]  ;;  %v18331_v23 = vadd.f32 %v17870_v34, %v18079_v37  ;;  %v18335_v29 = vadd.f32 %v17870_v34, %v18083_v57 }
 0x661   :  { %v18323_v62 = vadd.f32 %v17870_v34, %v21059_v10  ;;  %v18339_v47 = vadd.f32 %v17870_v34, %v18087_v51  ;;  %v18343_v10 = vadd.f32 %v17870_v34, %v18091_v56  ;;  %v18347_v15 = vadd.f32 %v17870_v34, %v18095_v19 }
 0x662   :  { %21060 = vst [vmem:[#allocation69_spill] sm:$0xff] %v18331_v23  ;;  %21061 = vst [vmem:[#allocation70_spill] sm:$0xff] %v18335_v29  ;;  %v18351_v37 = vadd.f32 %v17870_v34, %v18099_v60  ;;  %v5316_v23 = vmax.f32 %v18103_v8, 0.0  ;;  %v5317_v57 = vmax.f32 %v18107_v33, 0.0  ;;  %v5318_v29 = vmax.f32 %v18111_v61, 0.0 }
 0x663   :  { %21062 = vst [vmem:[#allocation71_spill] sm:$0xff] %v18339_v47  ;;  %21063 = vst [vmem:[#allocation72_spill] sm:$0xff] %v18343_v10  ;;  %v5319_v51 = vmax.f32 %v18115_v50, 0.0  ;;  %v5320_v47 = vmax.f32 %v18119_v41, 0.0  ;;  %v20668_v56 = vmax.f32 %v18123_v59, 0.0  ;;  %v20663_v10 = vmax.f32 %v18127_v18, 0.0 }
 0x664   :  { %21064 = vst [vmem:[#allocation73_spill] sm:$0xff] %v18347_v15  ;;  %v20662_v19 = vmax.f32 %v18131_v9, 0.0  ;;  %v20661_v15 = vmax.f32 %v18135_v52, 0.0  ;;  %5380 = vst [vmem:[#allocation2 + $0x19] sm:$0xff] %v5316_v23  ;;  %13342 = vmatprep.mubr.f32.mxu1 %v5316_v23  ;;  %v20664_v34 = vmax.f32 %v18139_v17, 0.0  ;;  %v20665_v60 = vmax.f32 %v18143_v42, 0.0 }
 0x665   :  { %v20666_v8 = vmax.f32 %v18147_v25, 0.0  ;;  %v20667_v33 = vmax.f32 %v18151_v30, 0.0  ;;  %5381 = vst [vmem:[#allocation2 + $0x21] sm:$0xff] %v5317_v57  ;;  %5382 = vst [vmem:[#allocation2 + $0x31] sm:$0xff] %v5318_v29  ;;  %13343 = vmatmul.mubr.f32.gmra.mrb[2].mxu1 %v5317_v57  ;;  %v20669_v61 = vmax.f32 %v18155_v31, 0.0  ;;  %v20681_v57 = vmax.f32 %v18171_v20, 0.0 }
 0x666   :  { %5383 = vst [vmem:[#allocation2 + $0x39] sm:$0xff] %v5319_v51  ;;  %5384 = vst [vmem:[#allocation2 + $0x49] sm:$0xff] %v5320_v47  ;;  %13345 = vmatprep.mubr.f32.mxu1 %v5318_v29  ;;  %v20672_v50 = vmax.f32 %v18175_v54, 0.0  ;;  %v20670_v41 = vmax.f32 %v18179_v24, 0.0  ;;  %v20671_v23 = vmax.f32 %v18183_v0, 0.0  ;;  %v20680_v29 = vmax.f32 %v18187_v7, 0.0 }
 0x667   :  { %5385 = vst [vmem:[#allocation2 + $0x51] sm:$0xff] %v20668_v56  ;;  %5386 = vst [vmem:[#allocation2 + $0x61] sm:$0xff] %v20663_v10  ;;  %v20676_v56 = vmax.f32 %v18207_v6, 0.0  ;;  %v20675_v10 = vmax.f32 %v18215_v14, 0.0 }
 0x668   :  { %5387 = vst [vmem:[#allocation2 + $0x69] sm:$0xff] %v20662_v19  ;;  %5388 = vst [vmem:[#allocation2 + $0x79] sm:$0xff] %v20661_v15  ;;  %v20673_v15 = vmax.f32 %v18191_v36, 0.0  ;;  %v20674_v19 = vmax.f32 %v18211_v22, 0.0 }
 0x669   :  { %5389 = vst [vmem:[#allocation2 + $0x81] sm:$0xff] %v20664_v34  ;;  %5390 = vst [vmem:[#allocation2 + $0x91] sm:$0xff] %v20665_v60  ;;  %v21065_v34 = vmax.f32 %v18159_v27, 0.0  ;;  %v21066_v60 = vmax.f32 %v18163_v55, 0.0  ;;  %13346 = vmatmul.mubr.f32.gmra.mrb[4].mxu1 %v5319_v51  ;;  %v20682_v51 = vmax.f32 %v18235_v21, 0.0 }
 0x66a   :  { %5391 = vst [vmem:[#allocation2 + $0x99] sm:$0xff] %v20666_v8  ;;  %5392 = vst [vmem:[#allocation2 + $0xa9] sm:$0xff] %v20667_v33  ;;  %v21067_v8 = vmax.f32 %v18167_v46, 0.0  ;;  %v20677_v33 = vmax.f32 %v18203_v49, 0.0  ;;  %13348 = vmatprep.mubr.f32.mxu1 %v5320_v47  ;;  %v20686_v47 = vmax.f32 %v18251_v13, 0.0 }
 0x66b   :  { %5393 = vst [vmem:[#allocation2 + $0xb1] sm:$0xff] %v20669_v61  ;;  %5394 = vst [vmem:[#allocation2 + $0xc1] sm:$0xff] %v21065_v34  ;;  %v20679_v34 = vmax.f32 %v18219_v38, 0.0  ;;  %v20678_v61 = vmax.f32 %v18231_v45, 0.0 }
 0x66c   :  { %5395 = vst [vmem:[#allocation2 + $0xc9] sm:$0xff] %v21066_v60  ;;  %5396 = vst [vmem:[#allocation2 + $0xd9] sm:$0xff] %v21067_v8  ;;  %v5346_v60 = vmax.f32 %v18223_v32, 0.0  ;;  %v5347_v8 = vmax.f32 %v18227_v58, 0.0  ;;  %v20685_v32 = vmax.f32 %v18239_v2, 0.0  ;;  %v20684_v58 = vmax.f32 %v18243_v53, 0.0 }
 0x66d   :  { %5397 = vst [vmem:[#allocation2 + $0xe1] sm:$0xff] %v20681_v57  ;;  %5398 = vst [vmem:[#allocation2 + $0xf1] sm:$0xff] %v20672_v50  ;;  %v20683_v50 = vmax.f32 %v18247_v44, 0.0  ;;  %v21073_v57 = vld [vmem:[#allocation66_spill] sm:$0xff] }
 0x66e   :  { %5399 = vst [vmem:[#allocation2 + $0xf9] sm:$0xff] %v20670_v41  ;;  %5400 = vst [vmem:[#allocation2 + $0x109] sm:$0xff] %v20671_v23  ;;  %v21068_v41 = vmax.f32 %v18195_v48, 0.0  ;;  %v21069_v23 = vmax.f32 %v18199_v5, 0.0 }
 0x66f   :  { %5401 = vst [vmem:[#allocation2 + $0x111] sm:$0xff] %v20680_v29  ;;  %5402 = vst [vmem:[#allocation2 + $0x121] sm:$0xff] %v20673_v15  ;;  %v20688_v15 = vmax.f32 %v18263_v26, 0.0 }
 0x670   :  { %5403 = vst [vmem:[#allocation2 + $0x129] sm:$0xff] %v21068_v41  ;;  %5404 = vst [vmem:[#allocation2 + $0x139] sm:$0xff] %v21069_v23  ;;  %v20689_v41 = vmax.f32 %v18255_v11, 0.0  ;;  %v20687_v23 = vmax.f32 %v18259_v40, 0.0 }
 0x671   :  { %5405 = vst [vmem:[#allocation2 + $0x141] sm:$0xff] %v20677_v33  ;;  %5406 = vst [vmem:[#allocation2 + $0x151] sm:$0xff] %v20676_v56  ;;  %v20695_v33 = vmax.f32 %v21073_v57, 0.0  ;;  %v21074_v56 = vld [vmem:[#allocation67_spill] sm:$0xff] }
 0x672   :  { %5407 = vst [vmem:[#allocation2 + $0x159] sm:$0xff] %v20674_v19  ;;  %5408 = vst [vmem:[#allocation2 + $0x169] sm:$0xff] %v20675_v10  ;;  %v20691_v19 = vmax.f32 %v18267_v28, 0.0  ;;  %v20690_v10 = vmax.f32 %v18271_v43, 0.0 }
 0x673   :  { %5409 = vst [vmem:[#allocation2 + $0x171] sm:$0xff] %v20679_v34  ;;  %5410 = vst [vmem:[#allocation2 + $0x181] sm:$0xff] %v5346_v60  ;;  %v21070_v60 = vmax.f32 %v18123_v59, 0.0  ;;  %v21072_v34 = vld [vmem:[#allocation65_spill] sm:$0xff]  ;;  %v21075_v59 = vmax.f32 %v18127_v18, 0.0  ;;  %v21078_v18 = vmax.f32 %v18279_v63, 0.0 }
 0x674   :  { %5411 = vst [vmem:[#allocation2 + $0x189] sm:$0xff] %v5347_v8  ;;  %5412 = vst [vmem:[#allocation2 + $0x1c9] sm:$0xff] %v20678_v61  ;;  %v21071_v8 = vld [vmem:[#allocation64_spill] sm:$0xff]  ;;  %v20694_v29 = vmax.f32 %v21072_v34, 0.0 }
 0x675   :  { %5413 = vst [vmem:[#allocation2 + $0x1d1] sm:$0xff] %v20682_v51  ;;  %5414 = vst [vmem:[#allocation2 + $0x1e1] sm:$0xff] %v20685_v32  ;;  %13349 = vmatmul.mubr.f32.gmra.mrb[6].mxu1 %v21070_v60  ;;  %v20693_v61 = vmax.f32 %v21071_v8, 0.0  ;;  %v20696_v51 = vmax.f32 %v21074_v56, 0.0  ;;  %v21076_v60 = vld [vmem:[#allocation68_spill] sm:$0xff]  ;;  %v21080_v32 = vld [vmem:[#allocation70_spill] sm:$0xff] }
 0x676   :  { %5415 = vst [vmem:[#allocation2 + $0x1e9] sm:$0xff] %v20684_v58  ;;  %5416 = vst [vmem:[#allocation2 + $0x1f9] sm:$0xff] %v20683_v50  ;;  %13351 = vmatprep.mubr.f32.mxu1 %v21075_v59  ;;  %v5520_v59 = vld [vmem:[#allocation8 + $0x60] sm:$0xff]  ;;  %v5379_v58 = vmax.f32 %v18351_v37, 0.0  ;;  %v21089_v8 = vmax.f32 %v18315_v39, 0.0  ;;  %v21095_v37 = vmax.f32 %v21080_v32, 0.0 }
 0x677   :  { %5417 = vst [vmem:[#allocation2 + $0x201] sm:$0xff] %v20686_v47  ;;  %5418 = vst [vmem:[#allocation2 + $0x211] sm:$0xff] %v20689_v41  ;;  %v21081_v41 = vld [vmem:[#allocation71_spill] sm:$0xff]  ;;  %v21082_v50 = vld [vmem:[#allocation72_spill] sm:$0xff] }
 0x678   :  { %5419 = vst [vmem:[#allocation2 + $0x219] sm:$0xff] %v20687_v23  ;;  %5420 = vst [vmem:[#allocation2 + $0x229] sm:$0xff] %v20688_v15  ;;  %v21077_v23 = vmax.f32 %v18275_v3, 0.0  ;;  %v5521_v15 = vld [vmem:[#allocation8 + $0x68] sm:$0xff] }
 0x679   :  { %5421 = vst [vmem:[#allocation2 + $0x231] sm:$0xff] %v20691_v19  ;;  %5422 = vst [vmem:[#allocation2 + $0x241] sm:$0xff] %v20690_v10  ;;  %v21079_v10 = vld [vmem:[#allocation69_spill] sm:$0xff]  ;;  %v21087_v19 = vmax.f32 %v18131_v9, 0.0  ;;  %v14803_v9 = vpack.c.bf16 %v5521_v15, %v5520_v59  ;;  %v21098_v59 = vmax.f32 %v18139_v17, 0.0  ;;  %v21103_v17 = vmax.f32 %v18159_v27, 0.0 }
 0x67a   :  { %5423 = vst [vmem:[#allocation2 + $0x249] sm:$0xff] %v21077_v23  ;;  %5424 = vst [vmem:[#allocation2 + $0x259] sm:$0xff] %v21078_v18  ;;  %v5522_v23 = vld [vmem:[#allocation8 + $0x70] sm:$0xff]  ;;  %v5523_v18 = vld [vmem:[#allocation8 + $0x78] sm:$0xff]  ;;  %v21110_v27 = vmax.f32 %v18187_v7, 0.0  ;;  %v21117_v7 = vmax.f32 %v18215_v14, 0.0 }
 0x67b   :  { %5425 = vst [vmem:[#allocation2 + $0x261] sm:$0xff] %v20693_v61  ;;  %5426 = vst [vmem:[#allocation2 + $0x271] sm:$0xff] %v20694_v29  ;;  %v21083_v61 = vmax.f32 %v21076_v60, 0.0  ;;  %v21084_v29 = vmax.f32 %v18303_v12, 0.0  ;;  %13352 = vmatmul.mubr.f32.gmra.mrb[8].mxu1 %v21087_v19  ;;  %v21088_v47 = vld [vmem:[#allocation73_spill] sm:$0xff]  ;;  %v21094_v19 = vmax.f32 %v21079_v10, 0.0  ;;  %14804 = vmatprep.subr.bf16.mxu1 %v14803_v9 }
 0x67c   :  { %5427 = vst [vmem:[#allocation2 + $0x279] sm:$0xff] %v20695_v33  ;;  %5428 = vst [vmem:[#allocation2 + $0x289] sm:$0xff] %v20696_v51  ;;  %v21085_v33 = vmax.f32 %v18307_v16, 0.0  ;;  %v21086_v51 = vmax.f32 %v18311_v1, 0.0  ;;  %v5377_v56 = vmax.f32 %v21088_v47, 0.0  ;;  %v6441_v15 = vld [vmem:[#allocation8 + $0x108] sm:$0xff]  ;;  %14806 = vmatpush3.bf16.msra.mxu1 %v14803_v9 }
 0x67d   :  { %5429 = vst [vmem:[#allocation2 + $0x291] sm:$0xff] %v21083_v61  ;;  %5430 = vst [vmem:[#allocation2 + $0x2a1] sm:$0xff] %v21084_v29  ;;  %v21090_v61 = vmax.f32 %v18319_v4, 0.0  ;;  %v21091_v29 = vmax.f32 %v18323_v62, 0.0  ;;  %v21108_v9 = vmax.f32 %v18179_v24, 0.0  ;;  %v21115_v24 = vmax.f32 %v18207_v6, 0.0 }
 0x67e   :  { %5431 = vst [vmem:[#allocation2 + $0x2a9] sm:$0xff] %v21085_v33  ;;  %5432 = vst [vmem:[#allocation2 + $0x2b9] sm:$0xff] %v21086_v51  ;;  %v21092_v33 = vmax.f32 %v18327_v35, 0.0  ;;  %v21093_v51 = vmax.f32 %v18135_v52, 0.0  ;;  %v6440_v52 = vld [vmem:[#allocation8 + $0x100] sm:$0xff]  ;;  %v21121_v6 = vmax.f32 %v18239_v2, 0.0 }
 0x67f   :  { %5433 = vst [vmem:[#allocation2 + $0x2c1] sm:$0xff] %v21089_v8  ;;  %5434 = vst [vmem:[#allocation2 + $0x2d1] sm:$0xff] %v21090_v61  ;;  %v21096_v8 = vmax.f32 %v21081_v41, 0.0  ;;  %v21097_v61 = vmax.f32 %v21082_v50, 0.0  ;;  %v21123_v14 = vmax.f32 %v18247_v44, 0.0  ;;  %v21128_v2 = vmax.f32 %v18267_v28, 0.0 }
 0x680   :  { %5435 = vst [vmem:[#allocation2 + $0x2d9] sm:$0xff] %v21091_v29  ;;  %5436 = vst [vmem:[#allocation2 + $0x2e9] sm:$0xff] %v21092_v33  ;;  %13354 = vmatprep.mubr.f32.mxu1 %v21093_v51  ;;  %v14807_v29 = vpack.c.bf16 %v5523_v18, %v5522_v23  ;;  %v21099_v33 = vmax.f32 %v18143_v42, 0.0  ;;  %v18538_v51 = vpack.c.bf16 %v6441_v15, %v6440_v52  ;;  %v21101_v23 = vmax.f32 %v18151_v30, 0.0  ;;  %v21136_v28 = vld [vmem:[#allocation67_spill] sm:$0xff] }
 0x681   :  { %5437 = vst [vmem:[#allocation2 + $0x2f1] sm:$0xff] %v21094_v19  ;;  %5438 = vst [vmem:[#allocation2 + $0x301] sm:$0xff] %v21095_v37  ;;  %13355 = vmatmul.mubr.f32.gmra.mrb[10].mxu1 %v21098_v59  ;;  %v21100_v19 = vmax.f32 %v18147_v25, 0.0  ;;  %v21104_v42 = vmax.f32 %v18163_v55, 0.0  ;;  %v21105_v18 = vmax.f32 %v18167_v46, 0.0  ;;  %v21106_v25 = vmax.f32 %v18171_v20, 0.0 }
 0x682   :  { %5439 = vst [vmem:[#allocation2 + $0x309] sm:$0xff] %v21096_v8  ;;  %5440 = vst [vmem:[#allocation2 + $0x319] sm:$0xff] %v21097_v61  ;;  %13357 = vmatprep.mubr.f32.mxu1 %v21099_v33  ;;  %14808 = vmatprep.subr.bf16.mxu1 %v14807_v29  ;;  %v21107_v30 = vmax.f32 %v18175_v54, 0.0  ;;  %v21111_v55 = vmax.f32 %v18191_v36, 0.0  ;;  %v21112_v46 = vmax.f32 %v18195_v48, 0.0  ;;  %v21113_v20 = vmax.f32 %v18199_v5, 0.0 }
 0x683   :  { %5441 = vst [vmem:[#allocation2 + $0x321] sm:$0xff] %v5377_v56  ;;  %5443 = vst [vmem:[#allocation2 + $0x339] sm:$0xff] %v5379_v58  ;;  %14810 = vmatpush3.bf16.msra.mxu1 %v14807_v29  ;;  %v21102_v58 = vmax.f32 %v18155_v31, 0.0  ;;  %v21109_v31 = vmax.f32 %v18183_v0, 0.0  ;;  %v21114_v54 = vmax.f32 %v18203_v49, 0.0  ;;  %v21116_v0 = vmax.f32 %v18211_v22, 0.0 }
 0x684   :  { %14812 = vmatprep.subr.bf16.mxu1 %v18538_v51  ;;  %v5556_v36 = vld [vmem:[#allocation2 + $0x1b1] sm:$0xff]  ;;  %v21118_v37 = vmax.f32 %v18219_v38, 0.0  ;;  %v5557_v48 = vld [vmem:[#allocation2 + $0x1b9] sm:$0xff]  ;;  %v21119_v5 = vmax.f32 %v18231_v45, 0.0  ;;  %v21120_v49 = vmax.f32 %v18235_v21, 0.0  ;;  %v21122_v22 = vmax.f32 %v18243_v53, 0.0 }
 0x685   :  { %13358 = vmatmul.mubr.f32.gmra.mrb[12].mxu1 %v21100_v19  ;;  %v21124_v38 = vmax.f32 %v18251_v13, 0.0  ;;  %v21125_v8 = vmax.f32 %v18255_v11, 0.0  ;;  %v21126_v45 = vmax.f32 %v18259_v40, 0.0  ;;  %v21127_v21 = vmax.f32 %v18263_v26, 0.0  ;;  %v21132_v11 = vld [vmem:[#allocation64_spill] sm:$0xff]  ;;  %v6443_v59 = vld [vmem:[#allocation8 + $0x118] sm:$0xff] }
 0x686   :  { %13360 = vmatprep.mubr.f32.mxu1 %v21101_v23  ;;  %v21129_v53 = vmax.f32 %v18271_v43, 0.0  ;;  %v21130_v44 = vmax.f32 %v18275_v3, 0.0  ;;  %v21131_v13 = vmax.f32 %v18279_v63, 0.0  ;;  %v21133_v61 = vmax.f32 %v21132_v11, 0.0  ;;  %v6445_v33 = vld [vmem:[#allocation8 + $0x128] sm:$0xff]  ;;  %v6447_v47 = vld [vmem:[#allocation8 + $0x138] sm:$0xff] }
 0x687   :  { %v21134_v40 = vmax.f32 %v21072_v34, 0.0  ;;  %v21135_v26 = vmax.f32 %v21073_v57, 0.0  ;;  %v21137_v29 = vmax.f32 %v21136_v28, 0.0  ;;  %v21138_v43 = vmax.f32 %v21076_v60, 0.0  ;;  %v18650_v19 = vld [vmem:[#allocation2 + $0x30] sm:$0xff]  ;;  %v18722_v28 = vld [vmem:[#allocation2 + $0x140] sm:$0xff] }
 0x688   :  { %v21139_v3 = vmax.f32 %v18303_v12, 0.0  ;;  %v21140_v63 = vmax.f32 %v18307_v16, 0.0  ;;  %v21141_v52 = vmax.f32 %v18311_v1, 0.0  ;;  %v21142_v34 = vmax.f32 %v18315_v39, 0.0  ;;  %v18710_v11 = vld [vmem:[#allocation2 + $0x110] sm:$0xff] }
 0x689   :  { %13361 = vmatmul.mubr.f32.gmra.mrb[14].mxu1 %v21102_v58  ;;  %v21143_v57 = vmax.f32 %v18319_v4, 0.0  ;;  %v21144_v15 = vmax.f32 %v18323_v62, 0.0  ;;  %v21145_v60 = vmax.f32 %v18327_v35, 0.0  ;;  %v21146_v12 = vmax.f32 %v21079_v10, 0.0  ;;  %v6442_v4 = vld [vmem:[#allocation8 + $0x110] sm:$0xff]  ;;  %v18639_v62 = vld [vmem:[#allocation2] sm:$0xff] }
 0x68a   :  { %13363 = vmatprep.mubr.f32.mxu1 %v21103_v17  ;;  %v21147_v16 = vmax.f32 %v21080_v32, 0.0  ;;  %v21148_v1 = vmax.f32 %v21081_v41, 0.0  ;;  %v21149_v39 = vmax.f32 %v21082_v50, 0.0  ;;  %v14815_v35 = vpack.c.bf16 %v6443_v59, %v6442_v4  ;;  %v6444_v10 = vld [vmem:[#allocation8 + $0x120] sm:$0xff]  ;;  %v18643_v32 = vld [vmem:[#allocation2 + $0x18] sm:$0xff]  ;;  %v18766_v4 = vld [vmem:[#allocation2 + $0x230] sm:$0xff] }
 0x68b   :  { %v14819_v50 = vpack.c.bf16 %v6445_v33, %v6444_v10  ;;  %v18647_v41 = vld [vmem:[#allocation2 + $0x20] sm:$0xff]  ;;  %v18653_v58 = vld [vmem:[#allocation2 + $0x38] sm:$0xff]  ;;  %v18781_v33 = vld [vmem:[#allocation2 + $0x270] sm:$0xff] }
 0x68c   :  { %v6448_v17 = vld [vmem:[#allocation8 + $0x140] sm:$0xff] }
 0x68d   :  { %13364 = vmatmul.mubr.f32.gmra.mrb[16].mxu1 %v21104_v42  ;;  %v6449_v42 = vld [vmem:[#allocation8 + $0x148] sm:$0xff]  ;;  %v18769_v59 = vld [vmem:[#allocation2 + $0x240] sm:$0xff] }
 0x68e   :  { %13366 = vmatprep.mubr.f32.mxu1 %v21105_v18  ;;  %v14827_v18 = vpack.c.bf16 %v6449_v42, %v6448_v17  ;;  %v18778_v10 = vld [vmem:[#allocation2 + $0x260] sm:$0xff]  ;;  %v18796_v17 = vld [vmem:[#allocation2 + $0x2a8] sm:$0xff]  ;;  %v18799_v42 = vld [vmem:[#allocation2 + $0x2b8] sm:$0xff] }
 0x68f   :  { %21150 = vst [vmem:[#allocation74_spill] sm:$0xff] %v18799_v42 }
 0x691   :  { %13367 = vmatmul.mubr.f32.gmra.mrb[18].mxu1 %v21106_v25  ;;  %v18659_v25 = vld [vmem:[#allocation2 + $0x50] sm:$0xff] }
 0x692   :  { %13369 = vmatprep.mubr.f32.mxu1 %v21107_v30  ;;  %v6450_v30 = vld [vmem:[#allocation8 + $0x150] sm:$0xff] }
 0x695   :  { %13370 = vmatmul.mubr.f32.gmra.mrb[20].mxu1 %v21108_v9  ;;  %v6451_v9 = vld [vmem:[#allocation8 + $0x158] sm:$0xff] }
 0x696   :  { %13372 = vmatprep.mubr.f32.mxu1 %v21109_v31  ;;  %v18662_v31 = vld [vmem:[#allocation2 + $0x60] sm:$0xff] }
 0x699   :  { %13373 = vmatmul.mubr.f32.gmra.mrb[22].mxu1 %v21110_v27  ;;  %v14831_v27 = vpack.c.bf16 %v6451_v9, %v6450_v30  ;;  %v18805_v30 = vld [vmem:[#allocation2 + $0x2d0] sm:$0xff]  ;;  %v18808_v9 = vld [vmem:[#allocation2 + $0x2d8] sm:$0xff] }
 0x69a   :  { %13375 = vmatprep.mubr.f32.mxu1 %v21111_v55  ;;  %v18665_v55 = vld [vmem:[#allocation2 + $0x68] sm:$0xff]  ;;  %21152 = vst [vmem:[#allocation76_spill] sm:$0xff] %v18805_v30  ;;  %21153 = vst [vmem:[#allocation77_spill] sm:$0xff] %v18808_v9 }
 0x69d   :  { %13376 = vmatmul.mubr.f32.gmra.mrb[24].mxu1 %v21112_v46  ;;  %v6452_v46 = vld [vmem:[#allocation8 + $0x160] sm:$0xff] }
 0x69e   :  { %13378 = vmatprep.mubr.f32.mxu1 %v21113_v20  ;;  %v6453_v20 = vld [vmem:[#allocation8 + $0x168] sm:$0xff] }
 0x6a1   :  { %13379 = vmatmul.mubr.f32.gmra.mrb[26].mxu1 %v21114_v54  ;;  %v18668_v54 = vld [vmem:[#allocation2 + $0x78] sm:$0xff] }
 0x6a2   :  { %13381 = vmatprep.mubr.f32.mxu1 %v21115_v24  ;;  %v14835_v24 = vpack.c.bf16 %v6453_v20, %v6452_v46  ;;  %v18814_v46 = vld [vmem:[#allocation2 + $0x2f0] sm:$0xff]  ;;  %v18817_v20 = vld [vmem:[#allocation2 + $0x300] sm:$0xff] }
 0x6a3   :  { %21155 = vst [vmem:[#allocation79_spill] sm:$0xff] %v18814_v46  ;;  %21156 = vst [vmem:[#allocation80_spill] sm:$0xff] %v18817_v20 }
 0x6a5   :  { %13382 = vmatmul.mubr.f32.gmra.mrb[28].mxu1 %v21116_v0  ;;  %v18671_v0 = vld [vmem:[#allocation2 + $0x80] sm:$0xff] }
 0x6a6   :  { %13384 = vmatprep.mubr.f32.mxu1 %v21117_v7  ;;  %v6454_v7 = vld [vmem:[#allocation8 + $0x170] sm:$0xff] }
 0x6a9   :  { %13385 = vmatmul.mubr.f32.gmra.mrb[30].mxu1 %v21118_v37  ;;  %v18674_v37 = vld [vmem:[#allocation2 + $0x90] sm:$0xff] }
 0x6aa   :  { %13387 = vmatprep.mubr.f32.mxu1 %v5556_v36  ;;  %v6455_v36 = vld [vmem:[#allocation8 + $0x178] sm:$0xff] }
 0x6ad   :  { %13388 = vmatmul.mubr.f32.gmra.mrb[32].mxu1 %v5557_v48  ;;  %v14839_v48 = vpack.c.bf16 %v6455_v36, %v6454_v7  ;;  %v18823_v7 = vld [vmem:[#allocation2 + $0x318] sm:$0xff]  ;;  %v6375_v36 = vld [vmem:[#allocation2 + $0x2] sm:$0xff] }
 0x6ae   :  { %13390 = vmatprep.mubr.f32.mxu1 %v21119_v5  ;;  %v18677_v5 = vld [vmem:[#allocation2 + $0x98] sm:$0xff]  ;;  %21158 = vst [vmem:[#allocation82_spill] sm:$0xff] %v18823_v7 }
 0x6b1   :  { %13391 = vmatmul.mubr.f32.gmra.mrb[34].mxu1 %v21120_v49  ;;  %v6970_v49 = vld [vmem:[#allocation8 + $0x180] sm:$0xff] }
 0x6b2   :  { %13393 = vmatprep.mubr.f32.mxu1 %v21121_v6  ;;  %v6971_v6 = vld [vmem:[#allocation8 + $0x188] sm:$0xff] }
 0x6b5   :  { %13394 = vmatmul.mubr.f32.gmra.mrb[36].mxu1 %v21122_v22  ;;  %v18680_v22 = vld [vmem:[#allocation2 + $0xa8] sm:$0xff] }
 0x6b6   :  { %13396 = vmatprep.mubr.f32.mxu1 %v21123_v14  ;;  %v18683_v14 = vpack.c.bf16 %v6971_v6, %v6970_v49  ;;  %v6972_v49 = vld [vmem:[#allocation8 + $0x190] sm:$0xff]  ;;  %v6973_v6 = vld [vmem:[#allocation8 + $0x198] sm:$0xff] }
 0x6b9   :  { %13397 = vmatmul.mubr.f32.gmra.mrb[38].mxu1 %v21124_v38  ;;  %v18685_v38 = vld [vmem:[#allocation2 + $0xb0] sm:$0xff] }
 0x6ba   :  { %13399 = vmatprep.mubr.f32.mxu1 %v21125_v8  ;;  %v18688_v8 = vld [vmem:[#allocation2 + $0xc0] sm:$0xff] }
 0x6bd   :  { %13400 = vmatmul.mubr.f32.gmra.mrb[40].mxu1 %v21126_v45  ;;  %v18692_v45 = vld [vmem:[#allocation2 + $0xc8] sm:$0xff] }
 0x6be   :  { %13402 = vmatprep.mubr.f32.mxu1 %v21127_v21  ;;  %v18695_v21 = vld [vmem:[#allocation2 + $0xd8] sm:$0xff] }
 0x6c1   :  { %13403 = vmatmul.mubr.f32.gmra.mrb[42].mxu1 %v21128_v2  ;;  %v18698_v2 = vld [vmem:[#allocation2 + $0xe0] sm:$0xff] }
 0x6c2   :  { %13405 = vmatprep.mubr.f32.mxu1 %v21129_v53  ;;  %v18701_v53 = vld [vmem:[#allocation2 + $0xf0] sm:$0xff] }
 0x6c5   :  { %13406 = vmatmul.mubr.f32.gmra.mrb[44].mxu1 %v21130_v44  ;;  %v18704_v44 = vld [vmem:[#allocation2 + $0xf8] sm:$0xff] }
 0x6c6   :  { %13408 = vmatprep.mubr.f32.mxu1 %v21131_v13  ;;  %v18707_v13 = vld [vmem:[#allocation2 + $0x108] sm:$0xff] }
 0x6c9   :  { %13409 = vmatmul.mubr.f32.gmra.mrb[46].mxu1 %v21133_v61  ;;  %v18713_v61 = vld [vmem:[#allocation2 + $0x120] sm:$0xff] }
 0x6ca   :  { %13411 = vmatprep.mubr.f32.mxu1 %v21134_v40  ;;  %v18716_v40 = vld [vmem:[#allocation2 + $0x128] sm:$0xff] }
 0x6cd   :  { %13412 = vmatmul.mubr.f32.gmra.mrb[48].mxu1 %v21135_v26  ;;  %v18719_v26 = vld [vmem:[#allocation2 + $0x138] sm:$0xff] }
 0x6ce   :  { %13414 = vmatprep.mubr.f32.mxu1 %v21137_v29  ;;  %v18725_v29 = vld [vmem:[#allocation2 + $0x150] sm:$0xff] }
 0x6d1   :  { %13415 = vmatmul.mubr.f32.gmra.mrb[50].mxu1 %v21138_v43  ;;  %v18728_v43 = vld [vmem:[#allocation2 + $0x158] sm:$0xff] }
 0x6d2   :  { %13417 = vmatprep.mubr.f32.mxu1 %v21139_v3  ;;  %v18731_v3 = vld [vmem:[#allocation2 + $0x168] sm:$0xff] }
 0x6d5   :  { %13418 = vmatmul.mubr.f32.gmra.mrb[52].mxu1 %v21140_v63  ;;  %v18734_v63 = vld [vmem:[#allocation2 + $0x170] sm:$0xff] }
 0x6d6   :  { %13420 = vmatprep.mubr.f32.mxu1 %v21141_v52  ;;  %v18739_v52 = vld [vmem:[#allocation2 + $0x1c8] sm:$0xff] }
 0x6d9   :  { %13421 = vmatmul.mubr.f32.gmra.mrb[54].mxu1 %v21142_v34  ;;  %v18742_v34 = vld [vmem:[#allocation2 + $0x1d0] sm:$0xff] }
 0x6da   :  { %13423 = vmatprep.mubr.f32.mxu1 %v21143_v57  ;;  %v18745_v57 = vld [vmem:[#allocation2 + $0x1e0] sm:$0xff] }
 0x6dd   :  { %13424 = vmatmul.mubr.f32.gmra.mrb[56].mxu1 %v21144_v15  ;;  %v18748_v15 = vld [vmem:[#allocation2 + $0x1e8] sm:$0xff] }
 0x6de   :  { %13426 = vmatprep.mubr.f32.mxu1 %v21145_v60  ;;  %v18751_v60 = vld [vmem:[#allocation2 + $0x1f8] sm:$0xff] }
 0x6e1   :  { %13427 = vmatmul.mubr.f32.gmra.mrb[58].mxu1 %v21146_v12  ;;  %v18754_v12 = vld [vmem:[#allocation2 + $0x200] sm:$0xff] }
 0x6e2   :  { %13429 = vmatprep.mubr.f32.mxu1 %v21147_v16  ;;  %v18757_v16 = vld [vmem:[#allocation2 + $0x210] sm:$0xff] }
 0x6e5   :  { %13430 = vmatmul.mubr.f32.gmra.mrb[60].mxu1 %v21148_v1  ;;  %v18760_v1 = vld [vmem:[#allocation2 + $0x218] sm:$0xff] }
 0x6e6   :  { %13432 = vmatprep.mubr.f32.mxu1 %v21149_v39  ;;  %v18763_v39 = vld [vmem:[#allocation2 + $0x228] sm:$0xff] }
 0x6e9   :  { %13433 = vmatmul.mubr.f32.gmra.mrb[62].mxu1 %v5377_v56  ;;  %v6446_v56 = vld [vmem:[#allocation8 + $0x130] sm:$0xff] }
 0x6ea   :  { %13467 = vmatprep.mubr.f32.mxu1 %v18639_v62  ;;  %v14823_v23 = vpack.c.bf16 %v6447_v47, %v6446_v56  ;;  %v18787_v56 = vld [vmem:[#allocation2 + $0x288] sm:$0xff]  ;;  %v18790_v47 = vld [vmem:[#allocation2 + $0x290] sm:$0xff] }
 0x6ed   :  { %13468 = vmatmul.mubr.f32.vlgmr.msra.gmra.mrb[0].mxu1 %v18639_v62 }
 0x6ee   :  { %13470 = vmatprep.mubr.f32.mxu1 %v18643_v32  ;;  %14814 = vmatpush3.bf16.msra.mxu1 %v18538_v51  ;;  %v18656_v51 = vld [vmem:[#allocation2 + $0x48] sm:$0xff] }
 0x6ef   :  { %14816 = vmatprep.subr.bf16.mxu1 %v14815_v35 }
 0x6f1   :  { %13471 = vmatmul.mubr.f32.gmra.mrb[2].mxu1 %v18647_v41 }
 0x6f2   :  { %13473 = vmatprep.mubr.f32.mxu1 %v18650_v19  ;;  %14818 = vmatpush3.bf16.msra.mxu1 %v14815_v35  ;;  %v18775_v35 = vld [vmem:[#allocation2 + $0x258] sm:$0xff] }
 0x6f3   :  { %14820 = vmatprep.subr.bf16.mxu1 %v14819_v50 }
 0x6f5   :  { %13474 = vmatmul.mubr.f32.gmra.mrb[4].mxu1 %v18653_v58 }
 0x6f6   :  { %13476 = vmatprep.mubr.f32.mxu1 %v18656_v51  ;;  %14822 = vmatpush3.bf16.msra.mxu1 %v14819_v50  ;;  %v18784_v50 = vld [vmem:[#allocation2 + $0x278] sm:$0xff] }
 0x6f7   :  { %14824 = vmatprep.subr.bf16.mxu1 %v14823_v23 }
 0x6f9   :  { %13477 = vmatmul.mubr.f32.gmra.mrb[6].mxu1 %v18659_v25 }
 0x6fa   :  { %13479 = vmatprep.mubr.f32.mxu1 %v18662_v31  ;;  %14826 = vmatpush3.bf16.msra.mxu1 %v14823_v23  ;;  %v18793_v23 = vld [vmem:[#allocation2 + $0x2a0] sm:$0xff] }
 0x6fb   :  { %14828 = vmatprep.subr.bf16.mxu1 %v14827_v18 }
 0x6fd   :  { %13480 = vmatmul.mubr.f32.gmra.mrb[8].mxu1 %v18665_v55 }
 0x6fe   :  { %13482 = vmatprep.mubr.f32.mxu1 %v18668_v54  ;;  %14830 = vmatpush3.bf16.msra.mxu1 %v14827_v18  ;;  %v18802_v18 = vld [vmem:[#allocation2 + $0x2c0] sm:$0xff] }
 0x6ff   :  { %14832 = vmatprep.subr.bf16.mxu1 %v14831_v27  ;;  %21151 = vst [vmem:[#allocation75_spill] sm:$0xff] %v18802_v18 }
 0x701   :  { %13483 = vmatmul.mubr.f32.gmra.mrb[10].mxu1 %v18671_v0 }
 0x702   :  { %13485 = vmatprep.mubr.f32.mxu1 %v18674_v37  ;;  %14834 = vmatpush3.bf16.msra.mxu1 %v14831_v27  ;;  %v18811_v27 = vld [vmem:[#allocation2 + $0x2e8] sm:$0xff] }
 0x703   :  { %14836 = vmatprep.subr.bf16.mxu1 %v14835_v24  ;;  %21154 = vst [vmem:[#allocation78_spill] sm:$0xff] %v18811_v27 }
 0x705   :  { %13486 = vmatmul.mubr.f32.gmra.mrb[12].mxu1 %v18677_v5 }
 0x706   :  { %13488 = vmatprep.mubr.f32.mxu1 %v18680_v22  ;;  %14838 = vmatpush3.bf16.msra.mxu1 %v14835_v24  ;;  %v18820_v24 = vld [vmem:[#allocation2 + $0x308] sm:$0xff] }
 0x707   :  { %14840 = vmatprep.subr.bf16.mxu1 %v14839_v48  ;;  %21157 = vst [vmem:[#allocation81_spill] sm:$0xff] %v18820_v24 }
 0x709   :  { %13489 = vmatmul.mubr.f32.gmra.mrb[14].mxu1 %v18685_v38 }
 0x70a   :  { %13491 = vmatprep.mubr.f32.mxu1 %v18688_v8  ;;  %14842 = vmatpush3.bf16.msra.mxu1 %v14839_v48  ;;  %v18826_v48 = vld [vmem:[#allocation2 + $0x320] sm:$0xff] }
 0x70b   :  { %14844 = vmatprep.subr.bf16.mxu1 %v18683_v14 }
 0x70d   :  { %13492 = vmatmul.mubr.f32.gmra.mrb[16].mxu1 %v18692_v45 }
 0x70e   :  { %13494 = vmatprep.mubr.f32.mxu1 %v18695_v21 }
 0x711   :  { %13495 = vmatmul.mubr.f32.gmra.mrb[18].mxu1 %v18698_v2 }
 0x712   :  { %13497 = vmatprep.mubr.f32.mxu1 %v18701_v53 }
 0x715   :  { %13498 = vmatmul.mubr.f32.gmra.mrb[20].mxu1 %v18704_v44 }
 0x716   :  { %13500 = vmatprep.mubr.f32.mxu1 %v18707_v13 }
 0x719   :  { %13501 = vmatmul.mubr.f32.gmra.mrb[22].mxu1 %v18710_v11 }
 0x71a   :  { %13503 = vmatprep.mubr.f32.mxu1 %v18713_v61 }
 0x71d   :  { %13504 = vmatmul.mubr.f32.gmra.mrb[24].mxu1 %v18716_v40 }
 0x71e   :  { %13506 = vmatprep.mubr.f32.mxu1 %v18719_v26 }
 0x721   :  { %13507 = vmatmul.mubr.f32.gmra.mrb[26].mxu1 %v18722_v28 }
 0x722   :  { %13509 = vmatprep.mubr.f32.mxu1 %v18725_v29 }
 0x725   :  { %13510 = vmatmul.mubr.f32.gmra.mrb[28].mxu1 %v18728_v43 }
 0x726   :  { %13512 = vmatprep.mubr.f32.mxu1 %v18731_v3 }
 0x729   :  { %13513 = vmatmul.mubr.f32.gmra.mrb[30].mxu1 %v18734_v63 }
 0x72a   :  { %13515 = vmatprep.mubr.f32.mxu1 %v18639_v62 }
 0x72d   :  { %13516 = vmatmul.mubr.f32.gmra.mrb[32].mxu1 %v18639_v62  ;;  %v18772_v62 = vld [vmem:[#allocation2 + $0x248] sm:$0xff] }
 0x72e   :  { %13518 = vmatprep.mubr.f32.mxu1 %v18739_v52 }
 0x731   :  { %13519 = vmatmul.mubr.f32.gmra.mrb[34].mxu1 %v18742_v34 }
 0x732   :  { %13521 = vmatprep.mubr.f32.mxu1 %v18745_v57 }
 0x735   :  { %13522 = vmatmul.mubr.f32.gmra.mrb[36].mxu1 %v18748_v15 }
 0x736   :  { %13524 = vmatprep.mubr.f32.mxu1 %v18751_v60 }
 0x739   :  { %13525 = vmatmul.mubr.f32.gmra.mrb[38].mxu1 %v18754_v12 }
 0x73a   :  { %13527 = vmatprep.mubr.f32.mxu1 %v18757_v16 }
 0x73d   :  { %13528 = vmatmul.mubr.f32.gmra.mrb[40].mxu1 %v18760_v1 }
 0x73e   :  { %13530 = vmatprep.mubr.f32.mxu1 %v18763_v39 }
 0x741   :  { %13531 = vmatmul.mubr.f32.gmra.mrb[42].mxu1 %v18766_v4 }
 0x742   :  { %13533 = vmatprep.mubr.f32.mxu1 %v18769_v59 }
 0x745   :  { %13534 = vmatmul.mubr.f32.gmra.mrb[44].mxu1 %v18772_v62 }
 0x746   :  { %13536 = vmatprep.mubr.f32.mxu1 %v18775_v35 }
 0x749   :  { %13537 = vmatmul.mubr.f32.gmra.mrb[46].mxu1 %v18778_v10 }
 0x74a   :  { %13539 = vmatprep.mubr.f32.mxu1 %v18781_v33 }
 0x74d   :  { %13540 = vmatmul.mubr.f32.gmra.mrb[48].mxu1 %v18784_v50 }
 0x74e   :  { %13542 = vmatprep.mubr.f32.mxu1 %v18787_v56 }
 0x751   :  { %13543 = vmatmul.mubr.f32.gmra.mrb[50].mxu1 %v18790_v47 }
 0x752   :  { %13545 = vmatprep.mubr.f32.mxu1 %v18793_v23 }
 0x755   :  { %13546 = vmatmul.mubr.f32.gmra.mrb[52].mxu1 %v18796_v17 }
 0x756   :  { %13548 = vmatprep.mubr.f32.mxu1 %v18799_v42  ;;  %v6977_v42 = vld [vmem:[#allocation8 + $0x1b8] sm:$0xff] }
 0x759   :  { %13549 = vmatmul.mubr.f32.gmra.mrb[54].mxu1 %v18802_v18  ;;  %v6976_v18 = vld [vmem:[#allocation8 + $0x1b0] sm:$0xff] }
 0x75a   :  { %13551 = vmatprep.mubr.f32.mxu1 %v18805_v30  ;;  %v18829_v30 = vld [vmem:[#allocation2 + $0x1a] sm:$0xff] }
 0x75b   :  { %21159 = vst [vmem:[#allocation83_spill] sm:$0xff] %v18829_v30 }
 0x75d   :  { %13552 = vmatmul.mubr.f32.gmra.mrb[56].mxu1 %v18808_v9  ;;  %v6974_v9 = vld [vmem:[#allocation8 + $0x1a0] sm:$0xff] }
 0x75e   :  { %13554 = vmatprep.mubr.f32.mxu1 %v18811_v27  ;;  %v14847_v27 = vpack.c.bf16 %v6973_v6, %v6972_v49  ;;  %v18839_v49 = vld [vmem:[#allocation2 + $0x3a] sm:$0xff] }
 0x75f   :  { %21162 = vst [vmem:[#allocation86_spill] sm:$0xff] %v18839_v49  ;;  %v6978_v6 = vld [vmem:[#allocation8 + $0x1c0] sm:$0xff] }
 0x761   :  { %13555 = vmatmul.mubr.f32.gmra.mrb[58].mxu1 %v18814_v46  ;;  %v6376_v46 = vld [vmem:[#allocation2 + $0xa] sm:$0xff] }
 0x762   :  { %13557 = vmatprep.mubr.f32.mxu1 %v18817_v20  ;;  %v6975_v20 = vld [vmem:[#allocation8 + $0x1a8] sm:$0xff] }
 0x765   :  { %13558 = vmatmul.mubr.f32.gmra.mrb[60].mxu1 %v18820_v24  ;;  %v18833_v24 = vld [vmem:[#allocation2 + $0x22] sm:$0xff] }
 0x766   :  { %13560 = vmatprep.mubr.f32.mxu1 %v18823_v7  ;;  %v14851_v7 = vpack.c.bf16 %v6975_v20, %v6974_v9  ;;  %21160 = vst [vmem:[#allocation84_spill] sm:$0xff] %v18833_v24  ;;  %v18845_v20 = vld [vmem:[#allocation2 + $0x52] sm:$0xff] }
 0x767   :  { %21164 = vst [vmem:[#allocation88_spill] sm:$0xff] %v18845_v20 }
 0x769   :  { %13561 = vmatmul.mubr.f32.gmra.mrb[62].mxu1 %v18826_v48 }
 0x76a   :  { %13595 = vmatprep.mubr.f32.mxu1 %v6375_v36  ;;  %v18836_v36 = vld [vmem:[#allocation2 + $0x32] sm:$0xff] }
 0x76b   :  { %21161 = vst [vmem:[#allocation85_spill] sm:$0xff] %v18836_v36 }
 0x76d   :  { %13596 = vmatmul.mubr.f32.vlgmr.msra.gmra.mrb[0].mxu1 %v6376_v46  ;;  %v14855_v46 = vpack.c.bf16 %v6977_v42, %v6976_v18  ;;  %v18848_v42 = vld [vmem:[#allocation2 + $0x62] sm:$0xff] }
 0x76e   :  { %13598 = vmatprep.mubr.f32.mxu1 %v18829_v30  ;;  %14846 = vmatpush3.bf16.msra.mxu1 %v18683_v14  ;;  %v6979_v30 = vld [vmem:[#allocation8 + $0x1c8] sm:$0xff]  ;;  %21165 = vst [vmem:[#allocation89_spill] sm:$0xff] %v18848_v42 }
 0x76f   :  { %14848 = vmatprep.subr.bf16.mxu1 %v14847_v27  ;;  %v18842_v14 = vld [vmem:[#allocation2 + $0x4a] sm:$0xff]  ;;  %v14859_v9 = vpack.c.bf16 %v6979_v30, %v6978_v6  ;;  %v18854_v30 = vld [vmem:[#allocation2 + $0x7a] sm:$0xff]  ;;  %v18857_v6 = vld [vmem:[#allocation2 + $0x82] sm:$0xff] }
 0x770   :  { %21163 = vst [vmem:[#allocation87_spill] sm:$0xff] %v18842_v14  ;;  %21167 = vst [vmem:[#allocation22_spill] sm:$0xff] %v18854_v30 }
 0x771   :  { %13599 = vmatmul.mubr.f32.gmra.mrb[2].mxu1 %v18833_v24  ;;  %v6980_v24 = vld [vmem:[#allocation8 + $0x1d0] sm:$0xff] }
 0x772   :  { %13601 = vmatprep.mubr.f32.mxu1 %v18836_v36  ;;  %14850 = vmatpush3.bf16.msra.mxu1 %v14847_v27  ;;  %v6981_v36 = vld [vmem:[#allocation8 + $0x1d8] sm:$0xff]  ;;  %v18851_v27 = vld [vmem:[#allocation2 + $0x6a] sm:$0xff] }
 0x773   :  { %14852 = vmatprep.subr.bf16.mxu1 %v14851_v7  ;;  %v14863_v18 = vpack.c.bf16 %v6981_v36, %v6980_v24  ;;  %21166 = vst [vmem:[#allocation21_spill] sm:$0xff] %v18851_v27  ;;  %v18860_v24 = vld [vmem:[#allocation2 + $0x92] sm:$0xff] }
 0x775   :  { %13602 = vmatmul.mubr.f32.gmra.mrb[4].mxu1 %v18839_v49  ;;  %v6982_v49 = vld [vmem:[#allocation8 + $0x1e0] sm:$0xff] }
 0x776   :  { %13604 = vmatprep.mubr.f32.mxu1 %v18842_v14  ;;  %14854 = vmatpush3.bf16.msra.mxu1 %v14851_v7  ;;  %v6983_v14 = vld [vmem:[#allocation8 + $0x1e8] sm:$0xff] }
 0x777   :  { %14856 = vmatprep.subr.bf16.mxu1 %v14855_v46  ;;  %v14867_v7 = vpack.c.bf16 %v6983_v14, %v6982_v49  ;;  %v18866_v49 = vld [vmem:[#allocation2 + $0xaa] sm:$0xff] }
 0x778   :  { %21168 = vst [vmem:[#allocation23_spill] sm:$0xff] %v18866_v49 }
 0x779   :  { %13605 = vmatmul.mubr.f32.gmra.mrb[6].mxu1 %v18845_v20  ;;  %v6984_v20 = vld [vmem:[#allocation8 + $0x1f0] sm:$0xff] }
 0x77a   :  { %13607 = vmatprep.mubr.f32.mxu1 %v18848_v42  ;;  %14858 = vmatpush3.bf16.msra.mxu1 %v14855_v46  ;;  %v6985_v42 = vld [vmem:[#allocation8 + $0x1f8] sm:$0xff] }
 0x77b   :  { %14860 = vmatprep.subr.bf16.mxu1 %v14859_v9  ;;  %v14871_v36 = vpack.c.bf16 %v6985_v42, %v6984_v20  ;;  %v18863_v46 = vld [vmem:[#allocation2 + $0x9a] sm:$0xff]  ;;  %v18878_v20 = vld [vmem:[#allocation2 + $0xca] sm:$0xff] }
 0x77c   :  { %21171 = vst [vmem:[#allocation26_spill] sm:$0xff] %v18878_v20  ;;  %v18881_v42 = vld [vmem:[#allocation2 + $0xda] sm:$0xff] }
 0x77d   :  { %13608 = vmatmul.mubr.f32.gmra.mrb[8].mxu1 %v18851_v27  ;;  %v7500_v27 = vld [vmem:[#allocation8 + $0x200] sm:$0xff]  ;;  %21172 = vst [vmem:[#allocation27_spill] sm:$0xff] %v18881_v42 }
 0x77e   :  { %13610 = vmatprep.mubr.f32.mxu1 %v18854_v30  ;;  %14862 = vmatpush3.bf16.msra.mxu1 %v14859_v9  ;;  %v7501_v30 = vld [vmem:[#allocation8 + $0x208] sm:$0xff]  ;;  %v18871_v9 = vld [vmem:[#allocation2 + $0xb2] sm:$0xff] }
 0x77f   :  { %14864 = vmatprep.subr.bf16.mxu1 %v14863_v18  ;;  %v18869_v14 = vpack.c.bf16 %v7501_v30, %v7500_v27  ;;  %21169 = vst [vmem:[#allocation24_spill] sm:$0xff] %v18871_v9  ;;  %v18884_v27 = vld [vmem:[#allocation2 + $0xe2] sm:$0xff]  ;;  %v18887_v30 = vld [vmem:[#allocation2 + $0xf2] sm:$0xff] }
 0x780   :  { %21173 = vst [vmem:[#allocation28_spill] sm:$0xff] %v18884_v27  ;;  %21174 = vst [vmem:[#allocation29_spill] sm:$0xff] %v18887_v30 }
 0x781   :  { %13611 = vmatmul.mubr.f32.gmra.mrb[10].mxu1 %v18857_v6 }
 0x782   :  { %13613 = vmatprep.mubr.f32.mxu1 %v18860_v24  ;;  %14866 = vmatpush3.bf16.msra.mxu1 %v14863_v18  ;;  %v18874_v18 = vld [vmem:[#allocation2 + $0xc2] sm:$0xff] }
 0x783   :  { %14868 = vmatprep.subr.bf16.mxu1 %v14867_v7  ;;  %21170 = vst [vmem:[#allocation25_spill] sm:$0xff] %v18874_v18 }
 0x785   :  { %13614 = vmatmul.mubr.f32.gmra.mrb[12].mxu1 %v18863_v46 }
 0x786   :  { %13616 = vmatprep.mubr.f32.mxu1 %v18866_v49  ;;  %14870 = vmatpush3.bf16.msra.mxu1 %v14867_v7  ;;  %v18890_v7 = vld [vmem:[#allocation2 + $0xfa] sm:$0xff]  ;;  %v7505_v49 = vld [vmem:[#allocation8 + $0x228] sm:$0xff] }
 0x787   :  { %14872 = vmatprep.subr.bf16.mxu1 %v14871_v36  ;;  %21175 = vst [vmem:[#allocation30_spill] sm:$0xff] %v18890_v7 }
 0x789   :  { %13617 = vmatmul.mubr.f32.gmra.mrb[14].mxu1 %v18871_v9  ;;  %v7504_v9 = vld [vmem:[#allocation8 + $0x220] sm:$0xff] }
 0x78a   :  { %13619 = vmatprep.mubr.f32.mxu1 %v18874_v18  ;;  %14874 = vmatpush3.bf16.msra.mxu1 %v14871_v36  ;;  %v18893_v36 = vld [vmem:[#allocation2 + $0x10a] sm:$0xff]  ;;  %v18920_v18 = vld [vmem:[#allocation2 + $0x172] sm:$0xff] }
 0x78b   :  { %14876 = vmatprep.subr.bf16.mxu1 %v18869_v14  ;;  %21176 = vst [vmem:[#allocation90_spill] sm:$0xff] %v18893_v36  ;;  %21185 = vst [vmem:[#allocation38_spill] sm:$0xff] %v18920_v18 }
 0x78d   :  { %13620 = vmatmul.mubr.f32.gmra.mrb[16].mxu1 %v18878_v20  ;;  %v18896_v20 = vld [vmem:[#allocation2 + $0x112] sm:$0xff] }
 0x78e   :  { %13622 = vmatprep.mubr.f32.mxu1 %v18881_v42  ;;  %21177 = vst [vmem:[#allocation91_spill] sm:$0xff] %v18896_v20  ;;  %v18899_v42 = vld [vmem:[#allocation2 + $0x122] sm:$0xff] }
 0x78f   :  { %21178 = vst [vmem:[#allocation92_spill] sm:$0xff] %v18899_v42 }
 0x791   :  { %13623 = vmatmul.mubr.f32.gmra.mrb[18].mxu1 %v18884_v27  ;;  %v18902_v27 = vld [vmem:[#allocation2 + $0x12a] sm:$0xff] }
 0x792   :  { %13625 = vmatprep.mubr.f32.mxu1 %v18887_v30  ;;  %21179 = vst [vmem:[#allocation31_spill] sm:$0xff] %v18902_v27  ;;  %v18905_v30 = vld [vmem:[#allocation2 + $0x13a] sm:$0xff] }
 0x793   :  { %21180 = vst [vmem:[#allocation32_spill] sm:$0xff] %v18905_v30 }
 0x795   :  { %13626 = vmatmul.mubr.f32.gmra.mrb[20].mxu1 %v18890_v7  ;;  %v18908_v7 = vld [vmem:[#allocation2 + $0x142] sm:$0xff] }
 0x796   :  { %13628 = vmatprep.mubr.f32.mxu1 %v18893_v36  ;;  %21181 = vst [vmem:[#allocation33_spill] sm:$0xff] %v18908_v7  ;;  %v18911_v36 = vld [vmem:[#allocation2 + $0x152] sm:$0xff] }
 0x797   :  { %21182 = vst [vmem:[#allocation34_spill] sm:$0xff] %v18911_v36 }
 0x799   :  { %13629 = vmatmul.mubr.f32.gmra.mrb[22].mxu1 %v18896_v20  ;;  %v18914_v20 = vld [vmem:[#allocation2 + $0x15a] sm:$0xff] }
 0x79a   :  { %13631 = vmatprep.mubr.f32.mxu1 %v18899_v42  ;;  %21183 = vst [vmem:[#allocation36_spill] sm:$0xff] %v18914_v20  ;;  %v18917_v42 = vld [vmem:[#allocation2 + $0x16a] sm:$0xff] }
 0x79b   :  { %21184 = vst [vmem:[#allocation35_spill] sm:$0xff] %v18917_v42 }
 0x79d   :  { %13632 = vmatmul.mubr.f32.gmra.mrb[24].mxu1 %v18902_v27  ;;  %v6407_v27 = vld [vmem:[#allocation2 + $0x1b2] sm:$0xff] }
 0x79e   :  { %13634 = vmatprep.mubr.f32.mxu1 %v18905_v30  ;;  %v6408_v30 = vld [vmem:[#allocation2 + $0x1ba] sm:$0xff] }
 0x7a1   :  { %13635 = vmatmul.mubr.f32.gmra.mrb[26].mxu1 %v18908_v7  ;;  %v18923_v7 = vld [vmem:[#allocation2 + $0x1ca] sm:$0xff] }
 0x7a2   :  { %13637 = vmatprep.mubr.f32.mxu1 %v18911_v36  ;;  %21186 = vst [vmem:[#allocation37_spill] sm:$0xff] %v18923_v7  ;;  %v18926_v36 = vld [vmem:[#allocation2 + $0x1d2] sm:$0xff] }
 0x7a3   :  { %21187 = vst [vmem:[#allocation40_spill] sm:$0xff] %v18926_v36 }
 0x7a5   :  { %13638 = vmatmul.mubr.f32.gmra.mrb[28].mxu1 %v18914_v20  ;;  %v18929_v20 = vld [vmem:[#allocation2 + $0x1e2] sm:$0xff] }
 0x7a6   :  { %13640 = vmatprep.mubr.f32.mxu1 %v18917_v42  ;;  %21188 = vst [vmem:[#allocation39_spill] sm:$0xff] %v18929_v20  ;;  %v18932_v42 = vld [vmem:[#allocation2 + $0x1ea] sm:$0xff] }
 0x7a7   :  { %21189 = vst [vmem:[#allocation42_spill] sm:$0xff] %v18932_v42 }
 0x7a9   :  { %13641 = vmatmul.mubr.f32.gmra.mrb[30].mxu1 %v18920_v18  ;;  %v18935_v18 = vld [vmem:[#allocation2 + $0x1fa] sm:$0xff] }
 0x7aa   :  { %13643 = vmatprep.mubr.f32.mxu1 %v6407_v27  ;;  %21190 = vst [vmem:[#allocation41_spill] sm:$0xff] %v18935_v18  ;;  %v18938_v27 = vld [vmem:[#allocation2 + $0x202] sm:$0xff] }
 0x7ab   :  { %21191 = vst [vmem:[#allocation44_spill] sm:$0xff] %v18938_v27 }
 0x7ad   :  { %13644 = vmatmul.mubr.f32.gmra.mrb[32].mxu1 %v6408_v30  ;;  %v18941_v30 = vld [vmem:[#allocation2 + $0x212] sm:$0xff] }
 0x7ae   :  { %13646 = vmatprep.mubr.f32.mxu1 %v18923_v7  ;;  %21192 = vst [vmem:[#allocation43_spill] sm:$0xff] %v18941_v30  ;;  %v7502_v7 = vld [vmem:[#allocation8 + $0x210] sm:$0xff] }
 0x7b1   :  { %13647 = vmatmul.mubr.f32.gmra.mrb[34].mxu1 %v18926_v36  ;;  %v18944_v36 = vld [vmem:[#allocation2 + $0x21a] sm:$0xff] }
 0x7b2   :  { %13649 = vmatprep.mubr.f32.mxu1 %v18929_v20  ;;  %21193 = vst [vmem:[#allocation46_spill] sm:$0xff] %v18944_v36  ;;  %v18947_v20 = vld [vmem:[#allocation2 + $0x22a] sm:$0xff] }
 0x7b3   :  { %21194 = vst [vmem:[#allocation45_spill] sm:$0xff] %v18947_v20 }
 0x7b5   :  { %13650 = vmatmul.mubr.f32.gmra.mrb[36].mxu1 %v18932_v42  ;;  %v18950_v42 = vld [vmem:[#allocation2 + $0x232] sm:$0xff] }
 0x7b6   :  { %13652 = vmatprep.mubr.f32.mxu1 %v18935_v18  ;;  %21195 = vst [vmem:[#allocation48_spill] sm:$0xff] %v18950_v42  ;;  %v18953_v18 = vld [vmem:[#allocation2 + $0x242] sm:$0xff] }
 0x7b7   :  { %21196 = vst [vmem:[#allocation47_spill] sm:$0xff] %v18953_v18 }
 0x7b9   :  { %13653 = vmatmul.mubr.f32.gmra.mrb[38].mxu1 %v18938_v27  ;;  %v18956_v27 = vld [vmem:[#allocation2 + $0x24a] sm:$0xff] }
 0x7ba   :  { %13655 = vmatprep.mubr.f32.mxu1 %v18941_v30  ;;  %21197 = vst [vmem:[#allocation50_spill] sm:$0xff] %v18956_v27  ;;  %v18959_v30 = vld [vmem:[#allocation2 + $0x25a] sm:$0xff] }
 0x7bb   :  { %21198 = vst [vmem:[#allocation49_spill] sm:$0xff] %v18959_v30 }
 0x7bd   :  { %13656 = vmatmul.mubr.f32.gmra.mrb[40].mxu1 %v18944_v36  ;;  %v18962_v36 = vld [vmem:[#allocation2 + $0x262] sm:$0xff] }
 0x7be   :  { %13658 = vmatprep.mubr.f32.mxu1 %v18947_v20  ;;  %21199 = vst [vmem:[#allocation52_spill] sm:$0xff] %v18962_v36  ;;  %v18965_v20 = vld [vmem:[#allocation2 + $0x272] sm:$0xff] }
 0x7bf   :  { %21200 = vst [vmem:[#allocation51_spill] sm:$0xff] %v18965_v20 }
 0x7c1   :  { %13659 = vmatmul.mubr.f32.gmra.mrb[42].mxu1 %v18950_v42  ;;  %v18968_v42 = vld [vmem:[#allocation2 + $0x27a] sm:$0xff] }
 0x7c2   :  { %13661 = vmatprep.mubr.f32.mxu1 %v18953_v18  ;;  %21201 = vst [vmem:[#allocation54_spill] sm:$0xff] %v18968_v42  ;;  %v18971_v18 = vld [vmem:[#allocation2 + $0x28a] sm:$0xff] }
 0x7c3   :  { %21202 = vst [vmem:[#allocation53_spill] sm:$0xff] %v18971_v18 }
 0x7c5   :  { %13662 = vmatmul.mubr.f32.gmra.mrb[44].mxu1 %v18956_v27  ;;  %v18974_v27 = vld [vmem:[#allocation2 + $0x292] sm:$0xff] }
 0x7c6   :  { %13664 = vmatprep.mubr.f32.mxu1 %v18959_v30  ;;  %21203 = vst [vmem:[#allocation56_spill] sm:$0xff] %v18974_v27  ;;  %v18977_v30 = vld [vmem:[#allocation2 + $0x2a2] sm:$0xff] }
 0x7c7   :  { %21204 = vst [vmem:[#allocation55_spill] sm:$0xff] %v18977_v30 }
 0x7c9   :  { %13665 = vmatmul.mubr.f32.gmra.mrb[46].mxu1 %v18962_v36  ;;  %v18980_v36 = vld [vmem:[#allocation2 + $0x2aa] sm:$0xff] }
 0x7ca   :  { %13667 = vmatprep.mubr.f32.mxu1 %v18965_v20  ;;  %21205 = vst [vmem:[#allocation58_spill] sm:$0xff] %v18980_v36  ;;  %v18983_v20 = vld [vmem:[#allocation2 + $0x2ba] sm:$0xff] }
 0x7cb   :  { %21206 = vst [vmem:[#allocation59_spill] sm:$0xff] %v18983_v20 }
 0x7cd   :  { %13668 = vmatmul.mubr.f32.gmra.mrb[48].mxu1 %v18968_v42  ;;  %v18986_v42 = vld [vmem:[#allocation2 + $0x2c2] sm:$0xff] }
 0x7ce   :  { %13670 = vmatprep.mubr.f32.mxu1 %v18971_v18  ;;  %21207 = vst [vmem:[#allocation60_spill] sm:$0xff] %v18986_v42  ;;  %v18989_v18 = vld [vmem:[#allocation2 + $0x2d2] sm:$0xff] }
 0x7cf   :  { %21208 = vst [vmem:[#allocation61_spill] sm:$0xff] %v18989_v18 }
 0x7d1   :  { %13671 = vmatmul.mubr.f32.gmra.mrb[50].mxu1 %v18974_v27  ;;  %v18992_v27 = vld [vmem:[#allocation2 + $0x2da] sm:$0xff] }
 0x7d2   :  { %13673 = vmatprep.mubr.f32.mxu1 %v18977_v30  ;;  %21209 = vst [vmem:[#allocation62_spill] sm:$0xff] %v18992_v27  ;;  %v18995_v30 = vld [vmem:[#allocation2 + $0x2ea] sm:$0xff] }
 0x7d3   :  { %21210 = vst [vmem:[#allocation63_spill] sm:$0xff] %v18995_v30 }
 0x7d5   :  { %13674 = vmatmul.mubr.f32.gmra.mrb[52].mxu1 %v18980_v36  ;;  %v18998_v36 = vld [vmem:[#allocation2 + $0x2f2] sm:$0xff] }
 0x7d6   :  { %13676 = vmatprep.mubr.f32.mxu1 %v18983_v20  ;;  %21211 = vst [vmem:[#allocation65_spill] sm:$0xff] %v18998_v36  ;;  %v19001_v20 = vld [vmem:[#allocation2 + $0x302] sm:$0xff] }
 0x7d7   :  { %21212 = vst [vmem:[#allocation66_spill] sm:$0xff] %v19001_v20 }
 0x7d9   :  { %13677 = vmatmul.mubr.f32.gmra.mrb[54].mxu1 %v18986_v42  ;;  %v19004_v42 = vld [vmem:[#allocation2 + $0x30a] sm:$0xff] }
 0x7da   :  { %13679 = vmatprep.mubr.f32.mxu1 %v18989_v18  ;;  %21213 = vst [vmem:[#allocation68_spill] sm:$0xff] %v19004_v42  ;;  %v19007_v18 = vld [vmem:[#allocation2 + $0x31a] sm:$0xff] }
 0x7db   :  { %21214 = vst [vmem:[#allocation69_spill] sm:$0xff] %v19007_v18 }
 0x7dd   :  { %13680 = vmatmul.mubr.f32.gmra.mrb[56].mxu1 %v18992_v27  ;;  %v19010_v27 = vld [vmem:[#allocation2 + $0x322] sm:$0xff] }
 0x7de   :  { %13682 = vmatprep.mubr.f32.mxu1 %v18995_v30  ;;  %v7503_v30 = vld [vmem:[#allocation8 + $0x218] sm:$0xff] }
 0x7e1   :  { %13683 = vmatmul.mubr.f32.gmra.mrb[58].mxu1 %v18998_v36  ;;  %v14879_v36 = vpack.c.bf16 %v7503_v30, %v7502_v7  ;;  %v7508_v7 = vld [vmem:[#allocation8 + $0x240] sm:$0xff]  ;;  %v7509_v30 = vld [vmem:[#allocation8 + $0x248] sm:$0xff] }
 0x7e2   :  { %13685 = vmatprep.mubr.f32.mxu1 %v19001_v20  ;;  %v7507_v20 = vld [vmem:[#allocation8 + $0x238] sm:$0xff] }
 0x7e5   :  { %13686 = vmatmul.mubr.f32.gmra.mrb[60].mxu1 %v19004_v42  ;;  %v14883_v42 = vpack.c.bf16 %v7505_v49, %v7504_v9  ;;  %v7511_v49 = vld [vmem:[#allocation8 + $0x258] sm:$0xff] }
 0x7e6   :  { %13688 = vmatprep.mubr.f32.mxu1 %v19007_v18  ;;  %v7506_v18 = vld [vmem:[#allocation8 + $0x230] sm:$0xff]  ;;  %v7515_v9 = vld [vmem:[#allocation8 + $0x278] sm:$0xff] }
 0x7e9   :  { %13689 = vmatmul.mubr.f32.gmra.mrb[62].mxu1 %v19010_v27 }
 0x7ea   :  { %13723 = vmatprep.mubr.f32.mxu1 %v18643_v32  ;;  %v14887_v32 = vpack.c.bf16 %v7507_v20, %v7506_v18  ;;  %v8031_v18 = vld [vmem:[#allocation8 + $0x288] sm:$0xff] }
 0x7ed   :  { %13724 = vmatmul.mubr.f32.vlgmr.msra.gmra.mrb[0].mxu1 %v18647_v41  ;;  %v14891_v41 = vpack.c.bf16 %v7509_v30, %v7508_v7  ;;  %v19120_v7 = vld [vmem:[#allocation2 + $0xa9] sm:$0xff] }
 0x7ee   :  { %13726 = vmatprep.mubr.f32.mxu1 %v18650_v19  ;;  %14878 = vmatpush3.bf16.msra.mxu1 %v18869_v14  ;;  %v7510_v19 = vld [vmem:[#allocation8 + $0x250] sm:$0xff]  ;;  %v7513_v14 = vld [vmem:[#allocation8 + $0x268] sm:$0xff] }
 0x7ef   :  { %14880 = vmatprep.subr.bf16.mxu1 %v14879_v36 }
 0x7f1   :  { %13727 = vmatmul.mubr.f32.gmra.mrb[2].mxu1 %v18653_v58  ;;  %v14895_v58 = vpack.c.bf16 %v7511_v49, %v7510_v19  ;;  %v8560_v19 = vld [vmem:[#allocation8 + $0x300] sm:$0xff]  ;;  %v8561_v49 = vld [vmem:[#allocation8 + $0x308] sm:$0xff] }
 0x7f2   :  { %13729 = vmatprep.mubr.f32.mxu1 %v18656_v51  ;;  %14882 = vmatpush3.bf16.msra.mxu1 %v14879_v36  ;;  %v7512_v51 = vld [vmem:[#allocation8 + $0x260] sm:$0xff]  ;;  %v8044_v36 = vld [vmem:[#allocation8 + $0x2f0] sm:$0xff] }
 0x7f3   :  { %14884 = vmatprep.subr.bf16.mxu1 %v14883_v42 }
 0x7f5   :  { %13730 = vmatmul.mubr.f32.gmra.mrb[4].mxu1 %v18659_v25  ;;  %v14899_v25 = vpack.c.bf16 %v7513_v14, %v7512_v51  ;;  %v19129_v51 = vpack.c.bf16 %v8561_v49, %v8560_v19  ;;  %v19131_v14 = vld [vmem:[#allocation2 + $0xc9] sm:$0xff]  ;;  %v19246_v19 = vld [vmem:[#allocation2 + $0x2d9] sm:$0xff] }
 0x7f6   :  { %13732 = vmatprep.mubr.f32.mxu1 %v18662_v31  ;;  %14886 = vmatpush3.bf16.msra.mxu1 %v14883_v42  ;;  %v7514_v31 = vld [vmem:[#allocation8 + $0x270] sm:$0xff]  ;;  %v19117_v42 = vld [vmem:[#allocation2 + $0x99] sm:$0xff] }
 0x7f7   :  { %14888 = vmatprep.subr.bf16.mxu1 %v14887_v32  ;;  %v19249_v49 = vld [vmem:[#allocation2 + $0x2e9] sm:$0xff] }
 0x7f9   :  { %13733 = vmatmul.mubr.f32.gmra.mrb[6].mxu1 %v18665_v55  ;;  %v14903_v55 = vpack.c.bf16 %v7515_v9, %v7514_v31  ;;  %v19138_v31 = vld [vmem:[#allocation2 + $0xe1] sm:$0xff]  ;;  %v19141_v9 = vld [vmem:[#allocation2 + $0xf1] sm:$0xff] }
 0x7fa   :  { %13735 = vmatprep.mubr.f32.mxu1 %v18668_v54  ;;  %14890 = vmatpush3.bf16.msra.mxu1 %v14887_v32  ;;  %v8030_v54 = vld [vmem:[#allocation8 + $0x280] sm:$0xff]  ;;  %v8045_v32 = vld [vmem:[#allocation8 + $0x2f8] sm:$0xff] }
 0x7fb   :  { %14892 = vmatprep.subr.bf16.mxu1 %v14891_v41  ;;  %v14935_v30 = vpack.c.bf16 %v8045_v32, %v8044_v36  ;;  %v19237_v36 = vld [vmem:[#allocation2 + $0x2b9] sm:$0xff]  ;;  %v19240_v32 = vld [vmem:[#allocation2 + $0x2c1] sm:$0xff] }
 0x7fd   :  { %13736 = vmatmul.mubr.f32.gmra.mrb[8].mxu1 %v18671_v0  ;;  %v19029_v0 = vpack.c.bf16 %v8031_v18, %v8030_v54  ;;  %v19147_v54 = vld [vmem:[#allocation2 + $0x109] sm:$0xff]  ;;  %v19150_v18 = vld [vmem:[#allocation2 + $0x111] sm:$0xff] }
 0x7fe   :  { %13738 = vmatprep.mubr.f32.mxu1 %v18674_v37  ;;  %14894 = vmatpush3.bf16.msra.mxu1 %v14891_v41  ;;  %v19047_v37 = vld [vmem:[#allocation2 + $0x180] sm:$0xff]  ;;  %v19123_v41 = vld [vmem:[#allocation2 + $0xb1] sm:$0xff] }
 0x7ff   :  { %14896 = vmatprep.subr.bf16.mxu1 %v14895_v58 }
 0x801   :  { %13739 = vmatmul.mubr.f32.gmra.mrb[10].mxu1 %v18677_v5  ;;  %v19050_v5 = vld [vmem:[#allocation2 + $0x188] sm:$0xff] }
 0x802   :  { %13741 = vmatprep.mubr.f32.mxu1 %v18680_v22  ;;  %14898 = vmatpush3.bf16.msra.mxu1 %v14895_v58  ;;  %v21215_v22 = vld [vmem:[#allocation74_spill] sm:$0xff]  ;;  %v19126_v58 = vld [vmem:[#allocation2 + $0xc1] sm:$0xff] }
 0x803   :  { %14900 = vmatprep.subr.bf16.mxu1 %v14899_v25 }
 0x805   :  { %13742 = vmatmul.mubr.f32.gmra.mrb[12].mxu1 %v18685_v38  ;;  %v21216_v38 = vld [vmem:[#allocation75_spill] sm:$0xff] }
 0x806   :  { %13744 = vmatprep.mubr.f32.mxu1 %v18688_v8  ;;  %14902 = vmatpush3.bf16.msra.mxu1 %v14899_v25  ;;  %v21217_v8 = vld [vmem:[#allocation76_spill] sm:$0xff] }
 0x807   :  { %14904 = vmatprep.subr.bf16.mxu1 %v14903_v55  ;;  %v19134_v25 = vld [vmem:[#allocation2 + $0xd9] sm:$0xff]  ;;  %21232 = vst [vmem:[#allocation76_spill] sm:$0xff] %v19237_v36 }
 0x809   :  { %13745 = vmatmul.mubr.f32.gmra.mrb[14].mxu1 %v18692_v45  ;;  %v21218_v45 = vld [vmem:[#allocation77_spill] sm:$0xff] }
 0x80a   :  { %13747 = vmatprep.mubr.f32.mxu1 %v18695_v21  ;;  %14906 = vmatpush3.bf16.msra.mxu1 %v14903_v55  ;;  %v21219_v21 = vld [vmem:[#allocation78_spill] sm:$0xff]  ;;  %v19144_v55 = vld [vmem:[#allocation2 + $0xf9] sm:$0xff]  ;;  %21233 = vst [vmem:[#allocation77_spill] sm:$0xff] %v19240_v32 }
 0x80b   :  { %14908 = vmatprep.subr.bf16.mxu1 %v19029_v0 }
 0x80d   :  { %13748 = vmatmul.mubr.f32.gmra.mrb[16].mxu1 %v18698_v2  ;;  %v21220_v2 = vld [vmem:[#allocation79_spill] sm:$0xff] }
 0x80e   :  { %13750 = vmatprep.mubr.f32.mxu1 %v18701_v53  ;;  %v21221_v53 = vld [vmem:[#allocation80_spill] sm:$0xff]  ;;  %21235 = vst [vmem:[#allocation79_spill] sm:$0xff] %v19246_v19 }
 0x80f   :  { %21236 = vst [vmem:[#allocation80_spill] sm:$0xff] %v19249_v49 }
 0x811   :  { %13751 = vmatmul.mubr.f32.gmra.mrb[18].mxu1 %v18704_v44  ;;  %v21222_v44 = vld [vmem:[#allocation81_spill] sm:$0xff] }
 0x812   :  { %13753 = vmatprep.mubr.f32.mxu1 %v18707_v13  ;;  %v21223_v13 = vld [vmem:[#allocation82_spill] sm:$0xff] }
 0x815   :  { %13754 = vmatmul.mubr.f32.gmra.mrb[20].mxu1 %v18710_v11  ;;  %v19083_v11 = vld [vmem:[#allocation2 + $0x330] sm:$0xff] }
 0x816   :  { %13756 = vmatprep.mubr.f32.mxu1 %v18713_v61  ;;  %v19086_v61 = vld [vmem:[#allocation2 + $0x338] sm:$0xff] }
 0x819   :  { %13757 = vmatmul.mubr.f32.gmra.mrb[22].mxu1 %v18716_v40  ;;  %v8032_v40 = vld [vmem:[#allocation8 + $0x290] sm:$0xff] }
 0x81a   :  { %13759 = vmatprep.mubr.f32.mxu1 %v18719_v26  ;;  %v8033_v26 = vld [vmem:[#allocation8 + $0x298] sm:$0xff] }
 0x81d   :  { %13760 = vmatmul.mubr.f32.gmra.mrb[24].mxu1 %v18722_v28  ;;  %v7435_v28 = vld [vmem:[#allocation2 + $0x19] sm:$0xff] }
 0x81e   :  { %13762 = vmatprep.mubr.f32.mxu1 %v18725_v29  ;;  %v14911_v29 = vpack.c.bf16 %v8033_v26, %v8032_v40  ;;  %v7467_v40 = vld [vmem:[#allocation2 + $0x1c9] sm:$0xff]  ;;  %v7468_v26 = vld [vmem:[#allocation2 + $0x1d1] sm:$0xff] }
 0x821   :  { %13763 = vmatmul.mubr.f32.gmra.mrb[26].mxu1 %v18728_v43  ;;  %v7436_v43 = vld [vmem:[#allocation2 + $0x21] sm:$0xff] }
 0x822   :  { %13765 = vmatprep.mubr.f32.mxu1 %v18731_v3  ;;  %v8034_v3 = vld [vmem:[#allocation8 + $0x2a0] sm:$0xff] }
 0x825   :  { %13766 = vmatmul.mubr.f32.gmra.mrb[28].mxu1 %v18734_v63  ;;  %v8035_v63 = vld [vmem:[#allocation8 + $0x2a8] sm:$0xff] }
 0x826   :  { %13768 = vmatprep.mubr.f32.mxu1 %v19047_v37 }
 0x829   :  { %13769 = vmatmul.mubr.f32.gmra.mrb[30].mxu1 %v19050_v5 }
 0x82a   :  { %13771 = vmatprep.mubr.f32.mxu1 %v18739_v52  ;;  %v19089_v52 = vld [vmem:[#allocation2 + $0x31] sm:$0xff] }
 0x82d   :  { %13772 = vmatmul.mubr.f32.gmra.mrb[32].mxu1 %v18742_v34  ;;  %v14915_v34 = vpack.c.bf16 %v8035_v63, %v8034_v3  ;;  %v19192_v3 = vld [vmem:[#allocation2 + $0x201] sm:$0xff]  ;;  %v19195_v63 = vld [vmem:[#allocation2 + $0x211] sm:$0xff] }
 0x82e   :  { %13774 = vmatprep.mubr.f32.mxu1 %v18745_v57  ;;  %v19093_v57 = vld [vmem:[#allocation2 + $0x39] sm:$0xff] }
 0x831   :  { %13775 = vmatmul.mubr.f32.gmra.mrb[34].mxu1 %v18748_v15  ;;  %v8036_v15 = vld [vmem:[#allocation8 + $0x2b0] sm:$0xff] }
 0x832   :  { %13777 = vmatprep.mubr.f32.mxu1 %v18751_v60  ;;  %v8037_v60 = vld [vmem:[#allocation8 + $0x2b8] sm:$0xff] }
 0x835   :  { %13778 = vmatmul.mubr.f32.gmra.mrb[36].mxu1 %v18754_v12  ;;  %v19096_v12 = vld [vmem:[#allocation2 + $0x49] sm:$0xff] }
 0x836   :  { %13780 = vmatprep.mubr.f32.mxu1 %v18757_v16  ;;  %v14919_v16 = vpack.c.bf16 %v8037_v60, %v8036_v15  ;;  %v19201_v15 = vld [vmem:[#allocation2 + $0x229] sm:$0xff]  ;;  %v19204_v60 = vld [vmem:[#allocation2 + $0x231] sm:$0xff] }
 0x839   :  { %13781 = vmatmul.mubr.f32.gmra.mrb[38].mxu1 %v18760_v1  ;;  %v19099_v1 = vld [vmem:[#allocation2 + $0x51] sm:$0xff] }
 0x83a   :  { %13783 = vmatprep.mubr.f32.mxu1 %v18763_v39  ;;  %v8038_v39 = vld [vmem:[#allocation8 + $0x2c0] sm:$0xff] }
 0x83d   :  { %13784 = vmatmul.mubr.f32.gmra.mrb[40].mxu1 %v18766_v4  ;;  %v8039_v4 = vld [vmem:[#allocation8 + $0x2c8] sm:$0xff] }
 0x83e   :  { %13786 = vmatprep.mubr.f32.mxu1 %v18769_v59  ;;  %v19102_v59 = vld [vmem:[#allocation2 + $0x61] sm:$0xff] }
 0x841   :  { %13787 = vmatmul.mubr.f32.gmra.mrb[42].mxu1 %v18772_v62  ;;  %v14923_v62 = vpack.c.bf16 %v8039_v4, %v8038_v39  ;;  %v19210_v39 = vld [vmem:[#allocation2 + $0x249] sm:$0xff]  ;;  %v19213_v4 = vld [vmem:[#allocation2 + $0x259] sm:$0xff] }
 0x842   :  { %13789 = vmatprep.mubr.f32.mxu1 %v18775_v35  ;;  %v19105_v35 = vld [vmem:[#allocation2 + $0x69] sm:$0xff]  ;;  %21224 = vst [vmem:[#allocation70_spill] sm:$0xff] %v19213_v4 }
 0x845   :  { %13790 = vmatmul.mubr.f32.gmra.mrb[44].mxu1 %v18778_v10  ;;  %v8040_v10 = vld [vmem:[#allocation8 + $0x2d0] sm:$0xff] }
 0x846   :  { %13792 = vmatprep.mubr.f32.mxu1 %v18781_v33  ;;  %v8041_v33 = vld [vmem:[#allocation8 + $0x2d8] sm:$0xff] }
 0x849   :  { %13793 = vmatmul.mubr.f32.gmra.mrb[46].mxu1 %v18784_v50  ;;  %v19108_v50 = vld [vmem:[#allocation2 + $0x79] sm:$0xff] }
 0x84a   :  { %13795 = vmatprep.mubr.f32.mxu1 %v18787_v56  ;;  %v14927_v56 = vpack.c.bf16 %v8041_v33, %v8040_v10  ;;  %v19219_v10 = vld [vmem:[#allocation2 + $0x271] sm:$0xff]  ;;  %v19222_v33 = vld [vmem:[#allocation2 + $0x279] sm:$0xff] }
 0x84b   :  { %21226 = vst [vmem:[#allocation72_spill] sm:$0xff] %v19219_v10  ;;  %21227 = vst [vmem:[#allocation73_spill] sm:$0xff] %v19222_v33 }
 0x84d   :  { %13796 = vmatmul.mubr.f32.gmra.mrb[48].mxu1 %v18790_v47  ;;  %v19111_v47 = vld [vmem:[#allocation2 + $0x81] sm:$0xff] }
 0x84e   :  { %13798 = vmatprep.mubr.f32.mxu1 %v18793_v23  ;;  %v8042_v23 = vld [vmem:[#allocation8 + $0x2e0] sm:$0xff] }
 0x851   :  { %13799 = vmatmul.mubr.f32.gmra.mrb[50].mxu1 %v18796_v17  ;;  %v8043_v17 = vld [vmem:[#allocation8 + $0x2e8] sm:$0xff] }
 0x852   :  { %13801 = vmatprep.mubr.f32.mxu1 %v21215_v22  ;;  %v14931_v20 = vpack.c.bf16 %v8043_v17, %v8042_v23  ;;  %v19156_v22 = vld [vmem:[#allocation2 + $0x129] sm:$0xff]  ;;  %v19228_v23 = vld [vmem:[#allocation2 + $0x291] sm:$0xff]  ;;  %v19231_v17 = vld [vmem:[#allocation2 + $0x2a1] sm:$0xff] }
 0x853   :  { %21229 = vst [vmem:[#allocation67_spill] sm:$0xff] %v19228_v23  ;;  %21230 = vst [vmem:[#allocation74_spill] sm:$0xff] %v19231_v17 }
 0x855   :  { %13802 = vmatmul.mubr.f32.gmra.mrb[52].mxu1 %v21216_v38  ;;  %v19159_v38 = vld [vmem:[#allocation2 + $0x139] sm:$0xff] }
 0x856   :  { %13804 = vmatprep.mubr.f32.mxu1 %v21217_v8  ;;  %v19162_v8 = vld [vmem:[#allocation2 + $0x141] sm:$0xff] }
 0x859   :  { %13805 = vmatmul.mubr.f32.gmra.mrb[54].mxu1 %v21218_v45  ;;  %v19165_v45 = vld [vmem:[#allocation2 + $0x151] sm:$0xff] }
 0x85a   :  { %13807 = vmatprep.mubr.f32.mxu1 %v21219_v21  ;;  %v19168_v21 = vld [vmem:[#allocation2 + $0x159] sm:$0xff] }
 0x85d   :  { %13808 = vmatmul.mubr.f32.gmra.mrb[56].mxu1 %v21220_v2  ;;  %v19171_v2 = vld [vmem:[#allocation2 + $0x169] sm:$0xff] }
 0x85e   :  { %13810 = vmatprep.mubr.f32.mxu1 %v21221_v53  ;;  %v19174_v53 = vld [vmem:[#allocation2 + $0x171] sm:$0xff] }
 0x861   :  { %13811 = vmatmul.mubr.f32.gmra.mrb[58].mxu1 %v21222_v44  ;;  %v19177_v44 = vld [vmem:[#allocation2 + $0x181] sm:$0xff] }
 0x862   :  { %13813 = vmatprep.mubr.f32.mxu1 %v21223_v13  ;;  %v19180_v13 = vld [vmem:[#allocation2 + $0x189] sm:$0xff] }
 0x865   :  { %13814 = vmatmul.mubr.f32.gmra.mrb[60].mxu1 %v18826_v48  ;;  %v19114_v48 = vld [vmem:[#allocation2 + $0x91] sm:$0xff] }
 0x866   :  { %13816 = vmatprep.mubr.f32.mxu1 %v19083_v11 }
 0x869   :  { %13817 = vmatmul.mubr.f32.gmra.mrb[62].mxu1 %v19086_v61 }
 0x86a   :  { %13851 = vmatprep.mubr.f32.mxu1 %v7435_v28  ;;  %v19183_v28 = vld [vmem:[#allocation2 + $0x1e1] sm:$0xff] }
 0x86d   :  { %13852 = vmatmul.mubr.f32.vlgmr.msra.gmra.mrb[0].mxu1 %v7436_v43  ;;  %v19189_v43 = vld [vmem:[#allocation2 + $0x1f9] sm:$0xff] }
 0x86e   :  { %13854 = vmatprep.mubr.f32.mxu1 %v19089_v52  ;;  %14910 = vmatpush3.bf16.msra.mxu1 %v19029_v0  ;;  %v19153_v0 = vld [vmem:[#allocation2 + $0x121] sm:$0xff] }
 0x86f   :  { %14912 = vmatprep.subr.bf16.mxu1 %v14911_v29 }
 0x871   :  { %13855 = vmatmul.mubr.f32.gmra.mrb[2].mxu1 %v19093_v57 }
 0x872   :  { %13857 = vmatprep.mubr.f32.mxu1 %v19096_v12  ;;  %14914 = vmatpush3.bf16.msra.mxu1 %v14911_v29  ;;  %v19186_v29 = vld [vmem:[#allocation2 + $0x1e9] sm:$0xff] }
 0x873   :  { %14916 = vmatprep.subr.bf16.mxu1 %v14915_v34 }
 0x875   :  { %13858 = vmatmul.mubr.f32.gmra.mrb[4].mxu1 %v19099_v1 }
 0x876   :  { %13860 = vmatprep.mubr.f32.mxu1 %v19102_v59  ;;  %14918 = vmatpush3.bf16.msra.mxu1 %v14915_v34  ;;  %v19198_v34 = vld [vmem:[#allocation2 + $0x219] sm:$0xff] }
 0x877   :  { %14920 = vmatprep.subr.bf16.mxu1 %v14919_v16 }
 0x879   :  { %13861 = vmatmul.mubr.f32.gmra.mrb[6].mxu1 %v19105_v35 }
 0x87a   :  { %13863 = vmatprep.mubr.f32.mxu1 %v19108_v50  ;;  %14922 = vmatpush3.bf16.msra.mxu1 %v14919_v16  ;;  %v19207_v16 = vld [vmem:[#allocation2 + $0x241] sm:$0xff] }
 0x87b   :  { %14924 = vmatprep.subr.bf16.mxu1 %v14923_v62 }
 0x87d   :  { %13864 = vmatmul.mubr.f32.gmra.mrb[8].mxu1 %v19111_v47 }
 0x87e   :  { %13866 = vmatprep.mubr.f32.mxu1 %v19114_v48  ;;  %14926 = vmatpush3.bf16.msra.mxu1 %v14923_v62  ;;  %v19216_v62 = vld [vmem:[#allocation2 + $0x261] sm:$0xff] }
 0x87f   :  { %14928 = vmatprep.subr.bf16.mxu1 %v14927_v56  ;;  %21225 = vst [vmem:[#allocation71_spill] sm:$0xff] %v19216_v62 }
 0x881   :  { %13867 = vmatmul.mubr.f32.gmra.mrb[10].mxu1 %v19117_v42 }
 0x882   :  { %13869 = vmatprep.mubr.f32.mxu1 %v19120_v7  ;;  %14930 = vmatpush3.bf16.msra.mxu1 %v14927_v56  ;;  %v19225_v56 = vld [vmem:[#allocation2 + $0x289] sm:$0xff] }
 0x883   :  { %14932 = vmatprep.subr.bf16.mxu1 %v14931_v20  ;;  %21228 = vst [vmem:[#allocation64_spill] sm:$0xff] %v19225_v56 }
 0x885   :  { %13870 = vmatmul.mubr.f32.gmra.mrb[12].mxu1 %v19123_v41 }
 0x886   :  { %13872 = vmatprep.mubr.f32.mxu1 %v19126_v58  ;;  %14934 = vmatpush3.bf16.msra.mxu1 %v14931_v20  ;;  %v19234_v20 = vld [vmem:[#allocation2 + $0x2a9] sm:$0xff] }
 0x887   :  { %14936 = vmatprep.subr.bf16.mxu1 %v14935_v30  ;;  %21231 = vst [vmem:[#allocation75_spill] sm:$0xff] %v19234_v20 }
 0x889   :  { %13873 = vmatmul.mubr.f32.gmra.mrb[14].mxu1 %v19131_v14 }
 0x88a   :  { %13875 = vmatprep.mubr.f32.mxu1 %v19134_v25  ;;  %14938 = vmatpush3.bf16.msra.mxu1 %v14935_v30  ;;  %v19243_v30 = vld [vmem:[#allocation2 + $0x2d1] sm:$0xff] }
 0x88b   :  { %14940 = vmatprep.subr.bf16.mxu1 %v19129_v51  ;;  %21234 = vst [vmem:[#allocation78_spill] sm:$0xff] %v19243_v30 }
 0x88d   :  { %13876 = vmatmul.mubr.f32.gmra.mrb[16].mxu1 %v19138_v31 }
 0x88e   :  { %13878 = vmatprep.mubr.f32.mxu1 %v19141_v9 }
 0x891   :  { %13879 = vmatmul.mubr.f32.gmra.mrb[18].mxu1 %v19144_v55 }
 0x892   :  { %13881 = vmatprep.mubr.f32.mxu1 %v19147_v54 }
 0x895   :  { %13882 = vmatmul.mubr.f32.gmra.mrb[20].mxu1 %v19150_v18 }
 0x896   :  { %13884 = vmatprep.mubr.f32.mxu1 %v19153_v0 }
 0x899   :  { %13885 = vmatmul.mubr.f32.gmra.mrb[22].mxu1 %v19156_v22 }
 0x89a   :  { %13887 = vmatprep.mubr.f32.mxu1 %v19159_v38 }
 0x89d   :  { %13888 = vmatmul.mubr.f32.gmra.mrb[24].mxu1 %v19162_v8 }
 0x89e   :  { %13890 = vmatprep.mubr.f32.mxu1 %v19165_v45 }
 0x8a1   :  { %13891 = vmatmul.mubr.f32.gmra.mrb[26].mxu1 %v19168_v21 }
 0x8a2   :  { %13893 = vmatprep.mubr.f32.mxu1 %v19171_v2 }
 0x8a5   :  { %13894 = vmatmul.mubr.f32.gmra.mrb[28].mxu1 %v19174_v53 }
 0x8a6   :  { %13896 = vmatprep.mubr.f32.mxu1 %v19177_v44 }
 0x8a9   :  { %13897 = vmatmul.mubr.f32.gmra.mrb[30].mxu1 %v19180_v13 }
 0x8aa   :  { %13899 = vmatprep.mubr.f32.mxu1 %v7467_v40  ;;  %v19252_v40 = vld [vmem:[#allocation2 + $0x2f1] sm:$0xff] }
 0x8ab   :  { %21237 = vst [vmem:[#allocation81_spill] sm:$0xff] %v19252_v40 }
 0x8ad   :  { %13900 = vmatmul.mubr.f32.gmra.mrb[32].mxu1 %v7468_v26  ;;  %v19255_v26 = vld [vmem:[#allocation2 + $0x301] sm:$0xff] }
 0x8ae   :  { %13902 = vmatprep.mubr.f32.mxu1 %v19183_v28  ;;  %21238 = vst [vmem:[#allocation82_spill] sm:$0xff] %v19255_v26 }
 0x8b1   :  { %13903 = vmatmul.mubr.f32.gmra.mrb[34].mxu1 %v19186_v29 }
 0x8b2   :  { %13905 = vmatprep.mubr.f32.mxu1 %v19189_v43 }
 0x8b5   :  { %13906 = vmatmul.mubr.f32.gmra.mrb[36].mxu1 %v19192_v3 }
 0x8b6   :  { %13908 = vmatprep.mubr.f32.mxu1 %v19195_v63 }
 0x8b9   :  { %13909 = vmatmul.mubr.f32.gmra.mrb[38].mxu1 %v19198_v34 }
 0x8ba   :  { %13911 = vmatprep.mubr.f32.mxu1 %v19201_v15 }
 0x8bd   :  { %13912 = vmatmul.mubr.f32.gmra.mrb[40].mxu1 %v19204_v60 }
 0x8be   :  { %13914 = vmatprep.mubr.f32.mxu1 %v19207_v16 }
 0x8c1   :  { %13915 = vmatmul.mubr.f32.gmra.mrb[42].mxu1 %v19210_v39 }
 0x8c2   :  { %13917 = vmatprep.mubr.f32.mxu1 %v19213_v4  ;;  %v21252_v4 = vld [vmem:[#allocation22_spill] sm:$0xff] }
 0x8c5   :  { %13918 = vmatmul.mubr.f32.gmra.mrb[44].mxu1 %v19216_v62  ;;  %v21248_v62 = vld [vmem:[#allocation87_spill] sm:$0xff] }
 0x8c6   :  { %13920 = vmatprep.mubr.f32.mxu1 %v19219_v10  ;;  %v21247_v10 = vld [vmem:[#allocation86_spill] sm:$0xff] }
 0x8c9   :  { %13921 = vmatmul.mubr.f32.gmra.mrb[46].mxu1 %v19222_v33  ;;  %v8567_v33 = vld [vmem:[#allocation8 + $0x338] sm:$0xff] }
 0x8ca   :  { %13923 = vmatprep.mubr.f32.mxu1 %v19225_v56  ;;  %v21246_v56 = vld [vmem:[#allocation85_spill] sm:$0xff] }
 0x8cd   :  { %13924 = vmatmul.mubr.f32.gmra.mrb[48].mxu1 %v19228_v23  ;;  %v8565_v23 = vld [vmem:[#allocation8 + $0x328] sm:$0xff] }
 0x8ce   :  { %13926 = vmatprep.mubr.f32.mxu1 %v19231_v17  ;;  %v8564_v17 = vld [vmem:[#allocation8 + $0x320] sm:$0xff] }
 0x8d1   :  { %13927 = vmatmul.mubr.f32.gmra.mrb[50].mxu1 %v19234_v20  ;;  %v21244_v20 = vld [vmem:[#allocation83_spill] sm:$0xff] }
 0x8d2   :  { %13929 = vmatprep.mubr.f32.mxu1 %v19237_v36  ;;  %v8562_v36 = vld [vmem:[#allocation8 + $0x310] sm:$0xff] }
 0x8d5   :  { %13930 = vmatmul.mubr.f32.gmra.mrb[52].mxu1 %v19240_v32  ;;  %v19258_v32 = vld [vmem:[#allocation2 + $0x309] sm:$0xff] }
 0x8d6   :  { %13932 = vmatprep.mubr.f32.mxu1 %v19243_v30  ;;  %21239 = vst [vmem:[#allocation93_spill] sm:$0xff] %v19258_v32  ;;  %v19261_v30 = vld [vmem:[#allocation2 + $0x319] sm:$0xff] }
 0x8d7   :  { %21240 = vst [vmem:[#allocation94_spill] sm:$0xff] %v19261_v30 }
 0x8d9   :  { %13933 = vmatmul.mubr.f32.gmra.mrb[54].mxu1 %v19246_v19  ;;  %v19264_v19 = vld [vmem:[#allocation2 + $0x321] sm:$0xff] }
 0x8da   :  { %13935 = vmatprep.mubr.f32.mxu1 %v19249_v49  ;;  %21241 = vst [vmem:[#allocation95_spill] sm:$0xff] %v19264_v19  ;;  %v19267_v49 = vld [vmem:[#allocation2 + $0x331] sm:$0xff] }
 0x8db   :  { %21242 = vst [vmem:[#allocation96_spill] sm:$0xff] %v19267_v49 }
 0x8dd   :  { %13936 = vmatmul.mubr.f32.gmra.mrb[56].mxu1 %v19252_v40  ;;  %v19270_v40 = vld [vmem:[#allocation2 + $0x339] sm:$0xff] }
 0x8de   :  { %13938 = vmatprep.mubr.f32.mxu1 %v19255_v26  ;;  %21243 = vst [vmem:[#allocation97_spill] sm:$0xff] %v19270_v40  ;;  %v8563_v26 = vld [vmem:[#allocation8 + $0x318] sm:$0xff] }
 0x8e1   :  { %13939 = vmatmul.mubr.f32.gmra.mrb[58].mxu1 %v19258_v32  ;;  %v14943_v32 = vpack.c.bf16 %v8563_v26, %v8562_v36  ;;  %v8568_v36 = vld [vmem:[#allocation8 + $0x340] sm:$0xff]  ;;  %v8569_v26 = vld [vmem:[#allocation8 + $0x348] sm:$0xff] }
 0x8e2   :  { %13941 = vmatprep.mubr.f32.mxu1 %v19261_v30  ;;  %v21245_v30 = vld [vmem:[#allocation84_spill] sm:$0xff] }
 0x8e5   :  { %13942 = vmatmul.mubr.f32.gmra.mrb[60].mxu1 %v19264_v19  ;;  %v14947_v19 = vpack.c.bf16 %v8565_v23, %v8564_v17  ;;  %v8571_v23 = vld [vmem:[#allocation8 + $0x358] sm:$0xff]  ;;  %v21251_v17 = vld [vmem:[#allocation21_spill] sm:$0xff] }
 0x8e6   :  { %13944 = vmatprep.mubr.f32.mxu1 %v19267_v49  ;;  %v8566_v49 = vld [vmem:[#allocation8 + $0x330] sm:$0xff] }
 0x8e9   :  { %13945 = vmatmul.mubr.f32.gmra.mrb[62].mxu1 %v19270_v40  ;;  %v21249_v40 = vld [vmem:[#allocation88_spill] sm:$0xff] }
 0x8ea   :  { %13979 = vmatprep.mubr.f32.mxu1 %v21244_v20  ;;  %v14951_v20 = vpack.c.bf16 %v8567_v33, %v8566_v49  ;;  %v8573_v33 = vld [vmem:[#allocation8 + $0x368] sm:$0xff]  ;;  %v8575_v49 = vld [vmem:[#allocation8 + $0x378] sm:$0xff] }
 0x8ed   :  { %13980 = vmatmul.mubr.f32.vlgmr.msra.gmra.mrb[0].mxu1 %v21245_v30  ;;  %v21250_v30 = vld [vmem:[#allocation89_spill] sm:$0xff] }
 0x8ee   :  { %13982 = vmatprep.mubr.f32.mxu1 %v21246_v56  ;;  %14942 = vmatpush3.bf16.msra.mxu1 %v19129_v51  ;;  %v14955_v51 = vpack.c.bf16 %v8569_v26, %v8568_v36  ;;  %v8570_v56 = vld [vmem:[#allocation8 + $0x350] sm:$0xff]  ;;  %v9091_v36 = vld [vmem:[#allocation8 + $0x388] sm:$0xff]  ;;  %v21254_v26 = vld [vmem:[#allocation24_spill] sm:$0xff] }
 0x8ef   :  { %14944 = vmatprep.subr.bf16.mxu1 %v14943_v32 }
 0x8f1   :  { %13983 = vmatmul.mubr.f32.gmra.mrb[2].mxu1 %v21247_v10  ;;  %v8572_v10 = vld [vmem:[#allocation8 + $0x360] sm:$0xff] }
 0x8f2   :  { %13985 = vmatprep.mubr.f32.mxu1 %v21248_v62  ;;  %14946 = vmatpush3.bf16.msra.mxu1 %v14943_v32  ;;  %v14959_v62 = vpack.c.bf16 %v8571_v23, %v8570_v56  ;;  %v14963_v32 = vpack.c.bf16 %v8573_v33, %v8572_v10  ;;  %v21259_v56 = vld [vmem:[#allocation29_spill] sm:$0xff]  ;;  %v21260_v23 = vld [vmem:[#allocation30_spill] sm:$0xff]  ;;  %v21263_v10 = vld [vmem:[#allocation92_spill] sm:$0xff] }
 0x8f3   :  { %14948 = vmatprep.subr.bf16.mxu1 %v14947_v19  ;;  %v21264_v33 = vld [vmem:[#allocation31_spill] sm:$0xff] }
 0x8f5   :  { %13986 = vmatmul.mubr.f32.gmra.mrb[4].mxu1 %v21249_v40  ;;  %v21253_v40 = vld [vmem:[#allocation23_spill] sm:$0xff] }
 0x8f6   :  { %13988 = vmatprep.mubr.f32.mxu1 %v21250_v30  ;;  %14950 = vmatpush3.bf16.msra.mxu1 %v14947_v19  ;;  %v8574_v19 = vld [vmem:[#allocation8 + $0x370] sm:$0xff]  ;;  %v21255_v30 = vld [vmem:[#allocation25_spill] sm:$0xff] }
 0x8f7   :  { %14952 = vmatprep.subr.bf16.mxu1 %v14951_v20 }
 0x8f9   :  { %13989 = vmatmul.mubr.f32.gmra.mrb[6].mxu1 %v21251_v17  ;;  %v21261_v17 = vld [vmem:[#allocation90_spill] sm:$0xff] }
 0x8fa   :  { %13991 = vmatprep.mubr.f32.mxu1 %v21252_v4  ;;  %14954 = vmatpush3.bf16.msra.mxu1 %v14951_v20  ;;  %v14967_v4 = vpack.c.bf16 %v8575_v49, %v8574_v19  ;;  %v9090_v20 = vld [vmem:[#allocation8 + $0x380] sm:$0xff]  ;;  %v21266_v19 = vld [vmem:[#allocation33_spill] sm:$0xff]  ;;  %v21267_v49 = vld [vmem:[#allocation34_spill] sm:$0xff] }
 0x8fb   :  { %14956 = vmatprep.subr.bf16.mxu1 %v14955_v51 }
 0x8fd   :  { %13992 = vmatmul.mubr.f32.gmra.mrb[8].mxu1 %v18857_v6  ;;  %v19289_v6 = vpack.c.bf16 %v9091_v36, %v9090_v20  ;;  %v21270_v20 = vld [vmem:[#allocation38_spill] sm:$0xff]  ;;  %v19307_v36 = vld [vmem:[#allocation2 + $0x182] sm:$0xff] }
 0x8fe   :  { %13994 = vmatprep.mubr.f32.mxu1 %v18860_v24  ;;  %14958 = vmatpush3.bf16.msra.mxu1 %v14955_v51  ;;  %v21256_v24 = vld [vmem:[#allocation26_spill] sm:$0xff]  ;;  %v21257_v51 = vld [vmem:[#allocation27_spill] sm:$0xff] }
 0x8ff   :  { %14960 = vmatprep.subr.bf16.mxu1 %v14959_v62 }
 0x901   :  { %13995 = vmatmul.mubr.f32.gmra.mrb[10].mxu1 %v18863_v46  ;;  %v21258_v46 = vld [vmem:[#allocation28_spill] sm:$0xff] }
 0x902   :  { %13997 = vmatprep.mubr.f32.mxu1 %v21253_v40  ;;  %14962 = vmatpush3.bf16.msra.mxu1 %v14959_v62  ;;  %v21262_v62 = vld [vmem:[#allocation91_spill] sm:$0xff]  ;;  %v21268_v40 = vld [vmem:[#allocation36_spill] sm:$0xff] }
 0x903   :  { %14964 = vmatprep.subr.bf16.mxu1 %v14963_v32 }
 0x905   :  { %13998 = vmatmul.mubr.f32.gmra.mrb[12].mxu1 %v21254_v26  ;;  %v19310_v26 = vld [vmem:[#allocation2 + $0x18a] sm:$0xff] }
 0x906   :  { %14000 = vmatprep.mubr.f32.mxu1 %v21255_v30  ;;  %14966 = vmatpush3.bf16.msra.mxu1 %v14963_v32  ;;  %v21265_v32 = vld [vmem:[#allocation32_spill] sm:$0xff]  ;;  %v21271_v30 = vld [vmem:[#allocation37_spill] sm:$0xff] }
 0x907   :  { %14968 = vmatprep.subr.bf16.mxu1 %v14967_v4 }
 0x909   :  { %14001 = vmatmul.mubr.f32.gmra.mrb[14].mxu1 %v21256_v24  ;;  %v21272_v24 = vld [vmem:[#allocation40_spill] sm:$0xff] }
 0x90a   :  { %14003 = vmatprep.mubr.f32.mxu1 %v21257_v51  ;;  %14970 = vmatpush3.bf16.msra.mxu1 %v14967_v4  ;;  %v21269_v4 = vld [vmem:[#allocation35_spill] sm:$0xff] }
 0x90b   :  { %14972 = vmatprep.subr.bf16.mxu1 %v19289_v6  ;;  %v21273_v51 = vld [vmem:[#allocation39_spill] sm:$0xff] }
 0x90d   :  { %14004 = vmatmul.mubr.f32.gmra.mrb[16].mxu1 %v21258_v46  ;;  %v21274_v46 = vld [vmem:[#allocation42_spill] sm:$0xff] }
 0x90e   :  { %14006 = vmatprep.mubr.f32.mxu1 %v21259_v56  ;;  %v21275_v56 = vld [vmem:[#allocation41_spill] sm:$0xff] }
 0x911   :  { %14007 = vmatmul.mubr.f32.gmra.mrb[18].mxu1 %v21260_v23  ;;  %v21276_v23 = vld [vmem:[#allocation44_spill] sm:$0xff] }
 0x912   :  { %14009 = vmatprep.mubr.f32.mxu1 %v21261_v17  ;;  %v21277_v17 = vld [vmem:[#allocation43_spill] sm:$0xff] }
 0x915   :  { %14010 = vmatmul.mubr.f32.gmra.mrb[20].mxu1 %v21262_v62  ;;  %v21278_v62 = vld [vmem:[#allocation46_spill] sm:$0xff] }
 0x916   :  { %14012 = vmatprep.mubr.f32.mxu1 %v21263_v10  ;;  %v21279_v10 = vld [vmem:[#allocation45_spill] sm:$0xff] }
 0x919   :  { %14013 = vmatmul.mubr.f32.gmra.mrb[22].mxu1 %v21264_v33  ;;  %v21280_v33 = vld [vmem:[#allocation48_spill] sm:$0xff] }
 0x91a   :  { %14015 = vmatprep.mubr.f32.mxu1 %v21265_v32  ;;  %v21281_v32 = vld [vmem:[#allocation47_spill] sm:$0xff] }
 0x91d   :  { %14016 = vmatmul.mubr.f32.gmra.mrb[24].mxu1 %v21266_v19  ;;  %v21282_v19 = vld [vmem:[#allocation50_spill] sm:$0xff] }
 0x91e   :  { %14018 = vmatprep.mubr.f32.mxu1 %v21267_v49  ;;  %v21283_v49 = vld [vmem:[#allocation49_spill] sm:$0xff] }
 0x921   :  { %14019 = vmatmul.mubr.f32.gmra.mrb[26].mxu1 %v21268_v40  ;;  %v21284_v40 = vld [vmem:[#allocation52_spill] sm:$0xff] }
 0x922   :  { %14021 = vmatprep.mubr.f32.mxu1 %v21269_v4  ;;  %v21285_v4 = vld [vmem:[#allocation51_spill] sm:$0xff] }
 0x925   :  { %14022 = vmatmul.mubr.f32.gmra.mrb[28].mxu1 %v21270_v20  ;;  %v21286_v20 = vld [vmem:[#allocation54_spill] sm:$0xff] }
 0x926   :  { %14024 = vmatprep.mubr.f32.mxu1 %v19307_v36 }
 0x929   :  { %14025 = vmatmul.mubr.f32.gmra.mrb[30].mxu1 %v19310_v26 }
 0x92a   :  { %14027 = vmatprep.mubr.f32.mxu1 %v21271_v30  ;;  %v21287_v30 = vld [vmem:[#allocation53_spill] sm:$0xff] }
 0x92d   :  { %14028 = vmatmul.mubr.f32.gmra.mrb[32].mxu1 %v21272_v24  ;;  %v21288_v24 = vld [vmem:[#allocation56_spill] sm:$0xff] }
 0x92e   :  { %14030 = vmatprep.mubr.f32.mxu1 %v21273_v51  ;;  %v21289_v51 = vld [vmem:[#allocation55_spill] sm:$0xff] }
 0x931   :  { %14031 = vmatmul.mubr.f32.gmra.mrb[34].mxu1 %v21274_v46  ;;  %v21290_v46 = vld [vmem:[#allocation58_spill] sm:$0xff] }
 0x932   :  { %14033 = vmatprep.mubr.f32.mxu1 %v21275_v56  ;;  %v21291_v56 = vld [vmem:[#allocation59_spill] sm:$0xff] }
 0x935   :  { %14034 = vmatmul.mubr.f32.gmra.mrb[36].mxu1 %v21276_v23  ;;  %v21292_v23 = vld [vmem:[#allocation60_spill] sm:$0xff] }
 0x936   :  { %14036 = vmatprep.mubr.f32.mxu1 %v21277_v17  ;;  %v21293_v17 = vld [vmem:[#allocation61_spill] sm:$0xff] }
 0x939   :  { %14037 = vmatmul.mubr.f32.gmra.mrb[38].mxu1 %v21278_v62  ;;  %v21294_v62 = vld [vmem:[#allocation62_spill] sm:$0xff] }
 0x93a   :  { %14039 = vmatprep.mubr.f32.mxu1 %v21279_v10  ;;  %v21295_v10 = vld [vmem:[#allocation63_spill] sm:$0xff] }
 0x93d   :  { %14040 = vmatmul.mubr.f32.gmra.mrb[40].mxu1 %v21280_v33  ;;  %v21296_v33 = vld [vmem:[#allocation65_spill] sm:$0xff] }
 0x93e   :  { %14042 = vmatprep.mubr.f32.mxu1 %v21281_v32  ;;  %v21297_v32 = vld [vmem:[#allocation66_spill] sm:$0xff] }
 0x941   :  { %14043 = vmatmul.mubr.f32.gmra.mrb[42].mxu1 %v21282_v19  ;;  %v21298_v19 = vld [vmem:[#allocation68_spill] sm:$0xff] }
 0x942   :  { %14045 = vmatprep.mubr.f32.mxu1 %v21283_v49  ;;  %v21299_v49 = vld [vmem:[#allocation69_spill] sm:$0xff] }
 0x945   :  { %14046 = vmatmul.mubr.f32.gmra.mrb[44].mxu1 %v21284_v40  ;;  %v19343_v40 = vld [vmem:[#allocation2 + $0x332] sm:$0xff] }
 0x946   :  { %14048 = vmatprep.mubr.f32.mxu1 %v21285_v4  ;;  %v19346_v4 = vld [vmem:[#allocation2 + $0x33a] sm:$0xff] }
 0x949   :  { %14049 = vmatmul.mubr.f32.gmra.mrb[46].mxu1 %v21286_v20  ;;  %v9092_v20 = vld [vmem:[#allocation8 + $0x390] sm:$0xff] }
 0x94a   :  { %14051 = vmatprep.mubr.f32.mxu1 %v21287_v30  ;;  %v9093_v30 = vld [vmem:[#allocation8 + $0x398] sm:$0xff] }
 0x94d   :  { %14052 = vmatmul.mubr.f32.gmra.mrb[48].mxu1 %v21288_v24  ;;  %v8495_v24 = vld [vmem:[#allocation2 + $0x30] sm:$0xff] }
 0x94e   :  { %14054 = vmatprep.mubr.f32.mxu1 %v21289_v51  ;;  %v14975_v51 = vpack.c.bf16 %v9093_v30, %v9092_v20  ;;  %v9098_v20 = vld [vmem:[#allocation8 + $0x3c0] sm:$0xff]  ;;  %v9099_v30 = vld [vmem:[#allocation8 + $0x3c8] sm:$0xff] }
 0x951   :  { %14055 = vmatmul.mubr.f32.gmra.mrb[50].mxu1 %v21290_v46  ;;  %v8496_v46 = vld [vmem:[#allocation2 + $0x38] sm:$0xff] }
 0x952   :  { %14057 = vmatprep.mubr.f32.mxu1 %v21291_v56  ;;  %v9094_v56 = vld [vmem:[#allocation8 + $0x3a0] sm:$0xff] }
 0x955   :  { %14058 = vmatmul.mubr.f32.gmra.mrb[52].mxu1 %v21292_v23  ;;  %v9095_v23 = vld [vmem:[#allocation8 + $0x3a8] sm:$0xff] }
 0x956   :  { %14060 = vmatprep.mubr.f32.mxu1 %v21293_v17  ;;  %v8497_v17 = vld [vmem:[#allocation2 + $0x48] sm:$0xff] }
 0x959   :  { %14061 = vmatmul.mubr.f32.gmra.mrb[54].mxu1 %v21294_v62  ;;  %v8498_v62 = vld [vmem:[#allocation2 + $0x50] sm:$0xff] }
 0x95a   :  { %14063 = vmatprep.mubr.f32.mxu1 %v21295_v10  ;;  %v9096_v10 = vld [vmem:[#allocation8 + $0x3b0] sm:$0xff] }
 0x95d   :  { %14064 = vmatmul.mubr.f32.gmra.mrb[56].mxu1 %v21296_v33  ;;  %v9097_v33 = vld [vmem:[#allocation8 + $0x3b8] sm:$0xff] }
 0x95e   :  { %14066 = vmatprep.mubr.f32.mxu1 %v21297_v32  ;;  %v8499_v32 = vld [vmem:[#allocation2 + $0x60] sm:$0xff] }
 0x961   :  { %14067 = vmatmul.mubr.f32.gmra.mrb[58].mxu1 %v21298_v19  ;;  %v14983_v19 = vpack.c.bf16 %v9097_v33, %v9096_v10  ;;  %v9102_v10 = vld [vmem:[#allocation8 + $0x3e0] sm:$0xff]  ;;  %v9103_v33 = vld [vmem:[#allocation8 + $0x3e8] sm:$0xff] }
 0x962   :  { %14069 = vmatprep.mubr.f32.mxu1 %v21299_v49  ;;  %v8500_v49 = vld [vmem:[#allocation2 + $0x68] sm:$0xff] }
 0x965   :  { %14070 = vmatmul.mubr.f32.gmra.mrb[60].mxu1 %v19010_v27  ;;  %v14979_v27 = vpack.c.bf16 %v9095_v23, %v9094_v56  ;;  %v9100_v56 = vld [vmem:[#allocation8 + $0x3d0] sm:$0xff]  ;;  %v9101_v23 = vld [vmem:[#allocation8 + $0x3d8] sm:$0xff] }
 0x966   :  { %14072 = vmatprep.mubr.f32.mxu1 %v19343_v40 }
 0x969   :  { %14073 = vmatmul.mubr.f32.gmra.mrb[62].mxu1 %v19346_v4 }
 0x96a   :  { %14107 = vmatprep.mubr.f32.mxu1 %v8495_v24  ;;  %v8501_v24 = vld [vmem:[#allocation2 + $0x78] sm:$0xff] }
 0x96d   :  { %14108 = vmatmul.mubr.f32.vlgmr.msra.gmra.mrb[0].mxu1 %v8496_v46  ;;  %v8502_v46 = vld [vmem:[#allocation2 + $0x80] sm:$0xff] }
 0x96e   :  { %14110 = vmatprep.mubr.f32.mxu1 %v8497_v17  ;;  %14974 = vmatpush3.bf16.msra.mxu1 %v19289_v6  ;;  %v14987_v6 = vpack.c.bf16 %v9099_v30, %v9098_v20  ;;  %v8503_v17 = vld [vmem:[#allocation2 + $0x90] sm:$0xff]  ;;  %v9105_v30 = vld [vmem:[#allocation8 + $0x3f8] sm:$0xff] }
 0x96f   :  { %14976 = vmatprep.subr.bf16.mxu1 %v14975_v51  ;;  %v9104_v20 = vld [vmem:[#allocation8 + $0x3f0] sm:$0xff] }
 0x971   :  { %14111 = vmatmul.mubr.f32.gmra.mrb[2].mxu1 %v8498_v62  ;;  %v8504_v62 = vld [vmem:[#allocation2 + $0x98] sm:$0xff] }
 0x972   :  { %14113 = vmatprep.mubr.f32.mxu1 %v8499_v32  ;;  %14978 = vmatpush3.bf16.msra.mxu1 %v14975_v51  ;;  %v14991_v51 = vpack.c.bf16 %v9101_v23, %v9100_v56  ;;  %v8505_v32 = vld [vmem:[#allocation2 + $0xa8] sm:$0xff]  ;;  %v9620_v56 = vld [vmem:[#allocation8 + $0x400] sm:$0xff] }
 0x973   :  { %14980 = vmatprep.subr.bf16.mxu1 %v14979_v27  ;;  %v9621_v23 = vld [vmem:[#allocation8 + $0x408] sm:$0xff] }
 0x975   :  { %14114 = vmatmul.mubr.f32.gmra.mrb[4].mxu1 %v8500_v49  ;;  %v8506_v49 = vld [vmem:[#allocation2 + $0xb0] sm:$0xff] }
 0x976   :  { %14116 = vmatprep.mubr.f32.mxu1 %v8501_v24  ;;  %14982 = vmatpush3.bf16.msra.mxu1 %v14979_v27  ;;  %v14995_v27 = vpack.c.bf16 %v9103_v33, %v9102_v10  ;;  %v8507_v24 = vld [vmem:[#allocation2 + $0xc0] sm:$0xff]  ;;  %v8511_v10 = vld [vmem:[#allocation2 + $0xf0] sm:$0xff]  ;;  %v8513_v33 = vld [vmem:[#allocation2 + $0x108] sm:$0xff] }
 0x977   :  { %14984 = vmatprep.subr.bf16.mxu1 %v14983_v19 }
 0x979   :  { %14117 = vmatmul.mubr.f32.gmra.mrb[6].mxu1 %v8502_v46  ;;  %v8508_v46 = vld [vmem:[#allocation2 + $0xc8] sm:$0xff] }
 0x97a   :  { %14119 = vmatprep.mubr.f32.mxu1 %v8503_v17  ;;  %14986 = vmatpush3.bf16.msra.mxu1 %v14983_v19  ;;  %v14999_v19 = vpack.c.bf16 %v9105_v30, %v9104_v20  ;;  %v8509_v17 = vld [vmem:[#allocation2 + $0xd8] sm:$0xff]  ;;  %v8516_v20 = vld [vmem:[#allocation2 + $0x128] sm:$0xff]  ;;  %v8518_v30 = vld [vmem:[#allocation2 + $0x140] sm:$0xff] }
 0x97b   :  { %14988 = vmatprep.subr.bf16.mxu1 %v14987_v6 }
 0x97d   :  { %14120 = vmatmul.mubr.f32.gmra.mrb[8].mxu1 %v8504_v62  ;;  %v8510_v62 = vld [vmem:[#allocation2 + $0xe0] sm:$0xff] }
 0x97e   :  { %14122 = vmatprep.mubr.f32.mxu1 %v8505_v32  ;;  %14990 = vmatpush3.bf16.msra.mxu1 %v14987_v6  ;;  %v19350_v6 = vpack.c.bf16 %v9621_v23, %v9620_v56  ;;  %v8514_v32 = vld [vmem:[#allocation2 + $0x110] sm:$0xff]  ;;  %v19355_v23 = vld [vmem:[#allocation2] sm:$0xff] }
 0x97f   :  { %14992 = vmatprep.subr.bf16.mxu1 %v14991_v51  ;;  %v8522_v56 = vld [vmem:[#allocation2 + $0x170] sm:$0xff] }
 0x981   :  { %14123 = vmatmul.mubr.f32.gmra.mrb[10].mxu1 %v8506_v49  ;;  %v8515_v49 = vld [vmem:[#allocation2 + $0x120] sm:$0xff] }
 0x982   :  { %14125 = vmatprep.mubr.f32.mxu1 %v8507_v24  ;;  %14994 = vmatpush3.bf16.msra.mxu1 %v14991_v51  ;;  %v8512_v51 = vld [vmem:[#allocation2 + $0xf8] sm:$0xff]  ;;  %v8519_v24 = vld [vmem:[#allocation2 + $0x150] sm:$0xff] }
 0x983   :  { %14996 = vmatprep.subr.bf16.mxu1 %v14995_v27 }
 0x985   :  { %14126 = vmatmul.mubr.f32.gmra.mrb[12].mxu1 %v8508_v46  ;;  %v8520_v46 = vld [vmem:[#allocation2 + $0x158] sm:$0xff] }
 0x986   :  { %14128 = vmatprep.mubr.f32.mxu1 %v8509_v17  ;;  %14998 = vmatpush3.bf16.msra.mxu1 %v14995_v27  ;;  %v8517_v27 = vld [vmem:[#allocation2 + $0x138] sm:$0xff]  ;;  %v8527_v17 = vld [vmem:[#allocation2 + $0x1e0] sm:$0xff] }
 0x987   :  { %15000 = vmatprep.subr.bf16.mxu1 %v14999_v19 }
 0x989   :  { %14129 = vmatmul.mubr.f32.gmra.mrb[14].mxu1 %v8510_v62  ;;  %v8528_v62 = vld [vmem:[#allocation2 + $0x1e8] sm:$0xff] }
 0x98a   :  { %14131 = vmatprep.mubr.f32.mxu1 %v8511_v10  ;;  %15002 = vmatpush3.bf16.msra.mxu1 %v14999_v19  ;;  %v8521_v19 = vld [vmem:[#allocation2 + $0x168] sm:$0xff]  ;;  %v8529_v10 = vld [vmem:[#allocation2 + $0x1f8] sm:$0xff] }
 0x98b   :  { %15004 = vmatprep.subr.bf16.mxu1 %v19350_v6 }
 0x98d   :  { %14132 = vmatmul.mubr.f32.gmra.mrb[16].mxu1 %v8512_v51  ;;  %v8530_v51 = vld [vmem:[#allocation2 + $0x200] sm:$0xff] }
 0x98e   :  { %14134 = vmatprep.mubr.f32.mxu1 %v8513_v33  ;;  %v8531_v33 = vld [vmem:[#allocation2 + $0x210] sm:$0xff] }
 0x991   :  { %14135 = vmatmul.mubr.f32.gmra.mrb[18].mxu1 %v8514_v32  ;;  %v8532_v32 = vld [vmem:[#allocation2 + $0x218] sm:$0xff] }
 0x992   :  { %14137 = vmatprep.mubr.f32.mxu1 %v8515_v49  ;;  %v8535_v49 = vld [vmem:[#allocation2 + $0x240] sm:$0xff] }
 0x995   :  { %14138 = vmatmul.mubr.f32.gmra.mrb[20].mxu1 %v8516_v20  ;;  %v8536_v20 = vld [vmem:[#allocation2 + $0x248] sm:$0xff] }
 0x996   :  { %14140 = vmatprep.mubr.f32.mxu1 %v8517_v27  ;;  %v8537_v27 = vld [vmem:[#allocation2 + $0x258] sm:$0xff] }
 0x999   :  { %14141 = vmatmul.mubr.f32.gmra.mrb[22].mxu1 %v8518_v30  ;;  %v8538_v30 = vld [vmem:[#allocation2 + $0x260] sm:$0xff] }
 0x99a   :  { %14143 = vmatprep.mubr.f32.mxu1 %v8519_v24  ;;  %v8539_v24 = vld [vmem:[#allocation2 + $0x270] sm:$0xff] }
 0x99d   :  { %14144 = vmatmul.mubr.f32.gmra.mrb[24].mxu1 %v8520_v46  ;;  %v8540_v46 = vld [vmem:[#allocation2 + $0x278] sm:$0xff] }
 0x99e   :  { %14146 = vmatprep.mubr.f32.mxu1 %v8521_v19  ;;  %v8541_v19 = vld [vmem:[#allocation2 + $0x288] sm:$0xff] }
 0x9a1   :  { %14147 = vmatmul.mubr.f32.gmra.mrb[26].mxu1 %v8522_v56  ;;  %v8542_v56 = vld [vmem:[#allocation2 + $0x290] sm:$0xff] }
 0x9a2   :  { %14149 = vmatprep.mubr.f32.mxu1 %v19047_v37  ;;  %v8533_v37 = vld [vmem:[#allocation2 + $0x228] sm:$0xff] }
 0x9a5   :  { %14150 = vmatmul.mubr.f32.gmra.mrb[28].mxu1 %v19050_v5  ;;  %v8534_v5 = vld [vmem:[#allocation2 + $0x230] sm:$0xff] }
 0x9a6   :  { %14152 = vmatprep.mubr.f32.mxu1 %v19355_v23 }
 0x9a9   :  { %14153 = vmatmul.mubr.f32.gmra.mrb[30].mxu1 %v19355_v23 }
 0x9aa   :  { %14155 = vmatprep.mubr.f32.mxu1 %v8527_v17  ;;  %v8543_v17 = vld [vmem:[#allocation2 + $0x2a0] sm:$0xff] }
 0x9ad   :  { %14156 = vmatmul.mubr.f32.gmra.mrb[32].mxu1 %v8528_v62  ;;  %v8544_v62 = vld [vmem:[#allocation2 + $0x2a8] sm:$0xff] }
 0x9ae   :  { %14158 = vmatprep.mubr.f32.mxu1 %v8529_v10  ;;  %v8545_v10 = vld [vmem:[#allocation2 + $0x2b8] sm:$0xff] }
 0x9b1   :  { %14159 = vmatmul.mubr.f32.gmra.mrb[34].mxu1 %v8530_v51  ;;  %v8546_v51 = vld [vmem:[#allocation2 + $0x2c0] sm:$0xff] }
 0x9b2   :  { %14161 = vmatprep.mubr.f32.mxu1 %v8531_v33  ;;  %v8547_v33 = vld [vmem:[#allocation2 + $0x2d0] sm:$0xff] }
 0x9b5   :  { %14162 = vmatmul.mubr.f32.gmra.mrb[36].mxu1 %v8532_v32  ;;  %v8548_v32 = vld [vmem:[#allocation2 + $0x2d8] sm:$0xff] }
 0x9b6   :  { %14164 = vmatprep.mubr.f32.mxu1 %v8533_v37  ;;  %v8549_v37 = vld [vmem:[#allocation2 + $0x2e8] sm:$0xff] }
 0x9b9   :  { %14165 = vmatmul.mubr.f32.gmra.mrb[38].mxu1 %v8534_v5  ;;  %v8550_v5 = vld [vmem:[#allocation2 + $0x2f0] sm:$0xff] }
 0x9ba   :  { %14167 = vmatprep.mubr.f32.mxu1 %v8535_v49  ;;  %v8551_v49 = vld [vmem:[#allocation2 + $0x300] sm:$0xff] }
 0x9bd   :  { %14168 = vmatmul.mubr.f32.gmra.mrb[40].mxu1 %v8536_v20  ;;  %v8552_v20 = vld [vmem:[#allocation2 + $0x308] sm:$0xff] }
 0x9be   :  { %14170 = vmatprep.mubr.f32.mxu1 %v8537_v27  ;;  %v8553_v27 = vld [vmem:[#allocation2 + $0x318] sm:$0xff] }
 0x9c1   :  { %14171 = vmatmul.mubr.f32.gmra.mrb[42].mxu1 %v8538_v30  ;;  %v8554_v30 = vld [vmem:[#allocation2 + $0x320] sm:$0xff] }
 0x9c2   :  { %14173 = vmatprep.mubr.f32.mxu1 %v8539_v24  ;;  %v9622_v24 = vld [vmem:[#allocation8 + $0x410] sm:$0xff] }
 0x9c5   :  { %14174 = vmatmul.mubr.f32.gmra.mrb[44].mxu1 %v8540_v46  ;;  %v9623_v46 = vld [vmem:[#allocation8 + $0x418] sm:$0xff] }
 0x9c6   :  { %14176 = vmatprep.mubr.f32.mxu1 %v8541_v19  ;;  %v15007_v19 = vpack.c.bf16 %v9623_v46, %v9622_v24  ;;  %v9570_v24 = vld [vmem:[#allocation2 + $0xe2] sm:$0xff]  ;;  %v9571_v46 = vld [vmem:[#allocation2 + $0xf2] sm:$0xff] }
 0x9c9   :  { %14177 = vmatmul.mubr.f32.gmra.mrb[46].mxu1 %v8542_v56  ;;  %v9624_v56 = vld [vmem:[#allocation8 + $0x420] sm:$0xff] }
 0x9ca   :  { %14179 = vmatprep.mubr.f32.mxu1 %v8543_v17  ;;  %v9625_v17 = vld [vmem:[#allocation8 + $0x428] sm:$0xff] }
 0x9cd   :  { %14180 = vmatmul.mubr.f32.gmra.mrb[48].mxu1 %v8544_v62  ;;  %v9627_v62 = vld [vmem:[#allocation8 + $0x438] sm:$0xff] }
 0x9ce   :  { %14182 = vmatprep.mubr.f32.mxu1 %v8545_v10  ;;  %v9629_v10 = vld [vmem:[#allocation8 + $0x448] sm:$0xff] }
 0x9d1   :  { %14183 = vmatmul.mubr.f32.gmra.mrb[50].mxu1 %v8546_v51  ;;  %v9633_v51 = vld [vmem:[#allocation8 + $0x468] sm:$0xff] }
 0x9d2   :  { %14185 = vmatprep.mubr.f32.mxu1 %v8547_v33  ;;  %v9635_v33 = vld [vmem:[#allocation8 + $0x478] sm:$0xff] }
 0x9d5   :  { %14186 = vmatmul.mubr.f32.gmra.mrb[52].mxu1 %v8548_v32  ;;  %v9563_v32 = vld [vmem:[#allocation2 + $0x92] sm:$0xff] }
 0x9d6   :  { %14188 = vmatprep.mubr.f32.mxu1 %v8549_v37  ;;  %v9564_v37 = vld [vmem:[#allocation2 + $0x9a] sm:$0xff] }
 0x9d9   :  { %14189 = vmatmul.mubr.f32.gmra.mrb[54].mxu1 %v8550_v5  ;;  %v9565_v5 = vld [vmem:[#allocation2 + $0xaa] sm:$0xff] }
 0x9da   :  { %14191 = vmatprep.mubr.f32.mxu1 %v8551_v49  ;;  %v9566_v49 = vld [vmem:[#allocation2 + $0xb2] sm:$0xff] }
 0x9dd   :  { %14192 = vmatmul.mubr.f32.gmra.mrb[56].mxu1 %v8552_v20  ;;  %v9567_v20 = vld [vmem:[#allocation2 + $0xc2] sm:$0xff] }
 0x9de   :  { %14194 = vmatprep.mubr.f32.mxu1 %v8553_v27  ;;  %v9568_v27 = vld [vmem:[#allocation2 + $0xca] sm:$0xff] }
 0x9e1   :  { %14195 = vmatmul.mubr.f32.gmra.mrb[58].mxu1 %v8554_v30  ;;  %v9569_v30 = vld [vmem:[#allocation2 + $0xda] sm:$0xff] }
 0x9e2   :  { %14197 = vmatprep.mubr.f32.mxu1 %v19083_v11  ;;  %v15011_v11 = vpack.c.bf16 %v9625_v17, %v9624_v56  ;;  %v9573_v56 = vld [vmem:[#allocation2 + $0x10a] sm:$0xff]  ;;  %v9574_v17 = vld [vmem:[#allocation2 + $0x112] sm:$0xff] }
 0x9e5   :  { %14198 = vmatmul.mubr.f32.gmra.mrb[60].mxu1 %v19086_v61  ;;  %v9626_v61 = vld [vmem:[#allocation8 + $0x430] sm:$0xff] }
 0x9e6   :  { %14200 = vmatprep.mubr.f32.mxu1 %v19355_v23 }
 0x9e9   :  { %14201 = vmatmul.mubr.f32.gmra.mrb[62].mxu1 %v19355_v23  ;;  %v9628_v23 = vld [vmem:[#allocation8 + $0x440] sm:$0xff] }
 0x9ea   :  { %14235 = vmatprep.mubr.f32.mxu1 %v19089_v52  ;;  %v15015_v52 = vpack.c.bf16 %v9627_v62, %v9626_v61  ;;  %v9576_v61 = vld [vmem:[#allocation2 + $0x12a] sm:$0xff]  ;;  %v9577_v62 = vld [vmem:[#allocation2 + $0x13a] sm:$0xff] }
 0x9ed   :  { %14236 = vmatmul.mubr.f32.vlgmr.msra.gmra.mrb[0].mxu1 %v19093_v57  ;;  %v15019_v57 = vpack.c.bf16 %v9629_v10, %v9628_v23  ;;  %v9579_v23 = vld [vmem:[#allocation2 + $0x152] sm:$0xff]  ;;  %v9580_v10 = vld [vmem:[#allocation2 + $0x15a] sm:$0xff] }
 0x9ee   :  { %14238 = vmatprep.mubr.f32.mxu1 %v19096_v12  ;;  %15006 = vmatpush3.bf16.msra.mxu1 %v19350_v6  ;;  %v9630_v12 = vld [vmem:[#allocation8 + $0x450] sm:$0xff]  ;;  %v9631_v6 = vld [vmem:[#allocation8 + $0x458] sm:$0xff] }
 0x9ef   :  { %15008 = vmatprep.subr.bf16.mxu1 %v15007_v19 }
 0x9f1   :  { %14239 = vmatmul.mubr.f32.gmra.mrb[2].mxu1 %v19099_v1  ;;  %v15023_v1 = vpack.c.bf16 %v9631_v6, %v9630_v12  ;;  %v9582_v12 = vld [vmem:[#allocation2 + $0x172] sm:$0xff]  ;;  %v9585_v6 = vld [vmem:[#allocation2 + $0x19a] sm:$0xff] }
 0x9f2   :  { %14241 = vmatprep.mubr.f32.mxu1 %v19102_v59  ;;  %15010 = vmatpush3.bf16.msra.mxu1 %v15007_v19  ;;  %v9632_v59 = vld [vmem:[#allocation8 + $0x460] sm:$0xff] }
 0x9f3   :  { %15012 = vmatprep.subr.bf16.mxu1 %v15011_v11  ;;  %v9572_v19 = vld [vmem:[#allocation2 + $0xfa] sm:$0xff] }
 0x9f5   :  { %14242 = vmatmul.mubr.f32.gmra.mrb[4].mxu1 %v19105_v35  ;;  %v15027_v35 = vpack.c.bf16 %v9633_v51, %v9632_v59  ;;  %v9587_v59 = vld [vmem:[#allocation2 + $0x1e2] sm:$0xff]  ;;  %v9588_v51 = vld [vmem:[#allocation2 + $0x1ea] sm:$0xff] }
 0x9f6   :  { %14244 = vmatprep.mubr.f32.mxu1 %v19108_v50  ;;  %15014 = vmatpush3.bf16.msra.mxu1 %v15011_v11  ;;  %v9634_v50 = vld [vmem:[#allocation8 + $0x470] sm:$0xff]  ;;  %v9575_v11 = vld [vmem:[#allocation2 + $0x122] sm:$0xff] }
 0x9f7   :  { %15016 = vmatprep.subr.bf16.mxu1 %v15015_v52 }
 0x9f9   :  { %14245 = vmatmul.mubr.f32.gmra.mrb[6].mxu1 %v19111_v47  ;;  %v15031_v47 = vpack.c.bf16 %v9635_v33, %v9634_v50  ;;  %v9590_v50 = vld [vmem:[#allocation2 + $0x202] sm:$0xff]  ;;  %v9591_v33 = vld [vmem:[#allocation2 + $0x212] sm:$0xff] }
 0x9fa   :  { %14247 = vmatprep.mubr.f32.mxu1 %v19114_v48  ;;  %15018 = vmatpush3.bf16.msra.mxu1 %v15015_v52  ;;  %v9055_v48 = vld [vmem:[#allocation2 + $0x199] sm:$0xff]  ;;  %v9578_v52 = vld [vmem:[#allocation2 + $0x142] sm:$0xff] }
 0x9fb   :  { %15020 = vmatprep.subr.bf16.mxu1 %v15019_v57 }
 0x9fd   :  { %14248 = vmatmul.mubr.f32.gmra.mrb[8].mxu1 %v19117_v42  ;;  %v9056_v42 = vld [vmem:[#allocation2 + $0x1a1] sm:$0xff] }
 0x9fe   :  { %14250 = vmatprep.mubr.f32.mxu1 %v19120_v7  ;;  %15022 = vmatpush3.bf16.msra.mxu1 %v15019_v57  ;;  %v21300_v7 = vld [vmem:[#allocation70_spill] sm:$0xff] }
 0x9ff   :  { %15024 = vmatprep.subr.bf16.mxu1 %v15023_v1  ;;  %v9581_v57 = vld [vmem:[#allocation2 + $0x16a] sm:$0xff] }
 0xa01   :  { %14251 = vmatmul.mubr.f32.gmra.mrb[10].mxu1 %v19123_v41  ;;  %v21301_v41 = vld [vmem:[#allocation71_spill] sm:$0xff] }
 0xa02   :  { %14253 = vmatprep.mubr.f32.mxu1 %v19126_v58  ;;  %15026 = vmatpush3.bf16.msra.mxu1 %v15023_v1  ;;  %v21302_v58 = vld [vmem:[#allocation72_spill] sm:$0xff] }
 0xa03   :  { %15028 = vmatprep.subr.bf16.mxu1 %v15027_v35  ;;  %v9586_v1 = vld [vmem:[#allocation2 + $0x1a2] sm:$0xff] }
 0xa05   :  { %14254 = vmatmul.mubr.f32.gmra.mrb[12].mxu1 %v19131_v14  ;;  %v21303_v14 = vld [vmem:[#allocation73_spill] sm:$0xff] }
 0xa06   :  { %14256 = vmatprep.mubr.f32.mxu1 %v19134_v25  ;;  %15030 = vmatpush3.bf16.msra.mxu1 %v15027_v35  ;;  %v21304_v25 = vld [vmem:[#allocation64_spill] sm:$0xff] }
 0xa07   :  { %15032 = vmatprep.subr.bf16.mxu1 %v15031_v47  ;;  %v9589_v35 = vld [vmem:[#allocation2 + $0x1fa] sm:$0xff] }
 0xa09   :  { %14257 = vmatmul.mubr.f32.gmra.mrb[14].mxu1 %v19138_v31  ;;  %v21305_v31 = vld [vmem:[#allocation67_spill] sm:$0xff] }
 0xa0a   :  { %14259 = vmatprep.mubr.f32.mxu1 %v19141_v9  ;;  %15034 = vmatpush3.bf16.msra.mxu1 %v15031_v47  ;;  %v21306_v9 = vld [vmem:[#allocation74_spill] sm:$0xff]  ;;  %v9592_v47 = vld [vmem:[#allocation2 + $0x21a] sm:$0xff] }
 0xa0d   :  { %14260 = vmatmul.mubr.f32.gmra.mrb[16].mxu1 %v19144_v55  ;;  %v21307_v55 = vld [vmem:[#allocation75_spill] sm:$0xff] }
 0xa0e   :  { %14262 = vmatprep.mubr.f32.mxu1 %v19147_v54  ;;  %v21308_v54 = vld [vmem:[#allocation76_spill] sm:$0xff] }
 0xa11   :  { %14263 = vmatmul.mubr.f32.gmra.mrb[18].mxu1 %v19150_v18  ;;  %v21309_v18 = vld [vmem:[#allocation77_spill] sm:$0xff] }
 0xa12   :  { %14265 = vmatprep.mubr.f32.mxu1 %v19153_v0  ;;  %v21310_v0 = vld [vmem:[#allocation78_spill] sm:$0xff] }
 0xa15   :  { %14266 = vmatmul.mubr.f32.gmra.mrb[20].mxu1 %v19156_v22  ;;  %v21311_v22 = vld [vmem:[#allocation79_spill] sm:$0xff] }
 0xa16   :  { %14268 = vmatprep.mubr.f32.mxu1 %v19159_v38  ;;  %v21312_v38 = vld [vmem:[#allocation80_spill] sm:$0xff] }
 0xa19   :  { %14269 = vmatmul.mubr.f32.gmra.mrb[22].mxu1 %v19162_v8  ;;  %v21313_v8 = vld [vmem:[#allocation81_spill] sm:$0xff] }
 0xa1a   :  { %14271 = vmatprep.mubr.f32.mxu1 %v19165_v45  ;;  %v21314_v45 = vld [vmem:[#allocation82_spill] sm:$0xff] }
 0xa1d   :  { %14272 = vmatmul.mubr.f32.gmra.mrb[24].mxu1 %v19168_v21  ;;  %v21315_v21 = vld [vmem:[#allocation93_spill] sm:$0xff] }
 0xa1e   :  { %14274 = vmatprep.mubr.f32.mxu1 %v19171_v2  ;;  %v21316_v2 = vld [vmem:[#allocation94_spill] sm:$0xff] }
 0xa21   :  { %14275 = vmatmul.mubr.f32.gmra.mrb[26].mxu1 %v19174_v53  ;;  %v21317_v53 = vld [vmem:[#allocation95_spill] sm:$0xff] }
 0xa22   :  { %14277 = vmatprep.mubr.f32.mxu1 %v19177_v44  ;;  %v21318_v44 = vld [vmem:[#allocation96_spill] sm:$0xff] }
 0xa25   :  { %14278 = vmatmul.mubr.f32.gmra.mrb[28].mxu1 %v19180_v13  ;;  %v9087_v13 = vld [vmem:[#allocation2 + $0x349] sm:$0xff] }
 0xa26   :  { %14280 = vmatprep.mubr.f32.mxu1 %v9055_v48  ;;  %v9593_v48 = vld [vmem:[#allocation2 + $0x22a] sm:$0xff] }
 0xa29   :  { %14281 = vmatmul.mubr.f32.gmra.mrb[30].mxu1 %v9056_v42  ;;  %v9596_v42 = vld [vmem:[#allocation2 + $0x24a] sm:$0xff] }
 0xa2a   :  { %14283 = vmatprep.mubr.f32.mxu1 %v19183_v28  ;;  %v21319_v28 = vld [vmem:[#allocation97_spill] sm:$0xff] }
 0xa2d   :  { %14284 = vmatmul.mubr.f32.gmra.mrb[32].mxu1 %v19186_v29  ;;  %v9088_v29 = vld [vmem:[#allocation2 + $0x351] sm:$0xff] }
 0xa2e   :  { %14286 = vmatprep.mubr.f32.mxu1 %v19189_v43  ;;  %v9555_v43 = vld [vmem:[#allocation2 + $0x32] sm:$0xff] }
 0xa31   :  { %14287 = vmatmul.mubr.f32.gmra.mrb[34].mxu1 %v19192_v3  ;;  %v9556_v3 = vld [vmem:[#allocation2 + $0x3a] sm:$0xff] }
 0xa32   :  { %14289 = vmatprep.mubr.f32.mxu1 %v19195_v63  ;;  %v9557_v63 = vld [vmem:[#allocation2 + $0x4a] sm:$0xff] }
 0xa35   :  { %14290 = vmatmul.mubr.f32.gmra.mrb[36].mxu1 %v19198_v34  ;;  %v9558_v34 = vld [vmem:[#allocation2 + $0x52] sm:$0xff] }
 0xa36   :  { %14292 = vmatprep.mubr.f32.mxu1 %v19201_v15  ;;  %v9559_v15 = vld [vmem:[#allocation2 + $0x62] sm:$0xff] }
 0xa39   :  { %14293 = vmatmul.mubr.f32.gmra.mrb[38].mxu1 %v19204_v60  ;;  %v9560_v60 = vld [vmem:[#allocation2 + $0x6a] sm:$0xff] }
 0xa3a   :  { %14295 = vmatprep.mubr.f32.mxu1 %v19207_v16  ;;  %v9561_v16 = vld [vmem:[#allocation2 + $0x7a] sm:$0xff] }
 0xa3d   :  { %14296 = vmatmul.mubr.f32.gmra.mrb[40].mxu1 %v19210_v39  ;;  %v9562_v39 = vld [vmem:[#allocation2 + $0x82] sm:$0xff] }
 0xa3e   :  { %14298 = vmatprep.mubr.f32.mxu1 %v21300_v7  ;;  %v9597_v7 = vld [vmem:[#allocation2 + $0x25a] sm:$0xff] }
 0xa41   :  { %14299 = vmatmul.mubr.f32.gmra.mrb[42].mxu1 %v21301_v41  ;;  %v9598_v41 = vld [vmem:[#allocation2 + $0x262] sm:$0xff] }
 0xa42   :  { %14301 = vmatprep.mubr.f32.mxu1 %v21302_v58  ;;  %v9599_v58 = vld [vmem:[#allocation2 + $0x272] sm:$0xff] }
 0xa45   :  { %14302 = vmatmul.mubr.f32.gmra.mrb[44].mxu1 %v21303_v14  ;;  %v9600_v14 = vld [vmem:[#allocation2 + $0x27a] sm:$0xff] }
 0xa46   :  { %14304 = vmatprep.mubr.f32.mxu1 %v21304_v25  ;;  %v9601_v25 = vld [vmem:[#allocation2 + $0x28a] sm:$0xff] }
 0xa49   :  { %14305 = vmatmul.mubr.f32.gmra.mrb[46].mxu1 %v21305_v31  ;;  %v9602_v31 = vld [vmem:[#allocation2 + $0x292] sm:$0xff] }
 0xa4a   :  { %14307 = vmatprep.mubr.f32.mxu1 %v21306_v9  ;;  %v9603_v9 = vld [vmem:[#allocation2 + $0x2a2] sm:$0xff] }
 0xa4d   :  { %14308 = vmatmul.mubr.f32.gmra.mrb[48].mxu1 %v21307_v55  ;;  %v9604_v55 = vld [vmem:[#allocation2 + $0x2aa] sm:$0xff] }
 0xa4e   :  { %14310 = vmatprep.mubr.f32.mxu1 %v21308_v54  ;;  %v9605_v54 = vld [vmem:[#allocation2 + $0x2ba] sm:$0xff] }
 0xa51   :  { %14311 = vmatmul.mubr.f32.gmra.mrb[50].mxu1 %v21309_v18  ;;  %v9606_v18 = vld [vmem:[#allocation2 + $0x2c2] sm:$0xff] }
 0xa52   :  { %14313 = vmatprep.mubr.f32.mxu1 %v21310_v0  ;;  %v9607_v0 = vld [vmem:[#allocation2 + $0x2d2] sm:$0xff] }
 0xa55   :  { %14314 = vmatmul.mubr.f32.gmra.mrb[52].mxu1 %v21311_v22  ;;  %v9608_v22 = vld [vmem:[#allocation2 + $0x2da] sm:$0xff] }
 0xa56   :  { %14316 = vmatprep.mubr.f32.mxu1 %v21312_v38  ;;  %v9609_v38 = vld [vmem:[#allocation2 + $0x2ea] sm:$0xff] }
 0xa59   :  { %14317 = vmatmul.mubr.f32.gmra.mrb[54].mxu1 %v21313_v8  ;;  %v9610_v8 = vld [vmem:[#allocation2 + $0x2f2] sm:$0xff] }
 0xa5a   :  { %14319 = vmatprep.mubr.f32.mxu1 %v21314_v45  ;;  %v9611_v45 = vld [vmem:[#allocation2 + $0x302] sm:$0xff] }
 0xa5d   :  { %14320 = vmatmul.mubr.f32.gmra.mrb[56].mxu1 %v21315_v21  ;;  %v9612_v21 = vld [vmem:[#allocation2 + $0x30a] sm:$0xff] }
 0xa5e   :  { %14322 = vmatprep.mubr.f32.mxu1 %v21316_v2  ;;  %v9613_v2 = vld [vmem:[#allocation2 + $0x31a] sm:$0xff] }
 0xa61   :  { %14323 = vmatmul.mubr.f32.gmra.mrb[58].mxu1 %v21317_v53  ;;  %v9614_v53 = vld [vmem:[#allocation2 + $0x322] sm:$0xff] }
 0xa62   :  { %14325 = vmatprep.mubr.f32.mxu1 %v21318_v44  ;;  %v9617_v44 = vld [vmem:[#allocation2 + $0x34a] sm:$0xff] }
 0xa65   :  { %14326 = vmatmul.mubr.f32.gmra.mrb[60].mxu1 %v21319_v28 }
 0xa66   :  { %14328 = vmatprep.mubr.f32.mxu1 %v9087_v13  ;;  %v9618_v13 = vld [vmem:[#allocation2 + $0x352] sm:$0xff] }
 0xa69   :  { %14329 = vmatmul.mubr.f32.gmra.mrb[62].mxu1 %v9088_v29 }
 0xa6a   :  { %14363 = vmatprep.mubr.f32.mxu1 %v9555_v43 }
 0xa6d   :  { %14364 = vmatmul.mubr.f32.vlgmr.msra.gmra.mrb[0].mxu1 %v9556_v3 }
 0xa6e   :  { %14366 = vmatprep.mubr.f32.mxu1 %v9557_v63 }
 0xa71   :  { %14367 = vmatmul.mubr.f32.gmra.mrb[2].mxu1 %v9558_v34 }
 0xa72   :  { %14369 = vmatprep.mubr.f32.mxu1 %v9559_v15 }
 0xa75   :  { %14370 = vmatmul.mubr.f32.gmra.mrb[4].mxu1 %v9560_v60 }
 0xa76   :  { %14372 = vmatprep.mubr.f32.mxu1 %v9561_v16 }
 0xa79   :  { %14373 = vmatmul.mubr.f32.gmra.mrb[6].mxu1 %v9562_v39 }
 0xa7a   :  { %14375 = vmatprep.mubr.f32.mxu1 %v9563_v32 }
 0xa7d   :  { %14376 = vmatmul.mubr.f32.gmra.mrb[8].mxu1 %v9564_v37 }
 0xa7e   :  { %14378 = vmatprep.mubr.f32.mxu1 %v9565_v5 }
 0xa81   :  { %14379 = vmatmul.mubr.f32.gmra.mrb[10].mxu1 %v9566_v49 }
 0xa82   :  { %14381 = vmatprep.mubr.f32.mxu1 %v9567_v20 }
 0xa85   :  { %14382 = vmatmul.mubr.f32.gmra.mrb[12].mxu1 %v9568_v27 }
 0xa86   :  { %14384 = vmatprep.mubr.f32.mxu1 %v9569_v30 }
 0xa89   :  { %14385 = vmatmul.mubr.f32.gmra.mrb[14].mxu1 %v9570_v24 }
 0xa8a   :  { %14387 = vmatprep.mubr.f32.mxu1 %v9571_v46 }
 0xa8d   :  { %14388 = vmatmul.mubr.f32.gmra.mrb[16].mxu1 %v9572_v19 }
 0xa8e   :  { %14390 = vmatprep.mubr.f32.mxu1 %v9573_v56 }
 0xa91   :  { %14391 = vmatmul.mubr.f32.gmra.mrb[18].mxu1 %v9574_v17 }
 0xa92   :  { %14393 = vmatprep.mubr.f32.mxu1 %v9575_v11 }
 0xa95   :  { %14394 = vmatmul.mubr.f32.gmra.mrb[20].mxu1 %v9576_v61 }
 0xa96   :  { %14396 = vmatprep.mubr.f32.mxu1 %v9577_v62 }
 0xa99   :  { %14397 = vmatmul.mubr.f32.gmra.mrb[22].mxu1 %v9578_v52 }
 0xa9a   :  { %14399 = vmatprep.mubr.f32.mxu1 %v9579_v23 }
 0xa9d   :  { %14400 = vmatmul.mubr.f32.gmra.mrb[24].mxu1 %v9580_v10 }
 0xa9e   :  { %14402 = vmatprep.mubr.f32.mxu1 %v9581_v57 }
 0xaa1   :  { %14403 = vmatmul.mubr.f32.gmra.mrb[26].mxu1 %v9582_v12 }
 0xaa2   :  { %14405 = vmatprep.mubr.f32.mxu1 %v19307_v36  ;;  %v9594_v36 = vld [vmem:[#allocation2 + $0x232] sm:$0xff] }
 0xaa5   :  { %14406 = vmatmul.mubr.f32.gmra.mrb[28].mxu1 %v19310_v26  ;;  %v9595_v26 = vld [vmem:[#allocation2 + $0x242] sm:$0xff] }
 0xaa6   :  { %14408 = vmatprep.mubr.f32.mxu1 %v9585_v6 }
 0xaa9   :  { %14409 = vmatmul.mubr.f32.gmra.mrb[30].mxu1 %v9586_v1 }
 0xaaa   :  { %14411 = vmatprep.mubr.f32.mxu1 %v9587_v59 }
 0xaad   :  { %14412 = vmatmul.mubr.f32.gmra.mrb[32].mxu1 %v9588_v51 }
 0xaae   :  { %14414 = vmatprep.mubr.f32.mxu1 %v9589_v35 }
 0xab1   :  { %14415 = vmatmul.mubr.f32.gmra.mrb[34].mxu1 %v9590_v50 }
 0xab2   :  { %14417 = vmatprep.mubr.f32.mxu1 %v9591_v33 }
 0xab5   :  { %14418 = vmatmul.mubr.f32.gmra.mrb[36].mxu1 %v9592_v47 }
 0xab6   :  { %14420 = vmatprep.mubr.f32.mxu1 %v9593_v48 }
 0xab9   :  { %14421 = vmatmul.mubr.f32.gmra.mrb[38].mxu1 %v9594_v36 }
 0xaba   :  { %14423 = vmatprep.mubr.f32.mxu1 %v9595_v26 }
 0xabd   :  { %14424 = vmatmul.mubr.f32.gmra.mrb[40].mxu1 %v9596_v42 }
 0xabe   :  { %14426 = vmatprep.mubr.f32.mxu1 %v9597_v7 }
 0xac1   :  { %14427 = vmatmul.mubr.f32.gmra.mrb[42].mxu1 %v9598_v41 }
 0xac2   :  { %14429 = vmatprep.mubr.f32.mxu1 %v9599_v58 }
 0xac5   :  { %14430 = vmatmul.mubr.f32.gmra.mrb[44].mxu1 %v9600_v14 }
 0xac6   :  { %14432 = vmatprep.mubr.f32.mxu1 %v9601_v25 }
 0xac9   :  { %14433 = vmatmul.mubr.f32.gmra.mrb[46].mxu1 %v9602_v31 }
 0xaca   :  { %14435 = vmatprep.mubr.f32.mxu1 %v9603_v9 }
 0xacd   :  { %14436 = vmatmul.mubr.f32.gmra.mrb[48].mxu1 %v9604_v55 }
 0xace   :  { %14438 = vmatprep.mubr.f32.mxu1 %v9605_v54 }
 0xad1   :  { %14439 = vmatmul.mubr.f32.gmra.mrb[50].mxu1 %v9606_v18 }
 0xad2   :  { %14441 = vmatprep.mubr.f32.mxu1 %v9607_v0 }
 0xad5   :  { %14442 = vmatmul.mubr.f32.gmra.mrb[52].mxu1 %v9608_v22 }
 0xad6   :  { %14444 = vmatprep.mubr.f32.mxu1 %v9609_v38 }
 0xad9   :  { %14445 = vmatmul.mubr.f32.gmra.mrb[54].mxu1 %v9610_v8 }
 0xada   :  { %14447 = vmatprep.mubr.f32.mxu1 %v9611_v45 }
 0xadd   :  { %14448 = vmatmul.mubr.f32.gmra.mrb[56].mxu1 %v9612_v21 }
 0xade   :  { %14450 = vmatprep.mubr.f32.mxu1 %v9613_v2 }
 0xae1   :  { %14451 = vmatmul.mubr.f32.gmra.mrb[58].mxu1 %v9614_v53 }
 0xae2   :  { %14453 = vmatprep.mubr.f32.mxu1 %v19343_v40 }
 0xae5   :  { %14454 = vmatmul.mubr.f32.gmra.mrb[60].mxu1 %v19346_v4 }
 0xae6   :  { %14456 = vmatprep.mubr.f32.mxu1 %v9617_v44 }
 0xae9   :  { %14457 = vmatmul.mubr.f32.gmra.mrb[62].mxu1 %v9618_v13 }
 0xb40   :  { %v19428_v28 = vpop.f32.mrb[0].mxu1 }
 0xb41   :  { %v10156_v29 = vmul.f32 %v19428_v28, %v19428_v28  ;;  %v19432_v43 = vpop.f32.mrb[1].mxu1 }
 0xb42   :  { %v10085_v3 = vadd.f32 %v19428_v28, %v19432_v43  ;;  %v10155_v63 = vmul.f32 %v19432_v43, %v19432_v43 }
 0xb44   :  { %v10219_v40 = vadd.f32 %v10156_v29, %v10155_v63  ;;  %v19438_v34 = vpop.f32.mrb[2].mxu1 }
 0xb45   :  { %v19440_v4 = vpop.f32.mrb[3].mxu1  ;;  %v10158_v16 = vmul.f32 %v19438_v34, %v19438_v34 }
 0xb46   :  { %v10086_v15 = vadd.f32 %v10085_v3, %v19440_v4  ;;  %v10157_v60 = vmul.f32 %v19440_v4, %v19440_v4 }
 0xb48   :  { %v10087_v39 = vadd.f32 %v19438_v34, %v10086_v15  ;;  %v10220_v32 = vadd.f32 %v10219_v40, %v10157_v60  ;;  %v19448_v37 = vpop.f32.mrb[4].mxu1 }
 0xb49   :  { %v19450_v5 = vpop.f32.mrb[5].mxu1  ;;  %v10160_v30 = vmul.f32 %v19448_v37, %v19448_v37 }
 0xb4a   :  { %v10221_v49 = vadd.f32 %v10220_v32, %v10158_v16  ;;  %v10088_v20 = vadd.f32 %v10087_v39, %v19450_v5  ;;  %v10159_v27 = vmul.f32 %v19450_v5, %v19450_v5 }
 0xb4c   :  { %v10222_v24 = vadd.f32 %v10221_v49, %v10159_v27  ;;  %v19457_v46 = vpop.f32.mrb[6].mxu1  ;;  %v10089_v19 = vadd.f32 %v19448_v37, %v10088_v20 }
 0xb4d   :  { %v19460_v56 = vpop.f32.mrb[7].mxu1  ;;  %v10162_v62 = vmul.f32 %v19457_v46, %v19457_v46 }
 0xb4e   :  { %v10090_v17 = vadd.f32 %v10089_v19, %v19460_v56  ;;  %v10161_v11 = vmul.f32 %v19460_v56, %v19460_v56  ;;  %v10223_v61 = vadd.f32 %v10222_v24, %v10160_v30 }
 0xb50   :  { %v10224_v52 = vadd.f32 %v10223_v61, %v10161_v11  ;;  %v19467_v23 = vpop.f32.mrb[8].mxu1  ;;  %v10091_v10 = vadd.f32 %v19457_v46, %v10090_v17 }
 0xb51   :  { %v19470_v57 = vpop.f32.mrb[9].mxu1  ;;  %v10164_v59 = vmul.f32 %v19467_v23, %v19467_v23 }
 0xb52   :  { %v10092_v12 = vadd.f32 %v10091_v10, %v19470_v57  ;;  %v10163_v6 = vmul.f32 %v19470_v57, %v19470_v57  ;;  %v10225_v1 = vadd.f32 %v10224_v52, %v10162_v62 }
 0xb54   :  { %v10226_v51 = vadd.f32 %v10225_v1, %v10163_v6  ;;  %v19477_v35 = vpop.f32.mrb[10].mxu1  ;;  %v10093_v50 = vadd.f32 %v19467_v23, %v10092_v12 }
 0xb55   :  { %v19480_v33 = vpop.f32.mrb[11].mxu1  ;;  %v10166_v26 = vmul.f32 %v19477_v35, %v19477_v35 }
 0xb56   :  { %v10094_v47 = vadd.f32 %v10093_v50, %v19480_v33  ;;  %v10165_v48 = vmul.f32 %v19480_v33, %v19480_v33  ;;  %v10227_v36 = vadd.f32 %v10226_v51, %v10164_v59 }
 0xb58   :  { %v10228_v42 = vadd.f32 %v10227_v36, %v10165_v48  ;;  %v19487_v7 = vpop.f32.mrb[12].mxu1  ;;  %v10095_v41 = vadd.f32 %v19477_v35, %v10094_v47 }
 0xb59   :  { %v19490_v58 = vpop.f32.mrb[13].mxu1  ;;  %v10168_v9 = vmul.f32 %v19487_v7, %v19487_v7 }
 0xb5a   :  { %v10096_v14 = vadd.f32 %v10095_v41, %v19490_v58  ;;  %v10167_v25 = vmul.f32 %v19490_v58, %v19490_v58  ;;  %v10229_v31 = vadd.f32 %v10228_v42, %v10166_v26 }
 0xb5c   :  { %v10230_v55 = vadd.f32 %v10229_v31, %v10167_v25  ;;  %v19497_v54 = vpop.f32.mrb[14].mxu1  ;;  %v10097_v18 = vadd.f32 %v19487_v7, %v10096_v14 }
 0xb5d   :  { %v19500_v0 = vpop.f32.mrb[15].mxu1  ;;  %v10170_v45 = vmul.f32 %v19497_v54, %v19497_v54 }
 0xb5e   :  { %v10098_v22 = vadd.f32 %v10097_v18, %v19500_v0  ;;  %v10169_v38 = vmul.f32 %v19500_v0, %v19500_v0  ;;  %v10231_v8 = vadd.f32 %v10230_v55, %v10168_v9 }
 0xb60   :  { %v10232_v21 = vadd.f32 %v10231_v8, %v10169_v38  ;;  %v19507_v2 = vpop.f32.mrb[16].mxu1  ;;  %v10099_v53 = vadd.f32 %v19497_v54, %v10098_v22 }
 0xb61   :  { %v19510_v44 = vpop.f32.mrb[17].mxu1  ;;  %v10172_v63 = vmul.f32 %v19507_v2, %v19507_v2 }
 0xb62   :  { %v10100_v13 = vadd.f32 %v10099_v53, %v19510_v44  ;;  %v10171_v29 = vmul.f32 %v19510_v44, %v19510_v44  ;;  %v10233_v3 = vadd.f32 %v10232_v21, %v10170_v45 }
 0xb64   :  { %v10234_v40 = vadd.f32 %v10233_v3, %v10171_v29  ;;  %v19517_v15 = vpop.f32.mrb[18].mxu1  ;;  %v10101_v60 = vadd.f32 %v19507_v2, %v10100_v13 }
 0xb65   :  { %v19520_v16 = vpop.f32.mrb[19].mxu1  ;;  %v10174_v20 = vmul.f32 %v19517_v15, %v19517_v15 }
 0xb66   :  { %v10102_v39 = vadd.f32 %v10101_v60, %v19520_v16  ;;  %v10173_v32 = vmul.f32 %v19520_v16, %v19520_v16  ;;  %v10235_v49 = vadd.f32 %v10234_v40, %v10172_v63 }
 0xb68   :  { %v10236_v27 = vadd.f32 %v10235_v49, %v10173_v32  ;;  %v19527_v30 = vpop.f32.mrb[20].mxu1  ;;  %v10103_v24 = vadd.f32 %v19517_v15, %v10102_v39 }
 0xb69   :  { %v19530_v19 = vpop.f32.mrb[21].mxu1  ;;  %v10176_v62 = vmul.f32 %v19527_v30, %v19527_v30 }
 0xb6a   :  { %v10104_v17 = vadd.f32 %v10103_v24, %v19530_v19  ;;  %v10175_v11 = vmul.f32 %v19530_v19, %v19530_v19  ;;  %v10237_v61 = vadd.f32 %v10236_v27, %v10174_v20 }
 0xb6c   :  { %v10238_v52 = vadd.f32 %v10237_v61, %v10175_v11  ;;  %v19537_v10 = vpop.f32.mrb[22].mxu1  ;;  %v10105_v12 = vadd.f32 %v19527_v30, %v10104_v17 }
 0xb6d   :  { %v19540_v6 = vpop.f32.mrb[23].mxu1  ;;  %v10178_v50 = vmul.f32 %v19537_v10, %v19537_v10 }
 0xb6e   :  { %v10106_v1 = vadd.f32 %v10105_v12, %v19540_v6  ;;  %v10177_v59 = vmul.f32 %v19540_v6, %v19540_v6  ;;  %v10239_v51 = vadd.f32 %v10238_v52, %v10176_v62 }
 0xb70   :  { %v10240_v47 = vadd.f32 %v10239_v51, %v10177_v59  ;;  %v19547_v48 = vpop.f32.mrb[24].mxu1  ;;  %v10107_v36 = vadd.f32 %v19537_v10, %v10106_v1 }
 0xb71   :  { %v19550_v26 = vpop.f32.mrb[25].mxu1  ;;  %v10180_v25 = vmul.f32 %v19547_v48, %v19547_v48 }
 0xb72   :  { %v10108_v42 = vadd.f32 %v10107_v36, %v19550_v26  ;;  %v10179_v41 = vmul.f32 %v19550_v26, %v19550_v26  ;;  %v10241_v14 = vadd.f32 %v10240_v47, %v10178_v50 }
 0xb74   :  { %v10242_v31 = vadd.f32 %v10241_v14, %v10179_v41  ;;  %v19557_v9 = vpop.f32.mrb[26].mxu1  ;;  %v10109_v55 = vadd.f32 %v19547_v48, %v10108_v42 }
 0xb75   :  { %v19560_v18 = vpop.f32.mrb[27].mxu1  ;;  %v10182_v45 = vmul.f32 %v19557_v9, %v19557_v9 }
 0xb76   :  { %v10110_v22 = vadd.f32 %v10109_v55, %v19560_v18  ;;  %v10181_v38 = vmul.f32 %v19560_v18, %v19560_v18  ;;  %v10243_v8 = vadd.f32 %v10242_v31, %v10180_v25 }
 0xb78   :  { %v10244_v21 = vadd.f32 %v10243_v8, %v10181_v38  ;;  %v19567_v53 = vpop.f32.mrb[28].mxu1  ;;  %v10111_v13 = vadd.f32 %v19557_v9, %v10110_v22 }
 0xb79   :  { %v19570_v29 = vpop.f32.mrb[29].mxu1  ;;  %v10184_v60 = vmul.f32 %v19567_v53, %v19567_v53 }
 0xb7a   :  { %v10112_v3 = vadd.f32 %v10111_v13, %v19570_v29  ;;  %v10183_v63 = vmul.f32 %v19570_v29, %v19570_v29  ;;  %v10245_v40 = vadd.f32 %v10244_v21, %v10182_v45 }
 0xb7c   :  { %v10246_v39 = vadd.f32 %v10245_v40, %v10183_v63  ;;  %v19577_v32 = vpop.f32.mrb[30].mxu1  ;;  %v10113_v49 = vadd.f32 %v19567_v53, %v10112_v3 }
 0xb7d   :  { %v19580_v20 = vpop.f32.mrb[31].mxu1  ;;  %v10186_v11 = vmul.f32 %v19577_v32, %v19577_v32 }
 0xb7e   :  { %v10114_v27 = vadd.f32 %v10113_v49, %v19580_v20  ;;  %v10185_v24 = vmul.f32 %v19580_v20, %v19580_v20  ;;  %v10247_v17 = vadd.f32 %v10246_v39, %v10184_v60 }
 0xb80   :  { %v10248_v61 = vadd.f32 %v10247_v17, %v10185_v24  ;;  %v19587_v62 = vpop.f32.mrb[32].mxu1  ;;  %v10115_v52 = vadd.f32 %v19577_v32, %v10114_v27 }
 0xb81   :  { %v19590_v12 = vpop.f32.mrb[33].mxu1  ;;  %v10188_v50 = vmul.f32 %v19587_v62, %v19587_v62 }
 0xb82   :  { %v10116_v1 = vadd.f32 %v10115_v52, %v19590_v12  ;;  %v10187_v59 = vmul.f32 %v19590_v12, %v19590_v12  ;;  %v10249_v51 = vadd.f32 %v10248_v61, %v10186_v11 }
 0xb84   :  { %v10250_v47 = vadd.f32 %v10249_v51, %v10187_v59  ;;  %v19597_v36 = vpop.f32.mrb[34].mxu1  ;;  %v10117_v42 = vadd.f32 %v19587_v62, %v10116_v1 }
 0xb85   :  { %v19600_v41 = vpop.f32.mrb[35].mxu1  ;;  %v10190_v55 = vmul.f32 %v19597_v36, %v19597_v36 }
 0xb86   :  { %v10118_v14 = vadd.f32 %v10117_v42, %v19600_v41  ;;  %v10189_v25 = vmul.f32 %v19600_v41, %v19600_v41  ;;  %v10251_v31 = vadd.f32 %v10250_v47, %v10188_v50 }
 0xb88   :  { %v10252_v22 = vadd.f32 %v10251_v31, %v10189_v25  ;;  %v19607_v38 = vpop.f32.mrb[36].mxu1  ;;  %v10119_v8 = vadd.f32 %v19597_v36, %v10118_v14 }
 0xb89   :  { %v19610_v45 = vpop.f32.mrb[37].mxu1  ;;  %v10192_v63 = vmul.f32 %v19607_v38, %v19607_v38 }
 0xb8a   :  { %v10120_v21 = vadd.f32 %v10119_v8, %v19610_v45  ;;  %v10191_v13 = vmul.f32 %v19610_v45, %v19610_v45  ;;  %v10253_v3 = vadd.f32 %v10252_v22, %v10190_v55 }
 0xb8c   :  { %v10254_v40 = vadd.f32 %v10253_v3, %v10191_v13  ;;  %v19617_v60 = vpop.f32.mrb[38].mxu1  ;;  %v10121_v39 = vadd.f32 %v19607_v38, %v10120_v21 }
 0xb8d   :  { %21320 = vst [vmem:[#allocation83_spill] sm:$0xff] %v19617_v60  ;;  %v19620_v49 = vpop.f32.mrb[39].mxu1  ;;  %v10194_v11 = vmul.f32 %v19617_v60, %v19617_v60 }
 0xb8e   :  { %21321 = vst [vmem:[#allocation84_spill] sm:$0xff] %v19620_v49  ;;  %v10122_v27 = vadd.f32 %v10121_v39, %v19620_v49  ;;  %v10193_v24 = vmul.f32 %v19620_v49, %v19620_v49  ;;  %v10255_v17 = vadd.f32 %v10254_v40, %v10192_v63 }
 0xb90   :  { %v10256_v61 = vadd.f32 %v10255_v17, %v10193_v24  ;;  %v19627_v52 = vpop.f32.mrb[40].mxu1  ;;  %v10123_v1 = vadd.f32 %v19617_v60, %v10122_v27 }
 0xb91   :  { %21322 = vst [vmem:[#allocation85_spill] sm:$0xff] %v19627_v52  ;;  %v19630_v59 = vpop.f32.mrb[41].mxu1  ;;  %v10196_v42 = vmul.f32 %v19627_v52, %v19627_v52 }
 0xb92   :  { %21323 = vst [vmem:[#allocation86_spill] sm:$0xff] %v19630_v59  ;;  %v10124_v51 = vadd.f32 %v10123_v1, %v19630_v59  ;;  %v10195_v50 = vmul.f32 %v19630_v59, %v19630_v59  ;;  %v10257_v47 = vadd.f32 %v10256_v61, %v10194_v11 }
 0xb94   :  { %v10258_v14 = vadd.f32 %v10257_v47, %v10195_v50  ;;  %v19637_v25 = vpop.f32.mrb[42].mxu1  ;;  %v10125_v31 = vadd.f32 %v19627_v52, %v10124_v51 }
 0xb95   :  { %21324 = vst [vmem:[#allocation87_spill] sm:$0xff] %v19637_v25  ;;  %v19640_v55 = vpop.f32.mrb[43].mxu1  ;;  %v10198_v13 = vmul.f32 %v19637_v25, %v19637_v25 }
 0xb96   :  { %21325 = vst [vmem:[#allocation88_spill] sm:$0xff] %v19640_v55  ;;  %v10126_v22 = vadd.f32 %v10125_v31, %v19640_v55  ;;  %v10197_v8 = vmul.f32 %v19640_v55, %v19640_v55  ;;  %v10259_v21 = vadd.f32 %v10258_v14, %v10196_v42 }
 0xb98   :  { %v10260_v3 = vadd.f32 %v10259_v21, %v10197_v8  ;;  %v19647_v63 = vpop.f32.mrb[44].mxu1  ;;  %v10127_v40 = vadd.f32 %v19637_v25, %v10126_v22 }
 0xb99   :  { %21326 = vst [vmem:[#allocation89_spill] sm:$0xff] %v19647_v63  ;;  %v19650_v39 = vpop.f32.mrb[45].mxu1  ;;  %v10200_v11 = vmul.f32 %v19647_v63, %v19647_v63 }
 0xb9a   :  { %21327 = vst [vmem:[#allocation21_spill] sm:$0xff] %v19650_v39  ;;  %v10128_v27 = vadd.f32 %v10127_v40, %v19650_v39  ;;  %v10199_v24 = vmul.f32 %v19650_v39, %v19650_v39  ;;  %v10261_v17 = vadd.f32 %v10260_v3, %v10198_v13 }
 0xb9c   :  { %v10262_v61 = vadd.f32 %v10261_v17, %v10199_v24  ;;  %v19657_v1 = vpop.f32.mrb[46].mxu1  ;;  %v10129_v51 = vadd.f32 %v19647_v63, %v10128_v27 }
 0xb9d   :  { %21328 = vst [vmem:[#allocation22_spill] sm:$0xff] %v19657_v1  ;;  %v19660_v50 = vpop.f32.mrb[47].mxu1  ;;  %v10202_v31 = vmul.f32 %v19657_v1, %v19657_v1 }
 0xb9e   :  { %21329 = vst [vmem:[#allocation23_spill] sm:$0xff] %v19660_v50  ;;  %v10130_v47 = vadd.f32 %v10129_v51, %v19660_v50  ;;  %v10201_v42 = vmul.f32 %v19660_v50, %v19660_v50  ;;  %v10263_v14 = vadd.f32 %v10262_v61, %v10200_v11 }
 0xba0   :  { %v10264_v22 = vadd.f32 %v10263_v14, %v10201_v42  ;;  %v19667_v8 = vpop.f32.mrb[48].mxu1  ;;  %v10131_v21 = vadd.f32 %v19657_v1, %v10130_v47 }
 0xba1   :  { %21330 = vst [vmem:[#allocation24_spill] sm:$0xff] %v19667_v8  ;;  %v19670_v13 = vpop.f32.mrb[49].mxu1  ;;  %v10204_v24 = vmul.f32 %v19667_v8, %v19667_v8 }
 0xba2   :  { %21331 = vst [vmem:[#allocation25_spill] sm:$0xff] %v19670_v13  ;;  %v10132_v3 = vadd.f32 %v10131_v21, %v19670_v13  ;;  %v10203_v40 = vmul.f32 %v19670_v13, %v19670_v13  ;;  %v10265_v27 = vadd.f32 %v10264_v22, %v10202_v31 }
 0xba4   :  { %v10266_v17 = vadd.f32 %v10265_v27, %v10203_v40  ;;  %v19677_v11 = vpop.f32.mrb[50].mxu1  ;;  %v10133_v61 = vadd.f32 %v19667_v8, %v10132_v3 }
 0xba5   :  { %21332 = vst [vmem:[#allocation26_spill] sm:$0xff] %v19677_v11  ;;  %v19680_v51 = vpop.f32.mrb[51].mxu1  ;;  %v10206_v21 = vmul.f32 %v19677_v11, %v19677_v11 }
 0xba6   :  { %21333 = vst [vmem:[#allocation27_spill] sm:$0xff] %v19680_v51  ;;  %v10134_v47 = vadd.f32 %v10133_v61, %v19680_v51  ;;  %v10205_v42 = vmul.f32 %v19680_v51, %v19680_v51  ;;  %v10267_v14 = vadd.f32 %v10266_v17, %v10204_v24 }
 0xba8   :  { %v10268_v31 = vadd.f32 %v10267_v14, %v10205_v42  ;;  %v19687_v22 = vpop.f32.mrb[52].mxu1  ;;  %v10135_v40 = vadd.f32 %v19677_v11, %v10134_v47 }
 0xba9   :  { %21334 = vst [vmem:[#allocation28_spill] sm:$0xff] %v19687_v22  ;;  %v19690_v27 = vpop.f32.mrb[53].mxu1  ;;  %v10208_v51 = vmul.f32 %v19687_v22, %v19687_v22 }
 0xbaa   :  { %21335 = vst [vmem:[#allocation29_spill] sm:$0xff] %v19690_v27  ;;  %v10136_v3 = vadd.f32 %v10135_v40, %v19690_v27  ;;  %v10207_v8 = vmul.f32 %v19690_v27, %v19690_v27  ;;  %v10269_v61 = vadd.f32 %v10268_v31, %v10206_v21 }
 0xbac   :  { %v10270_v24 = vadd.f32 %v10269_v61, %v10207_v8  ;;  %v19697_v17 = vpop.f32.mrb[54].mxu1  ;;  %v10137_v42 = vadd.f32 %v19687_v22, %v10136_v3 }
 0xbad   :  { %21336 = vst [vmem:[#allocation30_spill] sm:$0xff] %v19697_v17  ;;  %v19700_v14 = vpop.f32.mrb[55].mxu1  ;;  %v10210_v27 = vmul.f32 %v19697_v17, %v19697_v17 }
 0xbae   :  { %21337 = vst [vmem:[#allocation90_spill] sm:$0xff] %v19700_v14  ;;  %v10138_v47 = vadd.f32 %v10137_v42, %v19700_v14  ;;  %v10209_v11 = vmul.f32 %v19700_v14, %v19700_v14  ;;  %v10271_v40 = vadd.f32 %v10270_v24, %v10208_v51 }
 0xbb0   :  { %v10272_v21 = vadd.f32 %v10271_v40, %v10209_v11  ;;  %v19707_v31 = vpop.f32.mrb[56].mxu1  ;;  %v10139_v8 = vadd.f32 %v19697_v17, %v10138_v47 }
 0xbb1   :  { %21338 = vst [vmem:[#allocation91_spill] sm:$0xff] %v19707_v31  ;;  %v19710_v61 = vpop.f32.mrb[57].mxu1  ;;  %v10212_v14 = vmul.f32 %v19707_v31, %v19707_v31 }
 0xbb2   :  { %21339 = vst [vmem:[#allocation92_spill] sm:$0xff] %v19710_v61  ;;  %v10140_v3 = vadd.f32 %v10139_v8, %v19710_v61  ;;  %v10211_v22 = vmul.f32 %v19710_v61, %v19710_v61  ;;  %v10273_v42 = vadd.f32 %v10272_v21, %v10210_v27 }
 0xbb4   :  { %v10274_v51 = vadd.f32 %v10273_v42, %v10211_v22  ;;  %v19717_v24 = vpop.f32.mrb[58].mxu1  ;;  %v10141_v11 = vadd.f32 %v19707_v31, %v10140_v3 }
 0xbb5   :  { %21340 = vst [vmem:[#allocation31_spill] sm:$0xff] %v19717_v24  ;;  %v19720_v40 = vpop.f32.mrb[59].mxu1  ;;  %v10214_v61 = vmul.f32 %v19717_v24, %v19717_v24 }
 0xbb6   :  { %21341 = vst [vmem:[#allocation32_spill] sm:$0xff] %v19720_v40  ;;  %v10142_v47 = vadd.f32 %v10141_v11, %v19720_v40  ;;  %v10213_v17 = vmul.f32 %v19720_v40, %v19720_v40  ;;  %v10275_v8 = vadd.f32 %v10274_v51, %v10212_v14 }
 0xbb8   :  { %v10276_v27 = vadd.f32 %v10275_v8, %v10213_v17  ;;  %v19727_v21 = vpop.f32.mrb[60].mxu1  ;;  %v10143_v22 = vadd.f32 %v19717_v24, %v10142_v47 }
 0xbb9   :  { %21342 = vst [vmem:[#allocation33_spill] sm:$0xff] %v19727_v21  ;;  %v19730_v42 = vpop.f32.mrb[61].mxu1  ;;  %v10216_v40 = vmul.f32 %v19727_v21, %v19727_v21 }
 0xbba   :  { %21343 = vst [vmem:[#allocation34_spill] sm:$0xff] %v19730_v42  ;;  %v10144_v3 = vadd.f32 %v10143_v22, %v19730_v42  ;;  %v10215_v31 = vmul.f32 %v19730_v42, %v19730_v42  ;;  %v10277_v11 = vadd.f32 %v10276_v27, %v10214_v61 }
 0xbbc   :  { %v10278_v14 = vadd.f32 %v10277_v11, %v10215_v31  ;;  %v19737_v51 = vpop.f32.mrb[62].mxu1  ;;  %v10145_v17 = vadd.f32 %v19727_v21, %v10144_v3 }
 0xbbd   :  { %v10012_v8 = vpop.f32.mrb[63].mxu1  ;;  %v10218_v24 = vmul.f32 %v19737_v51, %v19737_v51 }
 0xbbe   :  { %v10146_v13 = vadd.f32 %v10145_v17, %v10012_v8  ;;  %v10217_v1 = vmul.f32 %v10012_v8, %v10012_v8  ;;  %v10279_v47 = vadd.f32 %v10278_v14, %v10216_v40 }
 0xbc0   :  { %v10147_v22 = vadd.f32 %v19737_v51, %v10146_v13  ;;  %v10280_v50 = vadd.f32 %v10279_v47, %v10217_v1  ;;  %v10292_v1 = vld [vmem:[#allocation12] sm:$0x1] }
 0xbc2   :  { %v10148_v42 = vrot.slane %v10147_v22, 4  ;;  %v10281_v61 = vadd.f32 %v10280_v50, %v10218_v24 }
 0xbc4   :  { %v10149_v27 = vadd.f32 %v10148_v42, %v10147_v22  ;;  %v10282_v63 = vrot.slane %v10281_v61, 4  ;;  %v10296_v42 = vld [vmem:[#allocation14] sm:$0x1] }
 0xbc6   :  { %v10150_v39 = vrot.slane %v10149_v27, 2  ;;  %v10283_v31 = vadd.f32 %v10282_v63, %v10281_v61  ;;  %v21344_v63 = vld [vmem:[#allocation57_spill] sm:$0xff] }
 0xbc8   :  { %v10151_v11 = vadd.f32 %v10150_v39, %v10149_v27  ;;  %v10284_v25 = vrot.slane %v10283_v31, 2 }
 0xbca   :  { %v10152_v55 = vrot.slane %v10151_v11, 1  ;;  %v10285_v3 = vadd.f32 %v10284_v25, %v10283_v31 }
 0xbcc   :  { %v10153_v21 = vadd.f32 %v10152_v55, %v10151_v11  ;;  %v10286_v17 = vrot.slane %v10285_v3, 1  ;;  %v21345_v11 = vld [vmem:[#allocation84_spill] sm:$0xff] }
 0xbce   :  { %v10154_v52 = vmul.f32 0.001953125, %v10153_v21  ;;  %v10287_v40 = vadd.f32 %v10286_v17, %v10285_v3  ;;  %v21346_v3 = vld [vmem:[#allocation83_spill] sm:$0xff]  ;;  %v21347_v17 = vld [vmem:[#allocation86_spill] sm:$0xff] }
 0xbd0   :  { %v10288_v14 = vmul.f32 0.001953125, %v10287_v40  ;;  %v10289_v59 = vmul.f32 %v10154_v52, %v10154_v52  ;;  %v21348_v40 = vld [vmem:[#allocation85_spill] sm:$0xff] }
 0xbd2   :  { %v10290_v60 = vsub.f32 %v10288_v14, %v10289_v59  ;;  %v21349_v14 = vld [vmem:[#allocation88_spill] sm:$0xff] }
 0xbd4   :  { %v10291_v49 = vmax.f32 %v10290_v60, 0.0 }
 0xbd6   :  { %v10293_v13 = vadd.f32 1e-05, %v10291_v49 }
 0xbd8   :  { %16072 = vrsqrt.f32 %v10293_v13  ;;  %v21350_v13 = vld [vmem:[#allocation87_spill] sm:$0xff] }
 0xbe2   :  { %v16073_v50 = vpop.eup %16072 }
 0xbe3   :  { %v10295_v24 = vmul.f32 %v16073_v50, %v10292_v1  ;;  %v21351_v50 = vld [vmem:[#allocation21_spill] sm:$0xff] }
 0xbe5   :  { %v10297_v47 = vmul.f32 %v10295_v24, %v10154_v52  ;;  %v19744_v39 = vrot.slane %v10295_v24, %v21344_v63 }
 0xbe7   :  { %v10298_v22 = vsub.f32 %v10296_v42, %v10297_v47  ;;  %v10367_v25 = vmul.f32 %v19744_v39, %v10012_v8  ;;  %v19749_v55 = vmul.f32 %v19744_v39, %v19432_v43  ;;  %v19753_v60 = vmul.f32 %v19428_v28, %v19744_v39  ;;  %v21352_v42 = vld [vmem:[#allocation89_spill] sm:$0xff] }
 0xbe8   :  { %v19757_v49 = vmul.f32 %v19744_v39, %v19440_v4  ;;  %v19761_v52 = vmul.f32 %v19438_v34, %v19744_v39  ;;  %v19765_v59 = vmul.f32 %v19744_v39, %v19450_v5  ;;  %v19769_v43 = vmul.f32 %v19448_v37, %v19744_v39  ;;  %v10501_v5 = vld [vmem:[#allocation3 + $0x1f0] sm:$0xff] }
 0xbe9   :  { %v19772_v21 = vrot.slane %v10298_v22, %v21344_v63  ;;  %v19776_v28 = vmul.f32 %v19744_v39, %v19460_v56  ;;  %v19780_v4 = vmul.f32 %v19457_v46, %v19744_v39  ;;  %v19784_v34 = vmul.f32 %v19744_v39, %v19470_v57  ;;  %v21353_v63 = vld [vmem:[#allocation23_spill] sm:$0xff] }
 0xbea   :  { %v19788_v37 = vmul.f32 %v19467_v23, %v19744_v39  ;;  %v19792_v8 = vmul.f32 %v19744_v39, %v19480_v33  ;;  %v19796_v56 = vmul.f32 %v19477_v35, %v19744_v39  ;;  %v19800_v46 = vmul.f32 %v19744_v39, %v19490_v58 }
 0xbeb   :  { %v10437_v57 = vadd.f32 %v19772_v21, %v10367_v25  ;;  %v19805_v61 = vmul.f32 %v19487_v7, %v19744_v39  ;;  %v19809_v23 = vmul.f32 %v19744_v39, %v19500_v0  ;;  %v19813_v33 = vmul.f32 %v19497_v54, %v19744_v39  ;;  %v21354_v25 = vld [vmem:[#allocation22_spill] sm:$0xff] }
 0xbec   :  { %v19817_v35 = vmul.f32 %v19744_v39, %v19510_v44  ;;  %v19821_v58 = vmul.f32 %v19507_v2, %v19744_v39  ;;  %v19825_v7 = vmul.f32 %v19744_v39, %v19520_v16  ;;  %v19829_v0 = vmul.f32 %v19517_v15, %v19744_v39 }
 0xbed   :  { %v10565_v27 = vadd.f32 %v10501_v5, %v10437_v57  ;;  %v19833_v54 = vmul.f32 %v19744_v39, %v19530_v19  ;;  %v19837_v44 = vmul.f32 %v19527_v30, %v19744_v39  ;;  %v19841_v2 = vmul.f32 %v19744_v39, %v19540_v6  ;;  %v21355_v57 = vld [vmem:[#allocation25_spill] sm:$0xff] }
 0xbee   :  { %v19845_v16 = vmul.f32 %v19537_v10, %v19744_v39  ;;  %v19849_v15 = vmul.f32 %v19744_v39, %v19550_v26  ;;  %v19853_v19 = vmul.f32 %v19547_v48, %v19744_v39  ;;  %v19857_v30 = vmul.f32 %v19744_v39, %v19560_v18 }
 0xbef   :  { %v10629_v31 = vmax.f32 %v10565_v27, 0.0  ;;  %v19861_v6 = vmul.f32 %v19557_v9, %v19744_v39  ;;  %v19865_v10 = vmul.f32 %v19744_v39, %v19570_v29  ;;  %v19869_v26 = vmul.f32 %v19567_v53, %v19744_v39 }
 0xbf0   :  { %v19873_v48 = vmul.f32 %v19744_v39, %v19580_v20  ;;  %v19877_v18 = vmul.f32 %v19577_v32, %v19744_v39  ;;  %v19881_v9 = vmul.f32 %v19744_v39, %v19590_v12  ;;  %v19885_v29 = vmul.f32 %v19587_v62, %v19744_v39 }
 0xbf1   :  { %10693 = vst [vmem:[#allocation15 + $0x1f0] sm:$0xff] %v10629_v31  ;;  %v19889_v53 = vmul.f32 %v19744_v39, %v19600_v41  ;;  %v19893_v20 = vmul.f32 %v19597_v36, %v19744_v39  ;;  %v19897_v32 = vmul.f32 %v19744_v39, %v19610_v45  ;;  %v19901_v12 = vmul.f32 %v19607_v38, %v19744_v39  ;;  %v21356_v31 = vld [vmem:[#allocation24_spill] sm:$0xff] }
 0xbf2   :  { %v19905_v62 = vmul.f32 %v19744_v39, %v21345_v11  ;;  %v19909_v41 = vmul.f32 %v21346_v3, %v19744_v39  ;;  %v19913_v36 = vmul.f32 %v19744_v39, %v21347_v17  ;;  %v19917_v45 = vmul.f32 %v21348_v40, %v19744_v39  ;;  %v21357_v3 = vld [vmem:[#allocation27_spill] sm:$0xff]  ;;  %v21359_v40 = vld [vmem:[#allocation26_spill] sm:$0xff] }
 0xbf3   :  { %v19921_v38 = vmul.f32 %v19744_v39, %v21349_v14  ;;  %v19925_v1 = vmul.f32 %v21350_v13, %v19744_v39  ;;  %v19929_v24 = vmul.f32 %v19744_v39, %v21351_v50  ;;  %v19933_v47 = vmul.f32 %v21352_v42, %v19744_v39  ;;  %v21361_v13 = vld [vmem:[#allocation29_spill] sm:$0xff]  ;;  %v21363_v42 = vld [vmem:[#allocation28_spill] sm:$0xff] }
 0xbf4   :  { %v19937_v22 = vmul.f32 %v19744_v39, %v21353_v63  ;;  %v19941_v5 = vmul.f32 %v21354_v25, %v19744_v39  ;;  %v19945_v27 = vmul.f32 %v19744_v39, %v21355_v57  ;;  %v19949_v11 = vmul.f32 %v21356_v31, %v19744_v39  ;;  %v21365_v25 = vld [vmem:[#allocation90_spill] sm:$0xff] }
 0xbf5   :  { %v19953_v17 = vmul.f32 %v19744_v39, %v21357_v3  ;;  %v19957_v14 = vmul.f32 %v21359_v40, %v19744_v39  ;;  %v19961_v50 = vmul.f32 %v19744_v39, %v21361_v13  ;;  %v19965_v63 = vmul.f32 %v21363_v42, %v19744_v39  ;;  %v21367_v31 = vld [vmem:[#allocation30_spill] sm:$0xff] }
 0xbf6   :  { %v19969_v57 = vmul.f32 %v19744_v39, %v21365_v25  ;;  %v19973_v3 = vmul.f32 %v21367_v31, %v19744_v39 }
 0xbf7   :  { %21358 = vst [vmem:[#allocation36_spill] sm:$0xff] %v19953_v17  ;;  %21360 = vst [vmem:[#allocation35_spill] sm:$0xff] %v19957_v14  ;;  %v21369_v17 = vld [vmem:[#allocation92_spill] sm:$0xff]  ;;  %v21370_v14 = vld [vmem:[#allocation91_spill] sm:$0xff] }
 0xbf8   :  { %21362 = vst [vmem:[#allocation38_spill] sm:$0xff] %v19961_v50  ;;  %21364 = vst [vmem:[#allocation37_spill] sm:$0xff] %v19965_v63  ;;  %v19977_v40 = vmul.f32 %v19744_v39, %v21369_v17  ;;  %v19981_v13 = vmul.f32 %v21370_v14, %v19744_v39  ;;  %v21371_v50 = vld [vmem:[#allocation32_spill] sm:$0xff]  ;;  %v21372_v63 = vld [vmem:[#allocation31_spill] sm:$0xff]  ;;  %v20001_v14 = vmul.f32 %v19737_v51, %v19744_v39 }
 0xbf9   :  { %21366 = vst [vmem:[#allocation40_spill] sm:$0xff] %v19969_v57  ;;  %21368 = vst [vmem:[#allocation39_spill] sm:$0xff] %v19973_v3  ;;  %v19985_v42 = vmul.f32 %v19744_v39, %v21371_v50  ;;  %v19989_v25 = vmul.f32 %v21372_v63, %v19744_v39  ;;  %v21373_v57 = vld [vmem:[#allocation34_spill] sm:$0xff]  ;;  %v21374_v3 = vld [vmem:[#allocation33_spill] sm:$0xff]  ;;  %v20005_v50 = vadd.f32 %v19772_v21, %v19749_v55 }
 0xbfa   :  { %v19993_v31 = vmul.f32 %v19744_v39, %v21373_v57  ;;  %v19997_v17 = vmul.f32 %v21374_v3, %v19744_v39  ;;  %v20009_v63 = vadd.f32 %v19772_v21, %v19753_v60  ;;  %v20013_v57 = vadd.f32 %v19772_v21, %v19757_v49 }
 0xbfb   :  { %v20017_v3 = vadd.f32 %v19772_v21, %v19761_v52  ;;  %v20021_v51 = vadd.f32 %v19772_v21, %v19765_v59  ;;  %v20025_v39 = vadd.f32 %v19772_v21, %v19769_v43  ;;  %v20029_v55 = vadd.f32 %v19772_v21, %v19776_v28 }
 0xbfc   :  { %v20033_v60 = vadd.f32 %v19772_v21, %v19780_v4  ;;  %v20037_v49 = vadd.f32 %v19772_v21, %v19784_v34  ;;  %v20041_v52 = vadd.f32 %v19772_v21, %v19788_v37  ;;  %v20045_v59 = vadd.f32 %v19772_v21, %v19792_v8 }
 0xbfd   :  { %v20049_v43 = vadd.f32 %v19772_v21, %v19796_v56  ;;  %v20053_v28 = vadd.f32 %v19772_v21, %v19800_v46  ;;  %v20057_v4 = vadd.f32 %v19772_v21, %v19805_v61  ;;  %v20061_v34 = vadd.f32 %v19772_v21, %v19809_v23 }
 0xbfe   :  { %v20065_v37 = vadd.f32 %v19772_v21, %v19813_v33  ;;  %v20069_v8 = vadd.f32 %v19772_v21, %v19817_v35  ;;  %v20073_v56 = vadd.f32 %v19772_v21, %v19821_v58  ;;  %v20077_v46 = vadd.f32 %v19772_v21, %v19825_v7 }
 0xbff   :  { %v20081_v61 = vadd.f32 %v19772_v21, %v19829_v0  ;;  %v20085_v23 = vadd.f32 %v19772_v21, %v19833_v54  ;;  %v20089_v33 = vadd.f32 %v19772_v21, %v19837_v44  ;;  %v20093_v35 = vadd.f32 %v19772_v21, %v19841_v2 }
 0xc00   :  { %v20097_v58 = vadd.f32 %v19772_v21, %v19845_v16  ;;  %v20101_v7 = vadd.f32 %v19772_v21, %v19849_v15  ;;  %v20105_v0 = vadd.f32 %v19772_v21, %v19853_v19  ;;  %v20109_v54 = vadd.f32 %v19772_v21, %v19857_v30 }
 0xc01   :  { %v20113_v44 = vadd.f32 %v19772_v21, %v19861_v6  ;;  %v20117_v2 = vadd.f32 %v19772_v21, %v19865_v10  ;;  %v20121_v16 = vadd.f32 %v19772_v21, %v19869_v26  ;;  %v20125_v15 = vadd.f32 %v19772_v21, %v19873_v48 }
 0xc02   :  { %v20129_v19 = vadd.f32 %v19772_v21, %v19877_v18  ;;  %v20133_v30 = vadd.f32 %v19772_v21, %v19881_v9  ;;  %v20137_v6 = vadd.f32 %v19772_v21, %v19885_v29  ;;  %v20141_v10 = vadd.f32 %v19772_v21, %v19889_v53 }
 0xc03   :  { %21375 = vst [vmem:[#allocation42_spill] sm:$0xff] %v20125_v15  ;;  %v20145_v26 = vadd.f32 %v19772_v21, %v19893_v20  ;;  %v20149_v48 = vadd.f32 %v19772_v21, %v19897_v32  ;;  %v20153_v18 = vadd.f32 %v19772_v21, %v19901_v12  ;;  %v20157_v9 = vadd.f32 %v19772_v21, %v19905_v62  ;;  %v10440_v12 = vld [vmem:[#allocation3 + $0x8] sm:$0xff]  ;;  %v10442_v62 = vld [vmem:[#allocation3 + $0x18] sm:$0xff] }
 0xc04   :  { %21376 = vst [vmem:[#allocation41_spill] sm:$0xff] %v20129_v19  ;;  %21377 = vst [vmem:[#allocation44_spill] sm:$0xff] %v20133_v30  ;;  %v20161_v29 = vadd.f32 %v19772_v21, %v19909_v41  ;;  %v20165_v53 = vadd.f32 %v19772_v21, %v19913_v36  ;;  %v20169_v20 = vadd.f32 %v19772_v21, %v19917_v45  ;;  %v10453_v30 = vld [vmem:[#allocation3 + $0x70] sm:$0xff]  ;;  %v21405_v19 = vld [vmem:[#allocation39_spill] sm:$0xff] }
 0xc05   :  { %21378 = vst [vmem:[#allocation43_spill] sm:$0xff] %v20137_v6  ;;  %21379 = vst [vmem:[#allocation46_spill] sm:$0xff] %v20141_v10  ;;  %v20173_v32 = vadd.f32 %v19772_v21, %v19921_v38  ;;  %v20177_v41 = vadd.f32 %v19772_v21, %v19925_v1  ;;  %v20181_v36 = vadd.f32 %v19772_v21, %v19929_v24  ;;  %v10451_v10 = vld [vmem:[#allocation3 + $0x60] sm:$0xff]  ;;  %v10454_v6 = vld [vmem:[#allocation3 + $0x78] sm:$0xff] }
 0xc06   :  { %21380 = vst [vmem:[#allocation45_spill] sm:$0xff] %v20145_v26  ;;  %21381 = vst [vmem:[#allocation48_spill] sm:$0xff] %v20149_v48  ;;  %v20185_v45 = vadd.f32 %v19772_v21, %v19933_v47  ;;  %v20189_v38 = vadd.f32 %v19772_v21, %v19937_v22  ;;  %v20193_v1 = vadd.f32 %v19772_v21, %v19941_v5  ;;  %v10449_v48 = vld [vmem:[#allocation3 + $0x50] sm:$0xff]  ;;  %v21397_v26 = vld [vmem:[#allocation35_spill] sm:$0xff] }
 0xc07   :  { %21382 = vst [vmem:[#allocation47_spill] sm:$0xff] %v20153_v18  ;;  %21383 = vst [vmem:[#allocation50_spill] sm:$0xff] %v20157_v9  ;;  %v10439_v18 = vld [vmem:[#allocation3] sm:$0xff]  ;;  %v10441_v9 = vld [vmem:[#allocation3 + $0x10] sm:$0xff]  ;;  %v20197_v24 = vadd.f32 %v19772_v21, %v19945_v27  ;;  %v20201_v47 = vadd.f32 %v19772_v21, %v19949_v11  ;;  %v20209_v5 = vadd.f32 %v19772_v21, %v21397_v26 }
 0xc08   :  { %21384 = vst [vmem:[#allocation49_spill] sm:$0xff] %v20161_v29  ;;  %21385 = vst [vmem:[#allocation52_spill] sm:$0xff] %v20165_v53  ;;  %v10446_v53 = vld [vmem:[#allocation3 + $0x38] sm:$0xff]  ;;  %v10445_v29 = vld [vmem:[#allocation3 + $0x30] sm:$0xff]  ;;  %v20225_v26 = vadd.f32 %v19772_v21, %v21405_v19  ;;  %v20241_v19 = vadd.f32 %v19772_v21, %v19989_v25  ;;  %v20256_v15 = vadd.f32 %v10439_v18, %v20005_v50 }
 0xc09   :  { %21386 = vst [vmem:[#allocation51_spill] sm:$0xff] %v20169_v20  ;;  %21387 = vst [vmem:[#allocation54_spill] sm:$0xff] %v20173_v32  ;;  %v10444_v32 = vld [vmem:[#allocation3 + $0x28] sm:$0xff]  ;;  %v10443_v20 = vld [vmem:[#allocation3 + $0x20] sm:$0xff]  ;;  %v20259_v25 = vadd.f32 %v10440_v12, %v20009_v63  ;;  %v20274_v50 = vadd.f32 %v10445_v29, %v20029_v55  ;;  %v20277_v63 = vadd.f32 %v10446_v53, %v20033_v60 }
 0xc0a   :  { %21388 = vst [vmem:[#allocation53_spill] sm:$0xff] %v20177_v41  ;;  %21389 = vst [vmem:[#allocation56_spill] sm:$0xff] %v20181_v36  ;;  %v10447_v36 = vld [vmem:[#allocation3 + $0x40] sm:$0xff]  ;;  %v10450_v41 = vld [vmem:[#allocation3 + $0x58] sm:$0xff] }
 0xc0b   :  { %21390 = vst [vmem:[#allocation55_spill] sm:$0xff] %v20185_v45  ;;  %21391 = vst [vmem:[#allocation58_spill] sm:$0xff] %v20189_v38  ;;  %v21395_v45 = vld [vmem:[#allocation36_spill] sm:$0xff]  ;;  %v10448_v38 = vld [vmem:[#allocation3 + $0x48] sm:$0xff]  ;;  %v20280_v12 = vadd.f32 %v10447_v36, %v20037_v49  ;;  %v20298_v49 = vadd.f32 %v10453_v30, %v20061_v34 }
 0xc0c   :  { %21392 = vst [vmem:[#allocation59_spill] sm:$0xff] %v20193_v1  ;;  %21393 = vst [vmem:[#allocation60_spill] sm:$0xff] %v20197_v24  ;;  %v20205_v22 = vadd.f32 %v19772_v21, %v21395_v45  ;;  %v21399_v1 = vld [vmem:[#allocation38_spill] sm:$0xff]  ;;  %v21401_v24 = vld [vmem:[#allocation37_spill] sm:$0xff] }
 0xc0d   :  { %21394 = vst [vmem:[#allocation61_spill] sm:$0xff] %v20201_v47  ;;  %21398 = vst [vmem:[#allocation63_spill] sm:$0xff] %v20209_v5  ;;  %v20213_v27 = vadd.f32 %v19772_v21, %v21399_v1  ;;  %v20217_v11 = vadd.f32 %v19772_v21, %v21401_v24  ;;  %v21403_v47 = vld [vmem:[#allocation40_spill] sm:$0xff]  ;;  %v20229_v1 = vadd.f32 %v19772_v21, %v19977_v40  ;;  %v10457_v5 = vld [vmem:[#allocation3 + $0x90] sm:$0xff] }
 0xc0e   :  { %21396 = vst [vmem:[#allocation62_spill] sm:$0xff] %v20205_v22  ;;  %v20221_v45 = vadd.f32 %v19772_v21, %v21403_v47  ;;  %v10452_v22 = vld [vmem:[#allocation3 + $0x68] sm:$0xff]  ;;  %21406 = vst [vmem:[#allocation69_spill] sm:$0xff] %v20225_v26  ;;  %v20233_v24 = vadd.f32 %v19772_v21, %v19981_v13  ;;  %v20237_v47 = vadd.f32 %v19772_v21, %v19985_v42  ;;  %v10461_v26 = vld [vmem:[#allocation3 + $0xb0] sm:$0xff] }
 0xc0f   :  { %21400 = vst [vmem:[#allocation65_spill] sm:$0xff] %v20213_v27  ;;  %21402 = vst [vmem:[#allocation66_spill] sm:$0xff] %v20217_v11  ;;  %v10455_v11 = vld [vmem:[#allocation3 + $0x80] sm:$0xff]  ;;  %v10458_v27 = vld [vmem:[#allocation3 + $0x98] sm:$0xff]  ;;  %v20245_v40 = vadd.f32 %v19772_v21, %v19993_v31  ;;  %v20249_v13 = vadd.f32 %v19772_v21, %v19997_v17  ;;  %v20253_v42 = vadd.f32 %v19772_v21, %v20001_v14 }
 0xc10   :  { %21404 = vst [vmem:[#allocation68_spill] sm:$0xff] %v20221_v45  ;;  %21407 = vst [vmem:[#allocation70_spill] sm:$0xff] %v20229_v1  ;;  %v10456_v45 = vld [vmem:[#allocation3 + $0x88] sm:$0xff]  ;;  %v10462_v1 = vld [vmem:[#allocation3 + $0xb8] sm:$0xff]  ;;  %v20262_v31 = vadd.f32 %v10441_v9, %v20013_v57  ;;  %v20265_v17 = vadd.f32 %v10442_v62, %v20017_v3  ;;  %v20283_v62 = vadd.f32 %v10448_v38, %v20041_v52 }
 0xc11   :  { %21408 = vst [vmem:[#allocation71_spill] sm:$0xff] %v20233_v24  ;;  %21409 = vst [vmem:[#allocation72_spill] sm:$0xff] %v20237_v47  ;;  %v10460_v47 = vld [vmem:[#allocation3 + $0xa8] sm:$0xff]  ;;  %v10459_v24 = vld [vmem:[#allocation3 + $0xa0] sm:$0xff]  ;;  %v20301_v52 = vadd.f32 %v10454_v6, %v20065_v37  ;;  %v20307_v36 = vadd.f32 %v10456_v45, %v20073_v56  ;;  %v20325_v56 = vadd.f32 %v10462_v1, %v20097_v58 }
 0xc12   :  { %21410 = vst [vmem:[#allocation73_spill] sm:$0xff] %v20241_v19  ;;  %21411 = vst [vmem:[#allocation64_spill] sm:$0xff] %v20245_v40  ;;  %v10463_v40 = vld [vmem:[#allocation3 + $0xc0] sm:$0xff]  ;;  %v10466_v21 = vld [vmem:[#allocation3 + $0xd8] sm:$0xff]  ;;  %v20271_v19 = vadd.f32 %v10444_v32, %v20025_v39  ;;  %v20289_v39 = vadd.f32 %v10450_v41, %v20049_v43  ;;  %v20295_v32 = vadd.f32 %v10452_v22, %v20057_v4 }
 0xc13   :  { %21412 = vst [vmem:[#allocation67_spill] sm:$0xff] %v20249_v13  ;;  %21413 = vst [vmem:[#allocation74_spill] sm:$0xff] %v20253_v42  ;;  %v10464_v13 = vld [vmem:[#allocation3 + $0xc8] sm:$0xff]  ;;  %v10465_v14 = vld [vmem:[#allocation3 + $0xd0] sm:$0xff]  ;;  %v20268_v42 = vadd.f32 %v10443_v20, %v20021_v51  ;;  %v20286_v51 = vadd.f32 %v10449_v48, %v20045_v59  ;;  %v20292_v20 = vadd.f32 %v10451_v10, %v20053_v28 }
 0xc14   :  { %v10468_v57 = vld [vmem:[#allocation3 + $0xe8] sm:$0xff]  ;;  %v10467_v18 = vld [vmem:[#allocation3 + $0xe0] sm:$0xff]  ;;  %v10470_v3 = vld [vmem:[#allocation3 + $0xf8] sm:$0xff]  ;;  %v20304_v41 = vadd.f32 %v10455_v11, %v20069_v8  ;;  %v20310_v28 = vadd.f32 %v10457_v5, %v20077_v46  ;;  %v20313_v4 = vadd.f32 %v10458_v27, %v20081_v61  ;;  %v20316_v37 = vadd.f32 %v10459_v24, %v20085_v23 }
 0xc15   :  { %v10469_v9 = vld [vmem:[#allocation3 + $0xf0] sm:$0xff]  ;;  %v10472_v55 = vld [vmem:[#allocation3 + $0x108] sm:$0xff]  ;;  %v10471_v29 = vld [vmem:[#allocation3 + $0x100] sm:$0xff]  ;;  %v20319_v6 = vadd.f32 %v10460_v47, %v20089_v33  ;;  %v20322_v8 = vadd.f32 %v10461_v26, %v20093_v35  ;;  %v20328_v61 = vadd.f32 %v10463_v40, %v20101_v7  ;;  %v20331_v5 = vadd.f32 %v10464_v13, %v20105_v0 }
 0xc16   :  { %v10474_v60 = vld [vmem:[#allocation3 + $0x118] sm:$0xff]  ;;  %v10473_v53 = vld [vmem:[#allocation3 + $0x110] sm:$0xff]  ;;  %v10476_v59 = vld [vmem:[#allocation3 + $0x128] sm:$0xff]  ;;  %v20334_v23 = vadd.f32 %v10465_v14, %v20109_v54  ;;  %v20337_v33 = vadd.f32 %v10466_v21, %v20113_v44  ;;  %v20340_v58 = vadd.f32 %v10467_v18, %v20117_v2  ;;  %v20343_v45 = vadd.f32 %v10468_v57, %v20121_v16 }
 0xc17   :  { %v10475_v48 = vld [vmem:[#allocation3 + $0x120] sm:$0xff]  ;;  %v10478_v43 = vld [vmem:[#allocation3 + $0x138] sm:$0xff]  ;;  %v10477_v34 = vld [vmem:[#allocation3 + $0x130] sm:$0xff] }
 0xc18   :  { %v10480_v30 = vld [vmem:[#allocation3 + $0x148] sm:$0xff]  ;;  %v10479_v10 = vld [vmem:[#allocation3 + $0x140] sm:$0xff]  ;;  %v10482_v46 = vld [vmem:[#allocation3 + $0x158] sm:$0xff] }
 0xc19   :  { %v10481_v38 = vld [vmem:[#allocation3 + $0x150] sm:$0xff]  ;;  %v10484_v22 = vld [vmem:[#allocation3 + $0x168] sm:$0xff]  ;;  %v10483_v35 = vld [vmem:[#allocation3 + $0x160] sm:$0xff] }
 0xc1a   :  { %v10486_v27 = vld [vmem:[#allocation3 + $0x178] sm:$0xff]  ;;  %v10485_v11 = vld [vmem:[#allocation3 + $0x170] sm:$0xff]  ;;  %v21416_v0 = vld [vmem:[#allocation41_spill] sm:$0xff] }
 0xc1b   :  { %v21414_v7 = vld [vmem:[#allocation42_spill] sm:$0xff]  ;;  %v20349_v1 = vadd.f32 %v10470_v3, %v21416_v0  ;;  %v10488_v54 = vld [vmem:[#allocation3 + $0x188] sm:$0xff]  ;;  %v10487_v24 = vld [vmem:[#allocation3 + $0x180] sm:$0xff] }
 0xc1c   :  { %v20346_v26 = vadd.f32 %v10469_v9, %v21414_v7  ;;  %v10490_v47 = vld [vmem:[#allocation3 + $0x198] sm:$0xff]  ;;  %v21418_v44 = vld [vmem:[#allocation44_spill] sm:$0xff]  ;;  %v21421_v2 = vld [vmem:[#allocation46_spill] sm:$0xff] }
 0xc1d   :  { %21417 = vst [vmem:[#allocation76_spill] sm:$0xff] %v20349_v1  ;;  %v20352_v40 = vadd.f32 %v10471_v29, %v21418_v44  ;;  %v21419_v13 = vld [vmem:[#allocation43_spill] sm:$0xff]  ;;  %v20358_v14 = vadd.f32 %v10473_v53, %v21421_v2  ;;  %v21423_v16 = vld [vmem:[#allocation45_spill] sm:$0xff]  ;;  %v10489_v18 = vld [vmem:[#allocation3 + $0x190] sm:$0xff] }
 0xc1e   :  { %21415 = vst [vmem:[#allocation75_spill] sm:$0xff] %v20346_v26  ;;  %v20355_v21 = vadd.f32 %v10472_v55, %v21419_v13  ;;  %v20361_v57 = vadd.f32 %v10474_v60, %v21423_v16  ;;  %v10492_v9 = vld [vmem:[#allocation3 + $0x1a8] sm:$0xff]  ;;  %v10491_v7 = vld [vmem:[#allocation3 + $0x1a0] sm:$0xff]  ;;  %v21426_v1 = vld [vmem:[#allocation47_spill] sm:$0xff] }
 0xc1f   :  { %21422 = vst [vmem:[#allocation78_spill] sm:$0xff] %v20358_v14  ;;  %v21425_v3 = vld [vmem:[#allocation48_spill] sm:$0xff]  ;;  %v20367_v26 = vadd.f32 %v10476_v59, %v21426_v1  ;;  %v21428_v29 = vld [vmem:[#allocation50_spill] sm:$0xff]  ;;  %v21430_v55 = vld [vmem:[#allocation49_spill] sm:$0xff] }
 0xc20   :  { %21420 = vst [vmem:[#allocation77_spill] sm:$0xff] %v20355_v21  ;;  %21424 = vst [vmem:[#allocation79_spill] sm:$0xff] %v20361_v57  ;;  %v20364_v0 = vadd.f32 %v10475_v48, %v21425_v3  ;;  %v20370_v44 = vadd.f32 %v10477_v34, %v21428_v29  ;;  %v20373_v13 = vadd.f32 %v10478_v43, %v21430_v55  ;;  %v10494_v53 = vld [vmem:[#allocation3 + $0x1b8] sm:$0xff]  ;;  %v10493_v2 = vld [vmem:[#allocation3 + $0x1b0] sm:$0xff] }
 0xc21   :  { %21427 = vst [vmem:[#allocation80_spill] sm:$0xff] %v20367_v26  ;;  %v10496_v14 = vld [vmem:[#allocation3 + $0x1c8] sm:$0xff]  ;;  %v21432_v60 = vld [vmem:[#allocation52_spill] sm:$0xff]  ;;  %v21433_v57 = vld [vmem:[#allocation51_spill] sm:$0xff] }
 0xc22   :  { %21429 = vst [vmem:[#allocation81_spill] sm:$0xff] %v20370_v44  ;;  %21431 = vst [vmem:[#allocation82_spill] sm:$0xff] %v20373_v13  ;;  %v20376_v16 = vadd.f32 %v10479_v10, %v21432_v60  ;;  %v20379_v21 = vadd.f32 %v10480_v30, %v21433_v57  ;;  %v21435_v48 = vld [vmem:[#allocation54_spill] sm:$0xff]  ;;  %v21437_v59 = vld [vmem:[#allocation53_spill] sm:$0xff] }
 0xc23   :  { %v20382_v3 = vadd.f32 %v10481_v38, %v21435_v48  ;;  %v20385_v1 = vadd.f32 %v10482_v46, %v21437_v59  ;;  %v10495_v34 = vld [vmem:[#allocation3 + $0x1c0] sm:$0xff]  ;;  %v10498_v29 = vld [vmem:[#allocation3 + $0x1d8] sm:$0xff]  ;;  %v10497_v44 = vld [vmem:[#allocation3 + $0x1d0] sm:$0xff] }
 0xc24   :  { %21434 = vst [vmem:[#allocation93_spill] sm:$0xff] %v20379_v21  ;;  %v21439_v43 = vld [vmem:[#allocation56_spill] sm:$0xff]  ;;  %v21440_v13 = vld [vmem:[#allocation55_spill] sm:$0xff]  ;;  %v21441_v10 = vld [vmem:[#allocation58_spill] sm:$0xff] }
 0xc25   :  { %21436 = vst [vmem:[#allocation94_spill] sm:$0xff] %v20382_v3  ;;  %21438 = vst [vmem:[#allocation95_spill] sm:$0xff] %v20385_v1  ;;  %v20388_v55 = vadd.f32 %v10483_v35, %v21439_v43  ;;  %v20391_v26 = vadd.f32 %v10484_v22, %v21440_v13  ;;  %v20394_v60 = vadd.f32 %v10485_v11, %v21441_v10  ;;  %v21443_v30 = vld [vmem:[#allocation59_spill] sm:$0xff]  ;;  %v10500_v38 = vld [vmem:[#allocation3 + $0x1e8] sm:$0xff] }
 0xc26   :  { %v20397_v57 = vadd.f32 %v10486_v27, %v21443_v30  ;;  %v10499_v48 = vld [vmem:[#allocation3 + $0x1e0] sm:$0xff]  ;;  %v10502_v3 = vld [vmem:[#allocation3 + $0x1f8] sm:$0xff]  ;;  %v21446_v1 = vld [vmem:[#allocation61_spill] sm:$0xff] }
 0xc27   :  { %21442 = vst [vmem:[#allocation96_spill] sm:$0xff] %v20394_v60  ;;  %v21445_v46 = vld [vmem:[#allocation60_spill] sm:$0xff]  ;;  %v20403_v21 = vadd.f32 %v10488_v54, %v21446_v1  ;;  %v21447_v35 = vld [vmem:[#allocation62_spill] sm:$0xff]  ;;  %v21448_v22 = vld [vmem:[#allocation63_spill] sm:$0xff] }
 0xc28   :  { %21444 = vst [vmem:[#allocation97_spill] sm:$0xff] %v20397_v57  ;;  %v20400_v59 = vadd.f32 %v10487_v24, %v21445_v46  ;;  %v20406_v43 = vadd.f32 %v10489_v18, %v21447_v35  ;;  %v20409_v13 = vadd.f32 %v10490_v47, %v21448_v22  ;;  %v21449_v11 = vld [vmem:[#allocation65_spill] sm:$0xff]  ;;  %v21450_v27 = vld [vmem:[#allocation66_spill] sm:$0xff]  ;;  %v21451_v57 = vld [vmem:[#allocation68_spill] sm:$0xff] }
 0xc29   :  { %v20412_v10 = vadd.f32 %v10491_v7, %v21449_v11  ;;  %v20415_v30 = vadd.f32 %v10492_v9, %v21450_v27  ;;  %v20418_v60 = vadd.f32 %v10493_v2, %v21451_v57  ;;  %v21452_v24 = vld [vmem:[#allocation69_spill] sm:$0xff]  ;;  %v21453_v54 = vld [vmem:[#allocation70_spill] sm:$0xff]  ;;  %v21454_v18 = vld [vmem:[#allocation71_spill] sm:$0xff] }
 0xc2a   :  { %v20421_v46 = vadd.f32 %v10494_v53, %v21452_v24  ;;  %v20424_v1 = vadd.f32 %v10495_v34, %v21453_v54  ;;  %v20427_v35 = vadd.f32 %v10496_v14, %v21454_v18  ;;  %v21455_v47 = vld [vmem:[#allocation72_spill] sm:$0xff]  ;;  %v21456_v7 = vld [vmem:[#allocation73_spill] sm:$0xff]  ;;  %v21458_v2 = vld [vmem:[#allocation67_spill] sm:$0xff]  ;;  %v10567_v34 = vmax.f32 %v20256_v15, 0.0 }
 0xc2b   :  { %v20430_v22 = vadd.f32 %v10497_v44, %v21455_v47  ;;  %v20433_v11 = vadd.f32 %v10498_v29, %v21456_v7  ;;  %v21457_v9 = vld [vmem:[#allocation64_spill] sm:$0xff]  ;;  %v20439_v57 = vadd.f32 %v10500_v38, %v21458_v2  ;;  %v21459_v53 = vld [vmem:[#allocation74_spill] sm:$0xff]  ;;  %v10568_v14 = vmax.f32 %v20259_v25, 0.0  ;;  %v21464_v7 = vld [vmem:[#allocation79_spill] sm:$0xff] }
 0xc2c   :  { %v20436_v27 = vadd.f32 %v10499_v48, %v21457_v9  ;;  %v20442_v24 = vadd.f32 %v10502_v3, %v21459_v53  ;;  %v10569_v54 = vmax.f32 %v20262_v31, 0.0  ;;  %v10570_v44 = vmax.f32 %v20265_v17, 0.0  ;;  %10631 = vst [vmem:[#allocation15] sm:$0xff] %v10567_v34  ;;  %v21466_v34 = vld [vmem:[#allocation81_spill] sm:$0xff] }
 0xc2d   :  { %v10571_v29 = vmax.f32 %v20268_v42, 0.0  ;;  %v10572_v18 = vmax.f32 %v20271_v19, 0.0  ;;  %v10573_v48 = vmax.f32 %v20274_v50, 0.0  ;;  %v10574_v38 = vmax.f32 %v20277_v63, 0.0  ;;  %10632 = vst [vmem:[#allocation15 + $0x8] sm:$0xff] %v10568_v14  ;;  %v21467_v14 = vld [vmem:[#allocation82_spill] sm:$0xff] }
 0xc2e   :  { %v10575_v47 = vmax.f32 %v20280_v12, 0.0  ;;  %v10576_v3 = vmax.f32 %v20283_v62, 0.0  ;;  %v10577_v15 = vmax.f32 %v20286_v51, 0.0  ;;  %v10578_v25 = vmax.f32 %v20289_v39, 0.0  ;;  %10633 = vst [vmem:[#allocation15 + $0x10] sm:$0xff] %v10569_v54  ;;  %10634 = vst [vmem:[#allocation15 + $0x18] sm:$0xff] %v10570_v44 }
 0xc2f   :  { %v10579_v31 = vmax.f32 %v20292_v20, 0.0  ;;  %10635 = vst [vmem:[#allocation15 + $0x20] sm:$0xff] %v10571_v29  ;;  %v10580_v19 = vmax.f32 %v20295_v32, 0.0  ;;  %v10581_v42 = vmax.f32 %v20298_v49, 0.0  ;;  %v10582_v17 = vmax.f32 %v20301_v52, 0.0  ;;  %10636 = vst [vmem:[#allocation15 + $0x28] sm:$0xff] %v10572_v18 }
 0xc30   :  { %v10583_v50 = vmax.f32 %v20304_v41, 0.0  ;;  %10637 = vst [vmem:[#allocation15 + $0x30] sm:$0xff] %v10573_v48  ;;  %10638 = vst [vmem:[#allocation15 + $0x38] sm:$0xff] %v10574_v38  ;;  %v10584_v63 = vmax.f32 %v20307_v36, 0.0  ;;  %v10585_v12 = vmax.f32 %v20310_v28, 0.0  ;;  %v10586_v62 = vmax.f32 %v20313_v4, 0.0 }
 0xc31   :  { %10639 = vst [vmem:[#allocation15 + $0x40] sm:$0xff] %v10575_v47  ;;  %v10587_v51 = vmax.f32 %v20316_v37, 0.0  ;;  %10640 = vst [vmem:[#allocation15 + $0x48] sm:$0xff] %v10576_v3  ;;  %v10588_v39 = vmax.f32 %v20319_v6, 0.0  ;;  %v10589_v20 = vmax.f32 %v20322_v8, 0.0  ;;  %v10590_v32 = vmax.f32 %v20325_v56, 0.0 }
 0xc32   :  { %10641 = vst [vmem:[#allocation15 + $0x50] sm:$0xff] %v10577_v15  ;;  %10642 = vst [vmem:[#allocation15 + $0x58] sm:$0xff] %v10578_v25  ;;  %v10591_v49 = vmax.f32 %v20328_v61, 0.0  ;;  %v10592_v52 = vmax.f32 %v20331_v5, 0.0  ;;  %v10593_v41 = vmax.f32 %v20334_v23, 0.0  ;;  %v10594_v36 = vmax.f32 %v20337_v33, 0.0 }
 0xc33   :  { %10643 = vst [vmem:[#allocation15 + $0x60] sm:$0xff] %v10579_v31  ;;  %10644 = vst [vmem:[#allocation15 + $0x68] sm:$0xff] %v10580_v19  ;;  %v10595_v28 = vmax.f32 %v20340_v58, 0.0  ;;  %v10596_v4 = vmax.f32 %v20343_v45, 0.0  ;;  %v21460_v37 = vld [vmem:[#allocation75_spill] sm:$0xff]  ;;  %v21461_v8 = vld [vmem:[#allocation76_spill] sm:$0xff] }
 0xc34   :  { %10645 = vst [vmem:[#allocation15 + $0x70] sm:$0xff] %v10581_v42  ;;  %10646 = vst [vmem:[#allocation15 + $0x78] sm:$0xff] %v10582_v17  ;;  %v10597_v6 = vmax.f32 %v21460_v37, 0.0  ;;  %v10598_v56 = vmax.f32 %v21461_v8, 0.0  ;;  %v10599_v61 = vmax.f32 %v20352_v40, 0.0  ;;  %v21462_v5 = vld [vmem:[#allocation77_spill] sm:$0xff] }
 0xc35   :  { %10647 = vst [vmem:[#allocation15 + $0x80] sm:$0xff] %v10583_v50  ;;  %10648 = vst [vmem:[#allocation15 + $0x88] sm:$0xff] %v10584_v63  ;;  %v10600_v23 = vmax.f32 %v21462_v5, 0.0  ;;  %v21463_v33 = vld [vmem:[#allocation78_spill] sm:$0xff]  ;;  %v10602_v9 = vmax.f32 %v21464_v7, 0.0  ;;  %v10603_v2 = vmax.f32 %v20364_v0, 0.0 }
 0xc36   :  { %10649 = vst [vmem:[#allocation15 + $0x90] sm:$0xff] %v10585_v12  ;;  %10650 = vst [vmem:[#allocation15 + $0x98] sm:$0xff] %v10586_v62  ;;  %v10601_v58 = vmax.f32 %v21463_v33, 0.0  ;;  %v21465_v45 = vld [vmem:[#allocation80_spill] sm:$0xff]  ;;  %v10605_v40 = vmax.f32 %v21466_v34, 0.0  ;;  %v10606_v54 = vmax.f32 %v21467_v14, 0.0 }
 0xc37   :  { %10651 = vst [vmem:[#allocation15 + $0xa0] sm:$0xff] %v10587_v51  ;;  %10652 = vst [vmem:[#allocation15 + $0xa8] sm:$0xff] %v10588_v39  ;;  %v10604_v53 = vmax.f32 %v21465_v45, 0.0  ;;  %v10607_v44 = vmax.f32 %v20376_v16, 0.0  ;;  %v21468_v29 = vld [vmem:[#allocation93_spill] sm:$0xff]  ;;  %v21469_v48 = vld [vmem:[#allocation94_spill] sm:$0xff] }
 0xc38   :  { %10653 = vst [vmem:[#allocation15 + $0xb0] sm:$0xff] %v10589_v20  ;;  %10654 = vst [vmem:[#allocation15 + $0xb8] sm:$0xff] %v10590_v32  ;;  %v10608_v18 = vmax.f32 %v21468_v29, 0.0  ;;  %v10609_v0 = vmax.f32 %v21469_v48, 0.0  ;;  %v21470_v38 = vld [vmem:[#allocation95_spill] sm:$0xff]  ;;  %v10611_v3 = vmax.f32 %v20388_v55, 0.0 }
 0xc39   :  { %10655 = vst [vmem:[#allocation15 + $0xc0] sm:$0xff] %v10591_v49  ;;  %10656 = vst [vmem:[#allocation15 + $0xc8] sm:$0xff] %v10592_v52  ;;  %v10610_v47 = vmax.f32 %v21470_v38, 0.0  ;;  %v10612_v15 = vmax.f32 %v20391_v26, 0.0  ;;  %v21471_v25 = vld [vmem:[#allocation96_spill] sm:$0xff]  ;;  %v21472_v31 = vld [vmem:[#allocation97_spill] sm:$0xff] }
 0xc3a   :  { %10657 = vst [vmem:[#allocation15 + $0xd0] sm:$0xff] %v10593_v41  ;;  %10658 = vst [vmem:[#allocation15 + $0xd8] sm:$0xff] %v10594_v36  ;;  %v10613_v16 = vmax.f32 %v21471_v25, 0.0  ;;  %v10614_v19 = vmax.f32 %v21472_v31, 0.0  ;;  %v10615_v42 = vmax.f32 %v20400_v59, 0.0  ;;  %v10616_v17 = vmax.f32 %v20403_v21, 0.0 }
 0xc3b   :  { %10659 = vst [vmem:[#allocation15 + $0xe0] sm:$0xff] %v10595_v28  ;;  %10660 = vst [vmem:[#allocation15 + $0xe8] sm:$0xff] %v10596_v4  ;;  %v10617_v55 = vmax.f32 %v20406_v43, 0.0  ;;  %v10618_v50 = vmax.f32 %v20409_v13, 0.0  ;;  %v10619_v63 = vmax.f32 %v20412_v10, 0.0  ;;  %v10620_v26 = vmax.f32 %v20415_v30, 0.0 }
 0xc3c   :  { %10661 = vst [vmem:[#allocation15 + $0xf0] sm:$0xff] %v10597_v6  ;;  %10662 = vst [vmem:[#allocation15 + $0xf8] sm:$0xff] %v10598_v56  ;;  %v10621_v59 = vmax.f32 %v20418_v60, 0.0  ;;  %v10622_v12 = vmax.f32 %v20421_v46, 0.0  ;;  %v10623_v21 = vmax.f32 %v20424_v1, 0.0  ;;  %v10624_v43 = vmax.f32 %v20427_v35, 0.0 }
 0xc3d   :  { %10663 = vst [vmem:[#allocation15 + $0x100] sm:$0xff] %v10599_v61  ;;  %10664 = vst [vmem:[#allocation15 + $0x108] sm:$0xff] %v10600_v23  ;;  %v10625_v13 = vmax.f32 %v20430_v22, 0.0  ;;  %v10626_v10 = vmax.f32 %v20433_v11, 0.0  ;;  %v10627_v62 = vmax.f32 %v20436_v27, 0.0  ;;  %v10628_v60 = vmax.f32 %v20439_v57, 0.0 }
 0xc3e   :  { %10665 = vst [vmem:[#allocation15 + $0x110] sm:$0xff] %v10601_v58  ;;  %10666 = vst [vmem:[#allocation15 + $0x118] sm:$0xff] %v10602_v9  ;;  %v10630_v30 = vmax.f32 %v20442_v24, 0.0 }
 0xc3f   :  { %10667 = vst [vmem:[#allocation15 + $0x120] sm:$0xff] %v10603_v2  ;;  %10668 = vst [vmem:[#allocation15 + $0x128] sm:$0xff] %v10604_v53 }
 0xc40   :  { %10669 = vst [vmem:[#allocation15 + $0x130] sm:$0xff] %v10605_v40  ;;  %10670 = vst [vmem:[#allocation15 + $0x138] sm:$0xff] %v10606_v54 }
 0xc41   :  { %10671 = vst [vmem:[#allocation15 + $0x140] sm:$0xff] %v10607_v44  ;;  %10672 = vst [vmem:[#allocation15 + $0x148] sm:$0xff] %v10608_v18 }
 0xc42   :  { %10673 = vst [vmem:[#allocation15 + $0x150] sm:$0xff] %v10609_v0  ;;  %10674 = vst [vmem:[#allocation15 + $0x158] sm:$0xff] %v10610_v47 }
 0xc43   :  { %10675 = vst [vmem:[#allocation15 + $0x160] sm:$0xff] %v10611_v3  ;;  %10676 = vst [vmem:[#allocation15 + $0x168] sm:$0xff] %v10612_v15 }
 0xc44   :  { %10677 = vst [vmem:[#allocation15 + $0x170] sm:$0xff] %v10613_v16  ;;  %10678 = vst [vmem:[#allocation15 + $0x178] sm:$0xff] %v10614_v19 }
 0xc45   :  { %10679 = vst [vmem:[#allocation15 + $0x180] sm:$0xff] %v10615_v42  ;;  %10680 = vst [vmem:[#allocation15 + $0x188] sm:$0xff] %v10616_v17 }
 0xc46   :  { %10681 = vst [vmem:[#allocation15 + $0x190] sm:$0xff] %v10617_v55  ;;  %10682 = vst [vmem:[#allocation15 + $0x198] sm:$0xff] %v10618_v50 }
 0xc47   :  { %10683 = vst [vmem:[#allocation15 + $0x1a0] sm:$0xff] %v10619_v63  ;;  %10684 = vst [vmem:[#allocation15 + $0x1a8] sm:$0xff] %v10620_v26 }
 0xc48   :  { %10685 = vst [vmem:[#allocation15 + $0x1b0] sm:$0xff] %v10621_v59  ;;  %10686 = vst [vmem:[#allocation15 + $0x1b8] sm:$0xff] %v10622_v12 }
 0xc49   :  { %10687 = vst [vmem:[#allocation15 + $0x1c0] sm:$0xff] %v10623_v21  ;;  %10688 = vst [vmem:[#allocation15 + $0x1c8] sm:$0xff] %v10624_v43 }
 0xc4a   :  { %10689 = vst [vmem:[#allocation15 + $0x1d0] sm:$0xff] %v10625_v13  ;;  %10690 = vst [vmem:[#allocation15 + $0x1d8] sm:$0xff] %v10626_v10 }
 0xc4b   :  { %10691 = vst [vmem:[#allocation15 + $0x1e0] sm:$0xff] %v10627_v62  ;;  %10692 = vst [vmem:[#allocation15 + $0x1e8] sm:$0xff] %v10628_v60 }
 0xc4c   :  { %10694 = vst [vmem:[#allocation15 + $0x1f8] sm:$0xff] %v10630_v30 }
 0xc4d   :  { %16242 = shalt.err (!%p16239_p4)
}
 0xc4e   :  { %s16243_s20 = scalar_lea.hbm %s20529_s7, 8192 }
 0xc4f   :  { %p16244_p5 = scmp.ne.s32.totalorder %s20529_s7, %s16243_s20  ;;  %p16247_p6 = scmp.lt.u32.totalorder %s16243_s20, %s20529_s7 }
 0xc51   :  { %p16249_p7 = pnand %p16247_p6, %p16244_p5 }
 0xc53   :  { %16252 = shalt.err (!%p16249_p7)
}
 0xc54   :  { %10706 = dma.vmem_to_hbm [thread:$0]  %s10701_s0, 8192, %s20529_s7, [#allocation5], %s16265_s13, %s16265_s13, %s16266_s14  }
 0xc55   :  { %16261 = dma.done.wait [#allocation5], 8192  }
 0xc56   :  { %16262 = vsyncadd [#allocation5], 4294959104 }
 0xc57   :  { %10710 = vsyncpa [#allocation4], 1 }
 0xc58   :  { %10711 = vsyncpa [#allocation7], 1 }
 0xc59   :  { %10712 = vsyncpa [#allocation10], 1 }
 0xc5a   :  { %10713 = vsyncpa [#allocation13], 1 }
 0xc5b   :  { %10714 = vsyncpa [#allocation5], 1 }

</bundles_post_ra>
